<compile_context>
chip_gen: v7x
topology: tpu7x:2x2x1
jax: 0.10.0
libtpu: 0.0.40
codegen_flags: <defaults>
</compile_context>

<pallas_src>
import functools

import jax
import jax.numpy as jnp
from jax.experimental import pallas as pl
from jax.experimental.pallas import tpu as pltpu

BN_EPS = 1e-5
CP = 128                      # lane-dense padded channel count


def _vmem_limit_bytes():
    try:
        cap = getattr(pltpu.get_tpu_info(), "vmem_capacity_bytes", None)
        if cap:
            return int(cap) * 3 // 4          # ~96 MiB on v5e/v6e, ~48 MiB on v7x
    except Exception:
        pass
    return 48 * 1024 * 1024


VMEM_LIMIT = _vmem_limit_bytes()


# ----------------------------- Pallas kernels ------------------------------

def _fused_conv_kernel(z_ref, sc_ref, sh_ref, w_ref, zout_ref, stats_ref,
                       acc_ref, yp_ref, *, TH, H, W, apply_act):
    """Fused [prev-stage BN+ReLU] -> 3x3 conv (9 bf16 MXU matmuls) -> BN stats.

    z_ref:     (H, W, CP)  bf16  previous stage pre-BN activation (raw input for
                                 stage 0), whole image, VMEM-resident across t
    sc_ref:    (1, CP)     f32   previous stage BN scale  (unused if !apply_act)
    sh_ref:    (1, CP)     f32   previous stage BN shift  (unused if !apply_act)
    w_ref:     (9, CP, CP) bf16  conv weights, tap-major
    zout_ref:  (TH, W, CP) bf16  this stage's pre-BN conv output tile
    stats_ref: (8, CP)     f32   per-image stats: row0 sum, row1 sum of squares
    acc_ref:   (TH*W, CP)  f32   VMEM accumulator scratch
    yp_ref:    (H+2,W+2,CP)bf16  zero-halo'd activated image scratch
    """
    t = pl.program_id(1)

    @pl.when(t == 0)
    def _build_padded_input():
        # Zero the whole scratch (border stays 0 = conv zero-padding), then fill
        # the interior with the activated previous-stage output.
        yp_ref[...] = jnp.zeros_like(yp_ref)
        if apply_act:
            y = jnp.maximum(
                z_ref[...].astype(jnp.float32) * sc_ref[...] + sh_ref[...], 0.0)
            yp_ref[1:H + 1, 1:W + 1, :] = y.astype(yp_ref.dtype)
        else:
            yp_ref[1:H + 1, 1:W + 1, :] = z_ref[...]
        stats_ref[...] = jnp.zeros_like(stats_ref)   # per-image partials

    # 3x3 conv as 9 accumulating (TH*W, CP) @ (CP, CP) bf16 MXU matmuls over
    # shifted windows of the padded image, accumulated in f32 VMEM.
    idx = 0
    for ky in range(3):
        for kx in range(3):
            tap = yp_ref[pl.ds(t * TH + ky, TH), kx:kx + W, :]      # (TH, W, CP)
            part = jnp.dot(tap.reshape(TH * W, CP), w_ref[idx],
                           preferred_element_type=jnp.float32)
            if idx == 0:
                acc_ref[...] = part
            else:
                acc_ref[...] += part
            idx += 1

    z_new = acc_ref[...]                                            # f32
    zout_ref[...] = z_new.reshape(TH, W, CP).astype(zout_ref.dtype)
    stats_ref[0:1, :] += jnp.sum(z_new, axis=0, keepdims=True)
    stats_ref[1:2, :] += jnp.sum(z_new * z_new, axis=0, keepdims=True)


def _bn_relu_pool_kernel(z_ref, sc_ref, sh_ref, o_ref, *, TH, W):
    """Final stage: BN affine + ReLU fused with 2x2 max-pool.

    z_ref: (TH, W//2, 2*CP) bf16  -- adjacent W columns packed on lanes
    o_ref: (TH//2, W//2, CP) f32
    """
    Wh = W // 2
    sc = sc_ref[...]
    sh = sh_ref[...]
    zb = z_ref[...].astype(jnp.float32)
    y_even = jnp.maximum(zb[..., :CP] * sc + sh, 0.0)   # w = 0, 2, 4, ...
    y_odd = jnp.maximum(zb[..., CP:] * sc + sh, 0.0)    # w = 1, 3, 5, ...
    wm = jnp.maximum(y_even, y_odd)                     # (TH, Wh, CP): W pooled
    wm = wm.reshape(TH // 2, 2, Wh, CP)                 # H pairs on leading axis
    o_ref[...] = jnp.maximum(wm[:, 0], wm[:, 1])        # (TH//2, Wh, CP)


# ------------------------------ wrappers ------------------------------------

def _pick_th(H, W):
    """Largest even row-tile TH dividing H with TH*W <= 1024 conv rows."""
    best = 2 if H % 2 == 0 else H
    for th in range(2, H + 1, 2):
        if H % th == 0 and th * W <= 1024:
            best = th
    return best


def _fused_conv(z_in, scale, shift, w9, TH, apply_act):
    """One conv stage. z_in: (N, H, W, CP) bf16."""
    N, H, W, _ = z_in.shape
    nt = H // TH
    kernel = functools.partial(_fused_conv_kernel, TH=TH, H=H, W=W,
                               apply_act=apply_act)
    z_out, stats = pl.pallas_call(
        kernel,
        out_shape=(jax.ShapeDtypeStruct((N, H, W, CP), jnp.bfloat16),
                   jax.ShapeDtypeStruct((N, 8, CP), jnp.float32)),
        grid=(N, nt),
        in_specs=[
            # Whole image; same block index across t -> stays VMEM-resident.
            pl.BlockSpec((None, H, W, CP), lambda n, t: (n, 0, 0, 0)),
            pl.BlockSpec((1, CP), lambda n, t: (0, 0)),
            pl.BlockSpec((1, CP), lambda n, t: (0, 0)),
            pl.BlockSpec((9, CP, CP), lambda n, t: (0, 0, 0)),
        ],
        out_specs=(
            pl.BlockSpec((None, TH, W, CP), lambda n, t: (n, t, 0, 0)),
            pl.BlockSpec((None, 8, CP), lambda n, t: (n, 0, 0)),  # per-image acc
        ),
        scratch_shapes=[
            pltpu.VMEM((TH * W, CP), jnp.float32),
            pltpu.VMEM((H + 2, W + 2, CP), jnp.bfloat16),
        ],
        compiler_params=pltpu.CompilerParams(
            # Stats are per-image partials -> N can be megacore-parallel;
            # the row-tile axis accumulates into the resident stats block.
            dimension_semantics=("parallel", "arbitrary"),
            vmem_limit_bytes=VMEM_LIMIT),
    )(z_in, scale, shift, w9)
    return z_out, stats


def _bn_scale_shift(stats, gamma_p, beta_p, count):
    """Fold BN(train) batch stats into per-channel scale/shift (f32)."""
    s = jnp.sum(stats[:, 0, :], axis=0, keepdims=True)      # (1, CP)
    q = jnp.sum(stats[:, 1, :], axis=0, keepdims=True)
    mean = s / count
    var = jnp.maximum(q / count - mean * mean, 0.0)          # biased variance
    scale = gamma_p * jax.lax.rsqrt(var + BN_EPS)
    shift = beta_p - mean * scale
    return scale, shift                                       # each (1, CP)


def _bn_relu_pool(z, scale, shift, TH):
    N, H, W, _ = z.shape
    Hh, Wh = H // 2, W // 2
    zv = z.reshape(N, H, Wh, 2 * CP)        # free contiguous view: W pairs on lanes
    kernel = functools.partial(_bn_relu_pool_kernel, TH=TH, W=W)
    return pl.pallas_call(
        kernel,
        out_shape=jax.ShapeDtypeStruct((N, Hh, Wh, CP), jnp.float32),
        grid=(N, H // TH),
        in_specs=[pl.BlockSpec((None, TH, Wh, 2 * CP), lambda n, t: (n, t, 0, 0)),
                  pl.BlockSpec((1, CP), lambda n, t: (0, 0)),
                  pl.BlockSpec((1, CP), lambda n, t: (0, 0))],
        out_specs=pl.BlockSpec((None, TH // 2, Wh, CP), lambda n, t: (n, t, 0, 0)),
        compiler_params=pltpu.CompilerParams(
            dimension_semantics=("parallel", "parallel"),
            vmem_limit_bytes=VMEM_LIMIT),
    )(zv, scale, shift)


def _pack_stage(w, gamma, beta):
    """PyTorch OIHW conv weight + BN params -> lane-dense bf16 kernel operands.

    The conv bias is intentionally dropped: training-mode BN subtracts the batch
    mean, so a per-channel constant cancels exactly.
    """
    cout, cin, _, _ = w.shape
    wt = jnp.transpose(w, (2, 3, 1, 0))                                 # (3,3,cin,cout)
    wt = jnp.pad(wt, ((0, 0), (0, 0), (0, CP - cin), (0, CP - cout)))
    w9 = wt.reshape(9, CP, CP).astype(jnp.bfloat16)
    gp = jnp.pad(gamma, (0, CP - cout)).reshape(1, CP)   # pad gamma/beta with 0 so
    btp = jnp.pad(beta, (0, CP - cout)).reshape(1, CP)   # padded channels stay 0
    return w9, gp, btp


def conv_block4(x_nchw, params):
    """Forward pass of ConvBlock4. Input/output are NCHW (PyTorch layout)."""
    N, cin0, H, W = x_nchw.shape
    assert H % 2 == 0 and W % 2 == 0
    TH = _pick_th(H, W)
    out_dim = params[-1][0].shape[0]
    count = float(N * H * W)

    # NCHW -> NHWC once at entry; channels zero-padded to lane-dense 128, bf16.
    x = jnp.transpose(x_nchw, (0, 2, 3, 1))
    x = jnp.pad(x, ((0, 0), (0, 0), (0, 0), (0, CP - cin0))).astype(jnp.bfloat16)

    z = x
    scale = jnp.ones((1, CP), jnp.float32)     # unused for stage 0 (no prev BN)
    shift = jnp.zeros((1, CP), jnp.float32)
    for i, (w, _b, gamma, beta) in enumerate(params):
        w9, gp, btp = _pack_stage(w, gamma, beta)
        # Fused: apply previous stage's BN+ReLU (i > 0) + conv + BN stats.
        z, stats = _fused_conv(z, scale, shift, w9, TH, apply_act=(i > 0))
        scale, shift = _bn_scale_shift(stats, gp, btp, count)

    # Final stage's BN affine + ReLU fused with the 2x2 max-pool.
    y = _bn_relu_pool(z, scale, shift, TH)
    out = y[..., :out_dim]                                       # drop channel padding
    return jnp.transpose(out, (0, 3, 1, 2))                      # NHWC -> NCHW


# --------------------------- deterministic params ---------------------------

def init_params(key, in_dim, out_dim):
    """4 conv/BN stages; shapes exactly as ConvBlock4.__init__ implies."""
    params = []
    dims = [(in_dim, out_dim)] + [(out_dim, out_dim)] * 3
    for (ci, co) in dims:
        key, kw, kb = jax.random.split(key, 3)
        bound = 1.0 / jnp.sqrt(ci * 9.0)
        w = jax.random.uniform(kw, (co, ci, 3, 3), jnp.float32, -bound, bound)
        b = jax.random.uniform(kb, (co,), jnp.float32, -bound, bound)
        gamma = jnp.ones((co,), jnp.float32)                     # BN default init
        beta = jnp.zeros((co,), jnp.float32)
        params.append((w, b, gamma, beta))
    return params


# ------------------------------ pure-JAX reference --------------------------

def reference(x_nchw, params):
    x = x_nchw
    for (w, b, g, bt) in params:
        y = jax.lax.conv_general_dilated(
            x, w, window_strides=(1, 1), padding=((1, 1), (1, 1)),
            dimension_numbers=("NCHW", "OIHW", "NCHW"))
        y = y + b[None, :, None, None]
        mean = jnp.mean(y, axis=(0, 2, 3), keepdims=True)
        var = jnp.mean((y - mean) ** 2, axis=(0, 2, 3), keepdims=True)
        y = (y - mean) * jax.lax.rsqrt(var + BN_EPS)
        y = y * g[None, :, None, None] + bt[None, :, None, None]
        x = jnp.maximum(y, 0.0)
    N, C, H, W = x.shape
    return x.reshape(N, C, H // 2, 2, W // 2, 2).max(axis=(3, 5))


# ---------------------------------- main -------------------------------------

if __name__ == "__main__":
    key = jax.random.PRNGKey(0)
    kx, kp = jax.random.split(key)

    in_dim, out_dim = 4, 8
    N, H, W = 2, 16, 16
    x = jax.random.normal(kx, (N, in_dim, H, W), jnp.float32)    # NCHW, like PyTorch
    params = init_params(kp, in_dim, out_dim)

    fwd = jax.jit(conv_block4)
    out = jax.block_until_ready(fwd(x, params))
    assert out.shape == (N, out_dim, H // 2, W // 2), out.shape
    assert bool(jnp.all(jnp.isfinite(out)))

    ref = jax.block_until_ready(reference(x, params))
    max_err = float(jnp.max(jnp.abs(out - ref)))
    # bf16 matmuls + bf16 inter-stage storage over 4 chained stages: allow a
    # few percent relative to the reference's dynamic range.
    tol = 5e-2 * (1.0 + float(jnp.max(jnp.abs(ref))))
    assert max_err < tol, f"mismatch vs reference: max abs err = {max_err} (tol {tol})"

    print("KERNEL_OK")
</pallas_src>

<mosaic_0001>
module attributes {stable_mosaic.version = 11 : i64} {
  func.func @_fused_conv_kernel(%arg0: i32, %arg1: i32, %arg2: memref<1x16x16x128xbf16, #tpu.memory_space<vmem>>, %arg3: memref<1x128xf32, #tpu.memory_space<vmem>>, %arg4: memref<1x128xf32, #tpu.memory_space<vmem>>, %arg5: memref<9x128x128xbf16, #tpu.memory_space<vmem>>, %arg6: memref<1x16x16x128xbf16, #tpu.memory_space<vmem>>, %arg7: memref<1x8x128xf32, #tpu.memory_space<vmem>>, %arg8: memref<256x128xf32, #tpu.memory_space<vmem>>, %arg9: memref<18x18x128xbf16, #tpu.memory_space<vmem>>) attributes {dimension_semantics = [#tpu.dimension_semantics<parallel>, #tpu.dimension_semantics<arbitrary>], iteration_bounds = array<i64: 2, 1>, scalar_prefetch = 0 : i64, scratch_operands = 2 : i64, tpu.core_type = #tpu.core_type<tc>, window_params = [{transform_indices = @transform_0, window_bounds = array<i64: 1, 16, 16, 128>}, {pipeline_mode = #tpu.pipeline_mode<synchronous>, transform_indices = @transform_1, window_bounds = array<i64: 1, 128>}, {pipeline_mode = #tpu.pipeline_mode<synchronous>, transform_indices = @transform_2, window_bounds = array<i64: 1, 128>}, {pipeline_mode = #tpu.pipeline_mode<synchronous>, transform_indices = @transform_3, window_bounds = array<i64: 9, 128, 128>}, {transform_indices = @transform_4, window_bounds = array<i64: 1, 16, 16, 128>}, {transform_indices = @transform_5, window_bounds = array<i64: 1, 8, 128>}]} {
    %c0_i32 = arith.constant 0 : i32
    %0 = arith.cmpi eq, %arg1, %c0_i32 : i32
    %1 = arith.extui %0 : i1 to i32
    %c0_i32_0 = arith.constant 0 : i32
    %2 = arith.cmpi ne, %1, %c0_i32_0 : i32
    scf.if %2 {
      %cst_114 = arith.constant 0.000000e+00 : bf16
      %123 = vector.broadcast %cst_114 : bf16 to vector<18x18x128xbf16>
      %c0_115 = arith.constant 0 : index
      %c0_116 = arith.constant 0 : index
      %c0_117 = arith.constant 0 : index
      %124 = vector.load %arg9[%c0_115, %c0_116, %c0_117] : memref<18x18x128xbf16, #tpu.memory_space<vmem>>, vector<18x18x128xbf16>
      tpu.vector_store %arg9[%c0_115, %c0_116, %c0_117], %123 {strides = array<i32>} : memref<18x18x128xbf16, #tpu.memory_space<vmem>>, vector<18x18x128xbf16>,
      %c0_118 = arith.constant 0 : index
      %c0_119 = arith.constant 0 : index
      %c0_120 = arith.constant 0 : index
      %c0_121 = arith.constant 0 : index
      %125 = vector.load %arg2[%c0_118, %c0_119, %c0_120, %c0_121] : memref<1x16x16x128xbf16, #tpu.memory_space<vmem>>, vector<1x16x16x128xbf16>
      %126 = vector.shape_cast %125 : vector<1x16x16x128xbf16> to vector<16x16x128xbf16>
      %c1_122 = arith.constant 1 : index
      %c1_123 = arith.constant 1 : index
      %c0_124 = arith.constant 0 : index
      %127 = vector.load %arg9[%c1_122, %c1_123, %c0_124] : memref<18x18x128xbf16, #tpu.memory_space<vmem>>, vector<16x16x128xbf16>
      tpu.vector_store %arg9[%c1_122, %c1_123, %c0_124], %126 {strides = array<i32>} : memref<18x18x128xbf16, #tpu.memory_space<vmem>>, vector<16x16x128xbf16>,
      %cst_125 = arith.constant 0.000000e+00 : f32
      %128 = vector.broadcast %cst_125 : f32 to vector<8x128xf32>
      %c0_126 = arith.constant 0 : index
      %c0_127 = arith.constant 0 : index
      %c0_128 = arith.constant 0 : index
      %129 = vector.load %arg7[%c0_126, %c0_127, %c0_128] : memref<1x8x128xf32, #tpu.memory_space<vmem>>, vector<1x8x128xf32>
      %130 = vector.shape_cast %129 : vector<1x8x128xf32> to vector<8x128xf32>
      %131 = vector.shape_cast %128 : vector<8x128xf32> to vector<1x8x128xf32>
      tpu.vector_store %arg7[%c0_126, %c0_127, %c0_128], %131 {strides = array<i32>} : memref<1x8x128xf32, #tpu.memory_space<vmem>>, vector<1x8x128xf32>,
    } else {
    }
    %c16_i32 = arith.constant 16 : i32
    %3 = arith.muli %arg1, %c16_i32 : i32
    %c0_i32_1 = arith.constant 0 : i32
    %4 = arith.addi %3, %c0_i32_1 : i32
    %5 = arith.index_cast %4 : i32 to index
    %c0 = arith.constant 0 : index
    %c0_2 = arith.constant 0 : index
    %6 = vector.load %arg9[%5, %c0, %c0_2] : memref<18x18x128xbf16, #tpu.memory_space<vmem>>, vector<16x16x128xbf16>
    %7 = vector.shape_cast %6 : vector<16x16x128xbf16> to vector<256x128xbf16>
    %c0_3 = arith.constant 0 : index
    %c0_4 = arith.constant 0 : index
    %c0_5 = arith.constant 0 : index
    %8 = vector.load %arg5[%c0_3, %c0_4, %c0_5] : memref<9x128x128xbf16, #tpu.memory_space<vmem>>, vector<1x128x128xbf16>
    %9 = vector.shape_cast %8 : vector<1x128x128xbf16> to vector<128x128xbf16>
    %cst = arith.constant dense<0.000000e+00> : vector<256x128xf32>
    %10 = tpu.matmul %7, %9, %cst {dimension_numbers = #tpu.dot_dimension_numbers<[1], [0], [0], [1], [0, 0, 1, 1], [], []>} : vector<256x128xbf16>, vector<128x128xbf16>, vector<256x128xf32> -> vector<256x128xf32>
    %c0_6 = arith.constant 0 : index
    %c0_7 = arith.constant 0 : index
    %11 = vector.load %arg8[%c0_6, %c0_7] : memref<256x128xf32, #tpu.memory_space<vmem>>, vector<256x128xf32>
    tpu.vector_store %arg8[%c0_6, %c0_7], %10 {strides = array<i32>} : memref<256x128xf32, #tpu.memory_space<vmem>>, vector<256x128xf32>,
    %c16_i32_8 = arith.constant 16 : i32
    %12 = arith.muli %arg1, %c16_i32_8 : i32
    %c0_i32_9 = arith.constant 0 : i32
    %13 = arith.addi %12, %c0_i32_9 : i32
    %14 = arith.index_cast %13 : i32 to index
    %c1 = arith.constant 1 : index
    %c0_10 = arith.constant 0 : index
    %15 = vector.load %arg9[%14, %c1, %c0_10] : memref<18x18x128xbf16, #tpu.memory_space<vmem>>, vector<16x16x128xbf16>
    %16 = vector.shape_cast %15 : vector<16x16x128xbf16> to vector<256x128xbf16>
    %c1_11 = arith.constant 1 : index
    %c0_12 = arith.constant 0 : index
    %c0_13 = arith.constant 0 : index
    %17 = vector.load %arg5[%c1_11, %c0_12, %c0_13] : memref<9x128x128xbf16, #tpu.memory_space<vmem>>, vector<1x128x128xbf16>
    %18 = vector.shape_cast %17 : vector<1x128x128xbf16> to vector<128x128xbf16>
    %cst_14 = arith.constant dense<0.000000e+00> : vector<256x128xf32>
    %19 = tpu.matmul %16, %18, %cst_14 {dimension_numbers = #tpu.dot_dimension_numbers<[1], [0], [0], [1], [0, 0, 1, 1], [], []>} : vector<256x128xbf16>, vector<128x128xbf16>, vector<256x128xf32> -> vector<256x128xf32>
    %c0_15 = arith.constant 0 : index
    %c0_16 = arith.constant 0 : index
    %20 = vector.load %arg8[%c0_15, %c0_16] : memref<256x128xf32, #tpu.memory_space<vmem>>, vector<256x128xf32>
    %21 = arith.addf %20, %19 : vector<256x128xf32>
    %c0_17 = arith.constant 0 : index
    %c0_18 = arith.constant 0 : index
    %22 = vector.load %arg8[%c0_17, %c0_18] : memref<256x128xf32, #tpu.memory_space<vmem>>, vector<256x128xf32>
    tpu.vector_store %arg8[%c0_17, %c0_18], %21 {strides = array<i32>} : memref<256x128xf32, #tpu.memory_space<vmem>>, vector<256x128xf32>,
    %c16_i32_19 = arith.constant 16 : i32
    %23 = arith.muli %arg1, %c16_i32_19 : i32
    %c0_i32_20 = arith.constant 0 : i32
    %24 = arith.addi %23, %c0_i32_20 : i32
    %25 = arith.index_cast %24 : i32 to index
    %c2 = arith.constant 2 : index
    %c0_21 = arith.constant 0 : index
    %26 = vector.load %arg9[%25, %c2, %c0_21] : memref<18x18x128xbf16, #tpu.memory_space<vmem>>, vector<16x16x128xbf16>
    %27 = vector.shape_cast %26 : vector<16x16x128xbf16> to vector<256x128xbf16>
    %c2_22 = arith.constant 2 : index
    %c0_23 = arith.constant 0 : index
    %c0_24 = arith.constant 0 : index
    %28 = vector.load %arg5[%c2_22, %c0_23, %c0_24] : memref<9x128x128xbf16, #tpu.memory_space<vmem>>, vector<1x128x128xbf16>
    %29 = vector.shape_cast %28 : vector<1x128x128xbf16> to vector<128x128xbf16>
    %cst_25 = arith.constant dense<0.000000e+00> : vector<256x128xf32>
    %30 = tpu.matmul %27, %29, %cst_25 {dimension_numbers = #tpu.dot_dimension_numbers<[1], [0], [0], [1], [0, 0, 1, 1], [], []>} : vector<256x128xbf16>, vector<128x128xbf16>, vector<256x128xf32> -> vector<256x128xf32>
    %c0_26 = arith.constant 0 : index
    %c0_27 = arith.constant 0 : index
    %31 = vector.load %arg8[%c0_26, %c0_27] : memref<256x128xf32, #tpu.memory_space<vmem>>, vector<256x128xf32>
    %32 = arith.addf %31, %30 : vector<256x128xf32>
    %c0_28 = arith.constant 0 : index
    %c0_29 = arith.constant 0 : index
    %33 = vector.load %arg8[%c0_28, %c0_29] : memref<256x128xf32, #tpu.memory_space<vmem>>, vector<256x128xf32>
    tpu.vector_store %arg8[%c0_28, %c0_29], %32 {strides = array<i32>} : memref<256x128xf32, #tpu.memory_space<vmem>>, vector<256x128xf32>,
    %c16_i32_30 = arith.constant 16 : i32
    %34 = arith.muli %arg1, %c16_i32_30 : i32
    %c1_i32 = arith.constant 1 : i32
    %35 = arith.addi %34, %c1_i32 : i32
    %36 = arith.index_cast %35 : i32 to index
    %c0_31 = arith.constant 0 : index
    %c0_32 = arith.constant 0 : index
    %37 = vector.load %arg9[%36, %c0_31, %c0_32] : memref<18x18x128xbf16, #tpu.memory_space<vmem>>, vector<16x16x128xbf16>
    %38 = vector.shape_cast %37 : vector<16x16x128xbf16> to vector<256x128xbf16>
    %c3 = arith.constant 3 : index
    %c0_33 = arith.constant 0 : index
    %c0_34 = arith.constant 0 : index
    %39 = vector.load %arg5[%c3, %c0_33, %c0_34] : memref<9x128x128xbf16, #tpu.memory_space<vmem>>, vector<1x128x128xbf16>
    %40 = vector.shape_cast %39 : vector<1x128x128xbf16> to vector<128x128xbf16>
    %cst_35 = arith.constant dense<0.000000e+00> : vector<256x128xf32>
    %41 = tpu.matmul %38, %40, %cst_35 {dimension_numbers = #tpu.dot_dimension_numbers<[1], [0], [0], [1], [0, 0, 1, 1], [], []>} : vector<256x128xbf16>, vector<128x128xbf16>, vector<256x128xf32> -> vector<256x128xf32>
    %c0_36 = arith.constant 0 : index
    %c0_37 = arith.constant 0 : index
    %42 = vector.load %arg8[%c0_36, %c0_37] : memref<256x128xf32, #tpu.memory_space<vmem>>, vector<256x128xf32>
    %43 = arith.addf %42, %41 : vector<256x128xf32>
    %c0_38 = arith.constant 0 : index
    %c0_39 = arith.constant 0 : index
    %44 = vector.load %arg8[%c0_38, %c0_39] : memref<256x128xf32, #tpu.memory_space<vmem>>, vector<256x128xf32>
    tpu.vector_store %arg8[%c0_38, %c0_39], %43 {strides = array<i32>} : memref<256x128xf32, #tpu.memory_space<vmem>>, vector<256x128xf32>,
    %c16_i32_40 = arith.constant 16 : i32
    %45 = arith.muli %arg1, %c16_i32_40 : i32
    %c1_i32_41 = arith.constant 1 : i32
    %46 = arith.addi %45, %c1_i32_41 : i32
    %47 = arith.index_cast %46 : i32 to index
    %c1_42 = arith.constant 1 : index
    %c0_43 = arith.constant 0 : index
    %48 = vector.load %arg9[%47, %c1_42, %c0_43] : memref<18x18x128xbf16, #tpu.memory_space<vmem>>, vector<16x16x128xbf16>
    %49 = vector.shape_cast %48 : vector<16x16x128xbf16> to vector<256x128xbf16>
    %c4 = arith.constant 4 : index
    %c0_44 = arith.constant 0 : index
    %c0_45 = arith.constant 0 : index
    %50 = vector.load %arg5[%c4, %c0_44, %c0_45] : memref<9x128x128xbf16, #tpu.memory_space<vmem>>, vector<1x128x128xbf16>
    %51 = vector.shape_cast %50 : vector<1x128x128xbf16> to vector<128x128xbf16>
    %cst_46 = arith.constant dense<0.000000e+00> : vector<256x128xf32>
    %52 = tpu.matmul %49, %51, %cst_46 {dimension_numbers = #tpu.dot_dimension_numbers<[1], [0], [0], [1], [0, 0, 1, 1], [], []>} : vector<256x128xbf16>, vector<128x128xbf16>, vector<256x128xf32> -> vector<256x128xf32>
    %c0_47 = arith.constant 0 : index
    %c0_48 = arith.constant 0 : index
    %53 = vector.load %arg8[%c0_47, %c0_48] : memref<256x128xf32, #tpu.memory_space<vmem>>, vector<256x128xf32>
    %54 = arith.addf %53, %52 : vector<256x128xf32>
    %c0_49 = arith.constant 0 : index
    %c0_50 = arith.constant 0 : index
    %55 = vector.load %arg8[%c0_49, %c0_50] : memref<256x128xf32, #tpu.memory_space<vmem>>, vector<256x128xf32>
    tpu.vector_store %arg8[%c0_49, %c0_50], %54 {strides = array<i32>} : memref<256x128xf32, #tpu.memory_space<vmem>>, vector<256x128xf32>,
    %c16_i32_51 = arith.constant 16 : i32
    %56 = arith.muli %arg1, %c16_i32_51 : i32
    %c1_i32_52 = arith.constant 1 : i32
    %57 = arith.addi %56, %c1_i32_52 : i32
    %58 = arith.index_cast %57 : i32 to index
    %c2_53 = arith.constant 2 : index
    %c0_54 = arith.constant 0 : index
    %59 = vector.load %arg9[%58, %c2_53, %c0_54] : memref<18x18x128xbf16, #tpu.memory_space<vmem>>, vector<16x16x128xbf16>
    %60 = vector.shape_cast %59 : vector<16x16x128xbf16> to vector<256x128xbf16>
    %c5 = arith.constant 5 : index
    %c0_55 = arith.constant 0 : index
    %c0_56 = arith.constant 0 : index
    %61 = vector.load %arg5[%c5, %c0_55, %c0_56] : memref<9x128x128xbf16, #tpu.memory_space<vmem>>, vector<1x128x128xbf16>
    %62 = vector.shape_cast %61 : vector<1x128x128xbf16> to vector<128x128xbf16>
    %cst_57 = arith.constant dense<0.000000e+00> : vector<256x128xf32>
    %63 = tpu.matmul %60, %62, %cst_57 {dimension_numbers = #tpu.dot_dimension_numbers<[1], [0], [0], [1], [0, 0, 1, 1], [], []>} : vector<256x128xbf16>, vector<128x128xbf16>, vector<256x128xf32> -> vector<256x128xf32>
    %c0_58 = arith.constant 0 : index
    %c0_59 = arith.constant 0 : index
    %64 = vector.load %arg8[%c0_58, %c0_59] : memref<256x128xf32, #tpu.memory_space<vmem>>, vector<256x128xf32>
    %65 = arith.addf %64, %63 : vector<256x128xf32>
    %c0_60 = arith.constant 0 : index
    %c0_61 = arith.constant 0 : index
    %66 = vector.load %arg8[%c0_60, %c0_61] : memref<256x128xf32, #tpu.memory_space<vmem>>, vector<256x128xf32>
    tpu.vector_store %arg8[%c0_60, %c0_61], %65 {strides = array<i32>} : memref<256x128xf32, #tpu.memory_space<vmem>>, vector<256x128xf32>,
    %c16_i32_62 = arith.constant 16 : i32
    %67 = arith.muli %arg1, %c16_i32_62 : i32
    %c2_i32 = arith.constant 2 : i32
    %68 = arith.addi %67, %c2_i32 : i32
    %69 = arith.index_cast %68 : i32 to index
    %c0_63 = arith.constant 0 : index
    %c0_64 = arith.constant 0 : index
    %70 = vector.load %arg9[%69, %c0_63, %c0_64] : memref<18x18x128xbf16, #tpu.memory_space<vmem>>, vector<16x16x128xbf16>
    %71 = vector.shape_cast %70 : vector<16x16x128xbf16> to vector<256x128xbf16>
    %c6 = arith.constant 6 : index
    %c0_65 = arith.constant 0 : index
    %c0_66 = arith.constant 0 : index
    %72 = vector.load %arg5[%c6, %c0_65, %c0_66] : memref<9x128x128xbf16, #tpu.memory_space<vmem>>, vector<1x128x128xbf16>
    %73 = vector.shape_cast %72 : vector<1x128x128xbf16> to vector<128x128xbf16>
    %cst_67 = arith.constant dense<0.000000e+00> : vector<256x128xf32>
    %74 = tpu.matmul %71, %73, %cst_67 {dimension_numbers = #tpu.dot_dimension_numbers<[1], [0], [0], [1], [0, 0, 1, 1], [], []>} : vector<256x128xbf16>, vector<128x128xbf16>, vector<256x128xf32> -> vector<256x128xf32>
    %c0_68 = arith.constant 0 : index
    %c0_69 = arith.constant 0 : index
    %75 = vector.load %arg8[%c0_68, %c0_69] : memref<256x128xf32, #tpu.memory_space<vmem>>, vector<256x128xf32>
    %76 = arith.addf %75, %74 : vector<256x128xf32>
    %c0_70 = arith.constant 0 : index
    %c0_71 = arith.constant 0 : index
    %77 = vector.load %arg8[%c0_70, %c0_71] : memref<256x128xf32, #tpu.memory_space<vmem>>, vector<256x128xf32>
    tpu.vector_store %arg8[%c0_70, %c0_71], %76 {strides = array<i32>} : memref<256x128xf32, #tpu.memory_space<vmem>>, vector<256x128xf32>,
    %c16_i32_72 = arith.constant 16 : i32
    %78 = arith.muli %arg1, %c16_i32_72 : i32
    %c2_i32_73 = arith.constant 2 : i32
    %79 = arith.addi %78, %c2_i32_73 : i32
    %80 = arith.index_cast %79 : i32 to index
    %c1_74 = arith.constant 1 : index
    %c0_75 = arith.constant 0 : index
    %81 = vector.load %arg9[%80, %c1_74, %c0_75] : memref<18x18x128xbf16, #tpu.memory_space<vmem>>, vector<16x16x128xbf16>
    %82 = vector.shape_cast %81 : vector<16x16x128xbf16> to vector<256x128xbf16>
    %c7 = arith.constant 7 : index
    %c0_76 = arith.constant 0 : index
    %c0_77 = arith.constant 0 : index
    %83 = vector.load %arg5[%c7, %c0_76, %c0_77] : memref<9x128x128xbf16, #tpu.memory_space<vmem>>, vector<1x128x128xbf16>
    %84 = vector.shape_cast %83 : vector<1x128x128xbf16> to vector<128x128xbf16>
    %cst_78 = arith.constant dense<0.000000e+00> : vector<256x128xf32>
    %85 = tpu.matmul %82, %84, %cst_78 {dimension_numbers = #tpu.dot_dimension_numbers<[1], [0], [0], [1], [0, 0, 1, 1], [], []>} : vector<256x128xbf16>, vector<128x128xbf16>, vector<256x128xf32> -> vector<256x128xf32>
    %c0_79 = arith.constant 0 : index
    %c0_80 = arith.constant 0 : index
    %86 = vector.load %arg8[%c0_79, %c0_80] : memref<256x128xf32, #tpu.memory_space<vmem>>, vector<256x128xf32>
    %87 = arith.addf %86, %85 : vector<256x128xf32>
    %c0_81 = arith.constant 0 : index
    %c0_82 = arith.constant 0 : index
    %88 = vector.load %arg8[%c0_81, %c0_82] : memref<256x128xf32, #tpu.memory_space<vmem>>, vector<256x128xf32>
    tpu.vector_store %arg8[%c0_81, %c0_82], %87 {strides = array<i32>} : memref<256x128xf32, #tpu.memory_space<vmem>>, vector<256x128xf32>,
    %c16_i32_83 = arith.constant 16 : i32
    %89 = arith.muli %arg1, %c16_i32_83 : i32
    %c2_i32_84 = arith.constant 2 : i32
    %90 = arith.addi %89, %c2_i32_84 : i32
    %91 = arith.index_cast %90 : i32 to index
    %c2_85 = arith.constant 2 : index
    %c0_86 = arith.constant 0 : index
    %92 = vector.load %arg9[%91, %c2_85, %c0_86] : memref<18x18x128xbf16, #tpu.memory_space<vmem>>, vector<16x16x128xbf16>
    %93 = vector.shape_cast %92 : vector<16x16x128xbf16> to vector<256x128xbf16>
    %c8 = arith.constant 8 : index
    %c0_87 = arith.constant 0 : index
    %c0_88 = arith.constant 0 : index
    %94 = vector.load %arg5[%c8, %c0_87, %c0_88] : memref<9x128x128xbf16, #tpu.memory_space<vmem>>, vector<1x128x128xbf16>
    %95 = vector.shape_cast %94 : vector<1x128x128xbf16> to vector<128x128xbf16>
    %cst_89 = arith.constant dense<0.000000e+00> : vector<256x128xf32>
    %96 = tpu.matmul %93, %95, %cst_89 {dimension_numbers = #tpu.dot_dimension_numbers<[1], [0], [0], [1], [0, 0, 1, 1], [], []>} : vector<256x128xbf16>, vector<128x128xbf16>, vector<256x128xf32> -> vector<256x128xf32>
    %c0_90 = arith.constant 0 : index
    %c0_91 = arith.constant 0 : index
    %97 = vector.load %arg8[%c0_90, %c0_91] : memref<256x128xf32, #tpu.memory_space<vmem>>, vector<256x128xf32>
    %98 = arith.addf %97, %96 : vector<256x128xf32>
    %c0_92 = arith.constant 0 : index
    %c0_93 = arith.constant 0 : index
    %99 = vector.load %arg8[%c0_92, %c0_93] : memref<256x128xf32, #tpu.memory_space<vmem>>, vector<256x128xf32>
    tpu.vector_store %arg8[%c0_92, %c0_93], %98 {strides = array<i32>} : memref<256x128xf32, #tpu.memory_space<vmem>>, vector<256x128xf32>,
    %c0_94 = arith.constant 0 : index
    %c0_95 = arith.constant 0 : index
    %100 = vector.load %arg8[%c0_94, %c0_95] : memref<256x128xf32, #tpu.memory_space<vmem>>, vector<256x128xf32>
    %101 = vector.shape_cast %100 : vector<256x128xf32> to vector<16x16x128xf32>
    %102 = arith.truncf %101 : vector<16x16x128xf32> to vector<16x16x128xbf16>
    %c0_96 = arith.constant 0 : index
    %c0_97 = arith.constant 0 : index
    %c0_98 = arith.constant 0 : index
    %c0_99 = arith.constant 0 : index
    %103 = vector.load %arg6[%c0_96, %c0_97, %c0_98, %c0_99] : memref<1x16x16x128xbf16, #tpu.memory_space<vmem>>, vector<1x16x16x128xbf16>
    %104 = vector.shape_cast %103 : vector<1x16x16x128xbf16> to vector<16x16x128xbf16>
    %105 = vector.shape_cast %102 : vector<16x16x128xbf16> to vector<1x16x16x128xbf16>
    tpu.vector_store %arg6[%c0_96, %c0_97, %c0_98, %c0_99], %105 {strides = array<i32>} : memref<1x16x16x128xbf16, #tpu.memory_space<vmem>>, vector<1x16x16x128xbf16>,
    %c0_100 = arith.constant 0 : index
    %c0_101 = arith.constant 0 : index
    %c0_102 = arith.constant 0 : index
    %106 = vector.load %arg7[%c0_100, %c0_101, %c0_102] : memref<1x8x128xf32, #tpu.memory_space<vmem>>, vector<1x1x128xf32>
    %107 = vector.shape_cast %106 : vector<1x1x128xf32> to vector<1x128xf32>
    %cst_103 = arith.constant dense<0.000000e+00> : vector<128xf32>
    %108 = vector.multi_reduction <add>, %100, %cst_103 [0] : vector<256x128xf32> to vector<128xf32>
    %109 = vector.shape_cast %108 : vector<128xf32> to vector<1x128xf32>
    %110 = arith.addf %107, %109 : vector<1x128xf32>
    %c0_104 = arith.constant 0 : index
    %c0_105 = arith.constant 0 : index
    %c0_106 = arith.constant 0 : index
    %111 = vector.load %arg7[%c0_104, %c0_105, %c0_106] : memref<1x8x128xf32, #tpu.memory_space<vmem>>, vector<1x1x128xf32>
    %112 = vector.shape_cast %111 : vector<1x1x128xf32> to vector<1x128xf32>
    %113 = vector.shape_cast %110 : vector<1x128xf32> to vector<1x1x128xf32>
    tpu.vector_store %arg7[%c0_104, %c0_105, %c0_106], %113 {strides = array<i32>} : memref<1x8x128xf32, #tpu.memory_space<vmem>>, vector<1x1x128xf32>,
    %c0_107 = arith.constant 0 : index
    %c1_108 = arith.constant 1 : index
    %c0_109 = arith.constant 0 : index
    %114 = vector.load %arg7[%c0_107, %c1_108, %c0_109] : memref<1x8x128xf32, #tpu.memory_space<vmem>>, vector<1x1x128xf32>
    %115 = vector.shape_cast %114 : vector<1x1x128xf32> to vector<1x128xf32>
    %116 = arith.mulf %100, %100 : vector<256x128xf32>
    %cst_110 = arith.constant dense<0.000000e+00> : vector<128xf32>
    %117 = vector.multi_reduction <add>, %116, %cst_110 [0] : vector<256x128xf32> to vector<128xf32>
    %118 = vector.shape_cast %117 : vector<128xf32> to vector<1x128xf32>
    %119 = arith.addf %115, %118 : vector<1x128xf32>
    %c0_111 = arith.constant 0 : index
    %c1_112 = arith.constant 1 : index
    %c0_113 = arith.constant 0 : index
    %120 = vector.load %arg7[%c0_111, %c1_112, %c0_113] : memref<1x8x128xf32, #tpu.memory_space<vmem>>, vector<1x1x128xf32>
    %121 = vector.shape_cast %120 : vector<1x1x128xf32> to vector<1x128xf32>
    %122 = vector.shape_cast %119 : vector<1x128xf32> to vector<1x1x128xf32>
    tpu.vector_store %arg7[%c0_111, %c1_112, %c0_113], %122 {strides = array<i32>} : memref<1x8x128xf32, #tpu.memory_space<vmem>>, vector<1x1x128xf32>,
    return
  }
  func.func @transform_0(%arg0: i32, %arg1: i32) -> (i32, i32, i32, i32) {
    %c0_i32 = arith.constant 0 : i32
    %c0_i32_0 = arith.constant 0 : i32
    %c0_i32_1 = arith.constant 0 : i32
    %c0_i32_2 = arith.constant 0 : i32
    return %arg0, %c0_i32, %c0_i32_0, %c0_i32_1 : i32, i32, i32, i32
  }
  func.func @transform_1(%arg0: i32, %arg1: i32) -> (i32, i32) {
    %c0_i32 = arith.constant 0 : i32
    %c0_i32_0 = arith.constant 0 : i32
    %c0_i32_1 = arith.constant 0 : i32
    return %c0_i32, %c0_i32_0 : i32, i32
  }
  func.func @transform_2(%arg0: i32, %arg1: i32) -> (i32, i32) {
    %c0_i32 = arith.constant 0 : i32
    %c0_i32_0 = arith.constant 0 : i32
    %c0_i32_1 = arith.constant 0 : i32
    return %c0_i32, %c0_i32_0 : i32, i32
  }
  func.func @transform_3(%arg0: i32, %arg1: i32) -> (i32, i32, i32) {
    %c0_i32 = arith.constant 0 : i32
    %c0_i32_0 = arith.constant 0 : i32
    %c0_i32_1 = arith.constant 0 : i32
    %c0_i32_2 = arith.constant 0 : i32
    return %c0_i32, %c0_i32_0, %c0_i32_1 : i32, i32, i32
  }
  func.func @transform_4(%arg0: i32, %arg1: i32) -> (i32, i32, i32, i32) {
    %c0_i32 = arith.constant 0 : i32
    %c0_i32_0 = arith.constant 0 : i32
    %c0_i32_1 = arith.constant 0 : i32
    return %arg0, %arg1, %c0_i32, %c0_i32_0 : i32, i32, i32, i32
  }
  func.func @transform_5(%arg0: i32, %arg1: i32) -> (i32, i32, i32) {
    %c0_i32 = arith.constant 0 : i32
    %c0_i32_0 = arith.constant 0 : i32
    %c0_i32_1 = arith.constant 0 : i32
    return %arg0, %c0_i32, %c0_i32_0 : i32, i32, i32
  }
}

module attributes {stable_mosaic.version = 11 : i64} {
  func.func @_fused_conv_kernel(%arg0: i32, %arg1: i32, %arg2: memref<1x16x16x128xbf16, #tpu.memory_space<vmem>>, %arg3: memref<1x128xf32, #tpu.memory_space<vmem>>, %arg4: memref<1x128xf32, #tpu.memory_space<vmem>>, %arg5: memref<9x128x128xbf16, #tpu.memory_space<vmem>>, %arg6: memref<1x16x16x128xbf16, #tpu.memory_space<vmem>>, %arg7: memref<1x8x128xf32, #tpu.memory_space<vmem>>, %arg8: memref<256x128xf32, #tpu.memory_space<vmem>>, %arg9: memref<18x18x128xbf16, #tpu.memory_space<vmem>>) attributes {dimension_semantics = [#tpu.dimension_semantics<parallel>, #tpu.dimension_semantics<arbitrary>], iteration_bounds = array<i64: 2, 1>, scalar_prefetch = 0 : i64, scratch_operands = 2 : i64, tpu.core_type = #tpu.core_type<tc>, window_params = [{transform_indices = @transform_0, window_bounds = array<i64: 1, 16, 16, 128>}, {pipeline_mode = #tpu.pipeline_mode<synchronous>, transform_indices = @transform_1, window_bounds = array<i64: 1, 128>}, {pipeline_mode = #tpu.pipeline_mode<synchronous>, transform_indices = @transform_2, window_bounds = array<i64: 1, 128>}, {pipeline_mode = #tpu.pipeline_mode<synchronous>, transform_indices = @transform_3, window_bounds = array<i64: 9, 128, 128>}, {transform_indices = @transform_4, window_bounds = array<i64: 1, 16, 16, 128>}, {transform_indices = @transform_5, window_bounds = array<i64: 1, 8, 128>}]} {
    %c0_i32 = arith.constant 0 : i32
    %0 = arith.cmpi eq, %arg1, %c0_i32 : i32
    %1 = arith.extui %0 : i1 to i32
    %c0_i32_0 = arith.constant 0 : i32
    %2 = arith.cmpi ne, %1, %c0_i32_0 : i32
    scf.if %2 {
      %cst_114 = arith.constant 0.000000e+00 : bf16
      %123 = vector.broadcast %cst_114 : bf16 to vector<18x18x128xbf16>
      %c0_115 = arith.constant 0 : index
      %c0_116 = arith.constant 0 : index
      %c0_117 = arith.constant 0 : index
      %124 = vector.load %arg9[%c0_115, %c0_116, %c0_117] : memref<18x18x128xbf16, #tpu.memory_space<vmem>>, vector<18x18x128xbf16>
      tpu.vector_store %arg9[%c0_115, %c0_116, %c0_117], %123 {strides = array<i32>} : memref<18x18x128xbf16, #tpu.memory_space<vmem>>, vector<18x18x128xbf16>,
      %c0_118 = arith.constant 0 : index
      %c0_119 = arith.constant 0 : index
      %c0_120 = arith.constant 0 : index
      %c0_121 = arith.constant 0 : index
      %125 = vector.load %arg2[%c0_118, %c0_119, %c0_120, %c0_121] : memref<1x16x16x128xbf16, #tpu.memory_space<vmem>>, vector<1x16x16x128xbf16>
      %126 = vector.shape_cast %125 : vector<1x16x16x128xbf16> to vector<16x16x128xbf16>
      %127 = arith.extf %126 : vector<16x16x128xbf16> to vector<16x16x128xf32>
      %c0_122 = arith.constant 0 : index
      %c0_123 = arith.constant 0 : index
      %128 = vector.load %arg3[%c0_122, %c0_123] : memref<1x128xf32, #tpu.memory_space<vmem>>, vector<1x128xf32>
      %129 = vector.shape_cast %128 : vector<1x128xf32> to vector<1x1x128xf32>
      %130 = vector.broadcast %129 : vector<1x1x128xf32> to vector<16x16x128xf32>
      %131 = arith.mulf %127, %130 : vector<16x16x128xf32>
      %c0_124 = arith.constant 0 : index
      %c0_125 = arith.constant 0 : index
      %132 = vector.load %arg4[%c0_124, %c0_125] : memref<1x128xf32, #tpu.memory_space<vmem>>, vector<1x128xf32>
      %133 = vector.shape_cast %132 : vector<1x128xf32> to vector<1x1x128xf32>
      %134 = vector.broadcast %133 : vector<1x1x128xf32> to vector<16x16x128xf32>
      %135 = arith.addf %131, %134 : vector<16x16x128xf32>
      %cst_126 = arith.constant 0.000000e+00 : f32
      %136 = vector.broadcast %cst_126 : f32 to vector<16x16x128xf32>
      %137 = arith.maximumf %135, %136 : vector<16x16x128xf32>
      %138 = arith.truncf %137 : vector<16x16x128xf32> to vector<16x16x128xbf16>
      %c1_127 = arith.constant 1 : index
      %c1_128 = arith.constant 1 : index
      %c0_129 = arith.constant 0 : index
      %139 = vector.load %arg9[%c1_127, %c1_128, %c0_129] : memref<18x18x128xbf16, #tpu.memory_space<vmem>>, vector<16x16x128xbf16>
      tpu.vector_store %arg9[%c1_127, %c1_128, %c0_129], %138 {strides = array<i32>} : memref<18x18x128xbf16, #tpu.memory_space<vmem>>, vector<16x16x128xbf16>,
      %cst_130 = arith.constant 0.000000e+00 : f32
      %140 = vector.broadcast %cst_130 : f32 to vector<8x128xf32>
      %c0_131 = arith.constant 0 : index
      %c0_132 = arith.constant 0 : index
      %c0_133 = arith.constant 0 : index
      %141 = vector.load %arg7[%c0_131, %c0_132, %c0_133] : memref<1x8x128xf32, #tpu.memory_space<vmem>>, vector<1x8x128xf32>
      %142 = vector.shape_cast %141 : vector<1x8x128xf32> to vector<8x128xf32>
      %143 = vector.shape_cast %140 : vector<8x128xf32> to vector<1x8x128xf32>
      tpu.vector_store %arg7[%c0_131, %c0_132, %c0_133], %143 {strides = array<i32>} : memref<1x8x128xf32, #tpu.memory_space<vmem>>, vector<1x8x128xf32>,
    } else {
    }
    %c16_i32 = arith.constant 16 : i32
    %3 = arith.muli %arg1, %c16_i32 : i32
    %c0_i32_1 = arith.constant 0 : i32
    %4 = arith.addi %3, %c0_i32_1 : i32
    %5 = arith.index_cast %4 : i32 to index
    %c0 = arith.constant 0 : index
    %c0_2 = arith.constant 0 : index
    %6 = vector.load %arg9[%5, %c0, %c0_2] : memref<18x18x128xbf16, #tpu.memory_space<vmem>>, vector<16x16x128xbf16>
    %7 = vector.shape_cast %6 : vector<16x16x128xbf16> to vector<256x128xbf16>
    %c0_3 = arith.constant 0 : index
    %c0_4 = arith.constant 0 : index
    %c0_5 = arith.constant 0 : index
    %8 = vector.load %arg5[%c0_3, %c0_4, %c0_5] : memref<9x128x128xbf16, #tpu.memory_space<vmem>>, vector<1x128x128xbf16>
    %9 = vector.shape_cast %8 : vector<1x128x128xbf16> to vector<128x128xbf16>
    %cst = arith.constant dense<0.000000e+00> : vector<256x128xf32>
    %10 = tpu.matmul %7, %9, %cst {dimension_numbers = #tpu.dot_dimension_numbers<[1], [0], [0], [1], [0, 0, 1, 1], [], []>} : vector<256x128xbf16>, vector<128x128xbf16>, vector<256x128xf32> -> vector<256x128xf32>
    %c0_6 = arith.constant 0 : index
    %c0_7 = arith.constant 0 : index
    %11 = vector.load %arg8[%c0_6, %c0_7] : memref<256x128xf32, #tpu.memory_space<vmem>>, vector<256x128xf32>
    tpu.vector_store %arg8[%c0_6, %c0_7], %10 {strides = array<i32>} : memref<256x128xf32, #tpu.memory_space<vmem>>, vector<256x128xf32>,
    %c16_i32_8 = arith.constant 16 : i32
    %12 = arith.muli %arg1, %c16_i32_8 : i32
    %c0_i32_9 = arith.constant 0 : i32
    %13 = arith.addi %12, %c0_i32_9 : i32
    %14 = arith.index_cast %13 : i32 to index
    %c1 = arith.constant 1 : index
    %c0_10 = arith.constant 0 : index
    %15 = vector.load %arg9[%14, %c1, %c0_10] : memref<18x18x128xbf16, #tpu.memory_space<vmem>>, vector<16x16x128xbf16>
    %16 = vector.shape_cast %15 : vector<16x16x128xbf16> to vector<256x128xbf16>
    %c1_11 = arith.constant 1 : index
    %c0_12 = arith.constant 0 : index
    %c0_13 = arith.constant 0 : index
    %17 = vector.load %arg5[%c1_11, %c0_12, %c0_13] : memref<9x128x128xbf16, #tpu.memory_space<vmem>>, vector<1x128x128xbf16>
    %18 = vector.shape_cast %17 : vector<1x128x128xbf16> to vector<128x128xbf16>
    %cst_14 = arith.constant dense<0.000000e+00> : vector<256x128xf32>
    %19 = tpu.matmul %16, %18, %cst_14 {dimension_numbers = #tpu.dot_dimension_numbers<[1], [0], [0], [1], [0, 0, 1, 1], [], []>} : vector<256x128xbf16>, vector<128x128xbf16>, vector<256x128xf32> -> vector<256x128xf32>
    %c0_15 = arith.constant 0 : index
    %c0_16 = arith.constant 0 : index
    %20 = vector.load %arg8[%c0_15, %c0_16] : memref<256x128xf32, #tpu.memory_space<vmem>>, vector<256x128xf32>
    %21 = arith.addf %20, %19 : vector<256x128xf32>
    %c0_17 = arith.constant 0 : index
    %c0_18 = arith.constant 0 : index
    %22 = vector.load %arg8[%c0_17, %c0_18] : memref<256x128xf32, #tpu.memory_space<vmem>>, vector<256x128xf32>
    tpu.vector_store %arg8[%c0_17, %c0_18], %21 {strides = array<i32>} : memref<256x128xf32, #tpu.memory_space<vmem>>, vector<256x128xf32>,
    %c16_i32_19 = arith.constant 16 : i32
    %23 = arith.muli %arg1, %c16_i32_19 : i32
    %c0_i32_20 = arith.constant 0 : i32
    %24 = arith.addi %23, %c0_i32_20 : i32
    %25 = arith.index_cast %24 : i32 to index
    %c2 = arith.constant 2 : index
    %c0_21 = arith.constant 0 : index
    %26 = vector.load %arg9[%25, %c2, %c0_21] : memref<18x18x128xbf16, #tpu.memory_space<vmem>>, vector<16x16x128xbf16>
    %27 = vector.shape_cast %26 : vector<16x16x128xbf16> to vector<256x128xbf16>
    %c2_22 = arith.constant 2 : index
    %c0_23 = arith.constant 0 : index
    %c0_24 = arith.constant 0 : index
    %28 = vector.load %arg5[%c2_22, %c0_23, %c0_24] : memref<9x128x128xbf16, #tpu.memory_space<vmem>>, vector<1x128x128xbf16>
    %29 = vector.shape_cast %28 : vector<1x128x128xbf16> to vector<128x128xbf16>
    %cst_25 = arith.constant dense<0.000000e+00> : vector<256x128xf32>
    %30 = tpu.matmul %27, %29, %cst_25 {dimension_numbers = #tpu.dot_dimension_numbers<[1], [0], [0], [1], [0, 0, 1, 1], [], []>} : vector<256x128xbf16>, vector<128x128xbf16>, vector<256x128xf32> -> vector<256x128xf32>
    %c0_26 = arith.constant 0 : index
    %c0_27 = arith.constant 0 : index
    %31 = vector.load %arg8[%c0_26, %c0_27] : memref<256x128xf32, #tpu.memory_space<vmem>>, vector<256x128xf32>
    %32 = arith.addf %31, %30 : vector<256x128xf32>
    %c0_28 = arith.constant 0 : index
    %c0_29 = arith.constant 0 : index
    %33 = vector.load %arg8[%c0_28, %c0_29] : memref<256x128xf32, #tpu.memory_space<vmem>>, vector<256x128xf32>
    tpu.vector_store %arg8[%c0_28, %c0_29], %32 {strides = array<i32>} : memref<256x128xf32, #tpu.memory_space<vmem>>, vector<256x128xf32>,
    %c16_i32_30 = arith.constant 16 : i32
    %34 = arith.muli %arg1, %c16_i32_30 : i32
    %c1_i32 = arith.constant 1 : i32
    %35 = arith.addi %34, %c1_i32 : i32
    %36 = arith.index_cast %35 : i32 to index
    %c0_31 = arith.constant 0 : index
    %c0_32 = arith.constant 0 : index
    %37 = vector.load %arg9[%36, %c0_31, %c0_32] : memref<18x18x128xbf16, #tpu.memory_space<vmem>>, vector<16x16x128xbf16>
    %38 = vector.shape_cast %37 : vector<16x16x128xbf16> to vector<256x128xbf16>
    %c3 = arith.constant 3 : index
    %c0_33 = arith.constant 0 : index
    %c0_34 = arith.constant 0 : index
    %39 = vector.load %arg5[%c3, %c0_33, %c0_34] : memref<9x128x128xbf16, #tpu.memory_space<vmem>>, vector<1x128x128xbf16>
    %40 = vector.shape_cast %39 : vector<1x128x128xbf16> to vector<128x128xbf16>
    %cst_35 = arith.constant dense<0.000000e+00> : vector<256x128xf32>
    %41 = tpu.matmul %38, %40, %cst_35 {dimension_numbers = #tpu.dot_dimension_numbers<[1], [0], [0], [1], [0, 0, 1, 1], [], []>} : vector<256x128xbf16>, vector<128x128xbf16>, vector<256x128xf32> -> vector<256x128xf32>
    %c0_36 = arith.constant 0 : index
    %c0_37 = arith.constant 0 : index
    %42 = vector.load %arg8[%c0_36, %c0_37] : memref<256x128xf32, #tpu.memory_space<vmem>>, vector<256x128xf32>
    %43 = arith.addf %42, %41 : vector<256x128xf32>
    %c0_38 = arith.constant 0 : index
    %c0_39 = arith.constant 0 : index
    %44 = vector.load %arg8[%c0_38, %c0_39] : memref<256x128xf32, #tpu.memory_space<vmem>>, vector<256x128xf32>
    tpu.vector_store %arg8[%c0_38, %c0_39], %43 {strides = array<i32>} : memref<256x128xf32, #tpu.memory_space<vmem>>, vector<256x128xf32>,
    %c16_i32_40 = arith.constant 16 : i32
    %45 = arith.muli %arg1, %c16_i32_40 : i32
    %c1_i32_41 = arith.constant 1 : i32
    %46 = arith.addi %45, %c1_i32_41 : i32
    %47 = arith.index_cast %46 : i32 to index
    %c1_42 = arith.constant 1 : index
    %c0_43 = arith.constant 0 : index
    %48 = vector.load %arg9[%47, %c1_42, %c0_43] : memref<18x18x128xbf16, #tpu.memory_space<vmem>>, vector<16x16x128xbf16>
    %49 = vector.shape_cast %48 : vector<16x16x128xbf16> to vector<256x128xbf16>
    %c4 = arith.constant 4 : index
    %c0_44 = arith.constant 0 : index
    %c0_45 = arith.constant 0 : index
    %50 = vector.load %arg5[%c4, %c0_44, %c0_45] : memref<9x128x128xbf16, #tpu.memory_space<vmem>>, vector<1x128x128xbf16>
    %51 = vector.shape_cast %50 : vector<1x128x128xbf16> to vector<128x128xbf16>
    %cst_46 = arith.constant dense<0.000000e+00> : vector<256x128xf32>
    %52 = tpu.matmul %49, %51, %cst_46 {dimension_numbers = #tpu.dot_dimension_numbers<[1], [0], [0], [1], [0, 0, 1, 1], [], []>} : vector<256x128xbf16>, vector<128x128xbf16>, vector<256x128xf32> -> vector<256x128xf32>
    %c0_47 = arith.constant 0 : index
    %c0_48 = arith.constant 0 : index
    %53 = vector.load %arg8[%c0_47, %c0_48] : memref<256x128xf32, #tpu.memory_space<vmem>>, vector<256x128xf32>
    %54 = arith.addf %53, %52 : vector<256x128xf32>
    %c0_49 = arith.constant 0 : index
    %c0_50 = arith.constant 0 : index
    %55 = vector.load %arg8[%c0_49, %c0_50] : memref<256x128xf32, #tpu.memory_space<vmem>>, vector<256x128xf32>
    tpu.vector_store %arg8[%c0_49, %c0_50], %54 {strides = array<i32>} : memref<256x128xf32, #tpu.memory_space<vmem>>, vector<256x128xf32>,
    %c16_i32_51 = arith.constant 16 : i32
    %56 = arith.muli %arg1, %c16_i32_51 : i32
    %c1_i32_52 = arith.constant 1 : i32
    %57 = arith.addi %56, %c1_i32_52 : i32
    %58 = arith.index_cast %57 : i32 to index
    %c2_53 = arith.constant 2 : index
    %c0_54 = arith.constant 0 : index
    %59 = vector.load %arg9[%58, %c2_53, %c0_54] : memref<18x18x128xbf16, #tpu.memory_space<vmem>>, vector<16x16x128xbf16>
    %60 = vector.shape_cast %59 : vector<16x16x128xbf16> to vector<256x128xbf16>
    %c5 = arith.constant 5 : index
    %c0_55 = arith.constant 0 : index
    %c0_56 = arith.constant 0 : index
    %61 = vector.load %arg5[%c5, %c0_55, %c0_56] : memref<9x128x128xbf16, #tpu.memory_space<vmem>>, vector<1x128x128xbf16>
    %62 = vector.shape_cast %61 : vector<1x128x128xbf16> to vector<128x128xbf16>
    %cst_57 = arith.constant dense<0.000000e+00> : vector<256x128xf32>
    %63 = tpu.matmul %60, %62, %cst_57 {dimension_numbers = #tpu.dot_dimension_numbers<[1], [0], [0], [1], [0, 0, 1, 1], [], []>} : vector<256x128xbf16>, vector<128x128xbf16>, vector<256x128xf32> -> vector<256x128xf32>
    %c0_58 = arith.constant 0 : index
    %c0_59 = arith.constant 0 : index
    %64 = vector.load %arg8[%c0_58, %c0_59] : memref<256x128xf32, #tpu.memory_space<vmem>>, vector<256x128xf32>
    %65 = arith.addf %64, %63 : vector<256x128xf32>
    %c0_60 = arith.constant 0 : index
    %c0_61 = arith.constant 0 : index
    %66 = vector.load %arg8[%c0_60, %c0_61] : memref<256x128xf32, #tpu.memory_space<vmem>>, vector<256x128xf32>
    tpu.vector_store %arg8[%c0_60, %c0_61], %65 {strides = array<i32>} : memref<256x128xf32, #tpu.memory_space<vmem>>, vector<256x128xf32>,
    %c16_i32_62 = arith.constant 16 : i32
    %67 = arith.muli %arg1, %c16_i32_62 : i32
    %c2_i32 = arith.constant 2 : i32
    %68 = arith.addi %67, %c2_i32 : i32
    %69 = arith.index_cast %68 : i32 to index
    %c0_63 = arith.constant 0 : index
    %c0_64 = arith.constant 0 : index
    %70 = vector.load %arg9[%69, %c0_63, %c0_64] : memref<18x18x128xbf16, #tpu.memory_space<vmem>>, vector<16x16x128xbf16>
    %71 = vector.shape_cast %70 : vector<16x16x128xbf16> to vector<256x128xbf16>
    %c6 = arith.constant 6 : index
    %c0_65 = arith.constant 0 : index
    %c0_66 = arith.constant 0 : index
    %72 = vector.load %arg5[%c6, %c0_65, %c0_66] : memref<9x128x128xbf16, #tpu.memory_space<vmem>>, vector<1x128x128xbf16>
    %73 = vector.shape_cast %72 : vector<1x128x128xbf16> to vector<128x128xbf16>
    %cst_67 = arith.constant dense<0.000000e+00> : vector<256x128xf32>
    %74 = tpu.matmul %71, %73, %cst_67 {dimension_numbers = #tpu.dot_dimension_numbers<[1], [0], [0], [1], [0, 0, 1, 1], [], []>} : vector<256x128xbf16>, vector<128x128xbf16>, vector<256x128xf32> -> vector<256x128xf32>
    %c0_68 = arith.constant 0 : index
    %c0_69 = arith.constant 0 : index
    %75 = vector.load %arg8[%c0_68, %c0_69] : memref<256x128xf32, #tpu.memory_space<vmem>>, vector<256x128xf32>
    %76 = arith.addf %75, %74 : vector<256x128xf32>
    %c0_70 = arith.constant 0 : index
    %c0_71 = arith.constant 0 : index
    %77 = vector.load %arg8[%c0_70, %c0_71] : memref<256x128xf32, #tpu.memory_space<vmem>>, vector<256x128xf32>
    tpu.vector_store %arg8[%c0_70, %c0_71], %76 {strides = array<i32>} : memref<256x128xf32, #tpu.memory_space<vmem>>, vector<256x128xf32>,
    %c16_i32_72 = arith.constant 16 : i32
    %78 = arith.muli %arg1, %c16_i32_72 : i32
    %c2_i32_73 = arith.constant 2 : i32
    %79 = arith.addi %78, %c2_i32_73 : i32
    %80 = arith.index_cast %79 : i32 to index
    %c1_74 = arith.constant 1 : index
    %c0_75 = arith.constant 0 : index
    %81 = vector.load %arg9[%80, %c1_74, %c0_75] : memref<18x18x128xbf16, #tpu.memory_space<vmem>>, vector<16x16x128xbf16>
    %82 = vector.shape_cast %81 : vector<16x16x128xbf16> to vector<256x128xbf16>
    %c7 = arith.constant 7 : index
    %c0_76 = arith.constant 0 : index
    %c0_77 = arith.constant 0 : index
    %83 = vector.load %arg5[%c7, %c0_76, %c0_77] : memref<9x128x128xbf16, #tpu.memory_space<vmem>>, vector<1x128x128xbf16>
    %84 = vector.shape_cast %83 : vector<1x128x128xbf16> to vector<128x128xbf16>
    %cst_78 = arith.constant dense<0.000000e+00> : vector<256x128xf32>
    %85 = tpu.matmul %82, %84, %cst_78 {dimension_numbers = #tpu.dot_dimension_numbers<[1], [0], [0], [1], [0, 0, 1, 1], [], []>} : vector<256x128xbf16>, vector<128x128xbf16>, vector<256x128xf32> -> vector<256x128xf32>
    %c0_79 = arith.constant 0 : index
    %c0_80 = arith.constant 0 : index
    %86 = vector.load %arg8[%c0_79, %c0_80] : memref<256x128xf32, #tpu.memory_space<vmem>>, vector<256x128xf32>
    %87 = arith.addf %86, %85 : vector<256x128xf32>
    %c0_81 = arith.constant 0 : index
    %c0_82 = arith.constant 0 : index
    %88 = vector.load %arg8[%c0_81, %c0_82] : memref<256x128xf32, #tpu.memory_space<vmem>>, vector<256x128xf32>
    tpu.vector_store %arg8[%c0_81, %c0_82], %87 {strides = array<i32>} : memref<256x128xf32, #tpu.memory_space<vmem>>, vector<256x128xf32>,
    %c16_i32_83 = arith.constant 16 : i32
    %89 = arith.muli %arg1, %c16_i32_83 : i32
    %c2_i32_84 = arith.constant 2 : i32
    %90 = arith.addi %89, %c2_i32_84 : i32
    %91 = arith.index_cast %90 : i32 to index
    %c2_85 = arith.constant 2 : index
    %c0_86 = arith.constant 0 : index
    %92 = vector.load %arg9[%91, %c2_85, %c0_86] : memref<18x18x128xbf16, #tpu.memory_space<vmem>>, vector<16x16x128xbf16>
    %93 = vector.shape_cast %92 : vector<16x16x128xbf16> to vector<256x128xbf16>
    %c8 = arith.constant 8 : index
    %c0_87 = arith.constant 0 : index
    %c0_88 = arith.constant 0 : index
    %94 = vector.load %arg5[%c8, %c0_87, %c0_88] : memref<9x128x128xbf16, #tpu.memory_space<vmem>>, vector<1x128x128xbf16>
    %95 = vector.shape_cast %94 : vector<1x128x128xbf16> to vector<128x128xbf16>
    %cst_89 = arith.constant dense<0.000000e+00> : vector<256x128xf32>
    %96 = tpu.matmul %93, %95, %cst_89 {dimension_numbers = #tpu.dot_dimension_numbers<[1], [0], [0], [1], [0, 0, 1, 1], [], []>} : vector<256x128xbf16>, vector<128x128xbf16>, vector<256x128xf32> -> vector<256x128xf32>
    %c0_90 = arith.constant 0 : index
    %c0_91 = arith.constant 0 : index
    %97 = vector.load %arg8[%c0_90, %c0_91] : memref<256x128xf32, #tpu.memory_space<vmem>>, vector<256x128xf32>
    %98 = arith.addf %97, %96 : vector<256x128xf32>
    %c0_92 = arith.constant 0 : index
    %c0_93 = arith.constant 0 : index
    %99 = vector.load %arg8[%c0_92, %c0_93] : memref<256x128xf32, #tpu.memory_space<vmem>>, vector<256x128xf32>
    tpu.vector_store %arg8[%c0_92, %c0_93], %98 {strides = array<i32>} : memref<256x128xf32, #tpu.memory_space<vmem>>, vector<256x128xf32>,
    %c0_94 = arith.constant 0 : index
    %c0_95 = arith.constant 0 : index
    %100 = vector.load %arg8[%c0_94, %c0_95] : memref<256x128xf32, #tpu.memory_space<vmem>>, vector<256x128xf32>
    %101 = vector.shape_cast %100 : vector<256x128xf32> to vector<16x16x128xf32>
    %102 = arith.truncf %101 : vector<16x16x128xf32> to vector<16x16x128xbf16>
    %c0_96 = arith.constant 0 : index
    %c0_97 = arith.constant 0 : index
    %c0_98 = arith.constant 0 : index
    %c0_99 = arith.constant 0 : index
    %103 = vector.load %arg6[%c0_96, %c0_97, %c0_98, %c0_99] : memref<1x16x16x128xbf16, #tpu.memory_space<vmem>>, vector<1x16x16x128xbf16>
    %104 = vector.shape_cast %103 : vector<1x16x16x128xbf16> to vector<16x16x128xbf16>
    %105 = vector.shape_cast %102 : vector<16x16x128xbf16> to vector<1x16x16x128xbf16>
    tpu.vector_store %arg6[%c0_96, %c0_97, %c0_98, %c0_99], %105 {strides = array<i32>} : memref<1x16x16x128xbf16, #tpu.memory_space<vmem>>, vector<1x16x16x128xbf16>,
    %c0_100 = arith.constant 0 : index
    %c0_101 = arith.constant 0 : index
    %c0_102 = arith.constant 0 : index
    %106 = vector.load %arg7[%c0_100, %c0_101, %c0_102] : memref<1x8x128xf32, #tpu.memory_space<vmem>>, vector<1x1x128xf32>
    %107 = vector.shape_cast %106 : vector<1x1x128xf32> to vector<1x128xf32>
    %cst_103 = arith.constant dense<0.000000e+00> : vector<128xf32>
    %108 = vector.multi_reduction <add>, %100, %cst_103 [0] : vector<256x128xf32> to vector<128xf32>
    %109 = vector.shape_cast %108 : vector<128xf32> to vector<1x128xf32>
    %110 = arith.addf %107, %109 : vector<1x128xf32>
    %c0_104 = arith.constant 0 : index
    %c0_105 = arith.constant 0 : index
    %c0_106 = arith.constant 0 : index
    %111 = vector.load %arg7[%c0_104, %c0_105, %c0_106] : memref<1x8x128xf32, #tpu.memory_space<vmem>>, vector<1x1x128xf32>
    %112 = vector.shape_cast %111 : vector<1x1x128xf32> to vector<1x128xf32>
    %113 = vector.shape_cast %110 : vector<1x128xf32> to vector<1x1x128xf32>
    tpu.vector_store %arg7[%c0_104, %c0_105, %c0_106], %113 {strides = array<i32>} : memref<1x8x128xf32, #tpu.memory_space<vmem>>, vector<1x1x128xf32>,
    %c0_107 = arith.constant 0 : index
    %c1_108 = arith.constant 1 : index
    %c0_109 = arith.constant 0 : index
    %114 = vector.load %arg7[%c0_107, %c1_108, %c0_109] : memref<1x8x128xf32, #tpu.memory_space<vmem>>, vector<1x1x128xf32>
    %115 = vector.shape_cast %114 : vector<1x1x128xf32> to vector<1x128xf32>
    %116 = arith.mulf %100, %100 : vector<256x128xf32>
    %cst_110 = arith.constant dense<0.000000e+00> : vector<128xf32>
    %117 = vector.multi_reduction <add>, %116, %cst_110 [0] : vector<256x128xf32> to vector<128xf32>
    %118 = vector.shape_cast %117 : vector<128xf32> to vector<1x128xf32>
    %119 = arith.addf %115, %118 : vector<1x128xf32>
    %c0_111 = arith.constant 0 : index
    %c1_112 = arith.constant 1 : index
    %c0_113 = arith.constant 0 : index
    %120 = vector.load %arg7[%c0_111, %c1_112, %c0_113] : memref<1x8x128xf32, #tpu.memory_space<vmem>>, vector<1x1x128xf32>
    %121 = vector.shape_cast %120 : vector<1x1x128xf32> to vector<1x128xf32>
    %122 = vector.shape_cast %119 : vector<1x128xf32> to vector<1x1x128xf32>
    tpu.vector_store %arg7[%c0_111, %c1_112, %c0_113], %122 {strides = array<i32>} : memref<1x8x128xf32, #tpu.memory_space<vmem>>, vector<1x1x128xf32>,
    return
  }
  func.func @transform_0(%arg0: i32, %arg1: i32) -> (i32, i32, i32, i32) {
    %c0_i32 = arith.constant 0 : i32
    %c0_i32_0 = arith.constant 0 : i32
    %c0_i32_1 = arith.constant 0 : i32
    %c0_i32_2 = arith.constant 0 : i32
    return %arg0, %c0_i32, %c0_i32_0, %c0_i32_1 : i32, i32, i32, i32
  }
  func.func @transform_1(%arg0: i32, %arg1: i32) -> (i32, i32) {
    %c0_i32 = arith.constant 0 : i32
    %c0_i32_0 = arith.constant 0 : i32
    %c0_i32_1 = arith.constant 0 : i32
    return %c0_i32, %c0_i32_0 : i32, i32
  }
  func.func @transform_2(%arg0: i32, %arg1: i32) -> (i32, i32) {
    %c0_i32 = arith.constant 0 : i32
    %c0_i32_0 = arith.constant 0 : i32
    %c0_i32_1 = arith.constant 0 : i32
    return %c0_i32, %c0_i32_0 : i32, i32
  }
  func.func @transform_3(%arg0: i32, %arg1: i32) -> (i32, i32, i32) {
    %c0_i32 = arith.constant 0 : i32
    %c0_i32_0 = arith.constant 0 : i32
    %c0_i32_1 = arith.constant 0 : i32
    %c0_i32_2 = arith.constant 0 : i32
    return %c0_i32, %c0_i32_0, %c0_i32_1 : i32, i32, i32
  }
  func.func @transform_4(%arg0: i32, %arg1: i32) -> (i32, i32, i32, i32) {
    %c0_i32 = arith.constant 0 : i32
    %c0_i32_0 = arith.constant 0 : i32
    %c0_i32_1 = arith.constant 0 : i32
    return %arg0, %arg1, %c0_i32, %c0_i32_0 : i32, i32, i32, i32
  }
  func.func @transform_5(%arg0: i32, %arg1: i32) -> (i32, i32, i32) {
    %c0_i32 = arith.constant 0 : i32
    %c0_i32_0 = arith.constant 0 : i32
    %c0_i32_1 = arith.constant 0 : i32
    return %arg0, %c0_i32, %c0_i32_0 : i32, i32, i32
  }
}

module attributes {stable_mosaic.version = 11 : i64} {
  func.func @_bn_relu_pool_kernel(%arg0: i32, %arg1: i32, %arg2: memref<1x16x8x256xbf16, #tpu.memory_space<vmem>>, %arg3: memref<1x128xf32, #tpu.memory_space<vmem>>, %arg4: memref<1x128xf32, #tpu.memory_space<vmem>>, %arg5: memref<1x8x8x128xf32, #tpu.memory_space<vmem>>) attributes {dimension_semantics = [#tpu.dimension_semantics<parallel>, #tpu.dimension_semantics<parallel>], iteration_bounds = array<i64: 2, 1>, scalar_prefetch = 0 : i64, scratch_operands = 0 : i64, tpu.core_type = #tpu.core_type<tc>, window_params = [{transform_indices = @transform_0, window_bounds = array<i64: 1, 16, 8, 256>}, {pipeline_mode = #tpu.pipeline_mode<synchronous>, transform_indices = @transform_1, window_bounds = array<i64: 1, 128>}, {pipeline_mode = #tpu.pipeline_mode<synchronous>, transform_indices = @transform_2, window_bounds = array<i64: 1, 128>}, {transform_indices = @transform_3, window_bounds = array<i64: 1, 8, 8, 128>}]} {
    %c0 = arith.constant 0 : index
    %c0_0 = arith.constant 0 : index
    %0 = vector.load %arg3[%c0, %c0_0] : memref<1x128xf32, #tpu.memory_space<vmem>>, vector<1x128xf32>
    %c0_1 = arith.constant 0 : index
    %c0_2 = arith.constant 0 : index
    %1 = vector.load %arg4[%c0_1, %c0_2] : memref<1x128xf32, #tpu.memory_space<vmem>>, vector<1x128xf32>
    %c0_3 = arith.constant 0 : index
    %c0_4 = arith.constant 0 : index
    %c0_5 = arith.constant 0 : index
    %c0_6 = arith.constant 0 : index
    %2 = vector.load %arg2[%c0_3, %c0_4, %c0_5, %c0_6] : memref<1x16x8x256xbf16, #tpu.memory_space<vmem>>, vector<1x16x8x256xbf16>
    %3 = vector.shape_cast %2 : vector<1x16x8x256xbf16> to vector<16x8x256xbf16>
    %4 = arith.extf %3 : vector<16x8x256xbf16> to vector<16x8x256xf32>
    %5 = vector.extract_strided_slice %4 {offsets = [0, 0, 0], sizes = [16, 8, 128], strides = [1, 1, 1]} : vector<16x8x256xf32> to vector<16x8x128xf32>
    %6 = vector.shape_cast %0 : vector<1x128xf32> to vector<1x1x128xf32>
    %7 = vector.broadcast %6 : vector<1x1x128xf32> to vector<16x8x128xf32>
    %8 = arith.mulf %5, %7 : vector<16x8x128xf32>
    %9 = vector.shape_cast %1 : vector<1x128xf32> to vector<1x1x128xf32>
    %10 = vector.broadcast %9 : vector<1x1x128xf32> to vector<16x8x128xf32>
    %11 = arith.addf %8, %10 : vector<16x8x128xf32>
    %cst = arith.constant 0.000000e+00 : f32
    %12 = vector.broadcast %cst : f32 to vector<16x8x128xf32>
    %13 = arith.maximumf %11, %12 : vector<16x8x128xf32>
    %14 = vector.extract_strided_slice %4 {offsets = [0, 0, 128], sizes = [16, 8, 128], strides = [1, 1, 1]} : vector<16x8x256xf32> to vector<16x8x128xf32>
    %15 = vector.shape_cast %0 : vector<1x128xf32> to vector<1x1x128xf32>
    %16 = vector.broadcast %15 : vector<1x1x128xf32> to vector<16x8x128xf32>
    %17 = arith.mulf %14, %16 : vector<16x8x128xf32>
    %18 = vector.shape_cast %1 : vector<1x128xf32> to vector<1x1x128xf32>
    %19 = vector.broadcast %18 : vector<1x1x128xf32> to vector<16x8x128xf32>
    %20 = arith.addf %17, %19 : vector<16x8x128xf32>
    %cst_7 = arith.constant 0.000000e+00 : f32
    %21 = vector.broadcast %cst_7 : f32 to vector<16x8x128xf32>
    %22 = arith.maximumf %20, %21 : vector<16x8x128xf32>
    %23 = arith.maximumf %13, %22 : vector<16x8x128xf32>
    %24 = vector.shape_cast %23 : vector<16x8x128xf32> to vector<8x2x8x128xf32>
    %25 = vector.extract_strided_slice %24 {offsets = [0, 0, 0, 0], sizes = [8, 1, 8, 128], strides = [1, 1, 1, 1]} : vector<8x2x8x128xf32> to vector<8x1x8x128xf32>
    %26 = vector.shape_cast %25 : vector<8x1x8x128xf32> to vector<8x8x128xf32>
    %27 = vector.extract_strided_slice %24 {offsets = [0, 1, 0, 0], sizes = [8, 1, 8, 128], strides = [1, 1, 1, 1]} : vector<8x2x8x128xf32> to vector<8x1x8x128xf32>
    %28 = vector.shape_cast %27 : vector<8x1x8x128xf32> to vector<8x8x128xf32>
    %29 = arith.maximumf %26, %28 : vector<8x8x128xf32>
    %c0_8 = arith.constant 0 : index
    %c0_9 = arith.constant 0 : index
    %c0_10 = arith.constant 0 : index
    %c0_11 = arith.constant 0 : index
    %30 = vector.load %arg5[%c0_8, %c0_9, %c0_10, %c0_11] : memref<1x8x8x128xf32, #tpu.memory_space<vmem>>, vector<1x8x8x128xf32>
    %31 = vector.shape_cast %30 : vector<1x8x8x128xf32> to vector<8x8x128xf32>
    %32 = vector.shape_cast %29 : vector<8x8x128xf32> to vector<1x8x8x128xf32>
    tpu.vector_store %arg5[%c0_8, %c0_9, %c0_10, %c0_11], %32 {strides = array<i32>} : memref<1x8x8x128xf32, #tpu.memory_space<vmem>>, vector<1x8x8x128xf32>,
    return
  }
  func.func @transform_0(%arg0: i32, %arg1: i32) -> (i32, i32, i32, i32) {
    %c0_i32 = arith.constant 0 : i32
    %c0_i32_0 = arith.constant 0 : i32
    %c0_i32_1 = arith.constant 0 : i32
    return %arg0, %arg1, %c0_i32, %c0_i32_0 : i32, i32, i32, i32
  }
  func.func @transform_1(%arg0: i32, %arg1: i32) -> (i32, i32) {
    %c0_i32 = arith.constant 0 : i32
    %c0_i32_0 = arith.constant 0 : i32
    %c0_i32_1 = arith.constant 0 : i32
    return %c0_i32, %c0_i32_0 : i32, i32
  }
  func.func @transform_2(%arg0: i32, %arg1: i32) -> (i32, i32) {
    %c0_i32 = arith.constant 0 : i32
    %c0_i32_0 = arith.constant 0 : i32
    %c0_i32_1 = arith.constant 0 : i32
    return %c0_i32, %c0_i32_0 : i32, i32
  }
  func.func @transform_3(%arg0: i32, %arg1: i32) -> (i32, i32, i32, i32) {
    %c0_i32 = arith.constant 0 : i32
    %c0_i32_0 = arith.constant 0 : i32
    %c0_i32_1 = arith.constant 0 : i32
    return %arg0, %arg1, %c0_i32, %c0_i32_0 : i32, i32, i32, i32
  }
}

</mosaic_0001>

<bundles_post_ra>
// kernel: conv_block4.9
= control target key start
LH: loop header
LB: loop body
LE: loop exit
PB: predicated region body
PF: predicated region fallthrough
CT: control target
= control target key end

     0   :  { %s576_s12 = smov 0   ;;  %s578_s13 = smov 0   ;;  %s715_s0 = inlined_call_operand.vmem [shape: bf16[2,16,8,256], index: 0, kind: input, shape index: {}]   ;;  %s716_s1 = inlined_call_operand.vmem [shape: f32[1,128], index: 1, kind: input, shape index: {}]   ;;  %s717_s2 = inlined_call_operand.vmem [shape: f32[1,128], index: 2, kind: input, shape index: {}]   ;;  %s718_s3 = inlined_call_operand.vmem [shape: f32[2,8,8,128], index: 3, kind: output, shape index: {}]  }
   0x1   :  { %s580_s14 = smov 0  }
   0x2 LB: > { %s25_s15 = sadd.s32 1, %s550_s13  ;;  %p497_p0 = scmp.ge.s32.totalorder %s554_s14, 1  ;;  %s554_s14 = sphi %s580_s14, %s13_s14   ;;  %s550_s13 = sphi %s578_s13, %s720_s13   ;;  %s546_s12 = sphi %s576_s12, %s719_s12  }
   0x3   : > { %p27_p1 = scmp.ge.s32.totalorder %s25_s15, 2  ;;  %p159_p2 = scmp.lt.s32.totalorder %s554_s14, 3 }
   0x5   : > { %s722_s15 = smov (%p27_p1, %s25_s15), 0  ;;  %p160_p3 = pnand %p497_p0, %p159_p2 }
   0x6   : > { %p193_p4 = scmp.lt.s32.totalorder (!%p160_p3), %s546_s12, 1  ;;  %v605_v0 = vld [vmem:[%s716_s1] ss:$0 sm:$0xff] (!%p160_p3) }
   0x7   : > { %163 = sbr.rel (%p160_p3) target bundleno = 63 (0x3f), region = 32  ;;  %v614_v9 = vld [vmem:[%s717_s2] ss:$0 sm:$0xff] (!%p160_p3) }
   0xe   : > { %s724_s12 = smov (!%p193_p4, %s546_s12), 1 }
   0xf   : > { %s506_s16 = sshll.u32 %s724_s12, 7  ;;  %s507_s24 = sshll.u32 %s724_s12, 6 }
  0x10   : > { %s600_s19 = scalar_lea.vmem %s715_s0, %s506_s16  ;;  %s639_s27 = scalar_lea.vmem %s718_s3, %s507_s24 }
  0x11   : > { %v215_v1 = vld [vmem:[%s600_s19] sm:$0xff]  ;;  %v216_v2 = vld [vmem:[%s600_s19 + $0x8] sm:$0xff]  ;;  %v217_v3 = vld [vmem:[%s600_s19 + $0x10] sm:$0xff] }
  0x12   : > { %v231_v4 = vunpack.c.l.bf16 %v215_v1  ;;  %v232_v5 = vunpack.c.h.bf16 %v215_v1  ;;  %v233_v6 = vunpack.c.l.bf16 %v216_v2  ;;  %v234_v7 = vunpack.c.h.bf16 %v216_v2  ;;  %v218_v8 = vld [vmem:[%s600_s19 + $0x18] sm:$0xff]  ;;  %v219_v30 = vld [vmem:[%s600_s19 + $0x20] sm:$0xff]  ;;  %v220_v35 = vld [vmem:[%s600_s19 + $0x28] sm:$0xff] }
  0x13   : > { %v235_v10 = vunpack.c.l.bf16 %v217_v3  ;;  %v236_v11 = vunpack.c.h.bf16 %v217_v3  ;;  %v237_v12 = vunpack.c.l.bf16 %v218_v8  ;;  %v238_v13 = vunpack.c.h.bf16 %v218_v8  ;;  %v221_v40 = vld [vmem:[%s600_s19 + $0x30] sm:$0xff]  ;;  %v222_v49 = vld [vmem:[%s600_s19 + $0x38] sm:$0xff]  ;;  %v223_v3 = vld [vmem:[%s600_s19 + $0x40] sm:$0xff] }
  0x14   : > { %v269_v14 = vmul.f32 %v605_v0, %v231_v4  ;;  %v270_v15 = vmul.f32 %v605_v0, %v233_v6  ;;  %v323_v16 = vmul.f32 %v605_v0, %v232_v5  ;;  %v324_v17 = vmul.f32 %v605_v0, %v234_v7 }
  0x15   : > { %v271_v18 = vmul.f32 %v605_v0, %v235_v10  ;;  %v272_v19 = vmul.f32 %v605_v0, %v237_v12  ;;  %v325_v20 = vmul.f32 %v605_v0, %v236_v11  ;;  %v326_v21 = vmul.f32 %v605_v0, %v238_v13  ;;  %v224_v13 = vld [vmem:[%s600_s19 + $0x48] sm:$0xff] }
  0x16   : > { %v291_v22 = vadd.f32 %v614_v9, %v269_v14  ;;  %v292_v23 = vadd.f32 %v614_v9, %v270_v15  ;;  %v339_v24 = vadd.f32 %v614_v9, %v323_v16  ;;  %v340_v25 = vadd.f32 %v614_v9, %v324_v17 }
  0x17   : > { %v293_v26 = vadd.f32 %v614_v9, %v271_v18  ;;  %v294_v27 = vadd.f32 %v614_v9, %v272_v19  ;;  %v341_v28 = vadd.f32 %v614_v9, %v325_v20  ;;  %v342_v29 = vadd.f32 %v614_v9, %v326_v21 }
  0x18   : > { %v307_v31 = vmax.f32 %v291_v22, 0.0  ;;  %v308_v32 = vmax.f32 %v292_v23, 0.0  ;;  %v355_v33 = vmax.f32 %v339_v24, 0.0  ;;  %v356_v34 = vmax.f32 %v340_v25, 0.0  ;;  %v225_v22 = vld [vmem:[%s600_s19 + $0x50] sm:$0xff] }
  0x19   : > { %v309_v36 = vmax.f32 %v293_v26, 0.0  ;;  %v310_v37 = vmax.f32 %v294_v27, 0.0  ;;  %v357_v38 = vmax.f32 %v341_v28, 0.0  ;;  %v358_v39 = vmax.f32 %v342_v29, 0.0  ;;  %v226_v27 = vld [vmem:[%s600_s19 + $0x58] sm:$0xff] }
  0x1a   : > { %v371_v41 = vmax.f32 %v307_v31, %v355_v33  ;;  %v372_v42 = vmax.f32 %v308_v32, %v356_v34  ;;  %v239_v43 = vunpack.c.l.bf16 %v219_v30  ;;  %v240_v44 = vunpack.c.h.bf16 %v219_v30 }
  0x1b   : > { %v373_v45 = vmax.f32 %v309_v36, %v357_v38  ;;  %v374_v46 = vmax.f32 %v310_v37, %v358_v39  ;;  %v241_v47 = vunpack.c.l.bf16 %v220_v35  ;;  %v242_v48 = vunpack.c.h.bf16 %v220_v35 }
  0x1c   : > { %v387_v50 = vmax.f32 %v371_v41, %v372_v42  ;;  %v273_v51 = vmul.f32 %v605_v0, %v239_v43  ;;  %v327_v52 = vmul.f32 %v605_v0, %v240_v44  ;;  %v243_v53 = vunpack.c.l.bf16 %v221_v40  ;;  %v227_v44 = vld [vmem:[%s600_s19 + $0x60] sm:$0xff] }
  0x1d   : > { %v388_v54 = vmax.f32 %v373_v45, %v374_v46  ;;  %v274_v55 = vmul.f32 %v605_v0, %v241_v47  ;;  %v328_v56 = vmul.f32 %v605_v0, %v242_v48  ;;  %v244_v57 = vunpack.c.h.bf16 %v221_v40 }
  0x1e   : > { %395 = vst [vmem:[%s639_s27] sm:$0xff] %v387_v50  ;;  %v295_v58 = vadd.f32 %v614_v9, %v273_v51  ;;  %v343_v59 = vadd.f32 %v614_v9, %v327_v52  ;;  %v245_v60 = vunpack.c.l.bf16 %v222_v49  ;;  %v246_v61 = vunpack.c.h.bf16 %v222_v49 }
  0x1f   : > { %396 = vst [vmem:[%s639_s27 + $0x8] sm:$0xff] %v388_v54  ;;  %v296_v62 = vadd.f32 %v614_v9, %v274_v55  ;;  %v344_v63 = vadd.f32 %v614_v9, %v328_v56  ;;  %v275_v1 = vmul.f32 %v605_v0, %v243_v53  ;;  %v329_v2 = vmul.f32 %v605_v0, %v244_v57  ;;  %v228_v53 = vld [vmem:[%s600_s19 + $0x68] sm:$0xff] }
  0x20   : > { %v311_v4 = vmax.f32 %v295_v58, 0.0  ;;  %v359_v5 = vmax.f32 %v343_v59, 0.0  ;;  %v276_v6 = vmul.f32 %v605_v0, %v245_v60  ;;  %v330_v7 = vmul.f32 %v605_v0, %v246_v61 }
  0x21   : > { %v312_v8 = vmax.f32 %v296_v62, 0.0  ;;  %v360_v10 = vmax.f32 %v344_v63, 0.0  ;;  %v297_v11 = vadd.f32 %v614_v9, %v275_v1  ;;  %v345_v12 = vadd.f32 %v614_v9, %v329_v2  ;;  %v229_v62 = vld [vmem:[%s600_s19 + $0x70] sm:$0xff] }
  0x22   : > { %v375_v14 = vmax.f32 %v311_v4, %v359_v5  ;;  %v298_v15 = vadd.f32 %v614_v9, %v276_v6  ;;  %v346_v16 = vadd.f32 %v614_v9, %v330_v7  ;;  %v247_v17 = vunpack.c.l.bf16 %v223_v3 }
  0x23   : > { %v376_v18 = vmax.f32 %v312_v8, %v360_v10  ;;  %v313_v19 = vmax.f32 %v297_v11, 0.0  ;;  %v361_v20 = vmax.f32 %v345_v12, 0.0  ;;  %v248_v21 = vunpack.c.h.bf16 %v223_v3  ;;  %v230_v8 = vld [vmem:[%s600_s19 + $0x78] sm:$0xff] }
  0x24   : > { %v314_v23 = vmax.f32 %v298_v15, 0.0  ;;  %v362_v24 = vmax.f32 %v346_v16, 0.0  ;;  %v249_v25 = vunpack.c.l.bf16 %v224_v13  ;;  %v250_v26 = vunpack.c.h.bf16 %v224_v13 }
  0x25   : > { %v389_v28 = vmax.f32 %v375_v14, %v376_v18  ;;  %v377_v29 = vmax.f32 %v313_v19, %v361_v20  ;;  %v277_v30 = vmul.f32 %v605_v0, %v247_v17  ;;  %v331_v31 = vmul.f32 %v605_v0, %v248_v21 }
  0x26   : > { %v378_v32 = vmax.f32 %v314_v23, %v362_v24  ;;  %v278_v33 = vmul.f32 %v605_v0, %v249_v25  ;;  %v332_v34 = vmul.f32 %v605_v0, %v250_v26  ;;  %v251_v35 = vunpack.c.l.bf16 %v225_v22 }
  0x27   : > { %397 = vst [vmem:[%s639_s27 + $0x10] sm:$0xff] %v389_v28  ;;  %v299_v36 = vadd.f32 %v614_v9, %v277_v30  ;;  %v347_v37 = vadd.f32 %v614_v9, %v331_v31  ;;  %v252_v38 = vunpack.c.h.bf16 %v225_v22  ;;  %v253_v39 = vunpack.c.l.bf16 %v226_v27 }
  0x28   : > { %v390_v40 = vmax.f32 %v377_v29, %v378_v32  ;;  %v300_v41 = vadd.f32 %v614_v9, %v278_v33  ;;  %v348_v42 = vadd.f32 %v614_v9, %v332_v34  ;;  %v254_v43 = vunpack.c.h.bf16 %v226_v27 }
  0x29   : > { %v315_v45 = vmax.f32 %v299_v36, 0.0  ;;  %v363_v46 = vmax.f32 %v347_v37, 0.0  ;;  %v279_v47 = vmul.f32 %v605_v0, %v251_v35  ;;  %v280_v48 = vmul.f32 %v605_v0, %v253_v39 }
  0x2a   : > { %398 = vst [vmem:[%s639_s27 + $0x18] sm:$0xff] %v390_v40  ;;  %v316_v49 = vmax.f32 %v300_v41, 0.0  ;;  %v364_v50 = vmax.f32 %v348_v42, 0.0  ;;  %v333_v51 = vmul.f32 %v605_v0, %v252_v38  ;;  %v334_v52 = vmul.f32 %v605_v0, %v254_v43 }
  0x2b   : > { %v379_v54 = vmax.f32 %v315_v45, %v363_v46  ;;  %v301_v55 = vadd.f32 %v614_v9, %v279_v47  ;;  %v302_v56 = vadd.f32 %v614_v9, %v280_v48  ;;  %v255_v57 = vunpack.c.l.bf16 %v227_v44 }
  0x2c   : > { %v380_v58 = vmax.f32 %v316_v49, %v364_v50  ;;  %v349_v59 = vadd.f32 %v614_v9, %v333_v51  ;;  %v350_v60 = vadd.f32 %v614_v9, %v334_v52  ;;  %v256_v61 = vunpack.c.h.bf16 %v227_v44 }
  0x2d   : > { %v317_v63 = vmax.f32 %v301_v55, 0.0  ;;  %v318_v1 = vmax.f32 %v302_v56, 0.0  ;;  %v257_v2 = vunpack.c.l.bf16 %v228_v53  ;;  %v258_v3 = vunpack.c.h.bf16 %v228_v53 }
  0x2e   : > { %v391_v4 = vmax.f32 %v379_v54, %v380_v58  ;;  %v365_v5 = vmax.f32 %v349_v59, 0.0  ;;  %v366_v6 = vmax.f32 %v350_v60, 0.0  ;;  %v281_v7 = vmul.f32 %v605_v0, %v255_v57 }
  0x2f   : > { %v282_v10 = vmul.f32 %v605_v0, %v257_v2  ;;  %v335_v11 = vmul.f32 %v605_v0, %v256_v61  ;;  %v336_v12 = vmul.f32 %v605_v0, %v258_v3  ;;  %v259_v13 = vunpack.c.l.bf16 %v229_v62 }
  0x30   : > { %399 = vst [vmem:[%s639_s27 + $0x20] sm:$0xff] %v391_v4  ;;  %v381_v14 = vmax.f32 %v317_v63, %v365_v5  ;;  %v382_v15 = vmax.f32 %v318_v1, %v366_v6  ;;  %v303_v16 = vadd.f32 %v614_v9, %v281_v7  ;;  %v260_v17 = vunpack.c.h.bf16 %v229_v62 }
  0x31   : > { %v304_v18 = vadd.f32 %v614_v9, %v282_v10  ;;  %v351_v19 = vadd.f32 %v614_v9, %v335_v11  ;;  %v352_v20 = vadd.f32 %v614_v9, %v336_v12  ;;  %v261_v21 = vunpack.c.l.bf16 %v230_v8 }
  0x32   : > { %v392_v22 = vmax.f32 %v381_v14, %v382_v15  ;;  %v319_v23 = vmax.f32 %v303_v16, 0.0  ;;  %v262_v24 = vunpack.c.h.bf16 %v230_v8  ;;  %v283_v25 = vmul.f32 %v605_v0, %v259_v13 }
  0x33   : > { %v320_v26 = vmax.f32 %v304_v18, 0.0  ;;  %v367_v27 = vmax.f32 %v351_v19, 0.0  ;;  %v368_v28 = vmax.f32 %v352_v20, 0.0  ;;  %v284_v29 = vmul.f32 %v605_v0, %v261_v21 }
  0x34   : > { %400 = vst [vmem:[%s639_s27 + $0x28] sm:$0xff] %v392_v22  ;;  %v305_v30 = vadd.f32 %v614_v9, %v283_v25  ;;  %v337_v31 = vmul.f32 %v605_v0, %v260_v17  ;;  %v338_v32 = vmul.f32 %v605_v0, %v262_v24 }
  0x35   : > { %v383_v33 = vmax.f32 %v319_v23, %v367_v27  ;;  %v384_v34 = vmax.f32 %v320_v26, %v368_v28  ;;  %v306_v35 = vadd.f32 %v614_v9, %v284_v29 }
  0x36   : > { %v321_v36 = vmax.f32 %v305_v30, 0.0  ;;  %v353_v37 = vadd.f32 %v614_v9, %v337_v31  ;;  %v354_v38 = vadd.f32 %v614_v9, %v338_v32 }
  0x37   : > { %v393_v39 = vmax.f32 %v383_v33, %v384_v34  ;;  %v322_v40 = vmax.f32 %v306_v35, 0.0 }
  0x38   : > { %v369_v41 = vmax.f32 %v353_v37, 0.0  ;;  %v370_v42 = vmax.f32 %v354_v38, 0.0 }
  0x39   : > { %401 = vst [vmem:[%s639_s27 + $0x30] sm:$0xff] %v393_v39 }
  0x3a   : > { %v385_v43 = vmax.f32 %v321_v36, %v369_v41  ;;  %v386_v44 = vmax.f32 %v322_v40, %v370_v42 }
  0x3c   : > { %v394_v45 = vmax.f32 %v385_v43, %v386_v44 }
  0x3e   : > { %402 = vst [vmem:[%s639_s27 + $0x38] sm:$0xff] %v394_v45 }
  0x3f PF: > { %s13_s14 = sadd.s32 1, %s554_s14   ;;  %s719_s12 = smov %s550_s13 }
  0x40   : > { %p10_p5 = scmp.ge.s32.totalorder %s13_s14, 4   ;;  %s720_s13 = smov %s722_s15 }
  0x42   :  { %12 = sbr.rel (!%p10_p5) target bundleno = 2 (0x2), region = 62 }

// kernel: conv_block4.5
= control target key start
LH: loop header
LB: loop body
LE: loop exit
PB: predicated region body
PF: predicated region fallthrough
CT: control target
= control target key end

     0   :  { %s8716_s18 = smov 0   ;;  %s8718_s19 = smov 0   ;;  %s9761_s0 = inlined_call_operand.vmem [shape: bf16[2,16,16,128], index: 0, kind: input, shape index: {}]   ;;  %s9762_s1 = inlined_call_operand.vmem [shape: f32[1,128], index: 1, kind: input, shape index: {}]   ;;  %s9763_s2 = inlined_call_operand.vmem [shape: f32[1,128], index: 2, kind: input, shape index: {}]   ;;  %s9764_s3 = inlined_call_operand.vmem [shape: bf16[9,128,128], index: 3, kind: input, shape index: {}]   ;;  %s9765_s4 = inlined_call_operand.vmem [shape: bf16[2,16,16,128], index: 4, kind: output, shape index: {0}]   ;;  %s9766_s5 = inlined_call_operand.vmem [shape: f32[2,8,128], index: 5, kind: output, shape index: {1}]  }
   0x1   :  { %s8720_s20 = smov 0  }
   0x2 LB: > { %s28_s1 = sadd.s32 1, %s8678_s19  ;;  %p6769_p0 = scmp.ge.s32.totalorder %s8682_s20, 1  ;;  %s8682_s20 = sphi %s8720_s20, %s16_s20   ;;  %s8678_s19 = sphi %s8718_s19, %s9778_s19   ;;  %s8674_s18 = sphi %s8716_s18, %s9777_s18  }
   0x3   : > { %p30_p1 = scmp.ge.s32.totalorder %s28_s1, 2  ;;  %p204_p2 = scmp.lt.s32.totalorder %s8682_s20, 3 }
   0x5   : > { %s9780_s1 = smov (%p30_p1, %s28_s1), 0  ;;  %p205_p3 = pnand %p6769_p0, %p204_p2 }
   0x6   : > { %v8532_v0 = vld [vmem:[%s9764_s3] sm:$0xff] (!%p205_p3)   ;;  %v8684_v2 = vmov (!%p205_p3), 0   ;;  %v8534_v3 = vld [vmem:[%s9764_s3 + $0x8] sm:$0xff] (!%p205_p3)   ;;  %p241_p4 = scmp.lt.s32.totalorder (!%p205_p3), %s8674_s18, 1  ;;  %v8536_v5 = vld [vmem:[%s9764_s3 + $0x10] sm:$0xff] (!%p205_p3)   ;;  %vm683_vm0 = vcmask (!%p205_p3), 1040384  }
   0x7   : > { %208 = sbr.rel (%p205_p3) target bundleno = 632 (0x278), region = 36  ;;  %v8533_v1 = vld [vmem:[%s9764_s3 + $0x100] sm:$0xff] (!%p205_p3)   ;;  %266 = vst [vmem:[#allocation3] sm:$0xf] (!%p205_p3), %v8684_v2  ;;  %267 = vst [vmem:[#allocation3 + $0x4] sm:$0xf] (!%p205_p3), %v8684_v2  ;;  %7802 = vmatprep.subr.bf16.mxu1 (!%p205_p3), %v8532_v0 }
   0x8   : > { %268 = vst [vmem:[#allocation3 + $0x8] sm:$0x1] (!%p205_p3), %v8684_v2  ;;  %269 = vst [vmem:[#allocation3 + $0xc] sm:$0xf] (!%p205_p3), %v8684_v2  ;;  %7994 = vmatprep.subr.bf16.mxu0 (!%p205_p3), %v8533_v1  ;;  %7803 = vmatpush3.bf16.msra.mxu1 (!%p205_p3), %v8532_v0  ;;  %v8535_v4 = vld [vmem:[%s9764_s3 + $0x108] sm:$0xff] (!%p205_p3)   ;;  %v8537_v6 = vld [vmem:[%s9764_s3 + $0x110] sm:$0xff] (!%p205_p3)  }
   0x9   : > { %270 = vst [vmem:[#allocation3 + $0x10] sm:$0xf] (!%p205_p3), %v8684_v2  ;;  %271 = vst [vmem:[#allocation3 + $0x14] sm:$0x1] (!%p205_p3), %v8684_v2  ;;  %7995 = vmatpush3.bf16.msra.mxu0 (!%p205_p3), %v8533_v1  ;;  %7804 = vmatprep.subr.bf16.mxu1 (!%p205_p3), %v8534_v3  ;;  %v8538_v7 = vld [vmem:[%s9764_s3 + $0x18] sm:$0xff] (!%p205_p3)   ;;  %v8540_v9 = vld [vmem:[%s9764_s3 + $0x20] sm:$0xff] (!%p205_p3)  }
   0xa   : > { %272 = vst [vmem:[#allocation3 + $0x18] sm:$0xf] (!%p205_p3), %v8684_v2  ;;  %273 = vst [vmem:[#allocation3 + $0x1c] sm:$0xf] (!%p205_p3), %v8684_v2  ;;  %7996 = vmatprep.subr.bf16.mxu0 (!%p205_p3), %v8535_v4  ;;  %v8539_v8 = vld [vmem:[%s9764_s3 + $0x118] sm:$0xff] (!%p205_p3)   ;;  %v8541_v10 = vld [vmem:[%s9764_s3 + $0x120] sm:$0xff] (!%p205_p3)  }
   0xb   : > { %274 = vst [vmem:[#allocation3 + $0x20] sm:$0x1] (!%p205_p3), %v8684_v2  ;;  %275 = vst [vmem:[#allocation3 + $0x24] sm:$0xf] (!%p205_p3), %v8684_v2  ;;  %v8542_v11 = vld [vmem:[%s9764_s3 + $0x28] sm:$0xff] (!%p205_p3)   ;;  %vm676_vm1 = vcmask (!%p205_p3), 1043456  }
   0xc   : > { %276 = vst [vmem:[#allocation3 + $0x28] sm:$0xf] (!%p205_p3), %v8684_v2  ;;  %277 = vst [vmem:[#allocation3 + $0x2c] sm:$0x1] (!%p205_p3), %v8684_v2  ;;  %7805 = vmatpush3.bf16.msra.mxu1 (!%p205_p3), %v8534_v3  ;;  %v8543_v12 = vld [vmem:[%s9764_s3 + $0x128] sm:$0xff] (!%p205_p3)   ;;  %v8544_v20 = vld [vmem:[%s9764_s3 + $0x30] sm:$0xff] (!%p205_p3)  }
   0xd   : > { %278 = vst [vmem:[#allocation3 + $0x30] sm:$0xf] (!%p205_p3), %v8684_v2  ;;  %279 = vst [vmem:[#allocation3 + $0x34] sm:$0xf] (!%p205_p3), %v8684_v2  ;;  %7997 = vmatpush3.bf16.msra.mxu0 (!%p205_p3), %v8535_v4  ;;  %7806 = vmatprep.subr.bf16.mxu1 (!%p205_p3), %v8536_v5  ;;  %vm352_vm2 = vsmask.f32 (!%p205_p3), 256 }
   0xe   : > { %280 = vst [vmem:[#allocation3 + $0x38] sm:$0x1] %v8684_v2  ;;  %281 = vst [vmem:[#allocation3 + $0x3c] sm:$0xf] %v8684_v2  ;;  %s9782_s18 = smov (!%p241_p4, %s8674_s18), 1  ;;  %7998 = vmatprep.subr.bf16.mxu0 %v8537_v6  ;;  %v8548_v13 = vld [vmem:[#allocation3] sm:$0xff]  }
   0xf   : > { %282 = vst [vmem:[#allocation3 + $0x40] sm:$0xf] %v8684_v2  ;;  %283 = vst [vmem:[#allocation3 + $0x44] sm:$0x1] %v8684_v2  ;;  %s7457_s11 = sshll.u32 %s9782_s18, 7  ;;  %7818 = vmatprep.mubr.bf16.mxu1 %v8548_v13  ;;  %v8545_v23 = vld [vmem:[%s9764_s3 + $0x130] sm:$0xff]  }
  0x10   : > { %284 = vst [vmem:[#allocation3 + $0x48] sm:$0xf] %v8684_v2  ;;  %285 = vst [vmem:[#allocation3 + $0x4c] sm:$0xf] %v8684_v2  ;;  %7807 = vmatpush3.bf16.msra.mxu1 %v8536_v5  ;;  %s8779_s22 = scalar_lea.vmem %s9761_s0, %s7457_s11  ;;  %vm353_vm3 = vsmask.f32 4368 }
  0x11   : > { %286 = vst [vmem:[#allocation3 + $0x50] sm:$0x1] %v8684_v2  ;;  %287 = vst [vmem:[#allocation3 + $0x54] sm:$0xf] %v8684_v2  ;;  %7999 = vmatpush3.bf16.msra.mxu0 %v8537_v6  ;;  %7808 = vmatprep.subr.bf16.mxu1 %v8538_v7  ;;  %v320_v14 = vld [vmem:[%s8779_s22] sm:$0xf] }
  0x12   : > { %288 = vst [vmem:[#allocation3 + $0x58] sm:$0xf] %v8684_v2  ;;  %289 = vst [vmem:[#allocation3 + $0x5c] sm:$0x1] %v8684_v2  ;;  %8000 = vmatprep.subr.bf16.mxu0 %v8539_v8  ;;  %v321_v15 = vld [vmem:[%s8779_s22 + $0x4] sm:$0xf] }
  0x13   : > { %290 = vst [vmem:[#allocation3 + $0x60] sm:$0xf] %v8684_v2  ;;  %291 = vst [vmem:[#allocation3 + $0x64] sm:$0xf] %v8684_v2  ;;  %v356_v16 = vshrl.u32 %v320_v14, 16  ;;  %v359_v17 = vshll.u32 %v320_v14, 16 }
  0x14   : > { %292 = vst [vmem:[#allocation3 + $0x68] sm:$0x1] %v8684_v2  ;;  %293 = vst [vmem:[#allocation3 + $0x6c] sm:$0xf] %v8684_v2  ;;  %7809 = vmatpush3.bf16.msra.mxu1 %v8538_v7  ;;  %v364_v18 = vshrl.u32 %v321_v15, 16  ;;  %v367_v22 = vshll.u32 %v321_v15, 16 }
  0x15   : > { %294 = vst [vmem:[#allocation3 + $0x70] sm:$0xf] %v8684_v2  ;;  %295 = vst [vmem:[#allocation3 + $0x74] sm:$0x1] %v8684_v2  ;;  %8001 = vmatpush3.bf16.msra.mxu0 %v8539_v8  ;;  %7810 = vmatprep.subr.bf16.mxu1 %v8540_v9  ;;  %vm677_vm6 = vsmask.f32 7938 }
  0x16   : > { %296 = vst [vmem:[#allocation3 + $0x78] sm:$0xf] %v8684_v2  ;;  %297 = vst [vmem:[#allocation3 + $0x7c] sm:$0xf] %v8684_v2  ;;  %8002 = vmatprep.subr.bf16.mxu0 %v8541_v10  ;;  %v358_v24 = vrot.slane %v356_v16, 7  ;;  %v366_v25 = vrot.slane %v364_v18, 7 }
  0x17   : > { %298 = vst [vmem:[#allocation3 + $0x80] sm:$0x1] %v8684_v2  ;;  %299 = vst [vmem:[#allocation3 + $0x84] sm:$0xf] %v8684_v2  ;;  %v679_v27 = vld [vmem:[#allocation3 + $0xc] sm:$0xf] }
  0x18   : > { %300 = vst [vmem:[#allocation3 + $0x88] sm:$0xf] %v8684_v2  ;;  %301 = vst [vmem:[#allocation3 + $0x8c] sm:$0x1] %v8684_v2  ;;  %7811 = vmatpush3.bf16.msra.mxu1 %v8540_v9  ;;  %v685_v28 = vld [vmem:[#allocation3 + $0x14] sm:$0x1]  ;;  %v361_v29 = vor.u32 %v359_v17, %v358_v24  ;;  %v369_v31 = vor.u32 %v367_v22, %v366_v25 }
  0x19   : > { %302 = vst [vmem:[#allocation3 + $0x90] sm:$0xf] %v8684_v2  ;;  %303 = vst [vmem:[#allocation3 + $0x94] sm:$0xf] %v8684_v2  ;;  %8003 = vmatpush3.bf16.msra.mxu0 %v8541_v10  ;;  %7812 = vmatprep.subr.bf16.mxu1 %v8542_v11  ;;  %v362_v30 = vrot.slane %v358_v24, 4  ;;  %v371_v32 = vrot.slane %v366_v25, 4 }
  0x1a   : > { %304 = vst [vmem:[#allocation3 + $0x98] sm:$0x1] %v8684_v2  ;;  %305 = vst [vmem:[#allocation3 + $0x9c] sm:$0xf] %v8684_v2  ;;  %8004 = vmatprep.subr.bf16.mxu0 %v8543_v12  ;;  %v322_v33 = vld [vmem:[%s8779_s22 + $0x8] sm:$0xf] }
  0x1b   : > { %306 = vst [vmem:[#allocation3 + $0xa0] sm:$0xf] %v8684_v2  ;;  %307 = vst [vmem:[#allocation3 + $0xa4] sm:$0x1] %v8684_v2  ;;  %v323_v34 = vld [vmem:[%s8779_s22 + $0xc] sm:$0xf] }
  0x1c   : > { %308 = vst [vmem:[#allocation3 + $0xa8] sm:$0xf] %v8684_v2  ;;  %309 = vst [vmem:[#allocation3 + $0xac] sm:$0xf] %v8684_v2  ;;  %7813 = vmatpush3.bf16.msra.mxu1 %v8542_v11  ;;  %v8546_v35 = vld [vmem:[%s9764_s3 + $0x38] sm:$0xff]   ;;  %v373_v37 = vshrl.u32 %v322_v33, 16 }
  0x1d   : > { %310 = vst [vmem:[#allocation3 + $0xb0] sm:$0x1] %v8684_v2  ;;  %311 = vst [vmem:[#allocation3 + $0xb4] sm:$0xf] %v8684_v2  ;;  %v8547_v36 = vld [vmem:[%s9764_s3 + $0x138] sm:$0xff]   ;;  %v376_v38 = vshll.u32 %v322_v33, 16  ;;  %8005 = vmatpush3.bf16.msra.mxu0 %v8543_v12  ;;  %7814 = vmatprep.subr.bf16.mxu1 %v8544_v20 }
  0x1e   : > { %312 = vst [vmem:[#allocation3 + $0xb8] sm:$0xf] %v8684_v2  ;;  %313 = vst [vmem:[#allocation3 + $0xbc] sm:$0x1] %v8684_v2  ;;  %v381_v39 = vshrl.u32 %v323_v34, 16  ;;  %v384_v40 = vshll.u32 %v323_v34, 16  ;;  %8006 = vmatprep.subr.bf16.mxu0 %v8545_v23 }
  0x1f   : > { %314 = vst [vmem:[#allocation3 + $0xc0] sm:$0xf] %v8684_v2  ;;  %315 = vst [vmem:[#allocation3 + $0xc4] sm:$0xf] %v8684_v2  ;;  %v688_v44 = vld [vmem:[#allocation3 + $0x18] sm:$0xf] }
  0x20   : > { %316 = vst [vmem:[#allocation3 + $0xc8] sm:$0x1] %v8684_v2  ;;  %317 = vst [vmem:[#allocation3 + $0xcc] sm:$0xf] %v8684_v2  ;;  %v375_v45 = vrot.slane %v373_v37, 7  ;;  %v383_v46 = vrot.slane %v381_v39, 7  ;;  %7815 = vmatpush3.bf16.msra.mxu1 %v8544_v20 }
  0x21   : > { %318 = vst [vmem:[#allocation3 + $0xd0] sm:$0xf] %v8684_v2  ;;  %319 = vst [vmem:[#allocation3 + $0xd4] sm:$0x1] %v8684_v2  ;;  %v692_v47 = vld [vmem:[#allocation3 + $0x20] sm:$0x1]  ;;  %8007 = vmatpush3.bf16.msra.mxu0 %v8545_v23  ;;  %7816 = vmatprep.subr.bf16.mxu1 %v8546_v35 }
  0x22   : > { %vm8786_vm4 = vmand %vm683_vm0, %vm352_vm2  ;;  %v324_v48 = vld [vmem:[%s8779_s22 + $0x10] sm:$0xf]  ;;  %v325_v49 = vld [vmem:[%s8779_s22 + $0x14] sm:$0xf]  ;;  %vm1231_vm8 = vsmask.f32 3328  ;;  %v378_v51 = vor.u32 %v376_v38, %v375_v45  ;;  %v386_v53 = vor.u32 %v384_v40, %v383_v46  ;;  %8008 = vmatprep.subr.bf16.mxu0 %v8547_v36 }
  0x23   : > { %vm8793_vm5 = vmor %vm352_vm2, %vm353_vm3  ;;  %v686_v43 = vsel %vm8786_vm4, %v371_v32, %v685_v28  ;;  %v8824_v50 = vld [vmem:[%s9764_s3 + $0x40] sm:$0xff]   ;;  %v379_v52 = vrot.slane %v375_v45, 4  ;;  %v388_v54 = vrot.slane %v383_v46, 4  ;;  %v390_v56 = vshrl.u32 %v324_v48, 16  ;;  %v326_v63 = vld [vmem:[%s8779_s22 + $0x18] sm:$0xf] }
  0x24   : > { %vm8801_vm7 = vmand %vm676_vm1, %vm677_vm6  ;;  %v370_v41 = vsel %vm8793_vm5, %v362_v30, %v369_v31  ;;  %687 = vst [vmem:[#allocation3 + $0x14] sm:$0x1] %v686_v43  ;;  %v8829_v55 = vld [vmem:[%s9764_s3 + $0x140] sm:$0xff]   ;;  %v393_v57 = vshll.u32 %v324_v48, 16  ;;  %v398_v58 = vshrl.u32 %v325_v49, 16  ;;  %v401_v59 = vshll.u32 %v325_v49, 16  ;;  %7817 = vmatpush3.bf16.msra.mxu1 %v8546_v35 }
  0x25   : > { %v680_v42 = vsel %vm8801_vm7, %v361_v29, %v679_v27  ;;  %682 = vst [vmem:[#allocation3 + $0x10] sm:$0xf] %v370_v41  ;;  %vm1232_vm9 = vsmask.f32 7440  ;;  %v387_v60 = vsel %vm8793_vm5, %v379_v52, %v386_v53  ;;  %v689_v61 = vsel %vm8801_vm7, %v378_v51, %v688_v44  ;;  %v695_v2 = vld [vmem:[#allocation3 + $0x24] sm:$0xf]  ;;  %8009 = vmatpush3.bf16.msra.mxu0 %v8547_v36 }
  0x26   : > { %681 = vst [vmem:[#allocation3 + $0xc] sm:$0xf] %v680_v42  ;;  %v693_v62 = vsel %vm8786_vm4, %v388_v54, %v692_v47  ;;  %690 = vst [vmem:[#allocation3 + $0x18] sm:$0xf] %v689_v61  ;;  %v392_v0 = vrot.slane %v390_v56, 7  ;;  %v400_v1 = vrot.slane %v398_v58, 7  ;;  %7850 = vmatprep.subr.bf16.mxu1 %v8824_v50  ;;  %8042 = vmatprep.subr.bf16.mxu0 %v8829_v55 }
  0x27   : > { %691 = vst [vmem:[#allocation3 + $0x1c] sm:$0xf] %v387_v60  ;;  %694 = vst [vmem:[#allocation3 + $0x20] sm:$0x1] %v693_v62  ;;  %v8839_v3 = vld [vmem:[%s8779_s22 + $0x1c] sm:$0xf] }
  0x28   : > { %v699_v4 = vld [vmem:[#allocation3 + $0x2c] sm:$0x1]  ;;  %v407_v5 = vshrl.u32 %v326_v63, 16  ;;  %v410_v6 = vshll.u32 %v326_v63, 16  ;;  %v415_v7 = vshrl.u32 %v8839_v3, 16  ;;  %v418_v8 = vshll.u32 %v8839_v3, 16  ;;  %vm8857_vm10 = vmor %vm1231_vm8, %vm1232_vm9 }
  0x29   : > { %v395_v12 = vor.u32 %v393_v57, %v392_v0  ;;  %v403_v13 = vor.u32 %v401_v59, %v400_v1  ;;  %v8555_v14 = vld [vmem:[%s9764_s3 + $0x48] sm:$0xff]   ;;  %v396_v23 = vrot.slane %v392_v0, 4  ;;  %v405_v24 = vrot.slane %v400_v1, 4  ;;  %v702_v45 = vld [vmem:[#allocation3 + $0x30] sm:$0xf]  ;;  %s6774_s7 = sshll.u32 %s9782_s18, 3 }
  0x2a   : > { %v409_v34 = vrot.slane %v407_v5, 7  ;;  %v328_v60 = vld [vmem:[%s8779_s22 + $0x20] sm:$0xf]  ;;  %v417_v1 = vrot.slane %v415_v7, 7  ;;  %v8552_v7 = vld [vmem:[%s9764_s3 + $0x148] sm:$0xff]   ;;  %vm2100_vm11 = vcmask 1042432   ;;  %s9710_s10 = scalar_lea.vmem %s9766_s5, %s6774_s7 }
  0x2b   : > { %v6969_v11 = vld [vmem:[#allocation3 + $0x14] sm:$0x1]  ;;  %v696_v25 = vsel %vm8801_vm7, %v395_v12, %v695_v2  ;;  %v404_v32 = vsel %vm8793_vm5, %v396_v23, %v403_v13  ;;  %v700_v33 = vsel %vm8786_vm4, %v405_v24, %v699_v4  ;;  %v706_v24 = vld [vmem:[#allocation3 + $0x38] sm:$0x1]  ;;  %vm2101_vm12 = vcmask 1046532  }
  0x2c   : > { %v6968_v10 = vld [vmem:[#allocation3 + $0x10] sm:$0xf]  ;;  %v3123_v20 = vshll.u32 %v6969_v11, 16  ;;  %697 = vst [vmem:[#allocation3 + $0x24] sm:$0xf] %v696_v25  ;;  %v413_v59 = vrot.slane %v409_v34, 4  ;;  %vm9008_vm13 = vmor %vm2100_vm11, %vm2101_vm12 }
  0x2d   : > { %v6967_v9 = vld [vmem:[#allocation3 + $0xc] sm:$0xf]  ;;  %v3113_v17 = vshll.u32 %v6968_v10, 16  ;;  %v3117_v18 = vshrl.u32 %v6968_v10, 16  ;;  %v6970_v37 = vld [vmem:[#allocation3 + $0x18] sm:$0xf] }
  0x2e   : > { %v3104_v15 = vshrl.u32 %v6967_v9, 16  ;;  %v3107_v16 = vshll.u32 %v6967_v9, 16  ;;  %v8549_v22 = vld [vmem:[#allocation3 + $0xc] sm:$0xff]   ;;  %v3125_v31 = vrot.slane %v3123_v20, 5  ;;  %v6971_v38 = vld [vmem:[#allocation3 + $0x1c] sm:$0xf] }
  0x2f   : > { %v3115_v29 = vrot.slane %v3113_v17, 5  ;;  %v3119_v30 = vrot.slane %v3117_v18, 4  ;;  %7819 = vmatmul.mubr.bf16.vlgmr.msra.gmra.mrb[0].mxu1 %v8549_v22  ;;  %v6972_v39 = vld [vmem:[#allocation3 + $0x20] sm:$0x1]  ;;  %698 = vst [vmem:[#allocation3 + $0x28] sm:$0xf] %v404_v32 }
  0x30   : > { %v3106_v27 = vrot.slane %v3104_v15, 4  ;;  %v3109_v28 = vrot.slane %v3107_v16, 5  ;;  %7851 = vmatpush3.bf16.msra.mxu1 %v8824_v50  ;;  %701 = vst [vmem:[#allocation3 + $0x2c] sm:$0x1] %v700_v33  ;;  %v3128_v41 = vshrl.u32 %v6970_v37, 16  ;;  %v3131_v42 = vshll.u32 %v6970_v37, 16 }
  0x31   : > { %v3120_v36 = vor.u32 %v3119_v30, %v3115_v29  ;;  %v3137_v43 = vshll.u32 %v6971_v38, 16  ;;  %v3141_v44 = vshrl.u32 %v6971_v38, 16  ;;  %7852 = vmatprep.subr.bf16.mxu1 %v8555_v14  ;;  %v3147_v48 = vshll.u32 %v6972_v39, 16  ;;  %v8553_v49 = vld [vmem:[#allocation3 + $0x18] sm:$0xff]   ;;  %v8560_v2 = vld [vmem:[%s9764_s3 + $0x50] sm:$0xff]  }
  0x32   : > { %v3110_v35 = vor.u32 %v3109_v28, %v3106_v27  ;;  %v412_v50 = vor.u32 %v410_v6, %v409_v34  ;;  %v3130_v51 = vrot.slane %v3128_v41, 4  ;;  %v3133_v52 = vrot.slane %v3131_v42, 5  ;;  %7822 = vmatprep.mubr.bf16.mxu1 %v8553_v49  ;;  %v329_v25 = vld [vmem:[%s8779_s22 + $0x24] sm:$0xf]  ;;  %v709_v41 = vld [vmem:[#allocation3 + $0x3c] sm:$0xf] }
  0x33   : > { %v3121_v47 = vrot.slane %v3120_v36, 4  ;;  %v3139_v53 = vrot.slane %v3137_v43, 5  ;;  %v3143_v54 = vrot.slane %v3141_v44, 4  ;;  %v3149_v58 = vrot.slane %v3147_v48, 5  ;;  %v6973_v0 = vld [vmem:[#allocation3 + $0x24] sm:$0xf] }
  0x34   : > { %v3111_v46 = vrot.slane %v3110_v35, 4  ;;  %7853 = vmatpush3.bf16.msra.mxu1 %v8555_v14  ;;  %v3134_v62 = vor.u32 %v3133_v52, %v3130_v51  ;;  %v3152_v4 = vshrl.u32 %v6973_v0, 16  ;;  %v3155_v5 = vshll.u32 %v6973_v0, 16  ;;  %v330_v35 = vld [vmem:[%s8779_s22 + $0x28] sm:$0xf]  ;;  %v8556_v43 = vld [vmem:[%s9764_s3 + $0x150] sm:$0xff]  }
  0x35   : > { %v3126_v57 = vsel %vm8857_vm10, %v3121_v47, %v3125_v31  ;;  %v3144_v63 = vor.u32 %v3143_v54, %v3139_v53  ;;  %v703_v6 = vsel %vm8801_vm7, %v412_v50, %v702_v45  ;;  %v424_v9 = vshrl.u32 %v328_v60, 16  ;;  %7854 = vmatprep.subr.bf16.mxu1 %v8560_v2 }
  0x36   : > { %v3116_v56 = vsel %vm8857_vm10, %v3111_v46, %v3115_v29  ;;  %v3135_v10 = vrot.slane %v3134_v62, 4  ;;  %v6974_v12 = vld [vmem:[#allocation3 + $0x28] sm:$0xf]  ;;  %v420_v14 = vor.u32 %v418_v8, %v417_v1  ;;  %704 = vst [vmem:[#allocation3 + $0x30] sm:$0xf] %v703_v6  ;;  %v3154_v15 = vrot.slane %v3152_v4, 4 }
  0x37   : > { %v7031_v61 = vcombine.low %v3116_v56, %v3126_v57  ;;  %v3145_v11 = vrot.slane %v3144_v63, 4  ;;  %v6975_v13 = vld [vmem:[#allocation3 + $0x2c] sm:$0x1]  ;;  %v3157_v16 = vrot.slane %v3155_v5, 5  ;;  %v3161_v17 = vshll.u32 %v6974_v12, 16  ;;  %v8554_v8 = vld [vmem:[#allocation3 + $0x24] sm:$0xff]  }
  0x38   : > { %v3165_v18 = vshrl.u32 %v6974_v12, 16  ;;  %7855 = vmatpush3.bf16.msra.mxu1 %v8560_v2  ;;  %v3140_v20 = vsel %vm8857_vm10, %v3135_v10, %v3139_v53  ;;  %v3171_v3 = vshll.u32 %v6975_v13, 16  ;;  %v421_v23 = vsel %vm8793_vm5, %v413_v59, %v420_v14  ;;  %v713_v46 = vld [vmem:[#allocation3 + $0x44] sm:$0x1]  ;;  %v8565_v57 = vld [vmem:[%s9764_s3 + $0x58] sm:$0xff]  }
  0x39   : > { %8010 = vmatprep.mubr.bf16.mxu0 %v7031_v61  ;;  %v3150_v22 = vsel %vm8857_vm10, %v3145_v11, %v3149_v58  ;;  %v3158_v28 = vor.u32 %v3157_v16, %v3154_v15  ;;  %v3163_v29 = vrot.slane %v3161_v17, 5  ;;  %705 = vst [vmem:[#allocation3 + $0x34] sm:$0xf] %v421_v23  ;;  %7823 = vmatmul.mubr.bf16.gmra.mrb[4].mxu1 %v8554_v8  ;;  %v422_v32 = vrot.slane %v417_v1, 4  ;;  %v716_v62 = vld [vmem:[#allocation3 + $0x48] sm:$0xf] }
  0x3a   : > { %v7032_v27 = vcombine.low %v3140_v20, %v3150_v22  ;;  %v3167_v30 = vrot.slane %v3165_v18, 4  ;;  %v3173_v31 = vrot.slane %v3171_v3, 5  ;;  %v426_v33 = vrot.slane %v424_v9, 7  ;;  %7856 = vmatprep.subr.bf16.mxu1 %v8565_v57  ;;  %v8557_v6 = vld [vmem:[%s9764_s3 + $0x158] sm:$0xff]   ;;  %v332_v15 = vld [vmem:[%s8779_s22 + $0x30] sm:$0xf] }
  0x3b   : > { %v427_v34 = vshll.u32 %v328_v60, 16  ;;  %v3159_v36 = vrot.slane %v3158_v28, 4  ;;  %v432_v38 = vshrl.u32 %v329_v25, 16  ;;  %v435_v39 = vshll.u32 %v329_v25, 16  ;;  %v8915_v16 = vld [vmem:[%s8779_s22 + $0x34] sm:$0xf] }
  0x3c   : > { %8011 = vmatmul.mubr.bf16.vlgmr.msra.gmra.mrb[0].mxu0 %v7032_v27  ;;  %v3168_v37 = vor.u32 %v3167_v30, %v3163_v29  ;;  %v707_v42 = vsel %vm8786_vm4, %v422_v32, %v706_v24  ;;  %v430_v45 = vrot.slane %v426_v33, 4  ;;  %v441_v47 = vshrl.u32 %v330_v35, 16  ;;  %7857 = vmatpush3.bf16.msra.mxu1 %v8565_v57  ;;  %v8561_v25 = vld [vmem:[%s9764_s3 + $0x160] sm:$0xff]   ;;  %v720_v30 = vld [vmem:[#allocation3 + $0x50] sm:$0x1] }
  0x3d   : > { %8043 = vmatpush3.bf16.msra.mxu0 %v8829_v55  ;;  %v429_v44 = vor.u32 %v427_v34, %v426_v33  ;;  %v3164_v48 = vsel %vm8857_vm10, %v3159_v36, %v3163_v29  ;;  %708 = vst [vmem:[#allocation3 + $0x38] sm:$0x1] %v707_v42  ;;  %v6976_v50 = vld [vmem:[#allocation3 + $0x30] sm:$0xf]  ;;  %v434_v51 = vrot.slane %v432_v38, 7  ;;  %v444_v61 = vshll.u32 %v330_v35, 16 }
  0x3e   : > { %8044 = vmatprep.subr.bf16.mxu0 %v8552_v7  ;;  %v3169_v49 = vrot.slane %v3168_v37, 4  ;;  %v331_v55 = vld [vmem:[%s8779_s22 + $0x2c] sm:$0xf]  ;;  %v3176_v52 = vshrl.u32 %v6976_v50, 16  ;;  %v3179_v53 = vshll.u32 %v6976_v50, 16  ;;  %v8897_v56 = vrot.slane %v441_v47, 7 }
  0x3f   : > { %v710_v54 = vsel %vm8801_vm7, %v429_v44, %v709_v41  ;;  %v437_v59 = vor.u32 %v435_v39, %v434_v51  ;;  %v439_v60 = vrot.slane %v434_v51, 4  ;;  %v452_v20 = vshll.u32 %v331_v55, 16  ;;  %v8570_v33 = vld [vmem:[%s9764_s3 + $0x60] sm:$0xff]   ;;  %v723_v39 = vld [vmem:[#allocation3 + $0x54] sm:$0xf]  ;;  %v8562_v47 = vld [vmem:[%s9764_s3 + $0x168] sm:$0xff]  }
  0x40   : > { %v3174_v58 = vsel %vm8857_vm10, %v3169_v49, %v3173_v31  ;;  %711 = vst [vmem:[#allocation3 + $0x3c] sm:$0xf] %v710_v54  ;;  %v6977_v0 = vld [vmem:[#allocation3 + $0x34] sm:$0xf]  ;;  %v3178_v1 = vrot.slane %v3176_v52, 4  ;;  %v3181_v2 = vrot.slane %v3179_v53, 5  ;;  %v446_v13 = vor.u32 %v444_v61, %v8897_v56  ;;  %7858 = vmatprep.subr.bf16.mxu1 %v8570_v33 }
  0x41   : > { %8045 = vmatpush3.bf16.msra.mxu0 %v8552_v7  ;;  %v7033_v63 = vcombine.low %v3164_v48, %v3174_v58  ;;  %v3185_v4 = vshll.u32 %v6977_v0, 16  ;;  %v3189_v5 = vshrl.u32 %v6977_v0, 16  ;;  %v8558_v9 = vld [vmem:[#allocation3 + $0x30] sm:$0xff]   ;;  %v438_v10 = vsel %vm8793_vm5, %v430_v45, %v437_v59  ;;  %v334_v50 = vld [vmem:[%s8779_s22 + $0x38] sm:$0xf]  ;;  %7859 = vmatpush3.bf16.msra.mxu1 %v8570_v33 }
  0x42   : > { %8046 = vmatprep.subr.bf16.mxu0 %v8556_v43  ;;  %v714_v11 = vsel %vm8786_vm4, %v439_v60, %v713_v46  ;;  %v3182_v12 = vor.u32 %v3181_v2, %v3178_v1  ;;  %712 = vst [vmem:[#allocation3 + $0x40] sm:$0xf] %v438_v10  ;;  %v447_v14 = vrot.slane %v8897_v56, 4  ;;  %v449_v7 = vshrl.u32 %v331_v55, 16  ;;  %7826 = vmatprep.mubr.bf16.mxu1 %v8558_v9  ;;  %v727_v0 = vld [vmem:[#allocation3 + $0x5c] sm:$0x1] }
  0x43   : > { %8014 = vmatprep.mubr.bf16.mxu0 %v7033_v63  ;;  %715 = vst [vmem:[#allocation3 + $0x44] sm:$0x1] %v714_v11  ;;  %v3187_v17 = vrot.slane %v3185_v4, 5  ;;  %v3191_v18 = vrot.slane %v3189_v5, 4  ;;  %v458_v22 = vshrl.u32 %v332_v15, 16  ;;  %v717_v24 = vsel %vm8801_vm7, %v446_v13, %v716_v62 }
  0x44   : > { %v6978_v3 = vld [vmem:[#allocation3 + $0x38] sm:$0x1]  ;;  %v3183_v8 = vrot.slane %v3182_v12, 4  ;;  %v451_v23 = vrot.slane %v449_v7, 7  ;;  %v461_v27 = vshll.u32 %v332_v15, 16  ;;  %v466_v32 = vshrl.u32 %v8915_v16, 16 }
  0x45   : > { %8047 = vmatpush3.bf16.msra.mxu0 %v8556_v43  ;;  %v3192_v28 = vor.u32 %v3191_v18, %v3187_v17  ;;  %v3195_v29 = vshll.u32 %v6978_v3, 16  ;;  %718 = vst [vmem:[#allocation3 + $0x48] sm:$0xf] %v717_v24  ;;  %v8922_v31 = vrot.slane %v458_v22, 7  ;;  %v469_v38 = vshll.u32 %v8915_v16, 16  ;;  %v8574_v7 = vld [vmem:[%s9764_s3 + $0x68] sm:$0xff]  }
  0x46   : > { %8048 = vmatprep.subr.bf16.mxu0 %v8557_v6  ;;  %v3188_v34 = vsel %vm8857_vm10, %v3183_v8, %v3187_v17  ;;  %v454_v36 = vor.u32 %v452_v20, %v451_v23  ;;  %v456_v37 = vrot.slane %v451_v23, 4  ;;  %v468_v62 = vrot.slane %v466_v32, 7  ;;  %v335_v1 = vld [vmem:[%s8779_s22 + $0x3c] sm:$0xf]  ;;  %v8566_v20 = vld [vmem:[%s9764_s3 + $0x170] sm:$0xff]   ;;  %7860 = vmatprep.subr.bf16.mxu1 %v8574_v7 }
  0x47   : > { %v6979_v35 = vld [vmem:[#allocation3 + $0x3c] sm:$0xf]  ;;  %v3193_v41 = vrot.slane %v3192_v28, 4  ;;  %v3197_v42 = vrot.slane %v3195_v29, 5  ;;  %v463_v48 = vor.u32 %v461_v27, %v8922_v31  ;;  %v464_v49 = vrot.slane %v8922_v31, 4  ;;  %7861 = vmatpush3.bf16.msra.mxu1 %v8574_v7 }
  0x48   : > { %v3200_v43 = vshrl.u32 %v6979_v35, 16  ;;  %v3203_v44 = vshll.u32 %v6979_v35, 16  ;;  %v455_v45 = vsel %vm8793_vm5, %v447_v14, %v454_v36  ;;  %v721_v46 = vsel %vm8786_vm4, %v456_v37, %v720_v30  ;;  %v730_v31 = vld [vmem:[#allocation3 + $0x60] sm:$0xf]  ;;  %v8578_v36 = vld [vmem:[%s9764_s3 + $0x70] sm:$0xff]  }
  0x49   : > { %8049 = vmatpush3.bf16.msra.mxu0 %v8557_v6  ;;  %v3198_v51 = vsel %vm8857_vm10, %v3193_v41, %v3197_v42  ;;  %v6980_v55 = vld [vmem:[#allocation3 + $0x40] sm:$0xf]  ;;  %719 = vst [vmem:[#allocation3 + $0x4c] sm:$0xf] %v455_v45  ;;  %722 = vst [vmem:[#allocation3 + $0x50] sm:$0x1] %v721_v46  ;;  %v724_v63 = vsel %vm8801_vm7, %v463_v48, %v723_v39  ;;  %v471_v14 = vor.u32 %v469_v38, %v468_v62 }
  0x4a   : > { %v6981_v52 = vld [vmem:[#allocation3 + $0x44] sm:$0x1]  ;;  %v3202_v53 = vrot.slane %v3200_v43, 4  ;;  %v3205_v54 = vrot.slane %v3203_v44, 5  ;;  %8050 = vmatprep.subr.bf16.mxu0 %v8561_v25  ;;  %v7034_v56 = vcombine.low %v3188_v34, %v3198_v51  ;;  %v3209_v57 = vshll.u32 %v6980_v55, 16  ;;  %v8559_v60 = vld [vmem:[#allocation3 + $0x3c] sm:$0xff]   ;;  %7862 = vmatprep.subr.bf16.mxu1 %v8578_v36 }
  0x4b   : > { %v3213_v58 = vshrl.u32 %v6980_v55, 16  ;;  %v3219_v59 = vshll.u32 %v6981_v52, 16  ;;  %v475_v2 = vshrl.u32 %v334_v50, 16  ;;  %7827 = vmatmul.mubr.bf16.gmra.mrb[8].mxu1 %v8559_v60  ;;  %725 = vst [vmem:[#allocation3 + $0x54] sm:$0xf] %v724_v63  ;;  %v478_v10 = vshll.u32 %v334_v50, 16 }
  0x4c   : > { %v3206_v61 = vor.u32 %v3205_v54, %v3202_v53  ;;  %8015 = vmatmul.mubr.bf16.gmra.mrb[4].mxu0 %v7034_v56  ;;  %v3211_v4 = vrot.slane %v3209_v57, 5  ;;  %v6982_v9 = vld [vmem:[#allocation3 + $0x48] sm:$0xf]  ;;  %v473_v16 = vrot.slane %v468_v62, 4  ;;  %v483_v18 = vshrl.u32 %v335_v1, 16  ;;  %v8567_v42 = vld [vmem:[%s9764_s3 + $0x178] sm:$0xff]   ;;  %7863 = vmatpush3.bf16.msra.mxu1 %v8578_v36 }
  0x4d   : > { %v3215_v5 = vrot.slane %v3213_v58, 4  ;;  %v3221_v6 = vrot.slane %v3219_v59, 5  ;;  %v3224_v12 = vshrl.u32 %v6982_v9, 16  ;;  %v3227_v13 = vshll.u32 %v6982_v9, 16  ;;  %8051 = vmatpush3.bf16.msra.mxu0 %v8561_v25  ;;  %v8582_v48 = vld [vmem:[%s9764_s3 + $0x78] sm:$0xff]   ;;  %v8980_v62 = vld [vmem:[%s9764_s3 + $0x180] sm:$0xff]  }
  0x4e   : > { %v3207_v11 = vrot.slane %v3206_v61, 4  ;;  %8052 = vmatprep.subr.bf16.mxu0 %v8562_v47  ;;  %v477_v17 = vrot.slane %v475_v2, 7  ;;  %v472_v8 = vsel %vm8793_vm5, %v464_v49, %v471_v14  ;;  %v728_v29 = vsel %vm8786_vm4, %v473_v16, %v727_v0  ;;  %v734_v55 = vld [vmem:[#allocation3 + $0x68] sm:$0x1]  ;;  %v8971_v57 = vld [vmem:[#allocation3 + $0xc] sm:$0xe]  ;;  %7864 = vmatprep.subr.bf16.mxu1 %v8582_v48 }
  0x4f   : > { %v3216_v15 = vor.u32 %v3215_v5, %v3211_v4  ;;  %v3226_v22 = vrot.slane %v3224_v12, 4  ;;  %v3229_v3 = vrot.slane %v3227_v13, 5  ;;  %726 = vst [vmem:[#allocation3 + $0x58] sm:$0xf] %v472_v8  ;;  %729 = vst [vmem:[#allocation3 + $0x5c] sm:$0x1] %v728_v29 }
  0x50   : > { %v3212_v23 = vsel %vm8857_vm10, %v3207_v11, %v3211_v4  ;;  %v6983_v25 = vld [vmem:[#allocation3 + $0x4c] sm:$0xf]  ;;  %v6984_v27 = vld [vmem:[#allocation3 + $0x50] sm:$0x1]  ;;  %v480_v30 = vor.u32 %v478_v10, %v477_v17  ;;  %v481_v38 = vrot.slane %v477_v17, 4  ;;  %v485_v39 = vrot.slane %v483_v18, 7  ;;  %7865 = vmatpush3.bf16.msra.mxu1 %v8582_v48 }
  0x51   : > { %v3217_v24 = vrot.slane %v3216_v15, 4  ;;  %v8563_v28 = vld [vmem:[#allocation3 + $0x48] sm:$0xff]   ;;  %v3230_v32 = vor.u32 %v3229_v3, %v3226_v22  ;;  %v3233_v33 = vshll.u32 %v6983_v25, 16  ;;  %v3237_v34 = vshrl.u32 %v6983_v25, 16  ;;  %8053 = vmatpush3.bf16.msra.mxu0 %v8562_v47  ;;  %v8975_v61 = vld [vmem:[#allocation3 + $0x10] sm:$0xf] }
  0x52   : > { %v3243_v35 = vshll.u32 %v6984_v27, 16  ;;  %7830 = vmatprep.mubr.bf16.mxu1 %v8563_v28  ;;  %v486_v41 = vshll.u32 %v335_v1, 16  ;;  %8054 = vmatprep.subr.bf16.mxu0 %v8566_v20  ;;  %v6985_v47 = vld [vmem:[#allocation3 + $0x54] sm:$0xf]  ;;  %v490_v54 = vrot.slane %v485_v39, 4  ;;  %v731_v56 = vsel %vm8801_vm7, %v480_v30, %v730_v31  ;;  %v8985_v63 = vld [vmem:[%s9764_s3 + $0x80] sm:$0xff]  }
  0x53   : > { %v3222_v37 = vsel %vm8857_vm10, %v3217_v24, %v3221_v6  ;;  %v3231_v44 = vrot.slane %v3230_v32, 4  ;;  %v3235_v45 = vrot.slane %v3233_v33, 5  ;;  %v3239_v46 = vrot.slane %v3237_v34, 4  ;;  %732 = vst [vmem:[#allocation3 + $0x60] sm:$0xf] %v731_v56  ;;  %7898 = vmatprep.subr.bf16.mxu1 %v8985_v63 }
  0x54   : > { %v7035_v43 = vcombine.low %v3212_v23, %v3222_v37  ;;  %v3248_v49 = vshrl.u32 %v6985_v47, 16  ;;  %v3251_v50 = vshll.u32 %v6985_v47, 16  ;;  %v488_v51 = vor.u32 %v486_v41, %v485_v39  ;;  %v8991_v12 = vld [vmem:[#allocation3 + $0x14] sm:$0x1]  ;;  %v336_v16 = vld [vmem:[%s8779_s22 + $0x40] sm:$0xf] }
  0x55   : > { %v3240_v52 = vor.u32 %v3239_v46, %v3235_v45  ;;  %v3245_v53 = vrot.slane %v3243_v35, 5  ;;  %8055 = vmatpush3.bf16.msra.mxu0 %v8566_v20  ;;  %v3236_v0 = vsel %vm8857_vm10, %v3231_v44, %v3235_v45  ;;  %v735_v5 = vsel %vm8786_vm4, %v490_v54, %v734_v55  ;;  %v337_v3 = vld [vmem:[%s8779_s22 + $0x44] sm:$0xf]  ;;  %v737_v33 = vld [vmem:[#allocation3 + $0x6c] sm:$0xf] }
  0x56   : > { %8018 = vmatprep.mubr.bf16.mxu0 %v7035_v43  ;;  %v3250_v58 = vrot.slane %v3248_v49, 4  ;;  %v3253_v59 = vrot.slane %v3251_v50, 5  ;;  %v489_v60 = vsel %vm8793_vm5, %v481_v38, %v488_v51  ;;  %8056 = vmatprep.subr.bf16.mxu0 %v8567_v42  ;;  %v6986_v2 = vld [vmem:[#allocation3 + $0x58] sm:$0xf]  ;;  %v6987_v6 = vld [vmem:[#allocation3 + $0x5c] sm:$0x1] }
  0x57   : > { %v3241_v1 = vrot.slane %v3240_v52, 4  ;;  %v8564_v4 = vld [vmem:[#allocation3 + $0x54] sm:$0xff]   ;;  %733 = vst [vmem:[#allocation3 + $0x64] sm:$0xf] %v489_v60  ;;  %v3257_v10 = vshll.u32 %v6986_v2, 16  ;;  %v3261_v11 = vshrl.u32 %v6986_v2, 16 }
  0x58   : > { %v3254_v9 = vor.u32 %v3253_v59, %v3250_v58  ;;  %736 = vst [vmem:[#allocation3 + $0x68] sm:$0x1] %v735_v5  ;;  %v3267_v14 = vshll.u32 %v6987_v6, 16  ;;  %7831 = vmatmul.mubr.bf16.gmra.mrb[12].mxu1 %v8564_v4  ;;  %v7103_v7 = vrot.slane %v8971_v57, 9  ;;  %v3971_v15 = vrot.slane %v8975_v61, 5 }
  0x59   : > { %v3246_v13 = vsel %vm8857_vm10, %v3241_v1, %v3245_v53  ;;  %8057 = vmatpush3.bf16.msra.mxu0 %v8567_v42  ;;  %v3259_v20 = vrot.slane %v3257_v10, 5  ;;  %v3263_v22 = vrot.slane %v3261_v11, 4  ;;  %v3974_v24 = vrot.slane %v8991_v12, 5  ;;  %v7058_v52 = vld [vmem:[#allocation3 + $0x18] sm:$0xe] }
  0x5a   : > { %v7036_v17 = vcombine.low %v3236_v0, %v3246_v13  ;;  %v3255_v18 = vrot.slane %v3254_v9, 4  ;;  %8090 = vmatprep.subr.bf16.mxu0 %v8980_v62  ;;  %v3269_v8 = vrot.slane %v3267_v14, 5  ;;  %v3973_v23 = vrot.slane %v3971_v15, 4  ;;  %v6988_v30 = vld [vmem:[#allocation3 + $0x60] sm:$0xf] }
  0x5b   : > { %v492_v25 = vshrl.u32 %v336_v16, 16  ;;  %v3264_v27 = vor.u32 %v3263_v22, %v3259_v20  ;;  %v495_v28 = vshll.u32 %v336_v16, 16  ;;  %v500_v29 = vshrl.u32 %v337_v3, 16  ;;  %v7059_v53 = vld [vmem:[#allocation3 + $0x1c] sm:$0xf] }
  0x5c   : > { %8019 = vmatmul.mubr.bf16.gmra.mrb[8].mxu0 %v7036_v17  ;;  %v503_v32 = vshll.u32 %v337_v3, 16  ;;  %v3260_v34 = vsel %vm8857_vm10, %v3255_v18, %v3259_v20  ;;  %v3272_v37 = vshrl.u32 %v6988_v30, 16  ;;  %v3275_v38 = vshll.u32 %v6988_v30, 16  ;;  %v7060_v59 = vld [vmem:[#allocation3 + $0x20] sm:$0x1] }
  0x5d   : > { %v494_v31 = vrot.slane %v492_v25, 7  ;;  %v3265_v35 = vrot.slane %v3264_v27, 4  ;;  %v9012_v57 = vrot.slane %v500_v29, 7  ;;  %v3972_v0 = vsel %vm9008_vm13, %v7103_v7, %v3971_v15  ;;  %v338_v9 = vld [vmem:[%s8779_s22 + $0x48] sm:$0xf] }
  0x5e   : > { %v6989_v36 = vld [vmem:[#allocation3 + $0x64] sm:$0xf]  ;;  %v3274_v46 = vrot.slane %v3272_v37, 4  ;;  %v3277_v47 = vrot.slane %v3275_v38, 5  ;;  %v3978_v1 = vrot.slane %v7059_v53, 5  ;;  %v3975_v4 = vsel %vm9008_vm13, %v3973_v23, %v3974_v24 }
  0x5f   : > { %v8568_v39 = vld [vmem:[#allocation3 + $0x60] sm:$0xff]   ;;  %v6990_v41 = vld [vmem:[#allocation3 + $0x68] sm:$0x1]  ;;  %v3281_v42 = vshll.u32 %v6989_v36, 16  ;;  %v3285_v43 = vshrl.u32 %v6989_v36, 16  ;;  %v497_v44 = vor.u32 %v495_v28, %v494_v31  ;;  %v3270_v45 = vsel %vm8857_vm10, %v3265_v35, %v3269_v8 }
  0x60   : > { %v3291_v48 = vshll.u32 %v6990_v41, 16  ;;  %7834 = vmatprep.mubr.bf16.mxu1 %v8568_v39  ;;  %v7037_v50 = vcombine.low %v3260_v34, %v3270_v45  ;;  %v3278_v54 = vor.u32 %v3277_v47, %v3274_v46  ;;  %v498_v56 = vrot.slane %v494_v31, 4  ;;  %v339_v10 = vld [vmem:[%s8779_s22 + $0x4c] sm:$0xf]  ;;  %v7061_v18 = vld [vmem:[#allocation3 + $0x24] sm:$0xe] }
  0x61   : > { %v3283_v51 = vrot.slane %v3281_v42, 5  ;;  %v3287_v55 = vrot.slane %v3285_v43, 4  ;;  %v738_v58 = vsel %vm8801_vm7, %v497_v44, %v737_v33  ;;  %v505_v5 = vor.u32 %v503_v32, %v9012_v57  ;;  %v7062_v20 = vld [vmem:[#allocation3 + $0x28] sm:$0xf]  ;;  %v7063_v24 = vld [vmem:[#allocation3 + $0x2c] sm:$0x1] }
  0x62   : > { %8022 = vmatprep.mubr.bf16.mxu0 %v7037_v50  ;;  %v3293_v61 = vrot.slane %v3291_v48, 5  ;;  %739 = vst [vmem:[#allocation3 + $0x6c] sm:$0xf] %v738_v58  ;;  %v3279_v2 = vrot.slane %v3278_v54, 4  ;;  %v7104_v6 = vrot.slane %v7058_v52, 9  ;;  %v3980_v12 = vrot.slane %v3978_v1, 4 }
  0x63   : > { %v3288_v60 = vor.u32 %v3287_v55, %v3283_v51  ;;  %v3981_v13 = vrot.slane %v7060_v59, 5  ;;  %v509_v14 = vshrl.u32 %v338_v9, 16  ;;  %v506_v7 = vsel %vm8793_vm5, %v498_v56, %v505_v5  ;;  %v340_v25 = vld [vmem:[%s8779_s22 + $0x50] sm:$0xf]  ;;  %v744_v29 = vld [vmem:[#allocation3 + $0x78] sm:$0xf] }
  0x64   : > { %v3284_v16 = vsel %vm8857_vm10, %v3279_v2, %v3283_v51  ;;  %v512_v15 = vshll.u32 %v338_v9, 16  ;;  %v517_v17 = vshrl.u32 %v339_v10, 16  ;;  %v7135_v3 = vcombine.low %v3972_v0, %v3975_v4  ;;  %740 = vst [vmem:[#allocation3 + $0x70] sm:$0xf] %v506_v7  ;;  %v341_v31 = vld [vmem:[%s8779_s22 + $0x54] sm:$0xf] }
  0x65   : > { %v3289_v11 = vrot.slane %v3288_v60, 4  ;;  %v511_v8 = vrot.slane %v509_v14, 7  ;;  %v520_v23 = vshll.u32 %v339_v10, 16  ;;  %v7105_v30 = vrot.slane %v7061_v18, 9  ;;  %v751_v45 = vld [vmem:[#allocation3 + $0x84] sm:$0xf] }
  0x66   : > { %v9030_v28 = vrot.slane %v517_v17, 7  ;;  %v3985_v34 = vrot.slane %v7062_v20, 5  ;;  %v3988_v35 = vrot.slane %v7063_v24, 5  ;;  %v3979_v36 = vsel %vm9008_vm13, %v7104_v6, %v3978_v1  ;;  %v7064_v46 = vld [vmem:[#allocation3 + $0x30] sm:$0xe]  ;;  %v8575_v10 = vld [vmem:[%s9764_s3 + $0x188] sm:$0xff]  }
  0x67   : > { %v3294_v22 = vsel %vm8857_vm10, %v3289_v11, %v3293_v61  ;;  %v514_v32 = vor.u32 %v512_v15, %v511_v8  ;;  %v515_v33 = vrot.slane %v511_v8, 4  ;;  %v526_v38 = vshrl.u32 %v340_v25, 16  ;;  %v7065_v55 = vld [vmem:[#allocation3 + $0x34] sm:$0xf]  ;;  %v7066_v52 = vld [vmem:[#allocation3 + $0x38] sm:$0x1] }
  0x68   : > { %v7038_v27 = vcombine.low %v3284_v16, %v3294_v22  ;;  %v522_v37 = vor.u32 %v520_v23, %v9030_v28  ;;  %v529_v39 = vshll.u32 %v340_v25, 16  ;;  %v3982_v41 = vsel %vm9008_vm13, %v3980_v12, %v3981_v13  ;;  %v342_v6 = vld [vmem:[%s8779_s22 + $0x58] sm:$0xf]  ;;  %v343_v11 = vld [vmem:[%s8779_s22 + $0x5c] sm:$0xf] }
  0x69   : > { %v745_v42 = vsel %vm8801_vm7, %v514_v32, %v744_v29  ;;  %v3987_v43 = vrot.slane %v3985_v34, 4  ;;  %v534_v44 = vshrl.u32 %v341_v31, 16  ;;  %v3986_v48 = vsel %vm9008_vm13, %v7105_v30, %v3985_v34  ;;  %v758_v17 = vld [vmem:[#allocation3 + $0x90] sm:$0xf]  ;;  %v7067_v18 = vld [vmem:[#allocation3 + $0x3c] sm:$0xe] }
  0x6a   : > { %8023 = vmatmul.mubr.bf16.gmra.mrb[12].mxu0 %v7038_v27  ;;  %v523_v47 = vsel %vm8793_vm5, %v515_v33, %v522_v37  ;;  %746 = vst [vmem:[#allocation3 + $0x78] sm:$0xf] %v745_v42  ;;  %v528_v50 = vrot.slane %v526_v38, 7  ;;  %v537_v51 = vshll.u32 %v341_v31, 16  ;;  %v7106_v56 = vrot.slane %v7064_v46, 9 }
  0x6b   : > { %8058 = vmatprep.mubr.bf16.mxu0 %v7135_v3  ;;  %747 = vst [vmem:[#allocation3 + $0x7c] sm:$0xf] %v523_v47  ;;  %v3989_v53 = vsel %vm9008_vm13, %v3987_v43, %v3988_v35  ;;  %v9046_v54 = vrot.slane %v534_v44, 7  ;;  %v3992_v58 = vrot.slane %v7065_v55, 5  ;;  %v8569_v59 = vld [vmem:[#allocation3 + $0x6c] sm:$0xff]   ;;  %v7136_v60 = vcombine.low %v3979_v36, %v3982_v41 }
  0x6c   : > { %v531_v61 = vor.u32 %v529_v39, %v528_v50  ;;  %v532_v0 = vrot.slane %v528_v50, 4  ;;  %v3995_v1 = vrot.slane %v7066_v52, 5  ;;  %v7137_v2 = vcombine.low %v3986_v48, %v3989_v53  ;;  %7835 = vmatmul.mubr.bf16.gmra.mrb[16].mxu1 %v8569_v59  ;;  %v7068_v20 = vld [vmem:[#allocation3 + $0x40] sm:$0xf]  ;;  %v7069_v8 = vld [vmem:[#allocation3 + $0x44] sm:$0x1] }
  0x6d   : > { %v539_v4 = vor.u32 %v537_v51, %v9046_v54  ;;  %v3994_v5 = vrot.slane %v3992_v58, 4  ;;  %v543_v12 = vshrl.u32 %v342_v6, 16  ;;  %v546_v13 = vshll.u32 %v342_v6, 16  ;;  %v344_v29 = vld [vmem:[%s8779_s22 + $0x60] sm:$0xf]  ;;  %v8579_v35 = vld [vmem:[%s9764_s3 + $0x190] sm:$0xff]  }
  0x6e   : > { %v752_v9 = vsel %vm8801_vm7, %v531_v61, %v751_v45  ;;  %v3993_v16 = vsel %vm9008_vm13, %v7106_v56, %v3992_v58  ;;  %v551_v7 = vshrl.u32 %v343_v11, 16  ;;  %v554_v15 = vshll.u32 %v343_v11, 16  ;;  %v345_v37 = vld [vmem:[%s8779_s22 + $0x64] sm:$0xf]  ;;  %v765_v45 = vld [vmem:[#allocation3 + $0x9c] sm:$0xf] }
  0x6f   : > { %v540_v14 = vsel %vm8793_vm5, %v532_v0, %v539_v4  ;;  %753 = vst [vmem:[#allocation3 + $0x84] sm:$0xf] %v752_v9  ;;  %v3996_v22 = vsel %vm9008_vm13, %v3994_v5, %v3995_v1  ;;  %v545_v3 = vrot.slane %v543_v12, 7  ;;  %v7107_v23 = vrot.slane %v7067_v18, 9  ;;  %v7070_v50 = vld [vmem:[#allocation3 + $0x48] sm:$0xe] }
  0x70   : > { %754 = vst [vmem:[#allocation3 + $0x88] sm:$0xf] %v540_v14  ;;  %v3999_v24 = vrot.slane %v7068_v20, 5  ;;  %v9063_v25 = vrot.slane %v551_v7, 7  ;;  %v4002_v27 = vrot.slane %v7069_v8, 5  ;;  %v7138_v36 = vcombine.low %v3993_v16, %v3996_v22  ;;  %v8583_v51 = vld [vmem:[%s9764_s3 + $0x198] sm:$0xff]  }
  0x71   : > { %v548_v31 = vor.u32 %v546_v13, %v545_v3  ;;  %v549_v32 = vrot.slane %v545_v3, 4  ;;  %v560_v38 = vshrl.u32 %v344_v29, 16  ;;  %v563_v39 = vshll.u32 %v344_v29, 16  ;;  %v7071_v52 = vld [vmem:[#allocation3 + $0x4c] sm:$0xf]  ;;  %v8585_v13 = vld [vmem:[%s9764_s3 + $0x1a0] sm:$0xff]  }
  0x72   : > { %8059 = vmatmul.mubr.bf16.vlgmr.msra.gmra.mrb[0].mxu0 %v7136_v60  ;;  %v8572_v30 = vld [vmem:[#allocation3 + $0x78] sm:$0xff]   ;;  %v4000_v33 = vsel %vm9008_vm13, %v7107_v23, %v3999_v24  ;;  %v4001_v34 = vrot.slane %v3999_v24, 4  ;;  %v568_v43 = vshrl.u32 %v345_v37, 16  ;;  %v571_v44 = vshll.u32 %v345_v37, 16  ;;  %v7072_v60 = vld [vmem:[#allocation3 + $0x50] sm:$0x1] }
  0x73   : > { %8091 = vmatpush3.bf16.msra.mxu0 %v8980_v62  ;;  %8062 = vmatprep.mubr.bf16.mxu0 %v7137_v2  ;;  %v556_v62 = vor.u32 %v554_v15, %v9063_v25  ;;  %v759_v41 = vsel %vm8801_vm7, %v548_v31, %v758_v17  ;;  %v562_v48 = vrot.slane %v560_v38, 7  ;;  %v7108_v53 = vrot.slane %v7070_v50, 9  ;;  %v346_v4 = vld [vmem:[%s8779_s22 + $0x68] sm:$0xf]  ;;  %v347_v5 = vld [vmem:[%s8779_s22 + $0x6c] sm:$0xf] }
  0x74   : > { %8092 = vmatprep.subr.bf16.mxu0 %v8575_v10  ;;  %7838 = vmatprep.mubr.bf16.mxu1 %v8572_v30  ;;  %v4003_v42 = vsel %vm9008_vm13, %v4001_v34, %v4002_v27  ;;  %760 = vst [vmem:[#allocation3 + $0x90] sm:$0xf] %v759_v41  ;;  %v9082_v55 = vrot.slane %v568_v43, 7  ;;  %v4006_v0 = vrot.slane %v7071_v52, 5  ;;  %v4009_v1 = vrot.slane %v7072_v60, 5  ;;  %v8587_v38 = vld [vmem:[%s9764_s3 + $0x1a8] sm:$0xff]  }
  0x75   : > { %v557_v46 = vsel %vm8793_vm5, %v549_v32, %v556_v62  ;;  %v7139_v47 = vcombine.low %v4000_v33, %v4003_v42  ;;  %v565_v58 = vor.u32 %v563_v39, %v562_v48  ;;  %v566_v59 = vrot.slane %v562_v48, 4  ;;  %v7073_v12 = vld [vmem:[#allocation3 + $0x54] sm:$0xe]  ;;  %v772_v15 = vld [vmem:[#allocation3 + $0xa8] sm:$0xf] }
  0x76   : > { %761 = vst [vmem:[#allocation3 + $0x94] sm:$0xf] %v557_v46  ;;  %v573_v61 = vor.u32 %v571_v44, %v9082_v55  ;;  %v4007_v9 = vsel %vm9008_vm13, %v7108_v53, %v4006_v0  ;;  %v577_v11 = vshrl.u32 %v346_v4, 16  ;;  %v580_v14 = vshll.u32 %v346_v4, 16  ;;  %v7074_v17 = vld [vmem:[#allocation3 + $0x58] sm:$0xf] }
  0x77   : > { %8093 = vmatpush3.bf16.msra.mxu0 %v8575_v10  ;;  %v8573_v56 = vld [vmem:[#allocation3 + $0x84] sm:$0xff]   ;;  %v766_v2 = vsel %vm8801_vm7, %v565_v58, %v765_v45  ;;  %v4008_v10 = vrot.slane %v4006_v0, 4  ;;  %v585_v16 = vshrl.u32 %v347_v5, 16  ;;  %v588_v7 = vshll.u32 %v347_v5, 16  ;;  %v7075_v3 = vld [vmem:[#allocation3 + $0x5c] sm:$0x1] }
  0x78   : > { %8094 = vmatprep.subr.bf16.mxu0 %v8579_v35  ;;  %7839 = vmatmul.mubr.bf16.gmra.mrb[20].mxu1 %v8573_v56  ;;  %v574_v6 = vsel %vm8793_vm5, %v566_v59, %v573_v61  ;;  %767 = vst [vmem:[#allocation3 + $0x9c] sm:$0xf] %v766_v2  ;;  %v7109_v18 = vrot.slane %v7073_v12, 9  ;;  %v579_v22 = vrot.slane %v577_v11, 7  ;;  %v4013_v8 = vrot.slane %v7074_v17, 5  ;;  %v8589_v61 = vld [vmem:[%s9764_s3 + $0x1b0] sm:$0xff]  }
  0x79   : > { %768 = vst [vmem:[#allocation3 + $0xa0] sm:$0xf] %v574_v6  ;;  %v4010_v20 = vsel %vm9008_vm13, %v4008_v10, %v4009_v1  ;;  %v9098_v27 = vrot.slane %v585_v16, 7  ;;  %v4016_v29 = vrot.slane %v7075_v3, 5  ;;  %v348_v34 = vld [vmem:[%s8779_s22 + $0x70] sm:$0xf] }
  0x7a   : > { %8063 = vmatmul.mubr.bf16.gmra.mrb[4].mxu0 %v7138_v36  ;;  %v7140_v24 = vcombine.low %v4007_v9, %v4010_v20  ;;  %v582_v30 = vor.u32 %v580_v14, %v579_v22  ;;  %v583_v31 = vrot.slane %v579_v22, 4  ;;  %v4014_v32 = vsel %vm9008_vm13, %v7109_v18, %v4013_v8  ;;  %v779_v44 = vld [vmem:[#allocation3 + $0xb4] sm:$0xf]  ;;  %v7076_v48 = vld [vmem:[#allocation3 + $0x60] sm:$0xe] }
  0x7b   : > { %8066 = vmatprep.mubr.bf16.mxu0 %v7139_v47  ;;  %8095 = vmatpush3.bf16.msra.mxu0 %v8579_v35  ;;  %v4015_v33 = vrot.slane %v4013_v8, 4  ;;  %v349_v35 = vld [vmem:[%s8779_s22 + $0x74] sm:$0xf]  ;;  %v590_v36 = vor.u32 %v588_v7, %v9098_v27  ;;  %v594_v62 = vshrl.u32 %v348_v34, 16  ;;  %v597_v37 = vshll.u32 %v348_v34, 16 }
  0x7c   : > { %8096 = vmatprep.subr.bf16.mxu0 %v8583_v51  ;;  %v773_v39 = vsel %vm8801_vm7, %v582_v30, %v772_v15  ;;  %v602_v42 = vshrl.u32 %v349_v35, 16  ;;  %v605_v43 = vshll.u32 %v349_v35, 16  ;;  %v7077_v52 = vld [vmem:[#allocation3 + $0x64] sm:$0xf]  ;;  %v7078_v58 = vld [vmem:[#allocation3 + $0x68] sm:$0x1] }
  0x7d   : > { %v8576_v23 = vld [vmem:[#allocation3 + $0x90] sm:$0xff]   ;;  %v4017_v41 = vsel %vm9008_vm13, %v4015_v33, %v4016_v29  ;;  %v591_v45 = vsel %vm8793_vm5, %v583_v31, %v590_v36  ;;  %774 = vst [vmem:[#allocation3 + $0xa8] sm:$0xf] %v773_v39  ;;  %v596_v47 = vrot.slane %v594_v62, 7  ;;  %v7110_v59 = vrot.slane %v7076_v48, 9 }
  0x7e   : > { %7842 = vmatprep.mubr.bf16.mxu1 %v8576_v23  ;;  %v7141_v46 = vcombine.low %v4014_v32, %v4017_v41  ;;  %775 = vst [vmem:[#allocation3 + $0xac] sm:$0xf] %v591_v45  ;;  %v4020_v60 = vrot.slane %v7077_v52, 5  ;;  %v4023_v1 = vrot.slane %v7078_v58, 5  ;;  %v507_v2 = vrot.slane %v9012_v57, 4 }
  0x7f   : > { %8097 = vmatpush3.bf16.msra.mxu0 %v8583_v51  ;;  %v9114_v51 = vrot.slane %v602_v42, 7  ;;  %v599_v53 = vor.u32 %v597_v37, %v596_v47  ;;  %v600_v56 = vrot.slane %v596_v47, 4  ;;  %v1183_v9 = vld [vmem:[#allocation3] sm:$0xf]  ;;  %v1184_v10 = vld [vmem:[#allocation3 + $0x4] sm:$0xf] }
  0x80   : > { %8098 = vmatprep.subr.bf16.mxu0 %v8585_v13  ;;  %v8577_v50 = vld [vmem:[#allocation3 + $0x9c] sm:$0xff]   ;;  %v4021_v5 = vsel %vm9008_vm13, %v7110_v59, %v4020_v60  ;;  %v4022_v6 = vrot.slane %v4020_v60, 4  ;;  %v1185_v12 = vld [vmem:[#allocation3 + $0x8] sm:$0x1]  ;;  %v1238_v14 = vshll.u32 %v1183_v9, 16  ;;  %v1244_v16 = vshll.u32 %v1184_v10, 16 }
  0x81   : > { %7843 = vmatmul.mubr.bf16.gmra.mrb[24].mxu1 %v8577_v50  ;;  %v607_v0 = vor.u32 %v605_v43, %v9114_v51  ;;  %v780_v4 = vsel %vm8801_vm7, %v599_v53, %v779_v44  ;;  %v524_v57 = vrot.slane %v9030_v28, 4  ;;  %v1248_v15 = vshrl.u32 %v1184_v10, 16  ;;  %v741_v18 = vld [vmem:[#allocation3 + $0x74] sm:$0x1]  ;;  %v7079_v23 = vld [vmem:[#allocation3 + $0x6c] sm:$0xe] }
  0x82   : > { %8067 = vmatmul.mubr.bf16.gmra.mrb[8].mxu0 %v7140_v24  ;;  %781 = vst [vmem:[#allocation3 + $0xb4] sm:$0xf] %v780_v4  ;;  %v4024_v7 = vsel %vm9008_vm13, %v4022_v6, %v4023_v1  ;;  %v1254_v17 = vshll.u32 %v1185_v12, 16  ;;  %v1240_v3 = vrot.slane %v1238_v14, 5  ;;  %v1246_v8 = vrot.slane %v1244_v16, 5  ;;  %v8591_v24 = vld [vmem:[%s9764_s3 + $0x1b8] sm:$0xff]  }
  0x83   : > { %8099 = vmatpush3.bf16.msra.mxu0 %v8585_v13  ;;  %8070 = vmatprep.mubr.bf16.mxu0 %v7141_v46  ;;  %v608_v11 = vsel %vm8793_vm5, %v600_v56, %v607_v0  ;;  %v1235_v13 = vshrl.u32 %v1183_v9, 16  ;;  %v7142_v20 = vcombine.low %v4021_v5, %v4024_v7  ;;  %v541_v29 = vrot.slane %v9046_v54, 4  ;;  %v7080_v34 = vld [vmem:[#allocation3 + $0x70] sm:$0xf]  ;;  %v1186_v35 = vld [vmem:[#allocation3 + $0xc] sm:$0xf] }
  0x84   : > { %8100 = vmatprep.subr.bf16.mxu0 %v8587_v38  ;;  %782 = vst [vmem:[#allocation3 + $0xb8] sm:$0xf] %v608_v11  ;;  %v1250_v30 = vrot.slane %v1248_v15, 4  ;;  %v1256_v31 = vrot.slane %v1254_v17, 5  ;;  %v742_v32 = vsel %vm8786_vm4, %v507_v2, %v741_v18  ;;  %v1187_v36 = vld [vmem:[#allocation3 + $0x10] sm:$0xf] }
  0x85   : > { %v1237_v22 = vrot.slane %v1235_v13, 4  ;;  %v8580_v28 = vld [vmem:[#allocation3 + $0xa8] sm:$0xff]   ;;  %743 = vst [vmem:[#allocation3 + $0x74] sm:$0x1] %v742_v32  ;;  %v4027_v37 = vrot.slane %v7080_v34, 5  ;;  %v1259_v39 = vshrl.u32 %v1186_v35, 16 }
  0x86   : > { %7846 = vmatprep.mubr.bf16.mxu1 %v8580_v28  ;;  %v1251_v62 = vor.u32 %v1250_v30, %v1246_v8  ;;  %v1262_v41 = vshll.u32 %v1186_v35, 16  ;;  %v9139_v42 = vld [vmem:[%s9764_s3 + $0x1c0] sm:$0xff]   ;;  %v1268_v44 = vshll.u32 %v1187_v36, 16  ;;  %v1272_v45 = vshrl.u32 %v1187_v36, 16  ;;  %v7082_v10 = vld [vmem:[#allocation3 + $0x78] sm:$0xe] }
  0x87   : > { %8101 = vmatpush3.bf16.msra.mxu0 %v8587_v38  ;;  %v1241_v33 = vor.u32 %v1240_v3, %v1237_v22  ;;  %v1188_v38 = vld [vmem:[#allocation3 + $0x14] sm:$0x1]  ;;  %v558_v47 = vrot.slane %v9063_v25, 4  ;;  %v7111_v50 = vrot.slane %v7079_v23, 9  ;;  %v1261_v52 = vrot.slane %v1259_v39, 4 }
  0x88   : > { %8102 = vmatprep.subr.bf16.mxu0 %v8589_v61  ;;  %v1278_v46 = vshll.u32 %v1188_v38, 16  ;;  %v1252_v48 = vrot.slane %v1251_v62, 4  ;;  %v1264_v58 = vrot.slane %v1262_v41, 5  ;;  %v1270_v59 = vrot.slane %v1268_v44, 5  ;;  %v748_v2 = vld [vmem:[#allocation3 + $0x80] sm:$0x1] }
  0x89   : > { %v1242_v43 = vrot.slane %v1241_v33, 4  ;;  %v1274_v60 = vrot.slane %v1272_v45, 4  ;;  %v4029_v0 = vrot.slane %v4027_v37, 4  ;;  %v749_v9 = vsel %vm8786_vm4, %v524_v57, %v748_v2  ;;  %v7083_v11 = vld [vmem:[#allocation3 + $0x7c] sm:$0xf]  ;;  %v8586_v44 = vld [vmem:[%s9764_s3 + $0x88] sm:$0xff]  }
  0x8a   : > { %8071 = vmatmul.mubr.bf16.gmra.mrb[12].mxu0 %v7142_v20  ;;  %v1280_v1 = vrot.slane %v1278_v46, 5  ;;  %v1265_v5 = vor.u32 %v1264_v58, %v1261_v52  ;;  %v575_v12 = vrot.slane %v9082_v55, 4  ;;  %v592_v13 = vrot.slane %v9098_v27, 4  ;;  %750 = vst [vmem:[#allocation3 + $0x80] sm:$0x1] %v749_v9  ;;  %v8588_v9 = vld [vmem:[%s9764_s3 + $0x90] sm:$0xff]  }
  0x8b   : > { %8103 = vmatpush3.bf16.msra.mxu0 %v8589_v61  ;;  %v8581_v53 = vld [vmem:[#allocation3 + $0xb4] sm:$0xff]   ;;  %v1247_v56 = vsel %vm8857_vm10, %v1242_v43, %v1246_v8  ;;  %v1257_v61 = vsel %vm8857_vm10, %v1252_v48, %v1256_v31  ;;  %v1275_v6 = vor.u32 %v1274_v60, %v1270_v59  ;;  %v4028_v16 = vsel %vm9008_vm13, %v7111_v50, %v4027_v37  ;;  %v1190_v22 = vld [vmem:[#allocation3 + $0x1c] sm:$0xf]  ;;  %v1191_v3 = vld [vmem:[#allocation3 + $0x20] sm:$0x1] }
  0x8c   : > { %8104 = vmatprep.subr.bf16.mxu0 %v8591_v24  ;;  %7847 = vmatmul.mubr.bf16.gmra.mrb[28].mxu1 %v8581_v53  ;;  %v6815_v4 = vcombine.low %v1247_v56, %v1257_v61  ;;  %v7081_v14 = vld [vmem:[#allocation3 + $0x74] sm:$0x1]  ;;  %v1266_v15 = vrot.slane %v1265_v5, 4  ;;  %v7112_v18 = vrot.slane %v7082_v10, 9  ;;  %v1189_v20 = vld [vmem:[#allocation3 + $0x18] sm:$0xf] }
  0x8d   : > { %v4030_v7 = vrot.slane %v7081_v14, 5  ;;  %v1276_v17 = vrot.slane %v1275_v6, 4  ;;  %v4034_v57 = vrot.slane %v7083_v11, 5  ;;  %v1283_v8 = vshrl.u32 %v1189_v20, 16  ;;  %v755_v31 = vld [vmem:[#allocation3 + $0x8c] sm:$0x1] }
  0x8e   : > { %7866 = vmatprep.mubr.bf16.mxu1 %v6815_v4  ;;  %v1286_v30 = vshll.u32 %v1189_v20, 16  ;;  %v7085_v32 = vld [vmem:[#allocation3 + $0x84] sm:$0xe]  ;;  %v1292_v36 = vshll.u32 %v1190_v22, 16  ;;  %v1296_v38 = vshrl.u32 %v1190_v22, 16  ;;  %v1302_v39 = vshll.u32 %v1191_v3, 16 }
  0x8f   : > { %8105 = vmatpush3.bf16.msra.mxu0 %v8591_v24  ;;  %v4031_v23 = vsel %vm9008_vm13, %v4029_v0, %v4030_v7  ;;  %v1271_v24 = vsel %vm8857_vm10, %v1266_v15, %v1270_v59  ;;  %v1281_v28 = vsel %vm8857_vm10, %v1276_v17, %v1280_v1  ;;  %v1285_v35 = vrot.slane %v1283_v8, 4  ;;  %v1192_v62 = vld [vmem:[#allocation3 + $0x24] sm:$0xf]  ;;  %v7086_v43 = vld [vmem:[#allocation3 + $0x88] sm:$0xf] }
  0x90   : > { %8138 = vmatprep.subr.bf16.mxu0 %v9139_v42  ;;  %v7143_v33 = vcombine.low %v4028_v16, %v4031_v23  ;;  %v6816_v34 = vcombine.low %v1271_v24, %v1281_v28  ;;  %v1288_v37 = vrot.slane %v1286_v30, 5  ;;  %v756_v41 = vsel %vm8786_vm4, %v541_v29, %v755_v31  ;;  %v1193_v50 = vld [vmem:[#allocation3 + $0x28] sm:$0xf]  ;;  %v1194_v29 = vld [vmem:[#allocation3 + $0x2c] sm:$0x1] }
  0x91   : > { %v4036_v45 = vrot.slane %v4034_v57, 4  ;;  %v1294_v46 = vrot.slane %v1292_v36, 5  ;;  %757 = vst [vmem:[#allocation3 + $0x8c] sm:$0x1] %v756_v41  ;;  %v7113_v48 = vrot.slane %v7085_v32, 9  ;;  %v1307_v52 = vshrl.u32 %v1192_v62, 16 }
  0x92   : > { %8074 = vmatprep.mubr.bf16.mxu0 %v7143_v33  ;;  %v7084_v53 = vld [vmem:[#allocation3 + $0x80] sm:$0x1]  ;;  %v4035_v54 = vsel %vm9008_vm13, %v7112_v18, %v4034_v57  ;;  %v1289_v56 = vor.u32 %v1288_v37, %v1285_v35  ;;  %v1298_v58 = vrot.slane %v1296_v38, 4  ;;  %v1310_v59 = vshll.u32 %v1192_v62, 16  ;;  %v762_v16 = vld [vmem:[#allocation3 + $0x98] sm:$0x1] }
  0x93   : > { %v4037_v60 = vrot.slane %v7084_v53, 5  ;;  %v1304_v61 = vrot.slane %v1302_v39, 5  ;;  %v4041_v0 = vrot.slane %v7086_v43, 5  ;;  %v1309_v1 = vrot.slane %v1307_v52, 4  ;;  %v7088_v7 = vld [vmem:[#allocation3 + $0x90] sm:$0xe] }
  0x94   : > { %7867 = vmatmul.mubr.bf16.vlgmr.msra.gmra.mrb[0].mxu1 %v6816_v34  ;;  %v1290_v2 = vrot.slane %v1289_v56, 4  ;;  %v1299_v4 = vor.u32 %v1298_v58, %v1294_v46  ;;  %v1312_v5 = vrot.slane %v1310_v59, 5  ;;  %v1316_v6 = vshll.u32 %v1193_v50, 16  ;;  %v7089_v57 = vld [vmem:[#allocation3 + $0x94] sm:$0xf]  ;;  %v8590_v33 = vld [vmem:[%s9764_s3 + $0x98] sm:$0xff]  }
  0x95   : > { %7899 = vmatpush3.bf16.msra.mxu1 %v8985_v63  ;;  %v4038_v10 = vsel %vm9008_vm13, %v4036_v45, %v4037_v60  ;;  %v4042_v11 = vsel %vm9008_vm13, %v7113_v48, %v4041_v0  ;;  %v1320_v14 = vshrl.u32 %v1193_v50, 16  ;;  %v1326_v63 = vshll.u32 %v1194_v29, 16  ;;  %v1196_v62 = vld [vmem:[#allocation3 + $0x34] sm:$0xf]  ;;  %v1197_v39 = vld [vmem:[#allocation3 + $0x38] sm:$0x1] }
  0x96   : > { %7900 = vmatprep.subr.bf16.mxu1 %v8586_v44  ;;  %v7144_v15 = vcombine.low %v4035_v54, %v4038_v10  ;;  %v1295_v17 = vsel %vm8857_vm10, %v1290_v2, %v1294_v46  ;;  %v1300_v18 = vrot.slane %v1299_v4, 4  ;;  %v1313_v20 = vor.u32 %v1312_v5, %v1309_v1  ;;  %v769_v43 = vld [vmem:[#allocation3 + $0xa4] sm:$0x1]  ;;  %v7092_v56 = vld [vmem:[#allocation3 + $0xa0] sm:$0xf] }
  0x97   : > { %v4043_v22 = vrot.slane %v4041_v0, 4  ;;  %v1318_v3 = vrot.slane %v1316_v6, 5  ;;  %v1322_v8 = vrot.slane %v1320_v14, 4  ;;  %v763_v23 = vsel %vm8786_vm4, %v558_v47, %v762_v16  ;;  %v1195_v47 = vld [vmem:[#allocation3 + $0x30] sm:$0xf]  ;;  %v8593_v58 = vld [vmem:[%s9764_s3 + $0xa0] sm:$0xff]  }
  0x98   : > { %8075 = vmatmul.mubr.bf16.gmra.mrb[16].mxu0 %v7144_v15  ;;  %v1305_v24 = vsel %vm8857_vm10, %v1300_v18, %v1304_v61  ;;  %v7087_v28 = vld [vmem:[#allocation3 + $0x8c] sm:$0x1]  ;;  %v1314_v30 = vrot.slane %v1313_v20, 4  ;;  %v1328_v31 = vrot.slane %v1326_v63, 5  ;;  %764 = vst [vmem:[#allocation3 + $0x98] sm:$0x1] %v763_v23  ;;  %v770_v61 = vsel %vm8786_vm4, %v575_v12, %v769_v43 }
  0x99   : > { %7901 = vmatpush3.bf16.msra.mxu1 %v8586_v44  ;;  %v4048_v32 = vrot.slane %v7089_v57, 5  ;;  %v6817_v34 = vcombine.low %v1295_v17, %v1305_v24  ;;  %v4044_v25 = vrot.slane %v7087_v28, 5  ;;  %v1323_v35 = vor.u32 %v1322_v8, %v1318_v3  ;;  %v1198_v0 = vld [vmem:[#allocation3 + $0x3c] sm:$0xf]  ;;  %v1199_v1 = vld [vmem:[#allocation3 + $0x40] sm:$0xf] }
  0x9a   : > { %7902 = vmatprep.subr.bf16.mxu1 %v8588_v9  ;;  %v7114_v36 = vrot.slane %v7088_v7, 9  ;;  %v1319_v37 = vsel %vm8857_vm10, %v1314_v30, %v1318_v3  ;;  %v1331_v41 = vshrl.u32 %v1195_v47, 16  ;;  %v1334_v46 = vshll.u32 %v1195_v47, 16  ;;  %771 = vst [vmem:[#allocation3 + $0xa4] sm:$0x1] %v770_v61  ;;  %v8597_v18 = vld [vmem:[%s9764_s3 + $0xa8] sm:$0xff]  }
  0x9b   : > { %v4050_v38 = vrot.slane %v4048_v32, 4  ;;  %7870 = vmatprep.mubr.bf16.mxu1 %v6817_v34  ;;  %v4045_v44 = vsel %vm9008_vm13, %v4043_v22, %v4044_v25  ;;  %v1324_v45 = vrot.slane %v1323_v35, 4  ;;  %v1340_v48 = vshll.u32 %v1196_v62, 16  ;;  %v1200_v10 = vld [vmem:[#allocation3 + $0x44] sm:$0x1]  ;;  %v8601_v35 = vld [vmem:[%s9764_s3 + $0xb0] sm:$0xff]  }
  0x9c   : > { %v7145_v50 = vcombine.low %v4042_v11, %v4045_v44  ;;  %v1333_v52 = vrot.slane %v1331_v41, 4  ;;  %v1344_v53 = vshrl.u32 %v1196_v62, 16  ;;  %v1350_v54 = vshll.u32 %v1197_v39, 16  ;;  %v776_v30 = vld [vmem:[#allocation3 + $0xb0] sm:$0x1] }
  0x9d   : > { %7903 = vmatpush3.bf16.msra.mxu1 %v8588_v9  ;;  %v1329_v29 = vsel %vm8857_vm10, %v1324_v45, %v1328_v31  ;;  %v1336_v59 = vrot.slane %v1334_v46, 5  ;;  %v1342_v60 = vrot.slane %v1340_v48, 5  ;;  %v4049_v4 = vsel %vm9008_vm13, %v7114_v36, %v4048_v32  ;;  %v7091_v9 = vld [vmem:[#allocation3 + $0x9c] sm:$0xe]  ;;  %v7095_v25 = vld [vmem:[#allocation3 + $0xac] sm:$0xf] }
  0x9e   : > { %7904 = vmatprep.subr.bf16.mxu1 %v8590_v33  ;;  %8078 = vmatprep.mubr.bf16.mxu0 %v7145_v50  ;;  %v6818_v2 = vcombine.low %v1319_v37, %v1329_v29  ;;  %v1346_v5 = vrot.slane %v1344_v53, 4  ;;  %v1352_v6 = vrot.slane %v1350_v54, 5  ;;  %v4055_v63 = vrot.slane %v7092_v56, 5  ;;  %v7094_v37 = vld [vmem:[#allocation3 + $0xa8] sm:$0xe] }
  0x9f   : > { %v7090_v11 = vld [vmem:[#allocation3 + $0x98] sm:$0x1]  ;;  %v1337_v14 = vor.u32 %v1336_v59, %v1333_v52  ;;  %v1355_v16 = vshrl.u32 %v1198_v0, 16  ;;  %v1358_v55 = vshll.u32 %v1198_v0, 16  ;;  %v1364_v15 = vshll.u32 %v1199_v1, 16 }
  0xa0   : > { %7871 = vmatmul.mubr.bf16.gmra.mrb[4].mxu1 %v6818_v2  ;;  %v4051_v12 = vrot.slane %v7090_v11, 5  ;;  %v1347_v7 = vor.u32 %v1346_v5, %v1342_v60  ;;  %v1368_v17 = vshrl.u32 %v1199_v1, 16  ;;  %v7115_v57 = vrot.slane %v7091_v9, 9  ;;  %v1201_v45 = vld [vmem:[#allocation3 + $0x48] sm:$0xf] }
  0xa1   : > { %7905 = vmatpush3.bf16.msra.mxu1 %v8590_v33  ;;  %v1338_v20 = vrot.slane %v1337_v14, 4  ;;  %v4057_v22 = vrot.slane %v4055_v63, 4  ;;  %v1357_v3 = vrot.slane %v1355_v16, 4  ;;  %v1360_v24 = vrot.slane %v1358_v55, 5  ;;  %v7093_v39 = vld [vmem:[#allocation3 + $0xa4] sm:$0x1] }
  0xa2   : > { %7906 = vmatprep.subr.bf16.mxu1 %v8593_v58  ;;  %v4052_v8 = vsel %vm9008_vm13, %v4050_v38, %v4051_v12  ;;  %v1348_v23 = vrot.slane %v1347_v7, 4  ;;  %v1366_v28 = vrot.slane %v1364_v15, 5  ;;  %v1370_v33 = vrot.slane %v1368_v17, 4  ;;  %v1202_v52 = vld [vmem:[#allocation3 + $0x4c] sm:$0xf] }
  0xa3   : > { %v7146_v31 = vcombine.low %v4049_v4, %v4052_v8  ;;  %v1343_v32 = vsel %vm8857_vm10, %v1338_v20, %v1342_v60  ;;  %v1374_v34 = vshll.u32 %v1200_v10, 16  ;;  %v1361_v47 = vor.u32 %v1360_v24, %v1357_v3  ;;  %v783_v0 = vld [vmem:[#allocation3 + $0xbc] sm:$0x1]  ;;  %v9228_v1 = vld [vmem:[#allocation3 + $0xb8] sm:$0xf] }
  0xa4   : > { %v1353_v36 = vsel %vm8857_vm10, %v1348_v23, %v1352_v6  ;;  %v777_v62 = vsel %vm8786_vm4, %v592_v13, %v776_v30  ;;  %v1371_v41 = vor.u32 %v1370_v33, %v1366_v28  ;;  %v4062_v44 = vrot.slane %v7095_v25, 5  ;;  %v8605_v13 = vld [vmem:[%s9764_s3 + $0xb8] sm:$0xff]   ;;  %v7097_v9 = vld [vmem:[#allocation3 + $0xb4] sm:$0xe]  ;;  %v9240_v23 = vld [vmem:[%s9764_s3 + $0xc0] sm:$0xff]  }
  0xa5   : > { %7907 = vmatpush3.bf16.msra.mxu1 %v8593_v58  ;;  %8079 = vmatmul.mubr.bf16.gmra.mrb[20].mxu0 %v7146_v31  ;;  %v6819_v38 = vcombine.low %v1343_v32, %v1353_v36  ;;  %v1376_v43 = vrot.slane %v1374_v34, 5  ;;  %778 = vst [vmem:[#allocation3 + $0xb0] sm:$0x1] %v777_v62  ;;  %v609_v46 = vrot.slane %v9114_v51, 4  ;;  %v4056_v48 = vsel %vm9008_vm13, %v7115_v57, %v4055_v63  ;;  %v1203_v58 = vld [vmem:[#allocation3 + $0x50] sm:$0x1] }
  0xa6   : > { %7908 = vmatprep.subr.bf16.mxu1 %v8597_v18  ;;  %v4058_v50 = vrot.slane %v7093_v39, 5  ;;  %v1362_v27 = vrot.slane %v1361_v47, 4  ;;  %v1372_v53 = vrot.slane %v1371_v41, 4  ;;  %v7116_v54 = vrot.slane %v7094_v37, 9  ;;  %v1204_v10 = vld [vmem:[#allocation3 + $0x54] sm:$0xf] }
  0xa7   : > { %7874 = vmatprep.mubr.bf16.mxu1 %v6819_v38  ;;  %v4064_v56 = vrot.slane %v4062_v44, 4  ;;  %v1379_v29 = vshrl.u32 %v1201_v45, 16  ;;  %v1382_v60 = vshll.u32 %v1201_v45, 16  ;;  %v1388_v61 = vshll.u32 %v1202_v52, 16  ;;  %v1205_v55 = vld [vmem:[#allocation3 + $0x58] sm:$0xf] }
  0xa8   : > { %v4059_v51 = vsel %vm9008_vm13, %v4057_v22, %v4058_v50  ;;  %v1367_v59 = vsel %vm8857_vm10, %v1362_v27, %v1366_v28  ;;  %v1377_v4 = vsel %vm8857_vm10, %v1372_v53, %v1376_v43  ;;  %v1392_v6 = vshrl.u32 %v1202_v52, 16  ;;  %v351_v38 = vld [vmem:[%s8779_s22 + $0x7c] sm:$0xf] }
  0xa9   : > { %7909 = vmatpush3.bf16.msra.mxu1 %v8597_v18  ;;  %v7147_v2 = vcombine.low %v4056_v48, %v4059_v51  ;;  %v1381_v5 = vrot.slane %v1379_v29, 4  ;;  %v6820_v11 = vcombine.low %v1367_v59, %v1377_v4  ;;  %v1384_v14 = vrot.slane %v1382_v60, 5  ;;  %v1206_v18 = vld [vmem:[#allocation3 + $0x5c] sm:$0x1] }
  0xaa   : > { %7910 = vmatprep.subr.bf16.mxu1 %v8601_v35  ;;  %v1390_v63 = vrot.slane %v1388_v61, 5  ;;  %v1398_v16 = vshll.u32 %v1203_v58, 16  ;;  %v4063_v12 = vsel %vm9008_vm13, %v7116_v54, %v4062_v44  ;;  %v1394_v7 = vrot.slane %v1392_v6, 4  ;;  %v790_v61 = vld [vmem:[#allocation3 + $0xc8] sm:$0x1] }
  0xab   : > { %8082 = vmatprep.mubr.bf16.mxu0 %v7147_v2  ;;  %v784_v15 = vsel %vm8786_vm4, %v609_v46, %v783_v0  ;;  %v4069_v17 = vrot.slane %v9228_v1, 5  ;;  %7875 = vmatmul.mubr.bf16.gmra.mrb[8].mxu1 %v6820_v11  ;;  %v1385_v57 = vor.u32 %v1384_v14, %v1381_v5  ;;  %v7117_v22 = vrot.slane %v7097_v9, 9  ;;  %v1208_v0 = vld [vmem:[#allocation3 + $0x64] sm:$0xf]  ;;  %v1209_v5 = vld [vmem:[#allocation3 + $0x68] sm:$0x1] }
  0xac   : > { %v7096_v20 = vld [vmem:[#allocation3 + $0xb0] sm:$0x1]  ;;  %785 = vst [vmem:[#allocation3 + $0xbc] sm:$0x1] %v784_v15  ;;  %v1403_v3 = vshrl.u32 %v1204_v10, 16  ;;  %v1406_v8 = vshll.u32 %v1204_v10, 16  ;;  %v1395_v28 = vor.u32 %v1394_v7, %v1390_v63 }
  0xad   : > { %7911 = vmatpush3.bf16.msra.mxu1 %v8601_v35  ;;  %v4065_v24 = vrot.slane %v7096_v20, 5  ;;  %v1400_v30 = vrot.slane %v1398_v16, 5  ;;  %v4071_v31 = vrot.slane %v4069_v17, 4  ;;  %v1386_v32 = vrot.slane %v1385_v57, 4  ;;  %v350_v35 = vld [vmem:[%s8779_s22 + $0x78] sm:$0xf]  ;;  %s9726_s22 = scalar_lea.vmem %s9765_s4, %s7457_s11 }
  0xae   : > { %7912 = vmatprep.subr.bf16.mxu1 %v8605_v13  ;;  %v1405_v33 = vrot.slane %v1403_v3, 4  ;;  %v1408_v34 = vrot.slane %v1406_v8, 5  ;;  %v1412_v25 = vshll.u32 %v1205_v55, 16  ;;  %v1396_v47 = vrot.slane %v1395_v28, 4  ;;  %v1210_v7 = vld [vmem:[#allocation3 + $0x6c] sm:$0xf] }
  0xaf   : > { %v4066_v36 = vsel %vm9008_vm13, %v4064_v56, %v4065_v24  ;;  %v1416_v62 = vshrl.u32 %v1205_v55, 16  ;;  %v1422_v37 = vshll.u32 %v1206_v18, 16  ;;  %v1391_v41 = vsel %vm8857_vm10, %v1386_v32, %v1390_v63  ;;  %v1207_v56 = vld [vmem:[#allocation3 + $0x60] sm:$0xf]  ;;  %v1211_v57 = vld [vmem:[#allocation3 + $0x70] sm:$0xf] }
  0xb0   : > { %v7148_v39 = vcombine.low %v4063_v12, %v4066_v36  ;;  %v1409_v43 = vor.u32 %v1408_v34, %v1405_v33  ;;  %v1414_v44 = vrot.slane %v1412_v25, 5  ;;  %v1401_v45 = vsel %vm8857_vm10, %v1396_v47, %v1400_v30 }
  0xb1   : > { %7913 = vmatpush3.bf16.msra.mxu1 %v8605_v13  ;;  %v1418_v46 = vrot.slane %v1416_v62, 4  ;;  %v1424_v48 = vrot.slane %v1422_v37, 5  ;;  %v611_v50 = vshrl.u32 %v350_v35, 16  ;;  %v6821_v27 = vcombine.low %v1391_v41, %v1401_v45  ;;  %v786_v13 = vld [vmem:[#allocation3 + $0xc0] sm:$0xf] }
  0xb2   : > { %7946 = vmatprep.subr.bf16.mxu1 %v9240_v23  ;;  %8083 = vmatmul.mubr.bf16.gmra.mrb[24].mxu0 %v7148_v39  ;;  %v1410_v52 = vrot.slane %v1409_v43, 4  ;;  %v614_v53 = vshll.u32 %v350_v35, 16  ;;  %v619_v54 = vshrl.u32 %v351_v38, 16  ;;  %v4070_v29 = vsel %vm9008_vm13, %v7117_v22, %v4069_v17  ;;  %v1212_v22 = vld [vmem:[#allocation3 + $0x74] sm:$0x1] }
  0xb3   : > { %v7099_v58 = vld [vmem:[#allocation3 + $0xbc] sm:$0x1]  ;;  %v1419_v51 = vor.u32 %v1418_v46, %v1414_v44  ;;  %v613_v59 = vrot.slane %v611_v50, 7  ;;  %v622_v60 = vshll.u32 %v351_v38, 16  ;;  %7878 = vmatprep.mubr.bf16.mxu1 %v6821_v27  ;;  %v1427_v6 = vshrl.u32 %v1207_v56, 16 }
  0xb4   : > { %v4072_v1 = vrot.slane %v7099_v58, 5  ;;  %v1415_v2 = vsel %vm8857_vm10, %v1410_v52, %v1414_v44  ;;  %v621_v4 = vrot.slane %v619_v54, 7  ;;  %v1430_v14 = vshll.u32 %v1207_v56, 16  ;;  %v1213_v44 = vld [vmem:[#allocation3 + $0x78] sm:$0xf] }
  0xb5   : > { %v1420_v9 = vrot.slane %v1419_v51, 4  ;;  %v616_v10 = vor.u32 %v614_v53, %v613_v59  ;;  %v617_v11 = vrot.slane %v613_v59, 4  ;;  %v1429_v12 = vrot.slane %v1427_v6, 4  ;;  %v1214_v45 = vld [vmem:[#allocation3 + $0x7c] sm:$0xf] }
  0xb6   : > { %v4073_v63 = vsel %vm9008_vm13, %v4071_v31, %v4072_v1  ;;  %v624_v16 = vor.u32 %v622_v60, %v621_v4  ;;  %v626_v55 = vrot.slane %v621_v4, 4  ;;  %v1432_v20 = vrot.slane %v1430_v14, 5 }
  0xb7   : > { %v7149_v15 = vcombine.low %v4070_v29, %v4073_v63  ;;  %v1425_v17 = vsel %vm8857_vm10, %v1420_v9, %v1424_v48  ;;  %v787_v18 = vsel %vm8801_vm7, %v616_v10, %v786_v13  ;;  %v1436_v28 = vshll.u32 %v1208_v0, 16  ;;  %v1216_v10 = vld [vmem:[#allocation3 + $0x84] sm:$0xf] }
  0xb8   : > { %v6822_v3 = vcombine.low %v1415_v2, %v1425_v17  ;;  %v625_v8 = vsel %vm8793_vm5, %v617_v11, %v624_v16  ;;  %788 = vst [vmem:[#allocation3 + $0xc0] sm:$0xf] %v787_v18  ;;  %v791_v24 = vsel %vm8786_vm4, %v626_v55, %v790_v61  ;;  %v1433_v30 = vor.u32 %v1432_v20, %v1429_v12  ;;  %v1215_v2 = vld [vmem:[#allocation3 + $0x80] sm:$0x1]  ;;  %v1217_v11 = vld [vmem:[#allocation3 + $0x88] sm:$0xf] }
  0xb9   : > { %8086 = vmatprep.mubr.bf16.mxu0 %v7149_v15  ;;  %789 = vst [vmem:[#allocation3 + $0xc4] sm:$0xf] %v625_v8  ;;  %792 = vst [vmem:[#allocation3 + $0xc8] sm:$0x1] %v791_v24  ;;  %v1440_v31 = vshrl.u32 %v1208_v0, 16  ;;  %v1446_v32 = vshll.u32 %v1209_v5, 16 }
  0xba   : > { %v1451_v26 = vshrl.u32 %v1210_v7, 16  ;;  %7879 = vmatmul.mubr.bf16.gmra.mrb[12].mxu1 %v6822_v3  ;;  %v1438_v33 = vrot.slane %v1436_v28, 5  ;;  %v1454_v34 = vshll.u32 %v1210_v7, 16  ;;  %v1460_v25 = vshll.u32 %v1211_v57, 16  ;;  %v1218_v12 = vld [vmem:[#allocation3 + $0x8c] sm:$0x1] }
  0xbb   : > { %v1464_v35 = vshrl.u32 %v1211_v57, 16  ;;  %v1434_v36 = vrot.slane %v1433_v30, 4  ;;  %v1442_v21 = vrot.slane %v1440_v31, 4  ;;  %v1470_v38 = vshll.u32 %v1212_v22, 16  ;;  %v8592_v57 = vld [vmem:[#allocation3 + $0x18] sm:$0xff]  }
  0xbc   : > { %v1453_v47 = vrot.slane %v1451_v26, 4  ;;  %v1456_v62 = vrot.slane %v1454_v34, 5  ;;  %v1462_v37 = vrot.slane %v1460_v25, 5  ;;  %v1448_v43 = vrot.slane %v1446_v32, 5  ;;  %v1219_v32 = vld [vmem:[#allocation3 + $0x90] sm:$0xf] }
  0xbd   : > { %v1466_v19 = vrot.slane %v1464_v35, 4  ;;  %v1439_v39 = vsel %vm8857_vm10, %v1434_v36, %v1438_v33  ;;  %v1443_v41 = vor.u32 %v1442_v21, %v1438_v33  ;;  %v1472_v50 = vrot.slane %v1470_v38, 5  ;;  %v1220_v35 = vld [vmem:[#allocation3 + $0x94] sm:$0xf] }
  0xbe   : > { %v1457_v46 = vor.u32 %v1456_v62, %v1453_v47  ;;  %v1475_v27 = vshrl.u32 %v1213_v44, 16  ;;  %v1478_v54 = vshll.u32 %v1213_v44, 16  ;;  %v1484_v13 = vshll.u32 %v1214_v45, 16  ;;  %v1221_v62 = vld [vmem:[#allocation3 + $0x98] sm:$0x1] }
  0xbf   : > { %v1467_v48 = vor.u32 %v1466_v19, %v1462_v37  ;;  %v7100_v52 = vld [vmem:[#allocation3 + $0xc0] sm:$0xe]  ;;  %v1444_v53 = vrot.slane %v1443_v41, 4  ;;  %v1488_v56 = vshrl.u32 %v1214_v45, 16  ;;  %v1494_v18 = vshll.u32 %v1215_v2, 16 }
  0xc0   : > { %v7101_v58 = vld [vmem:[#allocation3 + $0xc4] sm:$0xf]  ;;  %v7102_v29 = vld [vmem:[#allocation3 + $0xc8] sm:$0x1]  ;;  %v7118_v51 = vrot.slane %v7100_v52, 9  ;;  %v1458_v59 = vrot.slane %v1457_v46, 4 }
  0xc1   : > { %v4076_v60 = vrot.slane %v7101_v58, 5  ;;  %v4079_v61 = vrot.slane %v7102_v29, 5  ;;  %v1449_v0 = vsel %vm8857_vm10, %v1444_v53, %v1448_v43  ;;  %v1468_v1 = vrot.slane %v1467_v48, 4  ;;  %v8594_v43 = vld [vmem:[#allocation3 + $0x24] sm:$0xff]  }
  0xc2   : > { %v6823_v4 = vcombine.low %v1439_v39, %v1449_v0  ;;  %v1463_v5 = vsel %vm8857_vm10, %v1458_v59, %v1462_v37  ;;  %v1477_v6 = vrot.slane %v1475_v27, 4  ;;  %v1480_v9 = vrot.slane %v1478_v54, 5  ;;  %v8596_v27 = vld [vmem:[#allocation3 + $0x30] sm:$0xff]   ;;  %v1224_v59 = vld [vmem:[#allocation3 + $0xa4] sm:$0x1] }
  0xc3   : > { %v4077_v14 = vsel %vm9008_vm13, %v7118_v51, %v4076_v60  ;;  %v4078_v63 = vrot.slane %v4076_v60, 4  ;;  %v1473_v16 = vsel %vm8857_vm10, %v1468_v1, %v1472_v50  ;;  %v1486_v55 = vrot.slane %v1484_v13, 5  ;;  %v1222_v13 = vld [vmem:[#allocation3 + $0x9c] sm:$0xf] }
  0xc4   : > { %7882 = vmatprep.mubr.bf16.mxu1 %v6823_v4  ;;  %v6824_v7 = vcombine.low %v1463_v5, %v1473_v16  ;;  %v1481_v15 = vor.u32 %v1480_v9, %v1477_v6  ;;  %v1490_v17 = vrot.slane %v1488_v56, 4  ;;  %v1499_v22 = vshrl.u32 %v1216_v10, 16  ;;  %v1223_v56 = vld [vmem:[#allocation3 + $0xa0] sm:$0xf]  ;;  %v8599_v4 = vld [vmem:[%s9764_s3 + $0x1c8] sm:$0xff]  }
  0xc5   : > { %v4080_v20 = vsel %vm9008_vm13, %v4078_v63, %v4079_v61  ;;  %v1502_v3 = vshll.u32 %v1216_v10, 16  ;;  %v1508_v8 = vshll.u32 %v1217_v11, 16  ;;  %v1496_v31 = vrot.slane %v1494_v18, 5 }
  0xc6   : > { %v7150_v24 = vcombine.low %v4077_v14, %v4080_v20  ;;  %7883 = vmatmul.mubr.bf16.gmra.mrb[16].mxu1 %v6824_v7  ;;  %v1482_v28 = vrot.slane %v1481_v15, 4  ;;  %v1491_v30 = vor.u32 %v1490_v17, %v1486_v55  ;;  %v1501_v26 = vrot.slane %v1499_v22, 4  ;;  %v1225_v22 = vld [vmem:[#allocation3 + $0xa8] sm:$0xf] }
  0xc7   : > { %v1504_v33 = vrot.slane %v1502_v3, 5  ;;  %v1510_v34 = vrot.slane %v1508_v8, 5  ;;  %v1512_v25 = vshrl.u32 %v1217_v11, 16  ;;  %v1518_v47 = vshll.u32 %v1218_v12, 16  ;;  %v8598_v3 = vld [vmem:[#allocation3 + $0x3c] sm:$0xff]  }
  0xc8   : > { %8087 = vmatmul.mubr.bf16.gmra.mrb[28].mxu0 %v7150_v24  ;;  %v1487_v36 = vsel %vm8857_vm10, %v1482_v28, %v1486_v55  ;;  %v1492_v21 = vrot.slane %v1491_v30, 4  ;;  %v1523_v37 = vshrl.u32 %v1219_v32, 16  ;;  %v1526_v39 = vshll.u32 %v1219_v32, 16  ;;  %v1226_v28 = vld [vmem:[#allocation3 + $0xac] sm:$0xf] }
  0xc9   : > { %8106 = vmatprep.mubr.bf16.mxu0 %v8592_v57  ;;  %v1505_v19 = vor.u32 %v1504_v33, %v1501_v26  ;;  %v1514_v38 = vrot.slane %v1512_v25, 4  ;;  %v1532_v41 = vshll.u32 %v1220_v35, 16  ;;  %v1520_v45 = vrot.slane %v1518_v47, 5  ;;  %v8603_v57 = vld [vmem:[%s9764_s3 + $0x1d0] sm:$0xff]   ;;  %v8600_v32 = vld [vmem:[#allocation3 + $0x48] sm:$0xff]  }
  0xca   : > { %v1497_v44 = vsel %vm8857_vm10, %v1492_v21, %v1496_v31  ;;  %v1525_v46 = vrot.slane %v1523_v37, 4  ;;  %v1536_v48 = vshrl.u32 %v1220_v35, 16  ;;  %v1528_v54 = vrot.slane %v1526_v39, 5  ;;  %v1228_v47 = vld [vmem:[#allocation3 + $0xb4] sm:$0xf] }
  0xcb   : > { %v6825_v50 = vcombine.low %v1487_v36, %v1497_v44  ;;  %v1506_v52 = vrot.slane %v1505_v19, 4  ;;  %v1515_v53 = vor.u32 %v1514_v38, %v1510_v34  ;;  %v1534_v58 = vrot.slane %v1532_v41, 5  ;;  %v1229_v39 = vld [vmem:[#allocation3 + $0xb8] sm:$0xf]  ;;  %v1230_v41 = vld [vmem:[#allocation3 + $0xbc] sm:$0x1] }
  0xcc   : > { %v1538_v29 = vrot.slane %v1536_v48, 4  ;;  %v1542_v51 = vshll.u32 %v1221_v62, 16  ;;  %v1547_v60 = vshrl.u32 %v1222_v13, 16  ;;  %v1529_v1 = vor.u32 %v1528_v54, %v1525_v46  ;;  %v8607_v62 = vld [vmem:[%s9764_s3 + $0x1d8] sm:$0xff]  }
  0xcd   : > { %7886 = vmatprep.mubr.bf16.mxu1 %v6825_v50  ;;  %v1511_v61 = vsel %vm8857_vm10, %v1506_v52, %v1510_v34  ;;  %v1516_v0 = vrot.slane %v1515_v53, 4  ;;  %v1550_v2 = vshll.u32 %v1222_v13, 16  ;;  %v1556_v10 = vshll.u32 %v1223_v56, 16 }
  0xce   : > { %v1539_v5 = vor.u32 %v1538_v29, %v1534_v58  ;;  %v1544_v6 = vrot.slane %v1542_v51, 5  ;;  %v1549_v9 = vrot.slane %v1547_v60, 4  ;;  %v1530_v14 = vrot.slane %v1529_v1, 4 }
  0xcf   : > { %v1521_v11 = vsel %vm8857_vm10, %v1516_v0, %v1520_v45  ;;  %v1552_v63 = vrot.slane %v1550_v2, 5  ;;  %v1560_v16 = vshrl.u32 %v1223_v56, 16  ;;  %v1558_v7 = vrot.slane %v1556_v10, 5  ;;  %v2004_v2 = vld [vmem:[#allocation3] sm:$0xe] }
  0xd0   : > { %8107 = vmatmul.mubr.bf16.vlgmr.msra.gmra.mrb[0].mxu0 %v8594_v43  ;;  %v6826_v55 = vcombine.low %v1511_v61, %v1521_v11  ;;  %v1540_v12 = vrot.slane %v1539_v5, 4  ;;  %v1566_v15 = vshll.u32 %v1224_v59, 16  ;;  %v1535_v17 = vsel %vm8857_vm10, %v1530_v14, %v1534_v58  ;;  %v8611_v58 = vld [vmem:[%s9764_s3 + $0x1e0] sm:$0xff]   ;;  %v8602_v61 = vld [vmem:[#allocation3 + $0x54] sm:$0xff]   ;;  %v2006_v10 = vld [vmem:[#allocation3 + $0x8] sm:$0x1] }
  0xd1   : > { %8139 = vmatpush3.bf16.msra.mxu0 %v9139_v42  ;;  %8110 = vmatprep.mubr.bf16.mxu0 %v8596_v27  ;;  %v1553_v18 = vor.u32 %v1552_v63, %v1549_v9  ;;  %v1562_v20 = vrot.slane %v1560_v16, 4  ;;  %v1227_v42 = vld [vmem:[#allocation3 + $0xb0] sm:$0x1]  ;;  %v1571_v30 = vshrl.u32 %v1225_v22, 16  ;;  %v1574_v34 = vshll.u32 %v1225_v22, 16 }
  0xd2   : > { %7887 = vmatmul.mubr.bf16.gmra.mrb[20].mxu1 %v6826_v55  ;;  %8140 = vmatprep.subr.bf16.mxu0 %v8599_v4  ;;  %v1545_v8 = vsel %vm8857_vm10, %v1540_v12, %v1544_v6  ;;  %v1568_v24 = vrot.slane %v1566_v15, 5  ;;  %v1580_v35 = vshll.u32 %v1226_v28, 16  ;;  %v1584_v36 = vshrl.u32 %v1226_v28, 16  ;;  %v2007_v12 = vld [vmem:[#allocation3 + $0xc] sm:$0xe]  ;;  %v8604_v15 = vld [vmem:[#allocation3 + $0x60] sm:$0xff]  }
  0xd3   : > { %v6827_v31 = vcombine.low %v1535_v17, %v1545_v8  ;;  %v1554_v26 = vrot.slane %v1553_v18, 4  ;;  %v1563_v33 = vor.u32 %v1562_v20, %v1558_v7  ;;  %v1573_v25 = vrot.slane %v1571_v30, 4  ;;  %v2008_v18 = vld [vmem:[#allocation3 + $0x10] sm:$0xf]  ;;  %v2009_v20 = vld [vmem:[#allocation3 + $0x14] sm:$0x1] }
  0xd4   : > { %v1590_v21 = vshll.u32 %v1227_v42, 16  ;;  %v1576_v38 = vrot.slane %v1574_v34, 5  ;;  %v1582_v43 = vrot.slane %v1580_v35, 5  ;;  %v1586_v44 = vrot.slane %v1584_v36, 4  ;;  %v2010_v35 = vld [vmem:[#allocation3 + $0x18] sm:$0xe] }
  0xd5   : > { %8141 = vmatpush3.bf16.msra.mxu0 %v8599_v4  ;;  %7890 = vmatprep.mubr.bf16.mxu1 %v6827_v31  ;;  %v1559_v37 = vsel %vm8857_vm10, %v1554_v26, %v1558_v7  ;;  %v1564_v19 = vrot.slane %v1563_v33, 4  ;;  %v1595_v46 = vshrl.u32 %v1228_v47, 16  ;;  %v1598_v27 = vshll.u32 %v1228_v47, 16  ;;  %v2005_v4 = vld [vmem:[#allocation3 + $0x4] sm:$0xf]  ;;  %v8619_v33 = vld [vmem:[%s9764_s3 + $0x1f0] sm:$0xff]  }
  0xd6   : > { %8142 = vmatprep.subr.bf16.mxu0 %v8603_v57  ;;  %v1592_v45 = vrot.slane %v1590_v21, 5  ;;  %v1577_v50 = vor.u32 %v1576_v38, %v1573_v25  ;;  %v1604_v52 = vshll.u32 %v1229_v39, 16  ;;  %v1587_v54 = vor.u32 %v1586_v44, %v1582_v43  ;;  %v2011_v36 = vld [vmem:[#allocation3 + $0x1c] sm:$0xf]  ;;  %v2012_v21 = vld [vmem:[#allocation3 + $0x20] sm:$0x1] }
  0xd7   : > { %v1569_v48 = vsel %vm8857_vm10, %v1564_v19, %v1568_v24  ;;  %v1597_v13 = vrot.slane %v1595_v46, 4  ;;  %v1608_v56 = vshrl.u32 %v1229_v39, 16  ;;  %v1600_v51 = vrot.slane %v1598_v27, 5  ;;  %v8615_v24 = vld [vmem:[%s9764_s3 + $0x1e8] sm:$0xff]   ;;  %v2013_v38 = vld [vmem:[#allocation3 + $0x24] sm:$0xe] }
  0xd8   : > { %8111 = vmatmul.mubr.bf16.gmra.mrb[4].mxu0 %v8598_v3  ;;  %v6828_v53 = vcombine.low %v1559_v37, %v1569_v48  ;;  %v1578_v29 = vrot.slane %v1577_v50, 4  ;;  %v1606_v59 = vrot.slane %v1604_v52, 5  ;;  %v1614_v60 = vshll.u32 %v1230_v41, 16  ;;  %v8606_v37 = vld [vmem:[#allocation3 + $0x6c] sm:$0xff]   ;;  %v8608_v39 = vld [vmem:[#allocation3 + $0x78] sm:$0xff]  }
  0xd9   : > { %8114 = vmatprep.mubr.bf16.mxu0 %v8600_v32  ;;  %8143 = vmatpush3.bf16.msra.mxu0 %v8603_v57  ;;  %v1588_v0 = vrot.slane %v1587_v54, 4  ;;  %v1610_v1 = vrot.slane %v1608_v56, 4  ;;  %v1601_v6 = vor.u32 %v1600_v51, %v1597_v13  ;;  %v6839_v11 = vrot.slane %v2004_v2, 9  ;;  %v2015_v46 = vld [vmem:[#allocation3 + $0x2c] sm:$0x1]  ;;  %v8623_v27 = vld [vmem:[%s9764_s3 + $0x1f8] sm:$0xff]  }
  0xda   : > { %7891 = vmatmul.mubr.bf16.gmra.mrb[24].mxu1 %v6828_v53  ;;  %8144 = vmatprep.subr.bf16.mxu0 %v8607_v62  ;;  %v1583_v5 = vsel %vm8857_vm10, %v1578_v29, %v1582_v43  ;;  %v1616_v9 = vrot.slane %v1614_v60, 5  ;;  %v2105_v16 = vrot.slane %v2005_v4, 5  ;;  %v2108_v55 = vrot.slane %v2006_v10, 5  ;;  %v8613_v56 = vld [vmem:[%s9764_s3 + $0xc8] sm:$0xff]   ;;  %v2018_v60 = vld [vmem:[#allocation3 + $0x38] sm:$0x1] }
  0xdb   : > { %v1593_v14 = vsel %vm8857_vm10, %v1588_v0, %v1592_v45  ;;  %v1611_v63 = vor.u32 %v1610_v1, %v1606_v59  ;;  %v1602_v17 = vrot.slane %v1601_v6, 4  ;;  %v2112_v8 = vrot.slane %v2008_v18, 5  ;;  %v2014_v45 = vld [vmem:[#allocation3 + $0x28] sm:$0xf]  ;;  %v9341_v0 = vld [vmem:[%s9764_s3 + $0x200] sm:$0xff]   ;;  %v8612_v10 = vld [vmem:[#allocation3 + $0x90] sm:$0xff]  }
  0xdc   : > { %v6829_v7 = vcombine.low %v1583_v5, %v1593_v14  ;;  %v2106_v22 = vsel %vm9008_vm13, %v6839_v11, %v2105_v16  ;;  %v2107_v3 = vrot.slane %v2105_v16, 4  ;;  %v6840_v42 = vrot.slane %v2007_v12, 9  ;;  %v2019_v4 = vld [vmem:[#allocation3 + $0x3c] sm:$0xe]  ;;  %v2020_v5 = vld [vmem:[#allocation3 + $0x40] sm:$0xf] }
  0xdd   : > { %8145 = vmatpush3.bf16.msra.mxu0 %v8607_v62  ;;  %v1612_v57 = vrot.slane %v1611_v63, 4  ;;  %v1607_v28 = vsel %vm8857_vm10, %v1602_v17, %v1606_v59  ;;  %v2114_v32 = vrot.slane %v2112_v8, 4  ;;  %v2115_v26 = vrot.slane %v2009_v20, 5  ;;  %v2017_v59 = vld [vmem:[#allocation3 + $0x34] sm:$0xf] }
  0xde   : > { %8146 = vmatprep.subr.bf16.mxu0 %v8611_v58  ;;  %7894 = vmatprep.mubr.bf16.mxu1 %v6829_v7  ;;  %v2109_v31 = vsel %vm9008_vm13, %v2107_v3, %v2108_v55  ;;  %v6841_v47 = vrot.slane %v2010_v35, 9  ;;  %v2119_v62 = vrot.slane %v2011_v36, 5  ;;  %v2122_v19 = vrot.slane %v2012_v21, 5  ;;  %v2021_v6 = vld [vmem:[#allocation3 + $0x44] sm:$0x1]  ;;  %v8617_v12 = vld [vmem:[%s9764_s3 + $0xd0] sm:$0xff]  }
  0xdf   : > { %v1617_v30 = vsel %vm8857_vm10, %v1612_v57, %v1616_v9  ;;  %v6871_v25 = vcombine.low %v2106_v22, %v2109_v31  ;;  %v2113_v41 = vsel %vm9008_vm13, %v6840_v42, %v2112_v8  ;;  %v2116_v43 = vsel %vm9008_vm13, %v2114_v32, %v2115_v26  ;;  %v8610_v9 = vld [vmem:[#allocation3 + $0x84] sm:$0xff]   ;;  %v2023_v20 = vld [vmem:[#allocation3 + $0x4c] sm:$0xf]  ;;  %v2024_v22 = vld [vmem:[#allocation3 + $0x50] sm:$0x1] }
  0xe0   : > { %8115 = vmatmul.mubr.bf16.gmra.mrb[8].mxu0 %v8602_v61  ;;  %v6830_v34 = vcombine.low %v1607_v28, %v1617_v30  ;;  %v2121_v44 = vrot.slane %v2119_v62, 4  ;;  %v2120_v48 = vsel %vm9008_vm13, %v6841_v47, %v2119_v62  ;;  %v2126_v50 = vrot.slane %v2014_v45, 5  ;;  %v2022_v18 = vld [vmem:[#allocation3 + $0x48] sm:$0xe]  ;;  %v8621_v8 = vld [vmem:[%s9764_s3 + $0xd8] sm:$0xff]  }
  0xe1   : > { %8118 = vmatprep.mubr.bf16.mxu0 %v8604_v15  ;;  %8147 = vmatpush3.bf16.msra.mxu0 %v8611_v58  ;;  %v6872_v53 = vcombine.low %v2113_v41, %v2116_v43  ;;  %v6842_v54 = vrot.slane %v2013_v38, 9  ;;  %v2129_v13 = vrot.slane %v2015_v46, 5  ;;  %v2016_v58 = vld [vmem:[#allocation3 + $0x30] sm:$0xe]  ;;  %v2133_v1 = vrot.slane %v2017_v59, 5  ;;  %v8616_v47 = vld [vmem:[#allocation3 + $0xa8] sm:$0xff]  }
  0xe2   : > { %8148 = vmatprep.subr.bf16.mxu0 %v8615_v24  ;;  %7895 = vmatmul.mubr.bf16.gmra.mrb[28].mxu1 %v6830_v34  ;;  %v2123_v52 = vsel %vm9008_vm13, %v2121_v44, %v2122_v19  ;;  %v2128_v51 = vrot.slane %v2126_v50, 4  ;;  %v6843_v61 = vrot.slane %v2016_v58, 9  ;;  %v2136_v2 = vrot.slane %v2018_v60, 5  ;;  %v2025_v30 = vld [vmem:[#allocation3 + $0x54] sm:$0xe]  ;;  %v8614_v34 = vld [vmem:[#allocation3 + $0x9c] sm:$0xff]  }
  0xe3   : > { %7914 = vmatprep.mubr.bf16.mxu1 %v6871_v25  ;;  %v6873_v29 = vcombine.low %v2120_v48, %v2123_v52  ;;  %v2135_v11 = vrot.slane %v2133_v1, 4  ;;  %v2140_v14 = vrot.slane %v2020_v5, 5  ;;  %v2127_v63 = vsel %vm9008_vm13, %v6842_v54, %v2126_v50  ;;  %v2026_v32 = vld [vmem:[#allocation3 + $0x58] sm:$0xf]  ;;  %v2027_v26 = vld [vmem:[#allocation3 + $0x5c] sm:$0x1] }
  0xe4   : > { %v2130_v16 = vsel %vm9008_vm13, %v2128_v51, %v2129_v13  ;;  %v6844_v55 = vrot.slane %v2019_v4, 9  ;;  %v2134_v7 = vsel %vm9008_vm13, %v6843_v61, %v2133_v1  ;;  %v2143_v17 = vrot.slane %v2021_v6, 5  ;;  %v2029_v41 = vld [vmem:[#allocation3 + $0x64] sm:$0xf]  ;;  %v2030_v43 = vld [vmem:[#allocation3 + $0x68] sm:$0x1] }
  0xe5   : > { %8149 = vmatpush3.bf16.msra.mxu0 %v8615_v24  ;;  %v2137_v15 = vsel %vm9008_vm13, %v2135_v11, %v2136_v2  ;;  %v6874_v57 = vcombine.low %v2127_v63, %v2130_v16  ;;  %v2147_v3 = vrot.slane %v2023_v20, 5  ;;  %v6845_v28 = vrot.slane %v2022_v18, 9  ;;  %v8624_v44 = vld [vmem:[%s9764_s3 + $0xe0] sm:$0xff]   ;;  %v7232_v52 = vld [vmem:[#allocation3 + $0x1c] sm:$0xf]  ;;  %v8626_v1 = vld [vmem:[%s9764_s3 + $0xe8] sm:$0xff]  }
  0xe6   : > { %8150 = vmatprep.subr.bf16.mxu0 %v8619_v33  ;;  %v6875_v24 = vcombine.low %v2134_v7, %v2137_v15  ;;  %v2150_v42 = vrot.slane %v2024_v22, 5  ;;  %v2141_v25 = vsel %vm9008_vm13, %v6844_v55, %v2140_v14  ;;  %v2154_v36 = vrot.slane %v2026_v32, 5  ;;  %v7233_v54 = vld [vmem:[#allocation3 + $0x20] sm:$0x1]  ;;  %v2031_v61 = vld [vmem:[#allocation3 + $0x6c] sm:$0xe] }
  0xe7   : > { %v2149_v31 = vrot.slane %v2147_v3, 4  ;;  %v2157_v21 = vrot.slane %v2027_v26, 5  ;;  %v2148_v38 = vsel %vm9008_vm13, %v6845_v28, %v2147_v3  ;;  %v2161_v50 = vrot.slane %v2029_v41, 5  ;;  %v2032_v6 = vld [vmem:[#allocation3 + $0x70] sm:$0xf]  ;;  %v8620_v55 = vld [vmem:[#allocation3 + $0xc0] sm:$0xff]  }
  0xe8   : > { %8119 = vmatmul.mubr.bf16.gmra.mrb[12].mxu0 %v8606_v37  ;;  %v2156_v62 = vrot.slane %v2154_v36, 4  ;;  %v2028_v37 = vld [vmem:[#allocation3 + $0x60] sm:$0xe]  ;;  %v4979_v58 = vshll.u32 %v7232_v52, 16  ;;  %v4983_v59 = vshrl.u32 %v7232_v52, 16  ;;  %v4989_v60 = vshll.u32 %v7233_v54, 16 }
  0xe9   : > { %8122 = vmatprep.mubr.bf16.mxu0 %v8608_v39  ;;  %8151 = vmatpush3.bf16.msra.mxu0 %v8619_v33  ;;  %v6846_v33 = vrot.slane %v2025_v30, 9  ;;  %v2151_v39 = vsel %vm9008_vm13, %v2149_v31, %v2150_v42  ;;  %v6847_v48 = vrot.slane %v2028_v37, 9  ;;  %v2163_v51 = vrot.slane %v2161_v50, 4  ;;  %v2033_v63 = vld [vmem:[#allocation3 + $0x74] sm:$0x1]  ;;  %v8630_v41 = vld [vmem:[%s9764_s3 + $0xf8] sm:$0xff]  }
  0xea   : > { %8152 = vmatprep.subr.bf16.mxu0 %v8623_v27  ;;  %7915 = vmatmul.mubr.bf16.vlgmr.msra.gmra.mrb[0].mxu1 %v6872_v53  ;;  %v9376_v46 = vsel %vm9008_vm13, %v2156_v62, %v2157_v21  ;;  %v2164_v53 = vrot.slane %v2030_v43, 5  ;;  %v4981_v5 = vrot.slane %v4979_v58, 5  ;;  %v2168_v16 = vrot.slane %v2032_v6, 5  ;;  %v7234_v3 = vld [vmem:[#allocation3 + $0x24] sm:$0xf]  ;;  %v8622_v58 = vld [vmem:[#allocation3 + $0xcc] sm:$0xff]  }
  0xeb   : > { %7947 = vmatpush3.bf16.msra.mxu1 %v9240_v23  ;;  %7918 = vmatprep.mubr.bf16.mxu1 %v6873_v29  ;;  %v2142_v23 = vrot.slane %v2140_v14, 4  ;;  %v9372_v45 = vsel %vm9008_vm13, %v6846_v33, %v2154_v36  ;;  %v6877_v29 = vcombine.low %v2148_v38, %v2151_v39  ;;  %v4985_v14 = vrot.slane %v4983_v59, 4  ;;  %v7236_v28 = vld [vmem:[#allocation3 + $0x2c] sm:$0x1]  ;;  %v2035_v39 = vld [vmem:[#allocation3 + $0x7c] sm:$0xf] }
  0xec   : > { %7948 = vmatprep.subr.bf16.mxu1 %v8613_v56  ;;  %v6878_v11 = vcombine.low %v9372_v45, %v9376_v46  ;;  %v2165_v7 = vsel %vm9008_vm13, %v2163_v51, %v2164_v53  ;;  %v4991_v20 = vrot.slane %v4989_v60, 5  ;;  %v2170_v22 = vrot.slane %v2168_v16, 4  ;;  %v2036_v45 = vld [vmem:[#allocation3 + $0x80] sm:$0x1]  ;;  %v7238_v54 = vld [vmem:[#allocation3 + $0x34] sm:$0xf] }
  0xed   : > { %8153 = vmatpush3.bf16.msra.mxu0 %v8623_v27  ;;  %v2144_v35 = vsel %vm9008_vm13, %v2142_v23, %v2143_v17  ;;  %v7231_v27 = vld [vmem:[#allocation3 + $0x18] sm:$0xf]  ;;  %v2171_v23 = vrot.slane %v2033_v63, 5  ;;  %v8628_v17 = vld [vmem:[%s9764_s3 + $0xf0] sm:$0xff]   ;;  %v4986_v18 = vor.u32 %v4985_v14, %v4981_v5  ;;  %v4994_v42 = vshrl.u32 %v7234_v3, 16 }
  0xee   : > { %8186 = vmatprep.subr.bf16.mxu0 %v9341_v0  ;;  %v6876_v19 = vcombine.low %v2141_v25, %v2144_v35  ;;  %v4970_v13 = vshrl.u32 %v7231_v27, 16  ;;  %v4997_v30 = vshll.u32 %v7234_v3, 16  ;;  %v2178_v53 = vrot.slane %v2036_v45, 5  ;;  %v2038_v6 = vld [vmem:[#allocation3 + $0x88] sm:$0xf] }
  0xef   : > { %7949 = vmatpush3.bf16.msra.mxu1 %v8613_v56  ;;  %v4973_v56 = vshll.u32 %v7231_v27, 16  ;;  %v4987_v32 = vrot.slane %v4986_v18, 4  ;;  %v9396_v26 = vsel %vm9008_vm13, %v2170_v22, %v2171_v23  ;;  %v4996_v36 = vrot.slane %v4994_v42, 4  ;;  %v2039_v63 = vld [vmem:[#allocation3 + $0x8c] sm:$0x1] }
  0xf0   : > { %8123 = vmatmul.mubr.bf16.gmra.mrb[16].mxu0 %v8610_v9  ;;  %7950 = vmatprep.subr.bf16.mxu1 %v8617_v12  ;;  %v4972_v2 = vrot.slane %v4970_v13, 4  ;;  %v6848_v9 = vrot.slane %v2031_v61, 9  ;;  %v4999_v21 = vrot.slane %v4997_v30, 5  ;;  %v7239_v13 = vld [vmem:[#allocation3 + $0x38] sm:$0x1] }
  0xf1   : > { %8126 = vmatprep.mubr.bf16.mxu0 %v8612_v10  ;;  %v4975_v4 = vrot.slane %v4973_v56, 5  ;;  %v8618_v10 = vld [vmem:[#allocation3 + $0xb4] sm:$0xff]   ;;  %v4992_v62 = vsel %vm8857_vm10, %v4987_v32, %v4991_v20  ;;  %v2037_v61 = vld [vmem:[#allocation3 + $0x84] sm:$0xe]  ;;  %v5037_v14 = vshll.u32 %v7239_v13, 16 }
  0xf2   : > { %7919 = vmatmul.mubr.bf16.gmra.mrb[4].mxu1 %v6874_v57  ;;  %v9392_v57 = vsel %vm9008_vm13, %v6848_v9, %v2168_v16  ;;  %v6850_v20 = vrot.slane %v2037_v61, 9  ;;  %v7242_v22 = vld [vmem:[#allocation3 + $0x44] sm:$0x1] }
  0xf3   : > { %7922 = vmatprep.mubr.bf16.mxu1 %v6875_v24  ;;  %7951 = vmatpush3.bf16.msra.mxu1 %v8617_v12  ;;  %v2162_v12 = vsel %vm9008_vm13, %v6847_v48, %v2161_v50  ;;  %v4976_v15 = vor.u32 %v4975_v4, %v4972_v2  ;;  %v6880_v43 = vcombine.low %v9392_v57, %v9396_v26  ;;  %v2175_v48 = vrot.slane %v2035_v39, 5  ;;  %v7237_v50 = vld [vmem:[#allocation3 + $0x30] sm:$0xf]  ;;  %v7241_v57 = vld [vmem:[#allocation3 + $0x40] sm:$0xf] }
  0xf4   : > { %7952 = vmatprep.subr.bf16.mxu1 %v8621_v8  ;;  %v6879_v25 = vcombine.low %v2162_v12, %v2165_v7  ;;  %v5018_v56 = vshrl.u32 %v7237_v50, 16  ;;  %v5021_v60 = vshll.u32 %v7237_v50, 16  ;;  %v5027_v4 = vshll.u32 %v7238_v54, 16  ;;  %v9418_v26 = vld [vmem:[%s9764_s3 + $0x100] sm:$0xff]  }
  0xf5   : > { %v4977_v24 = vrot.slane %v4976_v15, 4  ;;  %v2177_v59 = vrot.slane %v2175_v48, 4  ;;  %v7240_v15 = vld [vmem:[#allocation3 + $0x3c] sm:$0xf]  ;;  %v5055_v32 = vshrl.u32 %v7241_v57, 16 }
  0xf6   : > { %v5020_v2 = vrot.slane %v5018_v56, 4  ;;  %v5029_v12 = vrot.slane %v5027_v4, 5  ;;  %v5045_v30 = vshll.u32 %v7240_v15, 16  ;;  %v2045_v4 = vld [vmem:[#allocation3 + $0xa4] sm:$0x1] }
  0xf7   : > { %7953 = vmatpush3.bf16.msra.mxu1 %v8621_v8  ;;  %v7235_v8 = vld [vmem:[#allocation3 + $0x28] sm:$0xf]  ;;  %v4982_v35 = vsel %vm8857_vm10, %v4977_v24, %v4981_v5  ;;  %v5031_v5 = vshrl.u32 %v7238_v54, 16  ;;  %v2185_v24 = vrot.slane %v2039_v63, 5  ;;  %v7245_v54 = vld [vmem:[#allocation3 + $0x50] sm:$0x1] }
  0xf8   : > { %8127 = vmatmul.mubr.bf16.gmra.mrb[20].mxu0 %v8614_v34  ;;  %7954 = vmatprep.subr.bf16.mxu1 %v8624_v44  ;;  %v5003_v31 = vshll.u32 %v7235_v8, 16  ;;  %v5007_v33 = vshrl.u32 %v7235_v8, 16  ;;  %v5013_v34 = vshll.u32 %v7236_v28, 16  ;;  %v7295_v27 = vcombine.low %v4982_v35, %v4992_v62 }
  0xf9   : > { %8130 = vmatprep.mubr.bf16.mxu0 %v8616_v47  ;;  %v2034_v47 = vld [vmem:[#allocation3 + $0x78] sm:$0xe]  ;;  %v5033_v7 = vrot.slane %v5031_v5, 4  ;;  %v2182_v8 = vrot.slane %v2038_v6, 5  ;;  %v5042_v28 = vshrl.u32 %v7240_v15, 16 }
  0xfa   : > { %7923 = vmatmul.mubr.bf16.gmra.mrb[8].mxu1 %v6876_v19  ;;  %v5005_v37 = vrot.slane %v5003_v31, 5  ;;  %v5009_v19 = vrot.slane %v5007_v33, 4  ;;  %v5015_v38 = vrot.slane %v5013_v34, 5  ;;  %v6849_v46 = vrot.slane %v2034_v47, 9 }
  0xfb   : > { %7926 = vmatprep.mubr.bf16.mxu1 %v6877_v29  ;;  %7955 = vmatpush3.bf16.msra.mxu1 %v8624_v44  ;;  %v5000_v44 = vor.u32 %v4999_v21, %v4996_v36  ;;  %v5034_v3 = vor.u32 %v5033_v7, %v5029_v12  ;;  %v5051_v31 = vshll.u32 %v7241_v57, 16  ;;  %v2183_v34 = vsel %vm9008_vm13, %v6850_v20, %v2182_v8  ;;  %v2040_v36 = vld [vmem:[#allocation3 + $0x90] sm:$0xe] }
  0xfc   : > { %7956 = vmatprep.subr.bf16.mxu1 %v8626_v1  ;;  %v5010_v52 = vor.u32 %v5009_v19, %v5005_v37  ;;  %v2176_v51 = vsel %vm9008_vm13, %v6849_v46, %v2175_v48  ;;  %v5044_v35 = vrot.slane %v5042_v28, 4  ;;  %v5047_v47 = vrot.slane %v5045_v30, 5  ;;  %v2041_v19 = vld [vmem:[#allocation3 + $0x94] sm:$0xf]  ;;  %v7243_v46 = vld [vmem:[#allocation3 + $0x48] sm:$0xf] }
  0xfd   : > { %v5001_v29 = vrot.slane %v5000_v44, 4  ;;  %v5035_v33 = vrot.slane %v5034_v3, 4  ;;  %v5053_v62 = vrot.slane %v5051_v31, 5  ;;  %v2042_v44 = vld [vmem:[#allocation3 + $0x98] sm:$0x1]  ;;  %v6851_v45 = vrot.slane %v2040_v36, 9 }
  0xfe   : > { %v5048_v50 = vor.u32 %v5047_v47, %v5044_v35  ;;  %v2189_v56 = vrot.slane %v2041_v19, 5  ;;  %v7248_v28 = vld [vmem:[#allocation3 + $0x5c] sm:$0x1] }
  0xff   : > { %7957 = vmatpush3.bf16.msra.mxu1 %v8626_v1  ;;  %v5011_v1 = vrot.slane %v5010_v52, 4  ;;  %v5006_v9 = vsel %vm8857_vm10, %v5001_v29, %v5005_v37  ;;  %v5057_v37 = vrot.slane %v5055_v32, 4  ;;  %v8627_v52 = vld [vmem:[%s9764_s3 + $0x208] sm:$0xff]   ;;  %v5066_v29 = vshrl.u32 %v7243_v46, 16 }
 0x100   : > { %8131 = vmatmul.mubr.bf16.gmra.mrb[24].mxu0 %v8618_v10  ;;  %7958 = vmatprep.subr.bf16.mxu1 %v8628_v17  ;;  %v2179_v10 = vsel %vm9008_vm13, %v2177_v59, %v2178_v53  ;;  %v7244_v53 = vld [vmem:[#allocation3 + $0x4c] sm:$0xf]  ;;  %v2044_v59 = vld [vmem:[#allocation3 + $0xa0] sm:$0xf]  ;;  %v2190_v5 = vsel %vm9008_vm13, %v6851_v45, %v2189_v56  ;;  %v2191_v6 = vrot.slane %v2189_v56, 4 }
 0x101   : > { %8134 = vmatprep.mubr.bf16.mxu0 %v8620_v55  ;;  %v5016_v16 = vsel %vm8857_vm10, %v5011_v1, %v5015_v38  ;;  %v6881_v55 = vcombine.low %v2176_v51, %v2179_v10  ;;  %v2043_v51 = vld [vmem:[#allocation3 + $0x9c] sm:$0xe]  ;;  %v5069_v1 = vshll.u32 %v7243_v46, 16  ;;  %v5079_v10 = vshrl.u32 %v7244_v53, 16  ;;  %v2049_v56 = vld [vmem:[#allocation3 + $0xb4] sm:$0xe] }
 0x102   : > { %7927 = vmatmul.mubr.bf16.gmra.mrb[12].mxu1 %v6878_v11  ;;  %v5023_v11 = vrot.slane %v5021_v60, 5  ;;  %v7296_v23 = vcombine.low %v5006_v9, %v5016_v16  ;;  %v5049_v60 = vrot.slane %v5048_v50, 4  ;;  %v5068_v9 = vrot.slane %v5066_v29, 4  ;;  %v7250_v50 = vld [vmem:[#allocation3 + $0x64] sm:$0xf] }
 0x103   : > { %7930 = vmatprep.mubr.bf16.mxu1 %v6879_v25  ;;  %7959 = vmatpush3.bf16.msra.mxu1 %v8628_v17  ;;  %v5039_v17 = vrot.slane %v5037_v14, 5  ;;  %v2184_v25 = vrot.slane %v2182_v8, 4  ;;  %v5071_v63 = vrot.slane %v5069_v1, 5  ;;  %v5081_v15 = vrot.slane %v5079_v10, 4 }
 0x104   : > { %7960 = vmatprep.subr.bf16.mxu1 %v8630_v41  ;;  %v5024_v18 = vor.u32 %v5023_v11, %v5020_v2  ;;  %v5075_v2 = vshll.u32 %v7244_v53, 16  ;;  %v5054_v11 = vsel %vm8857_vm10, %v5049_v60, %v5053_v62  ;;  %v6852_v57 = vrot.slane %v2043_v51, 9  ;;  %v8634_v60 = vld [vmem:[%s9764_s3 + $0x220] sm:$0xff]  }
 0x105   : > { %v5040_v38 = vsel %vm8857_vm10, %v5035_v33, %v5039_v17  ;;  %v2186_v39 = vsel %vm9008_vm13, %v2184_v25, %v2185_v24  ;;  %v5072_v20 = vor.u32 %v5071_v63, %v5068_v9  ;;  %v2199_v24 = vrot.slane %v2045_v4, 5  ;;  %v8631_v25 = vld [vmem:[%s9764_s3 + $0x218] sm:$0xff]  }
 0x106   : > { %v5025_v42 = vrot.slane %v5024_v18, 4  ;;  %v5077_v16 = vrot.slane %v5075_v2, 5  ;;  %v7247_v18 = vld [vmem:[#allocation3 + $0x58] sm:$0xf]  ;;  %v5123_v2 = vshll.u32 %v7250_v50, 16  ;;  %v5127_v4 = vshrl.u32 %v7250_v50, 16 }
 0x107   : > { %7961 = vmatpush3.bf16.msra.mxu1 %v8630_v41  ;;  %v5061_v41 = vshll.u32 %v7242_v22, 16  ;;  %v2196_v22 = vrot.slane %v2044_v59, 5  ;;  %v5073_v30 = vrot.slane %v5072_v20, 4  ;;  %v5103_v47 = vshrl.u32 %v7247_v18, 16  ;;  %v7253_v20 = vld [vmem:[#allocation3 + $0x70] sm:$0xf] }
 0x108   : > { %8135 = vmatmul.mubr.bf16.gmra.mrb[28].mxu0 %v8622_v58  ;;  %8234 = vmatprep.subr.bf16.mxu1 %v9418_v26  ;;  %v5030_v21 = vsel %vm8857_vm10, %v5025_v42, %v5029_v12  ;;  %v2192_v58 = vrot.slane %v2042_v44, 5  ;;  %v5082_v3 = vor.u32 %v5081_v15, %v5077_v16  ;;  %v7249_v44 = vld [vmem:[#allocation3 + $0x60] sm:$0xf]  ;;  %v8637_v15 = vld [vmem:[%s9764_s3 + $0x228] sm:$0xff]  }
 0x109   : > { %8154 = vmatprep.mubr.bf16.mxu0 %v7295_v27  ;;  %v7297_v48 = vcombine.low %v5030_v21, %v5040_v38  ;;  %v5058_v27 = vor.u32 %v5057_v37, %v5053_v62  ;;  %v5063_v13 = vrot.slane %v5061_v41, 5  ;;  %v2197_v31 = vsel %vm9008_vm13, %v6852_v57, %v2196_v22  ;;  %v2047_v62 = vld [vmem:[#allocation3 + $0xac] sm:$0xf]  ;;  %v2048_v41 = vld [vmem:[#allocation3 + $0xb0] sm:$0x1] }
 0x10a   : > { %7931 = vmatmul.mubr.bf16.gmra.mrb[16].mxu1 %v6880_v43  ;;  %v6882_v43 = vcombine.low %v2183_v34, %v2186_v39  ;;  %v2193_v7 = vsel %vm9008_vm13, %v2191_v6, %v2192_v58  ;;  %v2198_v32 = vrot.slane %v2196_v22, 4  ;;  %v2046_v34 = vld [vmem:[#allocation3 + $0xa8] sm:$0xe]  ;;  %v5083_v35 = vrot.slane %v5082_v3, 4 }
 0x10b   : > { %7934 = vmatprep.mubr.bf16.mxu1 %v6881_v55  ;;  %v5059_v61 = vrot.slane %v5058_v27, 4  ;;  %v7246_v55 = vld [vmem:[#allocation3 + $0x54] sm:$0xf]  ;;  %v6883_v17 = vcombine.low %v2190_v5, %v2193_v7  ;;  %v5099_v21 = vshll.u32 %v7247_v18, 16  ;;  %v5078_v37 = vsel %vm8857_vm10, %v5073_v30, %v5077_v16  ;;  %v2050_v5 = vld [vmem:[#allocation3 + $0xb8] sm:$0xf] }
 0x10c   : > { %v5090_v42 = vshrl.u32 %v7246_v55, 16  ;;  %v5093_v33 = vshll.u32 %v7246_v55, 16  ;;  %v2200_v19 = vsel %vm9008_vm13, %v2198_v32, %v2199_v24  ;;  %v5109_v39 = vshll.u32 %v7248_v28, 16  ;;  %v7252_v7 = vld [vmem:[#allocation3 + $0x6c] sm:$0xf] }
 0x10d   : > { %v5064_v14 = vsel %vm8857_vm10, %v5059_v61, %v5063_v13  ;;  %v6884_v46 = vcombine.low %v2197_v31, %v2200_v19  ;;  %v7251_v13 = vld [vmem:[#allocation3 + $0x68] sm:$0x1]  ;;  %v2203_v29 = vrot.slane %v2047_v62, 5  ;;  %v2206_v51 = vrot.slane %v2048_v41, 5  ;;  %v7254_v30 = vld [vmem:[#allocation3 + $0x74] sm:$0x1] }
 0x10e   : > { %v7298_v12 = vcombine.low %v5054_v11, %v5064_v14  ;;  %v5092_v36 = vrot.slane %v5090_v42, 4  ;;  %v5095_v38 = vrot.slane %v5093_v33, 5  ;;  %v5111_v53 = vrot.slane %v5109_v39, 5  ;;  %v2051_v14 = vld [vmem:[#allocation3 + $0xbc] sm:$0x1] }
 0x10f   : > { %v5114_v59 = vshrl.u32 %v7249_v44, 16  ;;  %v5117_v1 = vshll.u32 %v7249_v44, 16  ;;  %v2205_v10 = vrot.slane %v2203_v29, 4  ;;  %v5125_v55 = vrot.slane %v5123_v2, 5  ;;  %v7256_v19 = vld [vmem:[#allocation3 + $0x7c] sm:$0xf] }
 0x110   : > { %8155 = vmatmul.mubr.bf16.vlgmr.msra.gmra.mrb[0].mxu0 %v7296_v23  ;;  %v5085_v23 = vshll.u32 %v7245_v54, 16  ;;  %v6853_v54 = vrot.slane %v2046_v34, 9  ;;  %v2210_v28 = vrot.slane %v2050_v5, 5  ;;  %v2213_v42 = vrot.slane %v2051_v14, 5 }
 0x111   : > { %8187 = vmatpush3.bf16.msra.mxu0 %v9341_v0  ;;  %8158 = vmatprep.mubr.bf16.mxu0 %v7297_v48  ;;  %v8629_v0 = vld [vmem:[%s9764_s3 + $0x210] sm:$0xff]   ;;  %v5101_v48 = vrot.slane %v5099_v21, 5  ;;  %v5116_v11 = vrot.slane %v5114_v59, 4  ;;  %v5119_v16 = vrot.slane %v5117_v1, 5  ;;  %v2207_v18 = vsel %vm9008_vm13, %v2205_v10, %v2206_v51 }
 0x112   : > { %8188 = vmatprep.subr.bf16.mxu0 %v8627_v52  ;;  %7935 = vmatmul.mubr.bf16.gmra.mrb[20].mxu1 %v6882_v43  ;;  %v5087_v8 = vrot.slane %v5085_v23, 5  ;;  %v5105_v43 = vrot.slane %v5103_v47, 4  ;;  %v2204_v9 = vsel %vm9008_vm13, %v6853_v54, %v2203_v29  ;;  %v5138_v31 = vshrl.u32 %v7252_v7, 16 }
 0x113   : > { %7938 = vmatprep.mubr.bf16.mxu1 %v6883_v17  ;;  %v6854_v17 = vrot.slane %v2049_v56, 9  ;;  %v6885_v22 = vcombine.low %v2204_v9, %v2207_v18  ;;  %v5120_v3 = vor.u32 %v5119_v16, %v5116_v11  ;;  %v5141_v34 = vshll.u32 %v7252_v7, 16 }
 0x114   : > { %v5088_v45 = vsel %vm8857_vm10, %v5083_v35, %v5087_v8  ;;  %v5106_v58 = vor.u32 %v5105_v43, %v5101_v48  ;;  %v7255_v35 = vld [vmem:[#allocation3 + $0x78] sm:$0xf]  ;;  %v2212_v21 = vrot.slane %v2210_v28, 4  ;;  %v5140_v47 = vrot.slane %v5138_v31, 4 }
 0x115   : > { %8189 = vmatpush3.bf16.msra.mxu0 %v8627_v52  ;;  %v7299_v27 = vcombine.low %v5078_v37, %v5088_v45  ;;  %v5096_v52 = vor.u32 %v5095_v38, %v5092_v36  ;;  %v5121_v32 = vrot.slane %v5120_v3, 4  ;;  %v2211_v36 = vsel %vm9008_vm13, %v6854_v17, %v2210_v28  ;;  %v8632_v37 = vld [vmem:[#allocation3 + $0xc] sm:$0xff]   ;;  %v7263_v31 = vld [vmem:[#allocation3 + $0x98] sm:$0x1] }
 0x116   : > { %8190 = vmatprep.subr.bf16.mxu0 %v8629_v0  ;;  %v5107_v6 = vrot.slane %v5106_v58, 4  ;;  %v5151_v62 = vshrl.u32 %v7253_v20, 16  ;;  %v8640_v38 = vld [vmem:[%s9764_s3 + $0x230] sm:$0xff]   ;;  %v5143_v44 = vrot.slane %v5141_v34, 5  ;;  %v5157_v50 = vshll.u32 %v7254_v30, 16 }
 0x117   : > { %v5097_v61 = vrot.slane %v5096_v52, 4  ;;  %v5126_v39 = vsel %vm8857_vm10, %v5121_v32, %v5125_v55  ;;  %v7258_v52 = vld [vmem:[#allocation3 + $0x84] sm:$0xf]  ;;  %v5165_v56 = vshll.u32 %v7255_v35, 16  ;;  %v7259_v58 = vld [vmem:[#allocation3 + $0x88] sm:$0xf] }
 0x118   : > { %8159 = vmatmul.mubr.bf16.gmra.mrb[4].mxu0 %v7298_v12  ;;  %v5129_v12 = vrot.slane %v5127_v4, 4  ;;  %v5112_v23 = vsel %vm8857_vm10, %v5107_v6, %v5111_v53  ;;  %v5153_v43 = vrot.slane %v5151_v62, 4  ;;  %v5144_v54 = vor.u32 %v5143_v44, %v5140_v47 }
 0x119   : > { %8191 = vmatpush3.bf16.msra.mxu0 %v8629_v0  ;;  %8162 = vmatprep.mubr.bf16.mxu0 %v7299_v27  ;;  %v5102_v63 = vsel %vm8857_vm10, %v5097_v61, %v5101_v48  ;;  %v5133_v0 = vshll.u32 %v7251_v13, 16  ;;  %v2214_v48 = vsel %vm9008_vm13, %v2212_v21, %v2213_v42  ;;  %v7257_v27 = vld [vmem:[#allocation3 + $0x80] sm:$0x1]  ;;  %v5162_v13 = vshrl.u32 %v7255_v35, 16  ;;  %v8643_v61 = vld [vmem:[%s9764_s3 + $0x238] sm:$0xff]  }
 0x11a   : > { %8192 = vmatprep.subr.bf16.mxu0 %v8631_v25  ;;  %7939 = vmatmul.mubr.bf16.gmra.mrb[24].mxu1 %v6884_v46  ;;  %v7300_v57 = vcombine.low %v5102_v63, %v5112_v23  ;;  %v5130_v8 = vor.u32 %v5129_v12, %v5125_v55  ;;  %v6886_v53 = vcombine.low %v2211_v36, %v2214_v48  ;;  %v5159_v51 = vrot.slane %v5157_v50, 5  ;;  %v8633_v55 = vld [vmem:[#allocation3 + $0x18] sm:$0xff]   ;;  %v7260_v12 = vld [vmem:[#allocation3 + $0x8c] sm:$0x1]  ;;  %v7265_v21 = vld [vmem:[#allocation3 + $0xa0] sm:$0xf] }
 0x11b   : > { %v5135_v24 = vrot.slane %v5133_v0, 5  ;;  %7942 = vmatprep.mubr.bf16.mxu1 %v6885_v22  ;;  %v5171_v59 = vshll.u32 %v7256_v19, 16  ;;  %v5145_v1 = vrot.slane %v5144_v54, 4  ;;  %v5164_v2 = vrot.slane %v5162_v13, 4  ;;  %v7264_v36 = vld [vmem:[#allocation3 + $0x9c] sm:$0xf] }
 0x11c   : > { %v5131_v33 = vrot.slane %v5130_v8, 4  ;;  %v5167_v4 = vrot.slane %v5165_v56, 5  ;;  %v5181_v5 = vshll.u32 %v7257_v27, 16  ;;  %v5186_v11 = vshrl.u32 %v7258_v52, 16  ;;  %v7266_v54 = vld [vmem:[#allocation3 + $0xa4] sm:$0x1] }
 0x11d   : > { %8193 = vmatpush3.bf16.msra.mxu0 %v8631_v25  ;;  %v5147_v25 = vshll.u32 %v7253_v20, 16  ;;  %v5173_v9 = vrot.slane %v5171_v59, 5  ;;  %v5189_v7 = vshll.u32 %v7258_v52, 16  ;;  %v5195_v17 = vshll.u32 %v7259_v58, 16  ;;  %v7262_v20 = vld [vmem:[#allocation3 + $0x94] sm:$0xf] }
 0x11e   : > { %8194 = vmatprep.subr.bf16.mxu0 %v8634_v60  ;;  %v5136_v41 = vsel %vm8857_vm10, %v5131_v33, %v5135_v24  ;;  %v5168_v63 = vor.u32 %v5167_v4, %v5164_v2  ;;  %v5183_v16 = vrot.slane %v5181_v5, 5  ;;  %v5188_v0 = vrot.slane %v5186_v11, 4  ;;  %v8635_v24 = vld [vmem:[#allocation3 + $0x24] sm:$0xff]   ;;  %v7268_v59 = vld [vmem:[#allocation3 + $0xac] sm:$0xf]  ;;  %v8638_v11 = vld [vmem:[#allocation3 + $0x3c] sm:$0xff]  }
 0x11f   : > { %v5149_v45 = vrot.slane %v5147_v25, 5  ;;  %v7301_v46 = vcombine.low %v5126_v39, %v5136_v41  ;;  %v5191_v3 = vrot.slane %v5189_v7, 5  ;;  %v5199_v8 = vshrl.u32 %v7259_v58, 16  ;;  %v7267_v56 = vld [vmem:[#allocation3 + $0xa8] sm:$0xf]  ;;  %v8654_v7 = vld [vmem:[%s9764_s3 + $0x110] sm:$0xff]  }
 0x120   : > { %8163 = vmatmul.mubr.bf16.gmra.mrb[8].mxu0 %v7300_v57  ;;  %v5169_v22 = vrot.slane %v5168_v63, 4  ;;  %v5197_v42 = vrot.slane %v5195_v17, 5  ;;  %v5205_v30 = vshll.u32 %v7260_v12, 16  ;;  %v5229_v48 = vshll.u32 %v7263_v31, 16 }
 0x121   : > { %8195 = vmatpush3.bf16.msra.mxu0 %v8634_v60  ;;  %8166 = vmatprep.mubr.bf16.mxu0 %v7301_v46  ;;  %v5154_v29 = vor.u32 %v5153_v43, %v5149_v45  ;;  %v5175_v60 = vshrl.u32 %v7256_v19, 16  ;;  %v5150_v14 = vsel %vm8857_vm10, %v5145_v1, %v5149_v45  ;;  %v5192_v34 = vor.u32 %v5191_v3, %v5188_v0  ;;  %v8636_v1 = vld [vmem:[#allocation3 + $0x30] sm:$0xff]  }
 0x122   : > { %8196 = vmatprep.subr.bf16.mxu0 %v8637_v15  ;;  %7943 = vmatmul.mubr.bf16.gmra.mrb[28].mxu1 %v6886_v53  ;;  %v5174_v33 = vsel %vm8857_vm10, %v5169_v22, %v5173_v9  ;;  %v5201_v25 = vrot.slane %v5199_v8, 4  ;;  %v5207_v62 = vrot.slane %v5205_v30, 5  ;;  %v5219_v19 = vshll.u32 %v7262_v20, 16  ;;  %v8653_v53 = vld [vmem:[%s9764_s3 + $0x108] sm:$0xff]  }
 0x123   : > { %v5155_v6 = vrot.slane %v5154_v29, 4  ;;  %7962 = vmatprep.mubr.bf16.mxu1 %v8632_v37  ;;  %v5177_v10 = vrot.slane %v5175_v60, 4  ;;  %v5193_v39 = vrot.slane %v5192_v34, 4  ;;  %v5223_v46 = vshrl.u32 %v7262_v20, 16  ;;  %v7271_v20 = vld [vmem:[#allocation3 + $0xb8] sm:$0xf] }
 0x124   : > { %v5202_v41 = vor.u32 %v5201_v25, %v5197_v42  ;;  %v5221_v45 = vrot.slane %v5219_v19, 5  ;;  %v5234_v43 = vshrl.u32 %v7264_v36, 16  ;;  %v5237_v13 = vshll.u32 %v7264_v36, 16  ;;  %v7272_v25 = vld [vmem:[#allocation3 + $0xbc] sm:$0x1] }
 0x125   : > { %8197 = vmatpush3.bf16.msra.mxu0 %v8637_v15  ;;  %v7261_v15 = vld [vmem:[#allocation3 + $0x90] sm:$0xf]  ;;  %v5160_v23 = vsel %vm8857_vm10, %v5155_v6, %v5159_v51  ;;  %v5178_v18 = vor.u32 %v5177_v10, %v5173_v9  ;;  %v5198_v50 = vsel %vm8857_vm10, %v5193_v39, %v5197_v42  ;;  %v5231_v58 = vrot.slane %v5229_v48, 5  ;;  %v7273_v19 = vld [vmem:[#allocation3 + $0xc0] sm:$0xf] }
 0x126   : > { %8198 = vmatprep.subr.bf16.mxu0 %v8640_v38  ;;  %v7302_v57 = vcombine.low %v5150_v14, %v5160_v23  ;;  %v5210_v32 = vshrl.u32 %v7261_v15, 16  ;;  %v5213_v35 = vshll.u32 %v7261_v15, 16  ;;  %v5203_v27 = vrot.slane %v5202_v41, 4  ;;  %v7270_v15 = vld [vmem:[#allocation3 + $0xb4] sm:$0xf] }
 0x127   : > { %v5179_v28 = vrot.slane %v5178_v18, 4  ;;  %v5236_v29 = vrot.slane %v5234_v43, 4  ;;  %v5243_v51 = vshll.u32 %v7265_v21, 16  ;;  %v5239_v2 = vrot.slane %v5237_v13, 5 }
 0x128   : > { %8167 = vmatmul.mubr.bf16.gmra.mrb[12].mxu0 %v7302_v57  ;;  %v5212_v37 = vrot.slane %v5210_v32, 4  ;;  %v5215_v44 = vrot.slane %v5213_v35, 5  ;;  %v5208_v60 = vsel %vm8857_vm10, %v5203_v27, %v5207_v62  ;;  %v5247_v4 = vshrl.u32 %v7265_v21, 16  ;;  %v8655_v35 = vld [vmem:[%s9764_s3 + $0x118] sm:$0xff]  }
 0x129   : > { %8199 = vmatpush3.bf16.msra.mxu0 %v8640_v38  ;;  %v5184_v47 = vsel %vm8857_vm10, %v5179_v28, %v5183_v16  ;;  %v7304_v5 = vcombine.low %v5198_v50, %v5208_v60  ;;  %v5245_v9 = vrot.slane %v5243_v51, 5  ;;  %v5253_v10 = vshll.u32 %v7266_v54, 16  ;;  %v8641_v27 = vld [vmem:[#allocation3 + $0x54] sm:$0xff]   ;;  %v7276_v60 = vld [vmem:[#allocation3 + $0xcc] sm:$0xf] }
 0x12a   : > { %8200 = vmatprep.subr.bf16.mxu0 %v8643_v61  ;;  %v7303_v38 = vcombine.low %v5174_v33, %v5184_v47  ;;  %7963 = vmatmul.mubr.bf16.vlgmr.msra.gmra.mrb[0].mxu1 %v8633_v55  ;;  %v5216_v52 = vor.u32 %v5215_v44, %v5212_v37  ;;  %v5240_v63 = vor.u32 %v5239_v2, %v5236_v29  ;;  %v5249_v16 = vrot.slane %v5247_v4, 4  ;;  %v7269_v55 = vld [vmem:[#allocation3 + $0xb0] sm:$0x1]  ;;  %v8639_v47 = vld [vmem:[#allocation3 + $0x48] sm:$0xff]  }
 0x12b   : > { %8242 = vmatpush3.bf16.msra.mxu1 %v9418_v26  ;;  %7966 = vmatprep.mubr.bf16.mxu1 %v8635_v24  ;;  %v5225_v26 = vrot.slane %v5223_v46, 4  ;;  %v5258_v12 = vshrl.u32 %v7267_v56, 16  ;;  %v5255_v18 = vrot.slane %v5253_v10, 5  ;;  %v5261_v0 = vshll.u32 %v7267_v56, 16  ;;  %v7275_v56 = vld [vmem:[#allocation3 + $0xc8] sm:$0x1] }
 0x12c   : > { %8170 = vmatprep.mubr.bf16.mxu0 %v7303_v38  ;;  %8235 = vmatprep.subr.bf16.mxu1 %v8653_v53  ;;  %v5267_v17 = vshll.u32 %v7268_v59, 16  ;;  %v5241_v57 = vrot.slane %v5240_v63, 4  ;;  %v5250_v22 = vor.u32 %v5249_v16, %v5245_v9  ;;  %v5271_v8 = vshrl.u32 %v7268_v59, 16 }
 0x12d   : > { %8201 = vmatpush3.bf16.msra.mxu0 %v8643_v61  ;;  %v5217_v61 = vrot.slane %v5216_v52, 4  ;;  %v5226_v6 = vor.u32 %v5225_v26, %v5221_v45  ;;  %v5260_v3 = vrot.slane %v5258_v12, 4  ;;  %v5263_v28 = vrot.slane %v5261_v0, 5  ;;  %v8656_v26 = vld [vmem:[%s9764_s3 + $0x120] sm:$0xff]  }
 0x12e   : > { %v5269_v42 = vrot.slane %v5267_v17, 5  ;;  %v5277_v30 = vshll.u32 %v7269_v55, 16  ;;  %v5246_v32 = vsel %vm8857_vm10, %v5241_v57, %v5245_v9  ;;  %v5251_v33 = vrot.slane %v5250_v22, 4  ;;  %v7319_v17 = vld [vmem:[#allocation3 + $0x18] sm:$0xe] }
 0x12f   : > { %8243 = vmatpush3.bf16.msra.mxu1 %v8653_v53  ;;  %v5222_v14 = vsel %vm8857_vm10, %v5217_v61, %v5221_v45  ;;  %v5227_v23 = vrot.slane %v5226_v6, 4  ;;  %v5273_v34 = vrot.slane %v5271_v8, 4  ;;  %v5264_v36 = vor.u32 %v5263_v28, %v5260_v3  ;;  %v7274_v45 = vld [vmem:[#allocation3 + $0xc4] sm:$0xf]  ;;  %v7277_v61 = vld [vmem:[#allocation3 + $0xd0] sm:$0xf] }
 0x130   : > { %8236 = vmatprep.subr.bf16.mxu1 %v8654_v7  ;;  %8171 = vmatmul.mubr.bf16.gmra.mrb[16].mxu0 %v7304_v5  ;;  %v5279_v21 = vrot.slane %v5277_v30, 5  ;;  %v5282_v62 = vshrl.u32 %v7270_v15, 16  ;;  %v5285_v37 = vshll.u32 %v7270_v15, 16  ;;  %v5256_v38 = vsel %vm8857_vm10, %v5251_v33, %v5255_v18  ;;  %v8642_v8 = vld [vmem:[#allocation3 + $0x60] sm:$0xff]   ;;  %v8644_v33 = vld [vmem:[#allocation3 + $0x6c] sm:$0xff]  }
 0x131   : > { %v5232_v24 = vsel %vm8857_vm10, %v5227_v23, %v5231_v58  ;;  %v5274_v39 = vor.u32 %v5273_v34, %v5269_v42  ;;  %v5291_v41 = vshll.u32 %v7271_v20, 16  ;;  %v5295_v44 = vshrl.u32 %v7271_v20, 16  ;;  %v7320_v20 = vld [vmem:[#allocation3 + $0x1c] sm:$0xf]  ;;  %v7321_v28 = vld [vmem:[#allocation3 + $0x20] sm:$0x1] }
 0x132   : > { %7967 = vmatmul.mubr.bf16.gmra.mrb[4].mxu1 %v8636_v1  ;;  %v7305_v31 = vcombine.low %v5222_v14, %v5232_v24  ;;  %v7306_v46 = vcombine.low %v5246_v32, %v5256_v38  ;;  %v5265_v48 = vrot.slane %v5264_v36, 4  ;;  %v5284_v43 = vrot.slane %v5282_v62, 4  ;;  %v7278_v14 = vld [vmem:[#allocation3 + $0xd4] sm:$0x1]  ;;  %v7323_v38 = vld [vmem:[#allocation3 + $0x28] sm:$0xf] }
 0x133   : > { %7970 = vmatprep.mubr.bf16.mxu1 %v8638_v11  ;;  %8244 = vmatpush3.bf16.msra.mxu1 %v8654_v7  ;;  %v5287_v50 = vrot.slane %v5285_v37, 5  ;;  %v5275_v52 = vrot.slane %v5274_v39, 4  ;;  %v5293_v53 = vrot.slane %v5291_v41, 5  ;;  %v5297_v54 = vrot.slane %v5295_v44, 4  ;;  %v8657_v7 = vld [vmem:[%s9764_s3 + $0x128] sm:$0xff]  }
 0x134   : > { %8237 = vmatprep.subr.bf16.mxu1 %v8655_v35  ;;  %8174 = vmatprep.mubr.bf16.mxu0 %v7305_v31  ;;  %v5301_v13 = vshll.u32 %v7272_v25, 16  ;;  %v5270_v58 = vsel %vm8857_vm10, %v5265_v48, %v5269_v42  ;;  %v5306_v51 = vshrl.u32 %v7273_v19, 16  ;;  %v5309_v59 = vshll.u32 %v7273_v19, 16  ;;  %v7322_v19 = vld [vmem:[#allocation3 + $0x24] sm:$0xe] }
 0x135   : > { %v5288_v29 = vor.u32 %v5287_v50, %v5284_v43  ;;  %v5280_v1 = vsel %vm8857_vm10, %v5275_v52, %v5279_v21  ;;  %v5298_v2 = vor.u32 %v5297_v54, %v5293_v53  ;;  %v5315_v5 = vshll.u32 %v7274_v45, 16  ;;  %v8658_v21 = vld [vmem:[%s9764_s3 + $0x130] sm:$0xff]   ;;  %v8645_v54 = vld [vmem:[#allocation3 + $0x78] sm:$0xff]  }
 0x136   : > { %v5303_v4 = vrot.slane %v5301_v13, 5  ;;  %v7307_v6 = vcombine.low %v5270_v58, %v5280_v1  ;;  %v5308_v10 = vrot.slane %v5306_v51, 4  ;;  %v5311_v11 = vrot.slane %v5309_v59, 5  ;;  %v7327_v1 = vld [vmem:[#allocation3 + $0x38] sm:$0x1] }
 0x137   : > { %8245 = vmatpush3.bf16.msra.mxu1 %v8655_v35  ;;  %v5289_v9 = vrot.slane %v5288_v29, 4  ;;  %v5299_v63 = vrot.slane %v5298_v2, 4  ;;  %v5317_v16 = vrot.slane %v5315_v5, 5  ;;  %v5319_v55 = vshrl.u32 %v7274_v45, 16 }
 0x138   : > { %8238 = vmatprep.subr.bf16.mxu1 %v8656_v26  ;;  %8175 = vmatmul.mubr.bf16.gmra.mrb[20].mxu0 %v7306_v46  ;;  %v5325_v12 = vshll.u32 %v7275_v56, 16  ;;  %v5312_v23 = vor.u32 %v5311_v11, %v5308_v10  ;;  %v5330_v18 = vshrl.u32 %v7276_v60, 16  ;;  %v5333_v0 = vshll.u32 %v7276_v60, 16  ;;  %v7324_v46 = vld [vmem:[#allocation3 + $0x2c] sm:$0x1]  ;;  %v8646_v60 = vld [vmem:[#allocation3 + $0x84] sm:$0xff]  }
 0x139   : > { %8178 = vmatprep.mubr.bf16.mxu0 %v7307_v6  ;;  %v5294_v15 = vsel %vm8857_vm10, %v5289_v9, %v5293_v53  ;;  %v5304_v57 = vsel %vm8857_vm10, %v5299_v63, %v5303_v4  ;;  %v5321_v22 = vrot.slane %v5319_v55, 4  ;;  %v5339_v24 = vshll.u32 %v7277_v61, 16  ;;  %v7325_v56 = vld [vmem:[#allocation3 + $0x30] sm:$0xe]  ;;  %v7328_v10 = vld [vmem:[#allocation3 + $0x3c] sm:$0xe] }
 0x13a   : > { %7971 = vmatmul.mubr.bf16.gmra.mrb[8].mxu1 %v8639_v47  ;;  %v5327_v3 = vrot.slane %v5325_v12, 5  ;;  %v7308_v42 = vcombine.low %v5294_v15, %v5304_v57  ;;  %v5313_v30 = vrot.slane %v5312_v23, 4  ;;  %v5332_v31 = vrot.slane %v5330_v18, 4  ;;  %v7329_v11 = vld [vmem:[#allocation3 + $0x40] sm:$0xf] }
 0x13b   : > { %7974 = vmatprep.mubr.bf16.mxu1 %v8641_v27  ;;  %8246 = vmatpush3.bf16.msra.mxu1 %v8656_v26  ;;  %v5335_v32 = vrot.slane %v5333_v0, 5  ;;  %v5322_v34 = vor.u32 %v5321_v22, %v5317_v16  ;;  %v5341_v25 = vrot.slane %v5339_v24, 5  ;;  %v5343_v35 = vshrl.u32 %v7277_v61, 16  ;;  %v8659_v26 = vld [vmem:[%s9764_s3 + $0x138] sm:$0xff]   ;;  %v7326_v61 = vld [vmem:[#allocation3 + $0x34] sm:$0xf] }
 0x13c   : > { %8239 = vmatprep.subr.bf16.mxu1 %v8657_v7  ;;  %v5349_v36 = vshll.u32 %v7278_v14, 16  ;;  %v7367_v62 = vrot.slane %v7319_v17, 9  ;;  %v5837_v37 = vrot.slane %v7320_v20, 5  ;;  %v5318_v39 = vsel %vm8857_vm10, %v5313_v30, %v5317_v16  ;;  %v7330_v55 = vld [vmem:[#allocation3 + $0x44] sm:$0x1] }
 0x13d   : > { %v5336_v47 = vor.u32 %v5335_v32, %v5332_v31  ;;  %v5323_v41 = vrot.slane %v5322_v34, 4  ;;  %v5345_v44 = vrot.slane %v5343_v35, 4  ;;  %v5840_v45 = vrot.slane %v7321_v28, 5  ;;  %v7331_v18 = vld [vmem:[#allocation3 + $0x48] sm:$0xe]  ;;  %v8647_v31 = vld [vmem:[#allocation3 + $0x90] sm:$0xff]  }
 0x13e   : > { %v5351_v43 = vrot.slane %v5349_v36, 5  ;;  %v5839_v50 = vrot.slane %v5837_v37, 4  ;;  %v5838_v53 = vsel %vm9008_vm13, %v7367_v62, %v5837_v37  ;;  %v5844_v13 = vrot.slane %v7323_v38, 5  ;;  %v7332_v20 = vld [vmem:[#allocation3 + $0x4c] sm:$0xf] }
 0x13f   : > { %8247 = vmatpush3.bf16.msra.mxu1 %v8657_v7  ;;  %v5337_v48 = vrot.slane %v5336_v47, 4  ;;  %v5328_v27 = vsel %vm8857_vm10, %v5323_v41, %v5327_v3  ;;  %v5346_v52 = vor.u32 %v5345_v44, %v5341_v25  ;;  %v7368_v51 = vrot.slane %v7322_v19, 9  ;;  %v7333_v57 = vld [vmem:[#allocation3 + $0x50] sm:$0x1]  ;;  %v7334_v32 = vld [vmem:[#allocation3 + $0x54] sm:$0xe] }
 0x140   : > { %8240 = vmatprep.subr.bf16.mxu1 %v8658_v21  ;;  %8179 = vmatmul.mubr.bf16.gmra.mrb[24].mxu0 %v7308_v42  ;;  %v7309_v58 = vcombine.low %v5318_v39, %v5328_v27  ;;  %v5841_v29 = vsel %vm9008_vm13, %v5839_v50, %v5840_v45  ;;  %v5847_v59 = vrot.slane %v7324_v46, 5  ;;  %v7369_v5 = vrot.slane %v7325_v56, 9  ;;  %v7337_v37 = vld [vmem:[#allocation3 + $0x60] sm:$0xe]  ;;  %v7338_v44 = vld [vmem:[#allocation3 + $0x64] sm:$0xf] }
 0x141   : > { %v5342_v2 = vsel %vm8857_vm10, %v5337_v48, %v5341_v25  ;;  %v5347_v4 = vrot.slane %v5346_v52, 4  ;;  %v5846_v6 = vrot.slane %v5844_v13, 4  ;;  %v5851_v9 = vrot.slane %v7326_v61, 5  ;;  %v7336_v25 = vld [vmem:[#allocation3 + $0x5c] sm:$0x1] }
 0x142   : > { %7975 = vmatmul.mubr.bf16.gmra.mrb[12].mxu1 %v8642_v8  ;;  %8182 = vmatprep.mubr.bf16.mxu0 %v7309_v58  ;;  %v7399_v63 = vcombine.low %v5838_v53, %v5841_v29  ;;  %v5854_v16 = vrot.slane %v7327_v1, 5  ;;  %v5858_v12 = vrot.slane %v7329_v11, 5  ;;  %v7370_v23 = vrot.slane %v7328_v10, 9  ;;  %v8648_v39 = vld [vmem:[#allocation3 + $0x9c] sm:$0xff]   ;;  %v7339_v45 = vld [vmem:[#allocation3 + $0x68] sm:$0x1] }
 0x143   : > { %7978 = vmatprep.mubr.bf16.mxu1 %v8644_v33  ;;  %8248 = vmatpush3.bf16.msra.mxu1 %v8658_v21  ;;  %v5352_v14 = vsel %vm8857_vm10, %v5347_v4, %v5351_v43  ;;  %v5853_v15 = vrot.slane %v5851_v9, 4  ;;  %v5861_v17 = vrot.slane %v7330_v55, 5  ;;  %v7371_v22 = vrot.slane %v7331_v18, 9  ;;  %v7335_v33 = vld [vmem:[#allocation3 + $0x58] sm:$0xf] }
 0x144   : > { %8241 = vmatprep.subr.bf16.mxu1 %v8659_v26  ;;  %v7310_v7 = vcombine.low %v5342_v2, %v5352_v14  ;;  %v5860_v0 = vrot.slane %v5858_v12, 4  ;;  %v5865_v3 = vrot.slane %v7332_v20, 5  ;;  %v5868_v8 = vrot.slane %v7333_v57, 5  ;;  %v7342_v29 = vld [vmem:[#allocation3 + $0x74] sm:$0x1] }
 0x145   : > { %v5845_v24 = vsel %vm9008_vm13, %v7368_v51, %v5844_v13  ;;  %v5848_v28 = vsel %vm9008_vm13, %v5846_v6, %v5847_v59  ;;  %v5852_v42 = vsel %vm9008_vm13, %v7369_v5, %v5851_v9  ;;  %v5855_v30 = vsel %vm9008_vm13, %v5853_v15, %v5854_v16  ;;  %v7341_v13 = vld [vmem:[#allocation3 + $0x70] sm:$0xf]  ;;  %v6991_v59 = vld [vmem:[#allocation3 + $0x6c] sm:$0xf]  ;;  %v6993_v5 = vld [vmem:[#allocation3 + $0x74] sm:$0x1] }
 0x146   : > { %v5867_v34 = vrot.slane %v5865_v3, 4  ;;  %v7372_v35 = vrot.slane %v7334_v32, 9  ;;  %v9555_v36 = vsel %vm9008_vm13, %v7370_v23, %v5858_v12  ;;  %v9559_v21 = vsel %vm9008_vm13, %v5860_v0, %v5861_v17  ;;  %v6992_v4 = vld [vmem:[#allocation3 + $0x70] sm:$0xf]  ;;  %v8649_v6 = vld [vmem:[#allocation3 + $0xa8] sm:$0xff]  }
 0x147   : > { %8249 = vmatpush3.bf16.msra.mxu1 %v8659_v26  ;;  %v5872_v47 = vrot.slane %v7335_v33, 5  ;;  %v5875_v62 = vrot.slane %v7336_v25, 5  ;;  %v7400_v19 = vcombine.low %v5845_v24, %v5848_v28  ;;  %v7401_v38 = vcombine.low %v5852_v42, %v5855_v30  ;;  %v7344_v15 = vld [vmem:[#allocation3 + $0x7c] sm:$0xf]  ;;  %v7345_v23 = vld [vmem:[#allocation3 + $0x80] sm:$0x1] }
 0x148   : > { %8183 = vmatmul.mubr.bf16.gmra.mrb[28].mxu0 %v7310_v7  ;;  %v9563_v41 = vsel %vm9008_vm13, %v7371_v22, %v5865_v3  ;;  %v7373_v46 = vrot.slane %v7337_v37, 9  ;;  %v9567_v48 = vsel %vm9008_vm13, %v5867_v34, %v5868_v8  ;;  %v5879_v27 = vrot.slane %v7338_v44, 5  ;;  %v6994_v57 = vld [vmem:[#allocation3 + $0x78] sm:$0xf]  ;;  %v6995_v42 = vld [vmem:[#allocation3 + $0x7c] sm:$0xf] }
 0x149   : > { %8202 = vmatprep.mubr.bf16.mxu0 %v7399_v63  ;;  %v9571_v43 = vsel %vm9008_vm13, %v7372_v35, %v5872_v47  ;;  %v5874_v50 = vrot.slane %v5872_v47, 4  ;;  %v7402_v52 = vcombine.low %v9555_v36, %v9559_v21  ;;  %v5882_v53 = vrot.slane %v7339_v45, 5  ;;  %v7343_v63 = vld [vmem:[#allocation3 + $0x78] sm:$0xe]  ;;  %v6996_v34 = vld [vmem:[#allocation3 + $0x80] sm:$0x1] }
 0x14a   : > { %7979 = vmatmul.mubr.bf16.gmra.mrb[16].mxu1 %v8645_v54  ;;  %v7340_v54 = vld [vmem:[#allocation3 + $0x6c] sm:$0xe]  ;;  %v9581_v26 = vsel %vm9008_vm13, %v7373_v46, %v5879_v27  ;;  %v5881_v58 = vrot.slane %v5879_v27, 4  ;;  %v5886_v1 = vrot.slane %v7341_v13, 5  ;;  %v5889_v2 = vrot.slane %v7342_v29, 5  ;;  %v8650_v22 = vld [vmem:[#allocation3 + $0xb4] sm:$0xff]  }
 0x14b   : > { %7982 = vmatprep.mubr.bf16.mxu1 %v8646_v60  ;;  %v9577_v56 = vsel %vm9008_vm13, %v5874_v50, %v5875_v62  ;;  %v7374_v51 = vrot.slane %v7340_v54, 9  ;;  %v7403_v60 = vcombine.low %v9563_v41, %v9567_v48  ;;  %v3296_v10 = vshrl.u32 %v6991_v59, 16  ;;  %v7346_v47 = vld [vmem:[#allocation3 + $0x84] sm:$0xe]  ;;  %v7348_v48 = vld [vmem:[#allocation3 + $0x8c] sm:$0x1] }
 0x14c   : > { %v7404_v61 = vcombine.low %v9571_v43, %v9577_v56  ;;  %v9589_v9 = vsel %vm9008_vm13, %v5881_v58, %v5882_v53  ;;  %v3299_v11 = vshll.u32 %v6991_v59, 16  ;;  %v3305_v14 = vshll.u32 %v6992_v4, 16  ;;  %v6997_v13 = vld [vmem:[#allocation3 + $0x84] sm:$0xf]  ;;  %v7002_v43 = vld [vmem:[#allocation3 + $0x98] sm:$0x1] }
 0x14d   : > { %v7405_v16 = vcombine.low %v9581_v26, %v9589_v9  ;;  %v9595_v55 = vsel %vm9008_vm13, %v7374_v51, %v5886_v1  ;;  %v5888_v12 = vrot.slane %v5886_v1, 4  ;;  %v3309_v7 = vshrl.u32 %v6992_v4, 16  ;;  %v8651_v1 = vld [vmem:[#allocation3 + $0xc0] sm:$0xff]  }
 0x14e   : > { %v3298_v18 = vrot.slane %v3296_v10, 4  ;;  %v3301_v0 = vrot.slane %v3299_v11, 5  ;;  %v3307_v17 = vrot.slane %v3305_v14, 5  ;;  %v3315_v20 = vshll.u32 %v6993_v5, 16  ;;  %v6999_v10 = vld [vmem:[#allocation3 + $0x8c] sm:$0x1] }
 0x14f   : > { %v9599_v3 = vsel %vm9008_vm13, %v5888_v12, %v5889_v2  ;;  %v3311_v8 = vrot.slane %v3309_v7, 4  ;;  %v7375_v24 = vrot.slane %v7343_v63, 9  ;;  %v5893_v28 = vrot.slane %v7344_v15, 5 }
 0x150   : > { %8203 = vmatmul.mubr.bf16.vlgmr.msra.gmra.mrb[0].mxu0 %v7400_v19  ;;  %v7406_v30 = vcombine.low %v9595_v55, %v9599_v3  ;;  %v3317_v32 = vrot.slane %v3315_v20, 5  ;;  %v5896_v33 = vrot.slane %v7345_v23, 5  ;;  %v3320_v21 = vshrl.u32 %v6994_v57, 16 }
 0x151   : > { %8206 = vmatprep.mubr.bf16.mxu0 %v7401_v38  ;;  %v3312_v25 = vor.u32 %v3311_v8, %v3307_v17  ;;  %v9605_v35 = vsel %vm9008_vm13, %v7375_v24, %v5893_v28  ;;  %v5895_v36 = vrot.slane %v5893_v28, 4  ;;  %v3323_v37 = vshll.u32 %v6994_v57, 16 }
 0x152   : > { %7983 = vmatmul.mubr.bf16.gmra.mrb[20].mxu1 %v8647_v31  ;;  %v3302_v31 = vor.u32 %v3301_v0, %v3298_v18  ;;  %v3329_v19 = vshll.u32 %v6995_v42, 16  ;;  %v3333_v38 = vshrl.u32 %v6995_v42, 16  ;;  %v3322_v45 = vrot.slane %v3320_v21, 4  ;;  %v7349_v18 = vld [vmem:[#allocation3 + $0x90] sm:$0xe] }
 0x153   : > { %7986 = vmatprep.mubr.bf16.mxu1 %v8648_v39  ;;  %v7347_v39 = vld [vmem:[#allocation3 + $0x88] sm:$0xf]  ;;  %v3313_v41 = vrot.slane %v3312_v25, 4  ;;  %v9609_v44 = vsel %vm9008_vm13, %v5895_v36, %v5896_v33  ;;  %v3339_v46 = vshll.u32 %v6996_v34, 16  ;;  %v3325_v53 = vrot.slane %v3323_v37, 5 }
 0x154   : > { %v3303_v62 = vrot.slane %v3302_v31, 4  ;;  %v7407_v27 = vcombine.low %v9605_v35, %v9609_v44  ;;  %v3331_v54 = vrot.slane %v3329_v19, 5  ;;  %v3335_v29 = vrot.slane %v3333_v38, 4  ;;  %v7351_v31 = vld [vmem:[#allocation3 + $0x98] sm:$0x1] }
 0x155   : > { %v3318_v58 = vsel %vm8857_vm10, %v3313_v41, %v3317_v32  ;;  %v3341_v51 = vrot.slane %v3339_v46, 5  ;;  %v7376_v59 = vrot.slane %v7346_v47, 9  ;;  %v3326_v4 = vor.u32 %v3325_v53, %v3322_v45  ;;  %v7000_v32 = vld [vmem:[#allocation3 + $0x90] sm:$0xf]  ;;  %v7001_v21 = vld [vmem:[#allocation3 + $0x94] sm:$0xf] }
 0x156   : > { %v3308_v50 = vsel %vm8857_vm10, %v3303_v62, %v3307_v17  ;;  %v5903_v5 = vrot.slane %v7348_v48, 5  ;;  %v3344_v11 = vshrl.u32 %v6997_v13, 16  ;;  %v3347_v14 = vshll.u32 %v6997_v13, 16  ;;  %v7352_v41 = vld [vmem:[#allocation3 + $0x9c] sm:$0xe] }
 0x157   : > { %v7039_v2 = vcombine.low %v3308_v50, %v3318_v58  ;;  %v3327_v12 = vrot.slane %v3326_v4, 4  ;;  %v3363_v42 = vshll.u32 %v6999_v10, 16  ;;  %v7377_v36 = vrot.slane %v7349_v18, 9  ;;  %v7353_v53 = vld [vmem:[#allocation3 + $0xa0] sm:$0xf] }
 0x158   : > { %8207 = vmatmul.mubr.bf16.gmra.mrb[4].mxu0 %v7402_v52  ;;  %v6998_v52 = vld [vmem:[#allocation3 + $0x88] sm:$0xf]  ;;  %v3346_v17 = vrot.slane %v3344_v11, 4  ;;  %v3349_v20 = vrot.slane %v3347_v14, 5  ;;  %v3368_v38 = vshrl.u32 %v7000_v32, 16  ;;  %v3377_v50 = vshll.u32 %v7001_v21, 16 }
 0x159   : > { %8210 = vmatprep.mubr.bf16.mxu0 %v7403_v60  ;;  %v5900_v60 = vrot.slane %v7347_v39, 5  ;;  %v3353_v63 = vshll.u32 %v6998_v52, 16  ;;  %v3357_v23 = vshrl.u32 %v6998_v52, 16  ;;  %v3332_v8 = vsel %vm8857_vm10, %v3327_v12, %v3331_v54  ;;  %v7354_v13 = vld [vmem:[#allocation3 + $0xa4] sm:$0x1] }
 0x15a   : > { %7987 = vmatmul.mubr.bf16.gmra.mrb[24].mxu1 %v8649_v6  ;;  %v3336_v6 = vor.u32 %v3335_v29, %v3331_v54  ;;  %v3350_v25 = vor.u32 %v3349_v20, %v3346_v17  ;;  %v3365_v37 = vrot.slane %v3363_v42, 5  ;;  %v3371_v39 = vshll.u32 %v7000_v32, 16  ;;  %v7357_v42 = vld [vmem:[#allocation3 + $0xb0] sm:$0x1]  ;;  %v7006_v32 = vld [vmem:[#allocation3 + $0xa8] sm:$0xf] }
 0x15b   : > { %7990 = vmatprep.mubr.bf16.mxu1 %v8650_v22  ;;  %v9619_v7 = vsel %vm9008_vm13, %v7376_v59, %v5900_v60  ;;  %v5902_v15 = vrot.slane %v5900_v60, 4  ;;  %v3355_v57 = vrot.slane %v3353_v63, 5  ;;  %v7350_v22 = vld [vmem:[#allocation3 + $0x94] sm:$0xf]  ;;  %v3359_v28 = vrot.slane %v3357_v23, 4 }
 0x15c   : > { %v3337_v0 = vrot.slane %v3336_v6, 4  ;;  %v5907_v19 = vrot.slane %v7350_v22, 5  ;;  %v3351_v56 = vrot.slane %v3350_v25, 4  ;;  %v3370_v9 = vrot.slane %v3368_v38, 4  ;;  %v7003_v59 = vld [vmem:[#allocation3 + $0x9c] sm:$0xf] }
 0x15d   : > { %v9625_v24 = vsel %vm9008_vm13, %v5902_v15, %v5903_v5  ;;  %v3360_v62 = vor.u32 %v3359_v28, %v3355_v57  ;;  %v3381_v54 = vshrl.u32 %v7001_v21, 16  ;;  %v3379_v29 = vrot.slane %v3377_v50, 5  ;;  %v7004_v5 = vld [vmem:[#allocation3 + $0xa0] sm:$0xf]  ;;  %v7005_v63 = vld [vmem:[#allocation3 + $0xa4] sm:$0x1] }
 0x15e   : > { %v3342_v33 = vsel %vm8857_vm10, %v3337_v0, %v3341_v51  ;;  %v7408_v34 = vcombine.low %v9619_v7, %v9625_v24  ;;  %v9639_v46 = vsel %vm9008_vm13, %v7377_v36, %v5907_v19  ;;  %v5909_v48 = vrot.slane %v5907_v19, 4  ;;  %v7355_v0 = vld [vmem:[#allocation3 + $0xa8] sm:$0xe] }
 0x15f   : > { %v7040_v47 = vcombine.low %v3332_v8, %v3342_v33  ;;  %v3361_v45 = vrot.slane %v3360_v62, 4  ;;  %v3356_v26 = vsel %vm8857_vm10, %v3351_v56, %v3355_v57  ;;  %v3387_v51 = vshll.u32 %v7002_v43, 16  ;;  %v7356_v8 = vld [vmem:[#allocation3 + $0xac] sm:$0xf]  ;;  %v7008_v56 = vld [vmem:[#allocation3 + $0xb0] sm:$0x1] }
 0x160   : > { %8211 = vmatmul.mubr.bf16.gmra.mrb[8].mxu0 %v7404_v61  ;;  %v5910_v61 = vrot.slane %v7351_v31, 5  ;;  %v3383_v60 = vrot.slane %v3381_v54, 4  ;;  %v7378_v10 = vrot.slane %v7352_v41, 9  ;;  %v5914_v11 = vrot.slane %v7353_v53, 5 }
 0x161   : > { %8214 = vmatprep.mubr.bf16.mxu0 %v7405_v16  ;;  %v3373_v16 = vrot.slane %v3371_v39, 5  ;;  %v3366_v52 = vsel %vm8857_vm10, %v3361_v45, %v3365_v37  ;;  %v3389_v6 = vrot.slane %v3387_v51, 5  ;;  %v5917_v14 = vrot.slane %v7354_v13, 5  ;;  %v7358_v45 = vld [vmem:[#allocation3 + $0xb4] sm:$0xe] }
 0x162   : > { %7991 = vmatmul.mubr.bf16.gmra.mrb[28].mxu1 %v8651_v1  ;;  %v9647_v58 = vsel %vm9008_vm13, %v5909_v48, %v5910_v61  ;;  %v7041_v1 = vcombine.low %v3356_v26, %v3366_v52  ;;  %v3384_v15 = vor.u32 %v3383_v60, %v3379_v29  ;;  %v3392_v23 = vshrl.u32 %v7003_v59, 16  ;;  %v7359_v26 = vld [vmem:[#allocation3 + $0xb8] sm:$0xf]  ;;  %v7360_v52 = vld [vmem:[#allocation3 + $0xbc] sm:$0x1] }
 0x163   : > { %8026 = vmatprep.mubr.bf16.mxu1 %v7039_v2  ;;  %v7409_v2 = vcombine.low %v9639_v46, %v9647_v58  ;;  %v3374_v4 = vor.u32 %v3373_v16, %v3370_v9  ;;  %v3395_v18 = vshll.u32 %v7003_v59, 16  ;;  %v9659_v17 = vsel %vm9008_vm13, %v7378_v10, %v5914_v11  ;;  %v7010_v60 = vld [vmem:[#allocation3 + $0xb8] sm:$0xf] }
 0x164   : > { %v5916_v20 = vrot.slane %v5914_v11, 4  ;;  %v3401_v57 = vshll.u32 %v7004_v5, 16  ;;  %v3405_v22 = vshrl.u32 %v7004_v5, 16  ;;  %v3385_v3 = vrot.slane %v3384_v15, 4 }
 0x165   : > { %v3375_v12 = vrot.slane %v3374_v4, 4  ;;  %v3397_v28 = vrot.slane %v3395_v18, 5  ;;  %v7379_v21 = vrot.slane %v7355_v0, 9  ;;  %v5921_v43 = vrot.slane %v7356_v8, 5 }
 0x166   : > { %v9665_v31 = vsel %vm9008_vm13, %v5916_v20, %v5917_v14  ;;  %v3403_v35 = vrot.slane %v3401_v57, 5  ;;  %v3407_v44 = vrot.slane %v3405_v22, 4  ;;  %v3390_v33 = vsel %vm8857_vm10, %v3385_v3, %v3389_v6  ;;  %v7011_v14 = vld [vmem:[#allocation3 + $0xbc] sm:$0x1]  ;;  %v7362_v57 = vld [vmem:[#allocation3 + $0xc4] sm:$0xf] }
 0x167   : > { %v3380_v55 = vsel %vm8857_vm10, %v3375_v12, %v3379_v29  ;;  %v7410_v25 = vcombine.low %v9659_v17, %v9665_v31  ;;  %v5924_v38 = vrot.slane %v7357_v42, 5  ;;  %v3416_v39 = vshrl.u32 %v7006_v32, 16 }
 0x168   : > { %8215 = vmatmul.mubr.bf16.gmra.mrb[12].mxu0 %v7406_v30  ;;  %v3394_v30 = vrot.slane %v3392_v23, 4  ;;  %v7042_v62 = vcombine.low %v3380_v55, %v3390_v33  ;;  %v3408_v37 = vor.u32 %v3407_v44, %v3403_v35  ;;  %v3419_v41 = vshll.u32 %v7006_v32, 16  ;;  %v7361_v23 = vld [vmem:[#allocation3 + $0xc0] sm:$0xe] }
 0x169   : > { %8218 = vmatprep.mubr.bf16.mxu0 %v7407_v27  ;;  %v3411_v27 = vshll.u32 %v7005_v63, 16  ;;  %v5922_v48 = vsel %vm9008_vm13, %v7379_v21, %v5921_v43  ;;  %v5923_v50 = vrot.slane %v5921_v43, 4  ;;  %v3418_v16 = vrot.slane %v3416_v39, 4  ;;  %v7012_v44 = vld [vmem:[#allocation3 + $0xc0] sm:$0xf] }
 0x16a   : > { %8027 = vmatmul.mubr.bf16.vlgmr.msra.gmra.mrb[16].mxu1 %v7040_v47  ;;  %v3398_v36 = vor.u32 %v3397_v28, %v3394_v30  ;;  %v7007_v47 = vld [vmem:[#allocation3 + $0xac] sm:$0xf]  ;;  %v3409_v46 = vrot.slane %v3408_v37, 4  ;;  %v3421_v54 = vrot.slane %v3419_v41, 5  ;;  %v3435_v59 = vshll.u32 %v7008_v56, 16 }
 0x16b   : > { %8030 = vmatprep.mubr.bf16.mxu1 %v7041_v1  ;;  %v3413_v19 = vrot.slane %v3411_v27, 5  ;;  %v3425_v53 = vshll.u32 %v7007_v47, 16  ;;  %v3429_v13 = vshrl.u32 %v7007_v47, 16  ;;  %v5925_v29 = vsel %vm9008_vm13, %v5923_v50, %v5924_v38  ;;  %v7009_v1 = vld [vmem:[#allocation3 + $0xb4] sm:$0xf] }
 0x16c   : > { %v3399_v61 = vrot.slane %v3398_v36, 4  ;;  %v7411_v7 = vcombine.low %v5922_v48, %v5925_v29  ;;  %v3422_v24 = vor.u32 %v3421_v54, %v3418_v16  ;;  %v3437_v5 = vrot.slane %v3435_v59, 5  ;;  %v7363_v30 = vld [vmem:[#allocation3 + $0xc8] sm:$0x1]  ;;  %v7013_v21 = vld [vmem:[#allocation3 + $0xc4] sm:$0xf] }
 0x16d   : > { %v3414_v58 = vsel %vm8857_vm10, %v3409_v46, %v3413_v19  ;;  %v3427_v51 = vrot.slane %v3425_v53, 5  ;;  %v7380_v6 = vrot.slane %v7358_v45, 9  ;;  %v5928_v10 = vrot.slane %v7359_v26, 5  ;;  %v7014_v43 = vld [vmem:[#allocation3 + $0xc8] sm:$0x1] }
 0x16e   : > { %v3404_v9 = vsel %vm8857_vm10, %v3399_v61, %v3403_v35  ;;  %v5931_v11 = vrot.slane %v7360_v52, 5  ;;  %v3440_v12 = vshrl.u32 %v7009_v1, 16  ;;  %v3443_v15 = vshll.u32 %v7009_v1, 16  ;;  %v7364_v41 = vld [vmem:[#allocation3 + $0xcc] sm:$0xe] }
 0x16f   : > { %v7043_v4 = vcombine.low %v3404_v9, %v3414_v58  ;;  %v5929_v18 = vsel %vm9008_vm13, %v7380_v6, %v5928_v10  ;;  %v5930_v0 = vrot.slane %v5928_v10, 4  ;;  %v3449_v17 = vshll.u32 %v7010_v60, 16  ;;  %v7365_v50 = vld [vmem:[#allocation3 + $0xd0] sm:$0xf]  ;;  %v7366_v54 = vld [vmem:[#allocation3 + $0xd4] sm:$0x1] }
 0x170   : > { %8219 = vmatmul.mubr.bf16.gmra.mrb[16].mxu0 %v7408_v34  ;;  %v3431_v34 = vrot.slane %v3429_v13, 4  ;;  %v3453_v20 = vshrl.u32 %v7010_v60, 16  ;;  %v3442_v55 = vrot.slane %v3440_v12, 4  ;;  %v3445_v3 = vrot.slane %v3443_v15, 5 }
 0x171   : > { %8222 = vmatprep.mubr.bf16.mxu0 %v7409_v2  ;;  %v3423_v2 = vrot.slane %v3422_v24, 4  ;;  %v5932_v28 = vsel %vm9008_vm13, %v5930_v0, %v5931_v11  ;;  %v3451_v42 = vrot.slane %v3449_v17, 5  ;;  %v3459_v35 = vshll.u32 %v7011_v14, 16 }
 0x172   : > { %8031 = vmatmul.mubr.bf16.gmra.mrb[20].mxu1 %v7042_v62  ;;  %v3432_v63 = vor.u32 %v3431_v34, %v3427_v51  ;;  %v3455_v31 = vrot.slane %v3453_v20, 4  ;;  %v7412_v32 = vcombine.low %v5929_v18, %v5932_v28  ;;  %v3446_v33 = vor.u32 %v3445_v3, %v3442_v55 }
 0x173   : > { %8034 = vmatprep.mubr.bf16.mxu1 %v7043_v4  ;;  %v3428_v22 = vsel %vm8857_vm10, %v3423_v2, %v3427_v51  ;;  %v7381_v36 = vrot.slane %v7361_v23, 9  ;;  %v3461_v37 = vrot.slane %v3459_v35, 5  ;;  %v5935_v19 = vrot.slane %v7362_v57, 5 }
 0x174   : > { %v3433_v8 = vrot.slane %v3432_v63, 4  ;;  %v3456_v62 = vor.u32 %v3455_v31, %v3451_v42  ;;  %v3447_v56 = vrot.slane %v3446_v33, 4  ;;  %v5938_v61 = vrot.slane %v7363_v30, 5 }
 0x175   : > { %v3464_v38 = vshrl.u32 %v7012_v44, 16  ;;  %v3467_v39 = vshll.u32 %v7012_v44, 16  ;;  %v5936_v45 = vsel %vm9008_vm13, %v7381_v36, %v5935_v19  ;;  %v5937_v46 = vrot.slane %v5935_v19, 4 }
 0x176   : > { %v3438_v27 = vsel %vm8857_vm10, %v3433_v8, %v3437_v5  ;;  %v3473_v48 = vshll.u32 %v7013_v21, 16  ;;  %v3452_v53 = vsel %vm8857_vm10, %v3447_v56, %v3451_v42  ;;  %v3477_v16 = vshrl.u32 %v7013_v21, 16 }
 0x177   : > { %v7044_v47 = vcombine.low %v3428_v22, %v3438_v27  ;;  %v3466_v26 = vrot.slane %v3464_v38, 4  ;;  %v3469_v9 = vrot.slane %v3467_v39, 5  ;;  %v5939_v52 = vsel %vm9008_vm13, %v5937_v46, %v5938_v61 }
 0x178   : > { %8223 = vmatmul.mubr.bf16.gmra.mrb[20].mxu0 %v7410_v25  ;;  %v3457_v25 = vrot.slane %v3456_v62, 4  ;;  %v3475_v58 = vrot.slane %v3473_v48, 5  ;;  %v3483_v29 = vshll.u32 %v7014_v43, 16  ;;  %v7413_v59 = vcombine.low %v5936_v45, %v5939_v52 }
 0x179   : > { %8226 = vmatprep.mubr.bf16.mxu0 %v7411_v7  ;;  %v3470_v1 = vor.u32 %v3469_v9, %v3466_v26  ;;  %v3479_v4 = vrot.slane %v3477_v16, 4  ;;  %v7382_v7 = vrot.slane %v7364_v41, 9  ;;  %v5942_v24 = vrot.slane %v7365_v50, 5 }
 0x17a   : > { %8035 = vmatmul.mubr.bf16.gmra.mrb[24].mxu1 %v7044_v47  ;;  %v3462_v13 = vsel %vm8857_vm10, %v3457_v25, %v3461_v37  ;;  %v5945_v34 = vrot.slane %v7366_v54, 5  ;;  %v3485_v6 = vrot.slane %v3483_v29, 5  ;;  %v8685_v18 = vmov 0.0  }
 0x17b   : > { %v7045_v51 = vcombine.low %v3452_v53, %v3462_v13  ;;  %v3471_v60 = vrot.slane %v3470_v1, 4  ;;  %v3480_v5 = vor.u32 %v3479_v4, %v3475_v58  ;;  %v5943_v10 = vsel %vm9008_vm13, %v7382_v7, %v5942_v24  ;;  %793 = vst [vmem:[%s9710_s10] sm:$0xff] %v8685_v18 }
 0x17c   : > { %v5944_v11 = vrot.slane %v5942_v24, 4 }
 0x17d   : > { %8038 = vmatprep.mubr.bf16.mxu1 %v7045_v51  ;;  %v3476_v14 = vsel %vm8857_vm10, %v3471_v60, %v3475_v58  ;;  %v3481_v2 = vrot.slane %v3480_v5, 4 }
 0x17e   : > { %v5946_v63 = vsel %vm9008_vm13, %v5944_v11, %v5945_v34 }
 0x17f   : > { %v3486_v12 = vsel %vm8857_vm10, %v3481_v2, %v3485_v6  ;;  %v7414_v15 = vcombine.low %v5943_v10, %v5946_v63 }
 0x180   : > { %8227 = vmatmul.mubr.bf16.gmra.mrb[24].mxu0 %v7412_v32  ;;  %v7046_v23 = vcombine.low %v3476_v14, %v3486_v12 }
 0x181   : > { %8230 = vmatprep.mubr.bf16.mxu0 %v7413_v59 }
 0x182   : > { %8039 = vmatmul.mubr.bf16.gmra.mrb[28].mxu1 %v7046_v23 }
 0x188   : > { %8231 = vmatmul.mubr.bf16.gmra.mrb[28].mxu0 %v7414_v15 }
 0x1fd   : > { %v7964_v0 = vpop.f32.mrb[0].mxu1 }
 0x1fe   : > { %v2832_v17 = vpop.f32.mrb[1].mxu1 }
 0x1ff   : > { %v7965_v49 = vpop.f32.mrb[2].mxu1 }
 0x200   : > { %v2835_v20 = vpop.f32.mrb[3].mxu1 }
 0x205   : > { %v7968_v57 = vpop.f32.mrb[4].mxu1 }
 0x206   : > { %v2848_v40 = vpop.f32.mrb[5].mxu1 }
 0x207   : > { %v7969_v22 = vpop.f32.mrb[6].mxu1 }
 0x208   : > { %v2851_v8 = vpop.f32.mrb[7].mxu1 }
 0x20d   : > { %v7972_v55 = vpop.f32.mrb[8].mxu1 }
 0x20e   : > { %v2864_v3 = vpop.f32.mrb[9].mxu1 }
 0x20f   : > { %v7973_v30 = vpop.f32.mrb[10].mxu1 }
 0x210   : > { %v2867_v28 = vpop.f32.mrb[11].mxu1 }
 0x215   : > { %v9713_v42 = vpop.f32.mrb[12].mxu1 }
 0x216   : > { %v9715_v31 = vpop.f32.mrb[13].mxu1 }
 0x217   : > { %v9717_v35 = vpop.f32.mrb[14].mxu1 }
 0x218   : > { %v9719_v44 = vpop.f32.mrb[15].mxu1 }
 0x223   : > { %v8204_v27 = vpop.f32.mrb[0].mxu0 }
 0x224   : > { %v8250_v32 = vadd.f32 %v8204_v27, %v7964_v0  ;;  %v6110_v33 = vpop.f32.mrb[1].mxu0 }
 0x225   : > { %v8251_v36 = vadd.f32 %v6110_v33, %v2832_v17  ;;  %v8205_v21 = vpop.f32.mrb[2].mxu0 }
 0x226   : > { %v8252_v47 = vadd.f32 %v8205_v21, %v7965_v49  ;;  %v6113_v62 = vpop.f32.mrb[3].mxu0  ;;  %v6568_v39 = vmul.f32 %v8250_v32, %v8250_v32 }
 0x227   : > { %v8253_v37 = vadd.f32 %v6113_v62, %v2835_v20  ;;  %v6566_v43 = vmul.f32 %v8251_v36, %v8251_v36 }
 0x228   : > { %v7499_v19 = vpack.c.bf16 %v8252_v47, %v8250_v32  ;;  %v6569_v50 = vmul.f32 %v8252_v47, %v8252_v47 }
 0x229   : > { %v7494_v56 = vpack.c.bf16 %v8253_v37, %v8251_v36  ;;  %v6526_v61 = vadd.f32 %v8253_v37, %v8251_v36  ;;  %v6567_v38 = vmul.f32 %v8253_v37, %v8253_v37 }
 0x22a   : > { %7571 = vst [vmem:[%s9726_s22 + $0x8] sm:$0xff] %v7499_v19  }
 0x22b   : > { %7495 = vst [vmem:[%s9726_s22] sm:$0xff] %v7494_v56   ;;  %v6527_v41 = vadd.f32 %v8250_v32, %v6526_v61  ;;  %v6598_v25 = vadd.f32 %v6567_v38, %v6566_v43  ;;  %v8208_v45 = vpop.f32.mrb[4].mxu0 }
 0x22c   : > { %v8254_v46 = vadd.f32 %v8208_v45, %v7968_v57  ;;  %v6126_v48 = vpop.f32.mrb[5].mxu0 }
 0x22d   : > { %v6599_v53 = vadd.f32 %v6598_v25, %v6568_v39  ;;  %v8255_v26 = vadd.f32 %v6126_v48, %v2848_v40  ;;  %v6528_v9 = vadd.f32 %v8252_v47, %v6527_v41  ;;  %v8209_v16 = vpop.f32.mrb[6].mxu0 }
 0x22e   : > { %v8256_v54 = vadd.f32 %v8209_v16, %v7969_v22  ;;  %v6129_v13 = vpop.f32.mrb[7].mxu0  ;;  %v6572_v34 = vmul.f32 %v8254_v46, %v8254_v46 }
 0x22f   : > { %v6529_v52 = vadd.f32 %v8255_v26, %v6528_v9  ;;  %v6570_v58 = vmul.f32 %v8255_v26, %v8255_v26  ;;  %v6600_v29 = vadd.f32 %v6599_v53, %v6569_v50  ;;  %v8257_v51 = vadd.f32 %v6129_v13, %v2851_v8 }
 0x230   : > { %v7509_v59 = vpack.c.bf16 %v8256_v54, %v8254_v46  ;;  %v6573_v14 = vmul.f32 %v8256_v54, %v8256_v54 }
 0x231   : > { %v6601_v1 = vadd.f32 %v6600_v29, %v6570_v58  ;;  %v7504_v4 = vpack.c.bf16 %v8257_v51, %v8255_v26  ;;  %v6530_v7 = vadd.f32 %v8257_v51, %v6529_v52  ;;  %v6571_v24 = vmul.f32 %v8257_v51, %v8257_v51 }
 0x232   : > { %7573 = vst [vmem:[%s9726_s22 + $0x18] sm:$0xff] %v7509_v59  }
 0x233   : > { %7572 = vst [vmem:[%s9726_s22 + $0x10] sm:$0xff] %v7504_v4   ;;  %v6531_v60 = vadd.f32 %v8254_v46, %v6530_v7  ;;  %v6602_v5 = vadd.f32 %v6601_v1, %v6571_v24  ;;  %v8212_v6 = vpop.f32.mrb[8].mxu0 }
 0x234   : > { %v8258_v10 = vadd.f32 %v8212_v6, %v7972_v55  ;;  %v6142_v11 = vpop.f32.mrb[9].mxu0 }
 0x235   : > { %v6603_v2 = vadd.f32 %v6602_v5, %v6572_v34  ;;  %v8259_v63 = vadd.f32 %v6142_v11, %v2864_v3  ;;  %v6532_v12 = vadd.f32 %v8256_v54, %v6531_v60  ;;  %v8213_v15 = vpop.f32.mrb[10].mxu0 }
 0x236   : > { %v8260_v23 = vadd.f32 %v8213_v15, %v7973_v30  ;;  %v6145_v18 = vpop.f32.mrb[11].mxu0  ;;  %v6576_v32 = vmul.f32 %v8258_v10, %v8258_v10 }
 0x237   : > { %v6533_v0 = vadd.f32 %v8259_v63, %v6532_v12  ;;  %v6574_v17 = vmul.f32 %v8259_v63, %v8259_v63  ;;  %v6604_v49 = vadd.f32 %v6603_v2, %v6573_v14  ;;  %v8261_v20 = vadd.f32 %v6145_v18, %v2867_v28 }
 0x238   : > { %v7519_v57 = vpack.c.bf16 %v8260_v23, %v8258_v10  ;;  %v6577_v37 = vmul.f32 %v8260_v23, %v8260_v23 }
 0x239   : > { %v6605_v40 = vadd.f32 %v6604_v49, %v6574_v17  ;;  %v7514_v22 = vpack.c.bf16 %v8261_v20, %v8259_v63  ;;  %v6534_v8 = vadd.f32 %v8261_v20, %v6533_v0  ;;  %v6575_v27 = vmul.f32 %v8261_v20, %v8261_v20 }
 0x23a   : > { %7575 = vst [vmem:[%s9726_s22 + $0x28] sm:$0xff] %v7519_v57  }
 0x23b   : > { %7574 = vst [vmem:[%s9726_s22 + $0x20] sm:$0xff] %v7514_v22   ;;  %v6535_v33 = vadd.f32 %v8258_v10, %v6534_v8  ;;  %v6606_v3 = vadd.f32 %v6605_v40, %v6575_v27  ;;  %v8216_v36 = vpop.f32.mrb[12].mxu0 }
 0x23c   : > { %v8262_v30 = vadd.f32 %v8216_v36, %v9713_v42  ;;  %v6158_v47 = vpop.f32.mrb[13].mxu0 }
 0x23d   : > { %v8028_v55 = vpop.f32.mrb[16].mxu1  ;;  %v6607_v19 = vadd.f32 %v6606_v3, %v6576_v32  ;;  %v8263_v28 = vadd.f32 %v6158_v47, %v9715_v31  ;;  %v6536_v43 = vadd.f32 %v8260_v23, %v6535_v33  ;;  %v8217_v56 = vpop.f32.mrb[14].mxu0 }
 0x23e   : > { %v3714_v21 = vpop.f32.mrb[17].mxu1  ;;  %v8264_v38 = vadd.f32 %v8217_v56, %v9717_v35  ;;  %v6161_v39 = vpop.f32.mrb[15].mxu0  ;;  %v6580_v31 = vmul.f32 %v8262_v30, %v8262_v30 }
 0x23f   : > { %v8029_v62 = vpop.f32.mrb[18].mxu1  ;;  %v6537_v41 = vadd.f32 %v8263_v28, %v6536_v43  ;;  %v6578_v25 = vmul.f32 %v8263_v28, %v8263_v28  ;;  %v6608_v45 = vadd.f32 %v6607_v19, %v6577_v37  ;;  %v8265_v46 = vadd.f32 %v6161_v39, %v9719_v44 }
 0x240   : > { %v3717_v61 = vpop.f32.mrb[19].mxu1  ;;  %v7529_v42 = vpack.c.bf16 %v8264_v38, %v8262_v30  ;;  %v6581_v51 = vmul.f32 %v8264_v38, %v8264_v38 }
 0x241   : > { %v6609_v48 = vadd.f32 %v6608_v45, %v6578_v25  ;;  %v7524_v50 = vpack.c.bf16 %v8265_v46, %v8263_v28  ;;  %v6538_v53 = vadd.f32 %v8265_v46, %v6537_v41  ;;  %v6579_v26 = vmul.f32 %v8265_v46, %v8265_v46 }
 0x242   : > { %7577 = vst [vmem:[%s9726_s22 + $0x38] sm:$0xff] %v7529_v42  }
 0x243   : > { %7576 = vst [vmem:[%s9726_s22 + $0x30] sm:$0xff] %v7524_v50   ;;  %v6539_v16 = vadd.f32 %v8262_v30, %v6538_v53  ;;  %v6610_v54 = vadd.f32 %v6609_v48, %v6579_v26  ;;  %v8220_v13 = vpop.f32.mrb[16].mxu0 }
 0x244   : > { %v8266_v35 = vadd.f32 %v8220_v13, %v8028_v55  ;;  %v6174_v58 = vpop.f32.mrb[17].mxu0 }
 0x245   : > { %v8032_v9 = vpop.f32.mrb[20].mxu1  ;;  %v6611_v59 = vadd.f32 %v6610_v54, %v6580_v31  ;;  %v8267_v44 = vadd.f32 %v6174_v58, %v3714_v21  ;;  %v6540_v1 = vadd.f32 %v8264_v38, %v6539_v16  ;;  %v8221_v4 = vpop.f32.mrb[18].mxu0 }
 0x246   : > { %v3730_v52 = vpop.f32.mrb[21].mxu1  ;;  %v8268_v24 = vadd.f32 %v8221_v4, %v8029_v62  ;;  %v6177_v34 = vpop.f32.mrb[19].mxu0  ;;  %v6584_v15 = vmul.f32 %v8266_v35, %v8266_v35 }
 0x247   : > { %v8033_v29 = vpop.f32.mrb[22].mxu1  ;;  %v6541_v60 = vadd.f32 %v8267_v44, %v6540_v1  ;;  %v6582_v5 = vmul.f32 %v8267_v44, %v8267_v44  ;;  %v6612_v6 = vadd.f32 %v6611_v59, %v6581_v51  ;;  %v8269_v10 = vadd.f32 %v6177_v34, %v3717_v61 }
 0x248   : > { %v3733_v7 = vpop.f32.mrb[23].mxu1  ;;  %v7539_v11 = vpack.c.bf16 %v8268_v24, %v8266_v35  ;;  %v6585_v20 = vmul.f32 %v8268_v24, %v8268_v24 }
 0x249   : > { %v6613_v14 = vadd.f32 %v6612_v6, %v6582_v5  ;;  %v7534_v2 = vpack.c.bf16 %v8269_v10, %v8267_v44  ;;  %v6542_v63 = vadd.f32 %v8269_v10, %v6541_v60  ;;  %v6583_v12 = vmul.f32 %v8269_v10, %v8269_v10 }
 0x24a   : > { %7579 = vst [vmem:[%s9726_s22 + $0x48] sm:$0xff] %v7539_v11  }
 0x24b   : > { %7578 = vst [vmem:[%s9726_s22 + $0x40] sm:$0xff] %v7534_v2   ;;  %v6543_v23 = vadd.f32 %v8266_v35, %v6542_v63  ;;  %v6614_v18 = vadd.f32 %v6613_v14, %v6583_v12  ;;  %v8224_v0 = vpop.f32.mrb[20].mxu0 }
 0x24c   : > { %v8270_v17 = vadd.f32 %v8224_v0, %v8032_v9  ;;  %v6190_v49 = vpop.f32.mrb[21].mxu0 }
 0x24d   : > { %v6615_v57 = vadd.f32 %v6614_v18, %v6584_v15  ;;  %v8271_v40 = vadd.f32 %v6190_v49, %v3730_v52  ;;  %v6544_v22 = vadd.f32 %v8268_v24, %v6543_v23  ;;  %v8225_v8 = vpop.f32.mrb[22].mxu0  ;;  %v8036_v32 = vpop.f32.mrb[24].mxu1 }
 0x24e   : > { %v8272_v27 = vadd.f32 %v8225_v8, %v8033_v29  ;;  %v6193_v55 = vpop.f32.mrb[23].mxu0  ;;  %v3746_v30 = vpop.f32.mrb[25].mxu1  ;;  %v6588_v61 = vmul.f32 %v8270_v17, %v8270_v17 }
 0x24f   : > { %v6545_v33 = vadd.f32 %v8271_v40, %v6544_v22  ;;  %v6586_v3 = vmul.f32 %v8271_v40, %v8271_v40  ;;  %v6616_v36 = vadd.f32 %v6615_v57, %v6585_v20  ;;  %v8273_v21 = vadd.f32 %v6193_v55, %v3733_v7  ;;  %v8037_v62 = vpop.f32.mrb[26].mxu1 }
 0x250   : > { %v7549_v47 = vpack.c.bf16 %v8272_v27, %v8270_v17  ;;  %v3749_v56 = vpop.f32.mrb[27].mxu1  ;;  %v6589_v46 = vmul.f32 %v8272_v27, %v8272_v27 }
 0x251   : > { %v6617_v37 = vadd.f32 %v6616_v36, %v6586_v3  ;;  %v7544_v19 = vpack.c.bf16 %v8273_v21, %v8271_v40  ;;  %v6546_v28 = vadd.f32 %v8273_v21, %v6545_v33  ;;  %v6587_v43 = vmul.f32 %v8273_v21, %v8273_v21 }
 0x252   : > { %7581 = vst [vmem:[%s9726_s22 + $0x58] sm:$0xff] %v7549_v47  }
 0x253   : > { %7580 = vst [vmem:[%s9726_s22 + $0x50] sm:$0xff] %v7544_v19   ;;  %v6547_v38 = vadd.f32 %v8270_v17, %v6546_v28  ;;  %v6618_v39 = vadd.f32 %v6617_v37, %v6587_v43  ;;  %v8228_v41 = vpop.f32.mrb[24].mxu0 }
 0x254   : > { %v8274_v25 = vadd.f32 %v8228_v41, %v8036_v32  ;;  %v6206_v45 = vpop.f32.mrb[25].mxu0  ;;  %v6565_v41 = vld [vmem:[%s9710_s10 + $0x1] sm:$0x1] }
 0x255   : > { %v6619_v42 = vadd.f32 %v6618_v39, %v6588_v61  ;;  %v8275_v48 = vadd.f32 %v6206_v45, %v3746_v30  ;;  %v6548_v50 = vadd.f32 %v8272_v27, %v6547_v38  ;;  %v8229_v53 = vpop.f32.mrb[26].mxu0  ;;  %v8040_v59 = vpop.f32.mrb[28].mxu1  ;;  %v6525_v61 = vld [vmem:[%s9710_s10] sm:$0x1] }
 0x256   : > { %v8276_v26 = vadd.f32 %v8229_v53, %v8037_v62  ;;  %v6209_v9 = vpop.f32.mrb[27].mxu0  ;;  %v6592_v44 = vmul.f32 %v8274_v25, %v8274_v25  ;;  %v3762_v24 = vpop.f32.mrb[29].mxu1 }
 0x257   : > { %v6549_v31 = vadd.f32 %v8275_v48, %v6548_v50  ;;  %v6590_v16 = vmul.f32 %v8275_v48, %v8275_v48  ;;  %v6620_v54 = vadd.f32 %v6619_v42, %v6589_v46  ;;  %v8277_v13 = vadd.f32 %v6209_v9, %v3749_v56  ;;  %v8041_v5 = vpop.f32.mrb[30].mxu1 }
 0x258   : > { %v7559_v52 = vpack.c.bf16 %v8276_v26, %v8274_v25  ;;  %v6593_v6 = vmul.f32 %v8276_v26, %v8276_v26  ;;  %v3765_v63 = vpop.f32.mrb[31].mxu1 }
 0x259   : > { %v6621_v35 = vadd.f32 %v6620_v54, %v6590_v16  ;;  %v7554_v58 = vpack.c.bf16 %v8277_v13, %v8275_v48  ;;  %v6550_v29 = vadd.f32 %v8277_v13, %v6549_v31  ;;  %v6591_v51 = vmul.f32 %v8277_v13, %v8277_v13 }
 0x25a   : > { %7583 = vst [vmem:[%s9726_s22 + $0x68] sm:$0xff] %v7559_v52  }
 0x25b   : > { %7582 = vst [vmem:[%s9726_s22 + $0x60] sm:$0xff] %v7554_v58   ;;  %v6551_v1 = vadd.f32 %v8274_v25, %v6550_v29  ;;  %v6622_v4 = vadd.f32 %v6621_v35, %v6591_v51  ;;  %v8232_v7 = vpop.f32.mrb[28].mxu0 }
 0x25c   : > { %v8278_v34 = vadd.f32 %v8232_v7, %v8040_v59  ;;  %v6222_v60 = vpop.f32.mrb[29].mxu0 }
 0x25d   : > { %v6623_v10 = vadd.f32 %v6622_v4, %v6592_v44  ;;  %v8279_v11 = vadd.f32 %v6222_v60, %v3762_v24  ;;  %v6552_v14 = vadd.f32 %v8276_v26, %v6551_v1  ;;  %v8233_v2 = vpop.f32.mrb[30].mxu0 }
 0x25e   : > { %v8280_v12 = vadd.f32 %v8233_v2, %v8041_v5  ;;  %v6225_v15 = vpop.f32.mrb[31].mxu0  ;;  %v6596_v8 = vmul.f32 %v8278_v34, %v8278_v34 }
 0x25f   : > { %v6553_v23 = vadd.f32 %v8279_v11, %v6552_v14  ;;  %v6594_v18 = vmul.f32 %v8279_v11, %v8279_v11  ;;  %v6624_v0 = vadd.f32 %v6623_v10, %v6593_v6  ;;  %v8281_v17 = vadd.f32 %v6225_v15, %v3765_v63 }
 0x260   : > { %v7569_v49 = vpack.c.bf16 %v8280_v12, %v8278_v34  ;;  %v6597_v32 = vmul.f32 %v8280_v12, %v8280_v12 }
 0x261   : > { %v6625_v20 = vadd.f32 %v6624_v0, %v6594_v18  ;;  %v7564_v57 = vpack.c.bf16 %v8281_v17, %v8279_v11  ;;  %v6554_v40 = vadd.f32 %v8281_v17, %v6553_v23  ;;  %v6595_v22 = vmul.f32 %v8281_v17, %v8281_v17 }
 0x262   : > { %7585 = vst [vmem:[%s9726_s22 + $0x78] sm:$0xff] %v7569_v49  }
 0x263   : > { %7584 = vst [vmem:[%s9726_s22 + $0x70] sm:$0xff] %v7564_v57   ;;  %v6555_v27 = vadd.f32 %v8278_v34, %v6554_v40  ;;  %v6626_v55 = vadd.f32 %v6625_v20, %v6595_v22 }
 0x265   : > { %v6556_v33 = vadd.f32 %v8280_v12, %v6555_v27  ;;  %v6627_v3 = vadd.f32 %v6626_v55, %v6596_v8 }
 0x267   : > { %v6557_v36 = vrot.slane %v6556_v33, 4  ;;  %v6628_v21 = vadd.f32 %v6627_v3, %v6597_v32 }
 0x269   : > { %v6558_v30 = vadd.f32 %v6557_v36, %v6556_v33  ;;  %v6629_v47 = vrot.slane %v6628_v21, 4 }
 0x26b   : > { %v6559_v62 = vrot.slane %v6558_v30, 2  ;;  %v6630_v37 = vadd.f32 %v6629_v47, %v6628_v21 }
 0x26d   : > { %v6560_v19 = vadd.f32 %v6559_v62, %v6558_v30  ;;  %v6631_v28 = vrot.slane %v6630_v37, 2 }
 0x26f   : > { %v6561_v43 = vrot.slane %v6560_v19, 1  ;;  %v6632_v56 = vadd.f32 %v6631_v28, %v6630_v37 }
 0x271   : > { %v6562_v38 = vadd.f32 %v6561_v43, %v6560_v19  ;;  %v6633_v39 = vrot.slane %v6632_v56, 1 }
 0x273   : > { %v6563_v25 = vadd.f32 %v6562_v38, %v6525_v61  ;;  %v6634_v45 = vadd.f32 %v6633_v39, %v6632_v56 }
 0x275   : > { %6564 = vst [vmem:[%s9710_s10] sm:$0x1] %v6563_v25  ;;  %v6635_v46 = vadd.f32 %v6634_v45, %v6565_v41 }
 0x277   : > { %6636 = vst [vmem:[%s9710_s10 + $0x1] sm:$0x1] %v6635_v46 }
 0x278 PF: > { %s16_s20 = sadd.s32 1, %s8682_s20   ;;  %s9777_s18 = smov %s8678_s19 }
 0x279   : > { %p13_p5 = scmp.ge.s32.totalorder %s16_s20, 4   ;;  %s9778_s19 = smov %s9780_s1 }
 0x27b   :  { %15 = sbr.rel (!%p13_p5) target bundleno = 2 (0x2), region = 94 }

// kernel: conv_block4.6
= control target key start
LH: loop header
LB: loop body
LE: loop exit
PB: predicated region body
PF: predicated region fallthrough
CT: control target
= control target key end

     0   :  { %s9105_s18 = smov 0   ;;  %s9107_s19 = smov 0   ;;  %s10692_s0 = inlined_call_operand.vmem [shape: bf16[2,16,16,128], index: 0, kind: input, shape index: {}]   ;;  %s10693_s1 = inlined_call_operand.vmem [shape: f32[1,128], index: 1, kind: input, shape index: {}]   ;;  %s10694_s2 = inlined_call_operand.vmem [shape: f32[1,128], index: 2, kind: input, shape index: {}]   ;;  %s10695_s3 = inlined_call_operand.vmem [shape: bf16[9,128,128], index: 3, kind: input, shape index: {}]   ;;  %s10696_s4 = inlined_call_operand.vmem [shape: bf16[2,16,16,128], index: 4, kind: output, shape index: {0}]   ;;  %s10697_s5 = inlined_call_operand.vmem [shape: f32[2,8,128], index: 5, kind: output, shape index: {1}]  }
   0x1   :  { %s9109_s20 = smov 0  }
   0x2 LB: > { %s28_s21 = sadd.s32 1, %s9067_s19  ;;  %p7007_p0 = scmp.ge.s32.totalorder %s9071_s20, 1  ;;  %s9071_s20 = sphi %s9109_s20, %s16_s20   ;;  %s9067_s19 = sphi %s9107_s19, %s10709_s19   ;;  %s9063_s18 = sphi %s9105_s18, %s10708_s18  }
   0x3   : > { %p30_p1 = scmp.ge.s32.totalorder %s28_s21, 2  ;;  %p204_p2 = scmp.lt.s32.totalorder %s9071_s20, 3 }
   0x5   : > { %s10711_s21 = smov (%p30_p1, %s28_s21), 0  ;;  %p205_p3 = pnand %p7007_p0, %p204_p2 }
   0x6   : > { %v8915_v0 = vld [vmem:[%s10695_s3] sm:$0xff] (!%p205_p3)   ;;  %v9131_v1 = vld [vmem:[%s10695_s3 + $0x8] sm:$0xff] (!%p205_p3)   ;;  %v9073_v2 = vmov (!%p205_p3), 0   ;;  %p241_p4 = scmp.lt.s32.totalorder (!%p205_p3), %s9063_s18, 1  ;;  %v8917_v4 = vld [vmem:[%s10695_s3 + $0x10] sm:$0xff] (!%p205_p3)   ;;  %vm914_vm1 = vcmask (!%p205_p3), 1043456  }
   0x7   : > { %208 = sbr.rel (%p205_p3) target bundleno = 674 (0x2a2), region = 36  ;;  %266 = vst [vmem:[#allocation3] sm:$0xf] (!%p205_p3), %v9073_v2  ;;  %267 = vst [vmem:[#allocation3 + $0x4] sm:$0xf] (!%p205_p3), %v9073_v2  ;;  %8185 = vmatprep.subr.bf16.mxu1 (!%p205_p3), %v8915_v0  ;;  %v8918_v3 = vld [vmem:[%s10695_s3 + $0x100] sm:$0xff] (!%p205_p3)  }
   0x8   : > { %268 = vst [vmem:[#allocation3 + $0x8] sm:$0x1] (!%p205_p3), %v9073_v2  ;;  %269 = vst [vmem:[#allocation3 + $0xc] sm:$0xf] (!%p205_p3), %v9073_v2  ;;  %8186 = vmatpush3.bf16.msra.mxu1 (!%p205_p3), %v8915_v0  ;;  %8377 = vmatprep.subr.bf16.mxu0 (!%p205_p3), %v8918_v3  ;;  %v8920_v5 = vld [vmem:[%s10695_s3 + $0x108] sm:$0xff] (!%p205_p3)   ;;  %v8922_v6 = vld [vmem:[%s10695_s3 + $0x110] sm:$0xff] (!%p205_p3)  }
   0x9   : > { %270 = vst [vmem:[#allocation3 + $0x10] sm:$0xf] (!%p205_p3), %v9073_v2  ;;  %271 = vst [vmem:[#allocation3 + $0x14] sm:$0x1] (!%p205_p3), %v9073_v2  ;;  %8187 = vmatprep.subr.bf16.mxu1 (!%p205_p3), %v9131_v1  ;;  %8378 = vmatpush3.bf16.msra.mxu0 (!%p205_p3), %v8918_v3  ;;  %v8919_v7 = vld [vmem:[%s10695_s3 + $0x18] sm:$0xff] (!%p205_p3)   ;;  %v8921_v9 = vld [vmem:[%s10695_s3 + $0x20] sm:$0xff] (!%p205_p3)  }
   0xa   : > { %272 = vst [vmem:[#allocation3 + $0x18] sm:$0xf] (!%p205_p3), %v9073_v2  ;;  %273 = vst [vmem:[#allocation3 + $0x1c] sm:$0xf] (!%p205_p3), %v9073_v2  ;;  %8379 = vmatprep.subr.bf16.mxu0 (!%p205_p3), %v8920_v5  ;;  %v8924_v8 = vld [vmem:[%s10695_s3 + $0x118] sm:$0xff] (!%p205_p3)   ;;  %v8926_v11 = vld [vmem:[%s10695_s3 + $0x120] sm:$0xff] (!%p205_p3)  }
   0xb   : > { %274 = vst [vmem:[#allocation3 + $0x20] sm:$0x1] (!%p205_p3), %v9073_v2  ;;  %275 = vst [vmem:[#allocation3 + $0x24] sm:$0xf] (!%p205_p3), %v9073_v2  ;;  %v9175_v13 = vld [vmem:[%s10693_s1] ss:$0 sm:$0xff] (!%p205_p3) }
   0xc   : > { %276 = vst [vmem:[#allocation3 + $0x28] sm:$0xf] (!%p205_p3), %v9073_v2  ;;  %277 = vst [vmem:[#allocation3 + $0x2c] sm:$0x1] (!%p205_p3), %v9073_v2  ;;  %8188 = vmatpush3.bf16.msra.mxu1 (!%p205_p3), %v9131_v1  ;;  %v8923_v14 = vld [vmem:[%s10695_s3 + $0x28] sm:$0xff] (!%p205_p3)   ;;  %v8925_v21 = vld [vmem:[%s10695_s3 + $0x30] sm:$0xff] (!%p205_p3)  }
   0xd   : > { %278 = vst [vmem:[#allocation3 + $0x30] sm:$0xf] (!%p205_p3), %v9073_v2  ;;  %279 = vst [vmem:[#allocation3 + $0x34] sm:$0xf] (!%p205_p3), %v9073_v2  ;;  %8189 = vmatprep.subr.bf16.mxu1 (!%p205_p3), %v8917_v4  ;;  %8380 = vmatpush3.bf16.msra.mxu0 (!%p205_p3), %v8920_v5  ;;  %v9183_v17 = vld [vmem:[%s10694_s2] ss:$0 sm:$0xff] (!%p205_p3) }
   0xe   : > { %280 = vst [vmem:[#allocation3 + $0x38] sm:$0x1] %v9073_v2  ;;  %281 = vst [vmem:[#allocation3 + $0x3c] sm:$0xf] %v9073_v2  ;;  %s10713_s18 = smov (!%p241_p4, %s9063_s18), 1  ;;  %8381 = vmatprep.subr.bf16.mxu0 %v8922_v6  ;;  %v8929_v10 = vld [vmem:[#allocation3] sm:$0xff]  }
   0xf   : > { %282 = vst [vmem:[#allocation3 + $0x40] sm:$0xf] %v9073_v2  ;;  %283 = vst [vmem:[#allocation3 + $0x44] sm:$0x1] %v9073_v2  ;;  %s7729_s11 = sshll.u32 %s10713_s18, 7  ;;  %8201 = vmatprep.mubr.bf16.mxu1 %v8929_v10  ;;  %v8928_v20 = vld [vmem:[%s10695_s3 + $0x128] sm:$0xff]  }
  0x10   : > { %284 = vst [vmem:[#allocation3 + $0x48] sm:$0xf] %v9073_v2  ;;  %285 = vst [vmem:[#allocation3 + $0x4c] sm:$0xf] %v9073_v2  ;;  %8190 = vmatpush3.bf16.msra.mxu1 %v8917_v4  ;;  %s9166_s22 = scalar_lea.vmem %s10692_s0, %s7729_s11  ;;  %v8927_v30 = vld [vmem:[%s10695_s3 + $0x38] sm:$0xff]   ;;  %vm921_vm2 = vcmask 1040384   ;;  %s10608_s6 = scalar_lea.vmem %s10696_s4, %s7729_s11 }
  0x11   : > { %286 = vst [vmem:[#allocation3 + $0x50] sm:$0x1] %v9073_v2  ;;  %287 = vst [vmem:[#allocation3 + $0x54] sm:$0xf] %v9073_v2  ;;  %8191 = vmatprep.subr.bf16.mxu1 %v8919_v7  ;;  %8382 = vmatpush3.bf16.msra.mxu0 %v8922_v6  ;;  %v7796_v12 = vld [vmem:[%s9166_s22] sm:$0xff]   ;;  %v7939_v24 = vld [vmem:[%s9166_s22 + $0x8] sm:$0xff]  }
  0x12   : > { %288 = vst [vmem:[#allocation3 + $0x58] sm:$0xf] %v9073_v2  ;;  %289 = vst [vmem:[#allocation3 + $0x5c] sm:$0x1] %v9073_v2  ;;  %8383 = vmatprep.subr.bf16.mxu0 %v8924_v8  ;;  %v7797_v15 = vunpack.c.l.bf16 %v7796_v12  ;;  %v7798_v16 = vunpack.c.h.bf16 %v7796_v12  ;;  %v7940_v25 = vld [vmem:[%s9166_s22 + $0x10] sm:$0xff]   ;;  %v7801_v26 = vunpack.c.l.bf16 %v7939_v24  ;;  %v7802_v27 = vunpack.c.h.bf16 %v7939_v24  ;;  %v9211_v43 = vld [vmem:[%s9166_s22 + $0x18] sm:$0xff]  }
  0x13   : > { %290 = vst [vmem:[#allocation3 + $0x60] sm:$0xf] %v9073_v2  ;;  %291 = vst [vmem:[#allocation3 + $0x64] sm:$0xf] %v9073_v2  ;;  %v7805_v28 = vunpack.c.l.bf16 %v7940_v25  ;;  %v7806_v29 = vunpack.c.h.bf16 %v7940_v25  ;;  %vm590_vm0 = vsmask.f32 256  ;;  %v7809_v58 = vunpack.c.l.bf16 %v9211_v43 }
  0x14   : > { %292 = vst [vmem:[#allocation3 + $0x68] sm:$0x1] %v9073_v2  ;;  %293 = vst [vmem:[#allocation3 + $0x6c] sm:$0xf] %v9073_v2  ;;  %8192 = vmatpush3.bf16.msra.mxu1 %v8919_v7  ;;  %v391_v18 = vmul.f32 %v7797_v15, %v9175_v13  ;;  %v392_v19 = vmul.f32 %v7798_v16, %v9175_v13  ;;  %v8931_v33 = vld [vmem:[%s10695_s3 + $0x130] sm:$0xff]   ;;  %v393_v34 = vmul.f32 %v7801_v26, %v9175_v13  ;;  %v8932_v49 = vld [vmem:[%s10695_s3 + $0x138] sm:$0xff]  }
  0x15   : > { %294 = vst [vmem:[#allocation3 + $0x70] sm:$0xf] %v9073_v2  ;;  %295 = vst [vmem:[#allocation3 + $0x74] sm:$0x1] %v9073_v2  ;;  %8193 = vmatprep.subr.bf16.mxu1 %v8921_v9  ;;  %8384 = vmatpush3.bf16.msra.mxu0 %v8924_v8  ;;  %v394_v35 = vmul.f32 %v7802_v27, %v9175_v13  ;;  %v395_v36 = vmul.f32 %v7805_v28, %v9175_v13  ;;  %vm591_vm3 = vsmask.f32 4368  ;;  %v7810_v59 = vunpack.c.h.bf16 %v9211_v43 }
  0x16   : > { %296 = vst [vmem:[#allocation3 + $0x78] sm:$0xf] %v9073_v2  ;;  %297 = vst [vmem:[#allocation3 + $0x7c] sm:$0xf] %v9073_v2  ;;  %8385 = vmatprep.subr.bf16.mxu0 %v8926_v11  ;;  %v430_v22 = vadd.f32 %v9183_v17, %v391_v18  ;;  %v431_v23 = vadd.f32 %v9183_v17, %v392_v19  ;;  %v396_v39 = vmul.f32 %v7806_v29, %v9175_v13  ;;  %vm915_vm4 = vsmask.f32 7938 }
  0x17   : > { %298 = vst [vmem:[#allocation3 + $0x80] sm:$0x1] %v9073_v2  ;;  %299 = vst [vmem:[#allocation3 + $0x84] sm:$0xf] %v9073_v2  ;;  %v432_v40 = vadd.f32 %v9183_v17, %v393_v34  ;;  %v433_v41 = vadd.f32 %v9183_v17, %v394_v35  ;;  %v434_v42 = vadd.f32 %v9183_v17, %v395_v36  ;;  %v917_v48 = vld [vmem:[#allocation3 + $0xc] sm:$0xf] }
  0x18   : > { %300 = vst [vmem:[#allocation3 + $0x88] sm:$0xf] %v9073_v2  ;;  %301 = vst [vmem:[#allocation3 + $0x8c] sm:$0x1] %v9073_v2  ;;  %8194 = vmatpush3.bf16.msra.mxu1 %v8921_v9  ;;  %v462_v31 = vmax.f32 %v430_v22, 0.0  ;;  %v463_v32 = vmax.f32 %v431_v23, 0.0  ;;  %v435_v52 = vadd.f32 %v9183_v17, %v396_v39  ;;  %v397_v28 = vmul.f32 %v7809_v58, %v9175_v13 }
  0x19   : > { %302 = vst [vmem:[#allocation3 + $0x90] sm:$0xf] %v9073_v2  ;;  %303 = vst [vmem:[#allocation3 + $0x94] sm:$0xf] %v9073_v2  ;;  %8195 = vmatprep.subr.bf16.mxu1 %v8923_v14  ;;  %8386 = vmatpush3.bf16.msra.mxu0 %v8926_v11  ;;  %v464_v50 = vmax.f32 %v432_v40, 0.0  ;;  %v465_v51 = vmax.f32 %v433_v41, 0.0 }
  0x1a   : > { %304 = vst [vmem:[#allocation3 + $0x98] sm:$0x1] %v9073_v2  ;;  %305 = vst [vmem:[#allocation3 + $0x9c] sm:$0xf] %v9073_v2  ;;  %8387 = vmatprep.subr.bf16.mxu0 %v8928_v20  ;;  %v7731_v37 = vpack.c.bf16 %v462_v31, %v462_v31  ;;  %v7732_v38 = vpack.c.bf16 %v463_v32, %v463_v32  ;;  %v466_v53 = vmax.f32 %v434_v42, 0.0  ;;  %v9220_v54 = vld [vmem:[%s10695_s3 + $0x40] sm:$0xff]  }
  0x1b   : > { %306 = vst [vmem:[#allocation3 + $0xa0] sm:$0xf] %v9073_v2  ;;  %307 = vst [vmem:[#allocation3 + $0xa4] sm:$0x1] %v9073_v2  ;;  %v7733_v61 = vpack.c.bf16 %v464_v50, %v464_v50  ;;  %v7734_v62 = vpack.c.bf16 %v465_v51, %v465_v51  ;;  %v467_v63 = vmax.f32 %v435_v52, 0.0  ;;  %v9245_v7 = vld [vmem:[%s10695_s3 + $0x140] sm:$0xff]   ;;  %v436_v42 = vadd.f32 %v9183_v17, %v397_v28 }
  0x1c   : > { %308 = vst [vmem:[#allocation3 + $0xa8] sm:$0xf] %v9073_v2  ;;  %309 = vst [vmem:[#allocation3 + $0xac] sm:$0xf] %v9073_v2  ;;  %8196 = vmatpush3.bf16.msra.mxu1 %v8923_v14  ;;  %v594_v44 = vshrl.u32 %v7731_v37, 16  ;;  %v597_v45 = vshll.u32 %v7731_v37, 16  ;;  %v7735_v0 = vpack.c.bf16 %v466_v53, %v466_v53 }
  0x1d   : > { %310 = vst [vmem:[#allocation3 + $0xb0] sm:$0x1] %v9073_v2  ;;  %311 = vst [vmem:[#allocation3 + $0xb4] sm:$0xf] %v9073_v2  ;;  %8197 = vmatprep.subr.bf16.mxu1 %v8925_v21  ;;  %8388 = vmatpush3.bf16.msra.mxu0 %v8928_v20  ;;  %v602_v46 = vshrl.u32 %v7732_v38, 16  ;;  %v605_v47 = vshll.u32 %v7732_v38, 16  ;;  %v7736_v16 = vpack.c.bf16 %v467_v63, %v467_v63 }
  0x1e   : > { %312 = vst [vmem:[#allocation3 + $0xb8] sm:$0xf] %v9073_v2  ;;  %313 = vst [vmem:[#allocation3 + $0xbc] sm:$0x1] %v9073_v2  ;;  %8389 = vmatprep.subr.bf16.mxu0 %v8931_v33  ;;  %v596_v56 = vrot.slane %v594_v44, 7  ;;  %v611_v8 = vshrl.u32 %v7733_v61, 16  ;;  %v398_v38 = vmul.f32 %v7810_v59, %v9175_v13 }
  0x1f   : > { %314 = vst [vmem:[#allocation3 + $0xc0] sm:$0xf] %v9073_v2  ;;  %315 = vst [vmem:[#allocation3 + $0xc4] sm:$0xf] %v9073_v2  ;;  %v604_v57 = vrot.slane %v602_v46, 7  ;;  %v614_v9 = vshll.u32 %v7733_v61, 16 }
  0x20   : > { %316 = vst [vmem:[#allocation3 + $0xc8] sm:$0x1] %v9073_v2  ;;  %317 = vst [vmem:[#allocation3 + $0xcc] sm:$0xf] %v9073_v2  ;;  %8198 = vmatpush3.bf16.msra.mxu1 %v8925_v21  ;;  %v923_v1 = vld [vmem:[#allocation3 + $0x14] sm:$0x1] }
  0x21   : > { %318 = vst [vmem:[#allocation3 + $0xd0] sm:$0xf] %v9073_v2  ;;  %319 = vst [vmem:[#allocation3 + $0xd4] sm:$0x1] %v9073_v2  ;;  %8199 = vmatprep.subr.bf16.mxu1 %v8927_v30  ;;  %v599_v2 = vor.u32 %v597_v45, %v596_v56  ;;  %v600_v3 = vrot.slane %v596_v56, 4  ;;  %v607_v4 = vor.u32 %v605_v47, %v604_v57  ;;  %8390 = vmatpush3.bf16.msra.mxu0 %v8931_v33  ;;  %v7942_v33 = vld [vmem:[%s9166_s22 + $0x20] sm:$0xff]  }
  0x22   : > { %vm9224_vm5 = vmor %vm590_vm0, %vm591_vm3  ;;  %v609_v6 = vrot.slane %v604_v57, 4  ;;  %8391 = vmatprep.subr.bf16.mxu0 %v8932_v49  ;;  %v619_v10 = vshrl.u32 %v7734_v62, 16  ;;  %v622_v11 = vshll.u32 %v7734_v62, 16  ;;  %v926_v15 = vld [vmem:[#allocation3 + $0x18] sm:$0xf]  ;;  %v628_v18 = vshrl.u32 %v7735_v0, 16 }
  0x23   : > { %vm9232_vm6 = vmand %vm914_vm1, %vm915_vm4  ;;  %v608_v12 = vsel %vm9224_vm5, %v600_v3, %v607_v4  ;;  %v613_v19 = vrot.slane %v611_v8, 7  ;;  %v631_v21 = vshll.u32 %v7735_v0, 16  ;;  %v933_v22 = vld [vmem:[#allocation3 + $0x24] sm:$0xf]  ;;  %v930_v24 = vld [vmem:[#allocation3 + $0x20] sm:$0x1]  ;;  %v437_v47 = vadd.f32 %v9183_v17, %v398_v38 }
  0x24   : > { %vm9238_vm7 = vmand %vm921_vm2, %vm590_vm0  ;;  %8200 = vmatpush3.bf16.msra.mxu1 %v8927_v30  ;;  %v918_v14 = vsel %vm9232_vm6, %v599_v2, %v917_v48  ;;  %920 = vst [vmem:[#allocation3 + $0x10] sm:$0xf] %v608_v12  ;;  %v621_v20 = vrot.slane %v619_v10, 7  ;;  %v630_v25 = vrot.slane %v628_v18, 7  ;;  %v636_v26 = vshrl.u32 %v7736_v16, 16  ;;  %v7943_v34 = vld [vmem:[%s9166_s22 + $0x28] sm:$0xff]  }
  0x25   : > { %8233 = vmatprep.subr.bf16.mxu1 %v9220_v54  ;;  %919 = vst [vmem:[#allocation3 + $0xc] sm:$0xf] %v918_v14  ;;  %v924_v23 = vsel %vm9238_vm7, %v609_v6, %v923_v1  ;;  %8392 = vmatpush3.bf16.msra.mxu0 %v8932_v49  ;;  %v639_v27 = vshll.u32 %v7736_v16, 16  ;;  %v616_v29 = vor.u32 %v614_v9, %v613_v19  ;;  %v617_v30 = vrot.slane %v613_v19, 4  ;;  %v937_v43 = vld [vmem:[#allocation3 + $0x2c] sm:$0x1] }
  0x26   : > { %925 = vst [vmem:[#allocation3 + $0x14] sm:$0x1] %v924_v23  ;;  %v624_v31 = vor.u32 %v622_v11, %v621_v20  ;;  %v626_v32 = vrot.slane %v621_v20, 4  ;;  %8425 = vmatprep.subr.bf16.mxu0 %v9245_v7  ;;  %v633_v35 = vor.u32 %v631_v21, %v630_v25  ;;  %v634_v36 = vrot.slane %v630_v25, 4  ;;  %v8940_v51 = vld [vmem:[%s10695_s3 + $0x48] sm:$0xff]   ;;  %v8945_v21 = vld [vmem:[%s10695_s3 + $0x50] sm:$0xff]  }
  0x27   : > { %v638_v37 = vrot.slane %v636_v26, 7  ;;  %vm1469_vm8 = vsmask.f32 3328  ;;  %vm1470_vm9 = vsmask.f32 7440  ;;  %v927_v40 = vsel %vm9232_vm6, %v616_v29, %v926_v15  ;;  %v9287_v15 = vld [vmem:[%s9166_s22 + $0x30] sm:$0xff]  }
  0x28   : > { %v625_v39 = vsel %vm9224_vm5, %v617_v30, %v624_v31  ;;  %v931_v41 = vsel %vm9238_vm7, %v626_v32, %v930_v24  ;;  %928 = vst [vmem:[#allocation3 + $0x18] sm:$0xf] %v927_v40  ;;  %v934_v46 = vsel %vm9232_vm6, %v633_v35, %v933_v22  ;;  %v468_v48 = vmax.f32 %v436_v42, 0.0  ;;  %v8950_v32 = vld [vmem:[%s10695_s3 + $0x58] sm:$0xff]   ;;  %vm9306_vm10 = vmor %vm1469_vm8, %vm1470_vm9  ;;  %s7012_s25 = sshll.u32 %s10713_s18, 3 }
  0x29   : > { %929 = vst [vmem:[#allocation3 + $0x1c] sm:$0xf] %v625_v39  ;;  %v641_v44 = vor.u32 %v639_v27, %v638_v37  ;;  %v643_v45 = vrot.slane %v638_v37, 4  ;;  %932 = vst [vmem:[#allocation3 + $0x20] sm:$0x1] %v931_v41  ;;  %v7813_v49 = vunpack.c.l.bf16 %v7942_v33  ;;  %v7814_v50 = vunpack.c.h.bf16 %v7942_v33  ;;  %s10590_s28 = scalar_lea.vmem %s10697_s5, %s7012_s25 }
  0x2a   : > { %935 = vst [vmem:[#allocation3 + $0x24] sm:$0xf] %v934_v46  ;;  %v7817_v52 = vunpack.c.l.bf16 %v7943_v34  ;;  %v469_v57 = vmax.f32 %v437_v47, 0.0  ;;  %v7818_v59 = vunpack.c.h.bf16 %v7943_v34  ;;  %v9276_v0 = vpack.c.bf16 %v468_v48, %v468_v48 }
  0x2b   : > { %v642_v56 = vsel %vm9224_vm5, %v634_v36, %v641_v44  ;;  %v938_v58 = vsel %vm9238_vm7, %v643_v45, %v937_v43  ;;  %v7240_v62 = vld [vmem:[#allocation3 + $0x10] sm:$0xf]  ;;  %v399_v1 = vmul.f32 %v7813_v49, %v9175_v13  ;;  %v400_v2 = vmul.f32 %v7814_v50, %v9175_v13 }
  0x2c   : > { %v8930_v53 = vld [vmem:[#allocation3 + $0xc] sm:$0xff]   ;;  %936 = vst [vmem:[#allocation3 + $0x28] sm:$0xf] %v642_v56  ;;  %939 = vst [vmem:[#allocation3 + $0x2c] sm:$0x1] %v938_v58  ;;  %v401_v3 = vmul.f32 %v7817_v52, %v9175_v13  ;;  %v3351_v8 = vshll.u32 %v7240_v62, 16  ;;  %v9282_v11 = vpack.c.bf16 %v469_v57, %v469_v57  ;;  %v402_v25 = vmul.f32 %v7818_v59, %v9175_v13 }
  0x2d   : > { %v7239_v61 = vld [vmem:[#allocation3 + $0xc] sm:$0xf]  ;;  %v7241_v63 = vld [vmem:[#allocation3 + $0x14] sm:$0x1]  ;;  %8202 = vmatmul.mubr.bf16.vlgmr.msra.gmra.mrb[0].mxu1 %v8930_v53  ;;  %v3355_v9 = vshrl.u32 %v7240_v62, 16  ;;  %v645_v12 = vshrl.u32 %v9276_v0, 16  ;;  %v9294_v24 = vadd.f32 %v9183_v17, %v400_v2  ;;  %v7821_v31 = vunpack.c.l.bf16 %v9287_v15 }
  0x2e   : > { %v3342_v4 = vshrl.u32 %v7239_v61, 16  ;;  %v3345_v6 = vshll.u32 %v7239_v61, 16  ;;  %v3361_v10 = vshll.u32 %v7241_v63, 16  ;;  %8234 = vmatpush3.bf16.msra.mxu1 %v9220_v54  ;;  %v648_v14 = vshll.u32 %v9276_v0, 16  ;;  %v940_v52 = vld [vmem:[#allocation3 + $0x30] sm:$0xf] }
  0x2f   : > { %v3353_v19 = vrot.slane %v3351_v8, 5  ;;  %v3357_v20 = vrot.slane %v3355_v9, 4  ;;  %8235 = vmatprep.subr.bf16.mxu1 %v8940_v51  ;;  %v438_v54 = vadd.f32 %v9183_v17, %v399_v1  ;;  %v7242_v28 = vld [vmem:[#allocation3 + $0x18] sm:$0xf]  ;;  %v9298_v30 = vadd.f32 %v9183_v17, %v401_v3 }
  0x30   : > { %v3344_v16 = vrot.slane %v3342_v4, 4  ;;  %v3347_v18 = vrot.slane %v3345_v6, 5  ;;  %v8933_v22 = vld [vmem:[#allocation3 + $0x18] sm:$0xff]   ;;  %v3363_v23 = vrot.slane %v3361_v10, 5  ;;  %v7244_v34 = vld [vmem:[#allocation3 + $0x20] sm:$0x1]  ;;  %v9311_v43 = vadd.f32 %v9183_v17, %v402_v25 }
  0x31   : > { %v3358_v27 = vor.u32 %v3357_v20, %v3353_v19  ;;  %v7243_v29 = vld [vmem:[#allocation3 + $0x1c] sm:$0xf]  ;;  %8205 = vmatprep.mubr.bf16.mxu1 %v8933_v22  ;;  %v3366_v35 = vshrl.u32 %v7242_v28, 16  ;;  %v3369_v36 = vshll.u32 %v7242_v28, 16  ;;  %v3385_v42 = vshll.u32 %v7244_v34, 16  ;;  %v8937_v6 = vld [vmem:[%s10695_s3 + $0x148] sm:$0xff]  }
  0x32   : > { %v3348_v26 = vor.u32 %v3347_v18, %v3344_v16  ;;  %v3375_v37 = vshll.u32 %v7243_v29, 16  ;;  %v3379_v38 = vshrl.u32 %v7243_v29, 16  ;;  %8236 = vmatpush3.bf16.msra.mxu1 %v8940_v51  ;;  %v647_v51 = vrot.slane %v645_v12, 7  ;;  %v7245_v53 = vld [vmem:[#allocation3 + $0x24] sm:$0xf] }
  0x33   : > { %v8934_v39 = vld [vmem:[#allocation3 + $0x24] sm:$0xff]   ;;  %v3359_v41 = vrot.slane %v3358_v27, 4  ;;  %8237 = vmatprep.subr.bf16.mxu1 %v8945_v21  ;;  %v3368_v44 = vrot.slane %v3366_v35, 4  ;;  %v3371_v45 = vrot.slane %v3369_v36, 5  ;;  %v3387_v50 = vrot.slane %v3385_v42, 5 }
  0x34   : > { %v3349_v40 = vrot.slane %v3348_v26, 4  ;;  %v3377_v46 = vrot.slane %v3375_v37, 5  ;;  %v3381_v47 = vrot.slane %v3379_v38, 4  ;;  %v653_v59 = vshrl.u32 %v9282_v11, 16  ;;  %v7246_v10 = vld [vmem:[#allocation3 + $0x28] sm:$0xf] }
  0x35   : > { %8206 = vmatmul.mubr.bf16.gmra.mrb[4].mxu1 %v8934_v39  ;;  %v3364_v49 = vsel %vm9306_vm10, %v3359_v41, %v3363_v23  ;;  %v3372_v57 = vor.u32 %v3371_v45, %v3368_v44  ;;  %v650_v61 = vor.u32 %v648_v14, %v647_v51  ;;  %v651_v62 = vrot.slane %v647_v51, 4  ;;  %v7247_v20 = vld [vmem:[#allocation3 + $0x2c] sm:$0x1]  ;;  %v8955_v22 = vld [vmem:[%s10695_s3 + $0x60] sm:$0xff]   ;;  %v947_v37 = vld [vmem:[#allocation3 + $0x3c] sm:$0xf] }
  0x36   : > { %v3354_v48 = vsel %vm9306_vm10, %v3349_v40, %v3353_v19  ;;  %v3382_v58 = vor.u32 %v3381_v47, %v3377_v46  ;;  %8238 = vmatpush3.bf16.msra.mxu1 %v8945_v21  ;;  %v656_v63 = vshll.u32 %v9282_v11, 16  ;;  %v470_v0 = vmax.f32 %v438_v54, 0.0  ;;  %v944_v21 = vld [vmem:[#allocation3 + $0x38] sm:$0x1]  ;;  %v8941_v47 = vld [vmem:[%s10695_s3 + $0x150] sm:$0xff]  }
  0x37   : > { %v7303_v56 = vcombine.low %v3354_v48, %v3364_v49  ;;  %8239 = vmatprep.subr.bf16.mxu1 %v8950_v32  ;;  %v3373_v1 = vrot.slane %v3372_v57, 4  ;;  %v655_v3 = vrot.slane %v653_v59, 7  ;;  %v471_v4 = vmax.f32 %v9294_v24, 0.0  ;;  %v951_v51 = vld [vmem:[#allocation3 + $0x44] sm:$0x1]  ;;  %v9345_v59 = vld [vmem:[%s9166_s22 + $0x38] sm:$0xff]  }
  0x38   : > { %v3383_v2 = vrot.slane %v3382_v58, 4  ;;  %v941_v8 = vsel %vm9232_vm6, %v650_v61, %v940_v52  ;;  %v7739_v9 = vpack.c.bf16 %v470_v0, %v470_v0  ;;  %v3390_v12 = vshrl.u32 %v7245_v53, 16 }
  0x39   : > { %8393 = vmatprep.mubr.bf16.mxu0 %v7303_v56  ;;  %v3393_v14 = vshll.u32 %v7245_v53, 16  ;;  %v3378_v11 = vsel %vm9306_vm10, %v3373_v1, %v3377_v46  ;;  %v658_v18 = vor.u32 %v656_v63, %v655_v3  ;;  %v660_v19 = vrot.slane %v655_v3, 4  ;;  %942 = vst [vmem:[#allocation3 + $0x30] sm:$0xf] %v941_v8  ;;  %v8942_v1 = vld [vmem:[%s10695_s3 + $0x158] sm:$0xff]  }
  0x3a   : > { %v3388_v16 = vsel %vm9306_vm10, %v3383_v2, %v3387_v50  ;;  %8240 = vmatpush3.bf16.msra.mxu1 %v8950_v32  ;;  %v7740_v54 = vpack.c.bf16 %v471_v4, %v471_v4  ;;  %v662_v24 = vshrl.u32 %v7739_v9, 16  ;;  %v665_v25 = vshll.u32 %v7739_v9, 16  ;;  %v8959_v4 = vld [vmem:[%s10695_s3 + $0x68] sm:$0xff]  }
  0x3b   : > { %v7304_v23 = vcombine.low %v3378_v11, %v3388_v16  ;;  %v659_v26 = vsel %vm9224_vm5, %v651_v62, %v658_v18  ;;  %v3392_v27 = vrot.slane %v3390_v12, 4  ;;  %v3395_v28 = vrot.slane %v3393_v14, 5  ;;  %8241 = vmatprep.subr.bf16.mxu1 %v8955_v22 }
  0x3c   : > { %v3399_v29 = vshll.u32 %v7246_v10, 16  ;;  %943 = vst [vmem:[#allocation3 + $0x34] sm:$0xf] %v659_v26  ;;  %v664_v34 = vrot.slane %v662_v24, 7  ;;  %v670_v35 = vshrl.u32 %v7740_v54, 16  ;;  %v673_v32 = vshll.u32 %v7740_v54, 16 }
  0x3d   : > { %8394 = vmatmul.mubr.bf16.vlgmr.msra.gmra.mrb[0].mxu0 %v7304_v23  ;;  %v3403_v36 = vshrl.u32 %v7246_v10, 16  ;;  %v3396_v38 = vor.u32 %v3395_v28, %v3392_v27  ;;  %v3409_v40 = vshll.u32 %v7247_v20, 16  ;;  %v945_v41 = vsel %vm9238_vm7, %v660_v19, %v944_v21  ;;  %v8946_v26 = vld [vmem:[%s10695_s3 + $0x160] sm:$0xff]  }
  0x3e   : > { %8426 = vmatpush3.bf16.msra.mxu0 %v9245_v7  ;;  %v3401_v39 = vrot.slane %v3399_v29, 5  ;;  %8242 = vmatpush3.bf16.msra.mxu1 %v8955_v22  ;;  %v667_v42 = vor.u32 %v665_v25, %v664_v34  ;;  %v668_v44 = vrot.slane %v664_v34, 4  ;;  %v672_v45 = vrot.slane %v670_v35, 7  ;;  %946 = vst [vmem:[#allocation3 + $0x38] sm:$0x1] %v945_v41 }
  0x3f   : > { %8427 = vmatprep.subr.bf16.mxu0 %v8937_v6  ;;  %v3405_v46 = vrot.slane %v3403_v36, 4  ;;  %v3397_v7 = vrot.slane %v3396_v38, 4  ;;  %v3411_v48 = vrot.slane %v3409_v40, 5  ;;  %v472_v49 = vmax.f32 %v9298_v30, 0.0  ;;  %8243 = vmatprep.subr.bf16.mxu1 %v8959_v4  ;;  %v954_v34 = vld [vmem:[#allocation3 + $0x48] sm:$0xf] }
  0x40   : > { %v473_v50 = vmax.f32 %v9311_v43, 0.0  ;;  %v675_v52 = vor.u32 %v673_v32, %v672_v45  ;;  %v677_v53 = vrot.slane %v672_v45, 4  ;;  %v948_v56 = vsel %vm9232_vm6, %v667_v42, %v947_v37  ;;  %v7248_v58 = vld [vmem:[#allocation3 + $0x30] sm:$0xf] }
  0x41   : > { %v3406_v57 = vor.u32 %v3405_v46, %v3401_v39  ;;  %949 = vst [vmem:[#allocation3 + $0x3c] sm:$0xf] %v948_v56  ;;  %v3402_v61 = vsel %vm9306_vm10, %v3397_v7, %v3401_v39  ;;  %v3414_v62 = vshrl.u32 %v7248_v58, 16  ;;  %v3417_v63 = vshll.u32 %v7248_v58, 16  ;;  %v8963_v32 = vld [vmem:[%s10695_s3 + $0x70] sm:$0xff]  }
  0x42   : > { %8428 = vmatpush3.bf16.msra.mxu0 %v8937_v6  ;;  %v7741_v30 = vpack.c.bf16 %v472_v49, %v472_v49  ;;  %v676_v43 = vsel %vm9224_vm5, %v668_v44, %v675_v52  ;;  %v7742_v2 = vpack.c.bf16 %v473_v50, %v473_v50  ;;  %v7822_v3 = vunpack.c.h.bf16 %v9287_v15  ;;  %8244 = vmatpush3.bf16.msra.mxu1 %v8959_v4  ;;  %v958_v50 = vld [vmem:[#allocation3 + $0x50] sm:$0x1]  ;;  %v8965_v4 = vld [vmem:[%s10695_s3 + $0x78] sm:$0xff]  }
  0x43   : > { %v3407_v0 = vrot.slane %v3406_v57, 4  ;;  %8429 = vmatprep.subr.bf16.mxu0 %v8941_v47  ;;  %v8938_v6 = vld [vmem:[#allocation3 + $0x30] sm:$0xff]   ;;  %950 = vst [vmem:[#allocation3 + $0x40] sm:$0xf] %v676_v43  ;;  %v3416_v9 = vrot.slane %v3414_v62, 4  ;;  %v403_v10 = vmul.f32 %v7821_v31, %v9175_v13  ;;  %v952_v12 = vsel %vm9238_vm7, %v677_v53, %v951_v51  ;;  %8245 = vmatprep.subr.bf16.mxu1 %v8963_v32  ;;  %v8947_v51 = vld [vmem:[%s10695_s3 + $0x168] sm:$0xff]  }
  0x44   : > { %v7249_v8 = vld [vmem:[#allocation3 + $0x34] sm:$0xf]  ;;  %v7825_v14 = vunpack.c.l.bf16 %v9345_v59  ;;  %v3419_v16 = vrot.slane %v3417_v63, 5  ;;  %953 = vst [vmem:[#allocation3 + $0x44] sm:$0x1] %v952_v12  ;;  %8209 = vmatprep.mubr.bf16.mxu1 %v8938_v6  ;;  %v679_v22 = vshrl.u32 %v7741_v30, 16  ;;  %v404_v35 = vmul.f32 %v7822_v3, %v9175_v13 }
  0x45   : > { %v3412_v11 = vsel %vm9306_vm10, %v3407_v0, %v3411_v48  ;;  %v3423_v18 = vshll.u32 %v7249_v8, 16  ;;  %v3427_v19 = vshrl.u32 %v7249_v8, 16  ;;  %v7250_v21 = vld [vmem:[#allocation3 + $0x38] sm:$0x1]  ;;  %v682_v15 = vshll.u32 %v7741_v30, 16  ;;  %v8951_v12 = vld [vmem:[%s10695_s3 + $0x170] sm:$0xff]  }
  0x46   : > { %v7305_v20 = vcombine.low %v3402_v61, %v3412_v11  ;;  %8430 = vmatpush3.bf16.msra.mxu0 %v8941_v47  ;;  %v687_v31 = vshrl.u32 %v7742_v2, 16  ;;  %v3420_v23 = vor.u32 %v3419_v16, %v3416_v9  ;;  %v3433_v25 = vshll.u32 %v7250_v21, 16  ;;  %8246 = vmatpush3.bf16.msra.mxu1 %v8963_v32  ;;  %v961_v11 = vld [vmem:[#allocation3 + $0x54] sm:$0xf]  ;;  %v8952_v32 = vld [vmem:[%s10695_s3 + $0x178] sm:$0xff]  }
  0x47   : > { %v3425_v54 = vrot.slane %v3423_v18, 5  ;;  %v3429_v24 = vrot.slane %v3427_v19, 4  ;;  %8431 = vmatprep.subr.bf16.mxu0 %v8942_v1  ;;  %v681_v27 = vrot.slane %v679_v22, 7  ;;  %v690_v29 = vshll.u32 %v7742_v2, 16  ;;  %8247 = vmatprep.subr.bf16.mxu1 %v8965_v4 }
  0x48   : > { %8397 = vmatprep.mubr.bf16.mxu0 %v7305_v20  ;;  %v689_v28 = vrot.slane %v687_v31, 7  ;;  %v3421_v36 = vrot.slane %v3420_v23, 4  ;;  %v3435_v38 = vrot.slane %v3433_v25, 5  ;;  %v442_v39 = vadd.f32 %v9183_v17, %v403_v10  ;;  %v7251_v40 = vld [vmem:[#allocation3 + $0x3c] sm:$0xf]  ;;  %v9396_v23 = vld [vmem:[%s9166_s22 + $0x40] sm:$0xff]  }
  0x49   : > { %v3430_v37 = vor.u32 %v3429_v24, %v3425_v54  ;;  %v684_v41 = vor.u32 %v682_v15, %v681_v27  ;;  %v685_v42 = vrot.slane %v681_v27, 4  ;;  %v443_v48 = vadd.f32 %v9183_v17, %v404_v35 }
  0x4a   : > { %8432 = vmatpush3.bf16.msra.mxu0 %v8942_v1  ;;  %v692_v44 = vor.u32 %v690_v29, %v689_v28  ;;  %v694_v45 = vrot.slane %v689_v28, 4  ;;  %v8939_v46 = vld [vmem:[#allocation3 + $0x3c] sm:$0xff]   ;;  %v3426_v47 = vsel %vm9306_vm10, %v3421_v36, %v3425_v54  ;;  %v474_v49 = vmax.f32 %v442_v39, 0.0  ;;  %8248 = vmatpush3.bf16.msra.mxu1 %v8965_v4 }
  0x4b   : > { %v3431_v7 = vrot.slane %v3430_v37, 4  ;;  %8433 = vmatprep.subr.bf16.mxu0 %v8946_v26  ;;  %v955_v53 = vsel %vm9232_vm6, %v684_v41, %v954_v34  ;;  %v7252_v56 = vld [vmem:[#allocation3 + $0x40] sm:$0xf]  ;;  %v7253_v57 = vld [vmem:[#allocation3 + $0x44] sm:$0x1]  ;;  %v3438_v58 = vshrl.u32 %v7251_v40, 16  ;;  %8210 = vmatmul.mubr.bf16.gmra.mrb[8].mxu1 %v8939_v46  ;;  %v7826_v31 = vunpack.c.h.bf16 %v9345_v59 }
  0x4c   : > { %v693_v52 = vsel %vm9224_vm5, %v685_v42, %v692_v44  ;;  %v3441_v61 = vshll.u32 %v7251_v40, 16  ;;  %956 = vst [vmem:[#allocation3 + $0x48] sm:$0xf] %v955_v53  ;;  %v475_v63 = vmax.f32 %v443_v48, 0.0  ;;  %v7743_v30 = vpack.c.bf16 %v474_v49, %v474_v49  ;;  %v8967_v54 = vld [vmem:[%s10695_s3 + $0x80] sm:$0xff]  }
  0x4d   : > { %v3436_v62 = vsel %vm9306_vm10, %v3431_v7, %v3435_v38  ;;  %957 = vst [vmem:[#allocation3 + $0x4c] sm:$0xf] %v693_v52  ;;  %v3447_v43 = vshll.u32 %v7252_v56, 16  ;;  %v3440_v1 = vrot.slane %v3438_v58, 4  ;;  %v3451_v3 = vshrl.u32 %v7252_v56, 16  ;;  %8281 = vmatprep.subr.bf16.mxu1 %v8967_v54 }
  0x4e   : > { %v7306_v0 = vcombine.low %v3426_v47, %v3436_v62  ;;  %v3443_v2 = vrot.slane %v3441_v61, 5  ;;  %8434 = vmatpush3.bf16.msra.mxu0 %v8946_v26  ;;  %v7744_v6 = vpack.c.bf16 %v475_v63, %v475_v63  ;;  %v696_v8 = vshrl.u32 %v7743_v30, 16  ;;  %v965_v49 = vld [vmem:[#allocation3 + $0x5c] sm:$0x1] }
  0x4f   : > { %v699_v9 = vshll.u32 %v7743_v30, 16  ;;  %v3449_v10 = vrot.slane %v3447_v43, 5  ;;  %8435 = vmatprep.subr.bf16.mxu0 %v8947_v51  ;;  %v3453_v18 = vrot.slane %v3451_v3, 4  ;;  %v3457_v19 = vshll.u32 %v7253_v57, 16 }
  0x50   : > { %8398 = vmatmul.mubr.bf16.gmra.mrb[4].mxu0 %v7306_v0  ;;  %v3444_v16 = vor.u32 %v3443_v2, %v3440_v1  ;;  %v959_v20 = vsel %vm9238_vm7, %v694_v45, %v958_v50  ;;  %v698_v21 = vrot.slane %v696_v8, 7  ;;  %v704_v22 = vshrl.u32 %v7744_v6, 16  ;;  %v9420_v50 = vld [vmem:[%s10695_s3 + $0x180] sm:$0xff]   ;;  %v9429_v8 = vld [vmem:[%s9166_s22 + $0x48] sm:$0xff]  }
  0x51   : > { %v707_v15 = vshll.u32 %v7744_v6, 16  ;;  %960 = vst [vmem:[#allocation3 + $0x50] sm:$0x1] %v959_v20  ;;  %v3454_v25 = vor.u32 %v3453_v18, %v3449_v10  ;;  %v3459_v26 = vrot.slane %v3457_v19, 5  ;;  %v405_v27 = vmul.f32 %v7825_v14, %v9175_v13 }
  0x52   : > { %v3445_v24 = vrot.slane %v3444_v16, 4  ;;  %8436 = vmatpush3.bf16.msra.mxu0 %v8947_v51  ;;  %v701_v28 = vor.u32 %v699_v9, %v698_v21  ;;  %v702_v29 = vrot.slane %v698_v21, 4  ;;  %v706_v34 = vrot.slane %v704_v22, 7 }
  0x53   : > { %v406_v35 = vmul.f32 %v7826_v31, %v9175_v13  ;;  %8437 = vmatprep.subr.bf16.mxu0 %v8951_v12  ;;  %v3455_v38 = vrot.slane %v3454_v25, 4  ;;  %v444_v39 = vadd.f32 %v9183_v17, %v405_v27  ;;  %v7829_v59 = vunpack.c.l.bf16 %v9396_v23  ;;  %v7254_v42 = vld [vmem:[#allocation3 + $0x48] sm:$0xf]  ;;  %v968_v25 = vld [vmem:[#allocation3 + $0x60] sm:$0xf] }
  0x54   : > { %v8943_v36 = vld [vmem:[#allocation3 + $0x48] sm:$0xff]   ;;  %v3450_v37 = vsel %vm9306_vm10, %v3445_v24, %v3449_v10  ;;  %v709_v14 = vor.u32 %v707_v15, %v706_v34  ;;  %v711_v40 = vrot.slane %v706_v34, 4  ;;  %v962_v41 = vsel %vm9232_vm6, %v701_v28, %v961_v11 }
  0x55   : > { %v7255_v44 = vld [vmem:[#allocation3 + $0x4c] sm:$0xf]  ;;  %v445_v45 = vadd.f32 %v9183_v17, %v406_v35  ;;  %8213 = vmatprep.mubr.bf16.mxu1 %v8943_v36  ;;  %963 = vst [vmem:[#allocation3 + $0x54] sm:$0xf] %v962_v41  ;;  %v3460_v46 = vsel %vm9306_vm10, %v3455_v38, %v3459_v26  ;;  %v3462_v47 = vshrl.u32 %v7254_v42, 16  ;;  %v3465_v7 = vshll.u32 %v7254_v42, 16 }
  0x56   : > { %v3471_v48 = vshll.u32 %v7255_v44, 16  ;;  %8438 = vmatpush3.bf16.msra.mxu0 %v8951_v12  ;;  %v710_v51 = vsel %vm9224_vm5, %v702_v29, %v709_v14  ;;  %v7307_v52 = vcombine.low %v3450_v37, %v3460_v46  ;;  %v3475_v53 = vshrl.u32 %v7255_v44, 16 }
  0x57   : > { %v476_v56 = vmax.f32 %v444_v39, 0.0  ;;  %8439 = vmatprep.subr.bf16.mxu0 %v8952_v32  ;;  %964 = vst [vmem:[#allocation3 + $0x58] sm:$0xf] %v710_v51  ;;  %v3464_v58 = vrot.slane %v3462_v47, 4  ;;  %v3467_v61 = vrot.slane %v3465_v7, 5  ;;  %v477_v63 = vmax.f32 %v445_v45, 0.0 }
  0x58   : > { %v7256_v57 = vld [vmem:[#allocation3 + $0x50] sm:$0x1]  ;;  %v3473_v62 = vrot.slane %v3471_v48, 5  ;;  %8401 = vmatprep.mubr.bf16.mxu0 %v7307_v52  ;;  %v3477_v30 = vrot.slane %v3475_v53, 4  ;;  %v7830_v1 = vunpack.c.h.bf16 %v9396_v23  ;;  %v407_v4 = vmul.f32 %v7829_v59, %v9175_v13  ;;  %v972_v47 = vld [vmem:[#allocation3 + $0x68] sm:$0x1] }
  0x59   : > { %v3481_v43 = vshll.u32 %v7256_v57, 16  ;;  %v7745_v0 = vpack.c.bf16 %v476_v56, %v476_v56  ;;  %v3468_v2 = vor.u32 %v3467_v61, %v3464_v58  ;;  %v7746_v3 = vpack.c.bf16 %v477_v63, %v477_v63  ;;  %v7948_v52 = vld [vmem:[%s9166_s22 + $0x50] sm:$0xff]  }
  0x5a   : > { %v966_v6 = vsel %vm9238_vm7, %v711_v40, %v965_v49  ;;  %8440 = vmatpush3.bf16.msra.mxu0 %v8952_v32  ;;  %v3478_v9 = vor.u32 %v3477_v30, %v3473_v62  ;;  %v408_v20 = vmul.f32 %v7830_v1, %v9175_v13  ;;  %v446_v15 = vadd.f32 %v9183_v17, %v407_v4 }
  0x5b   : > { %v3483_v10 = vrot.slane %v3481_v43, 5  ;;  %v713_v12 = vshrl.u32 %v7745_v0, 16  ;;  %v716_v11 = vshll.u32 %v7745_v0, 16  ;;  %967 = vst [vmem:[#allocation3 + $0x5c] sm:$0x1] %v966_v6  ;;  %8473 = vmatprep.subr.bf16.mxu0 %v9420_v50  ;;  %v3469_v16 = vrot.slane %v3468_v2, 4 }
  0x5c   : > { %v721_v18 = vshrl.u32 %v7746_v3, 16  ;;  %v724_v19 = vshll.u32 %v7746_v3, 16  ;;  %v3479_v21 = vrot.slane %v3478_v9, 4  ;;  %v7257_v31 = vld [vmem:[#allocation3 + $0x54] sm:$0xf]  ;;  %v7833_v23 = vunpack.c.l.bf16 %v9429_v8 }
  0x5d   : > { %v715_v22 = vrot.slane %v713_v12, 7  ;;  %v3474_v54 = vsel %vm9306_vm10, %v3469_v16, %v3473_v62  ;;  %v447_v26 = vadd.f32 %v9183_v17, %v408_v20  ;;  %v3486_v27 = vshrl.u32 %v7257_v31, 16  ;;  %v975_v0 = vld [vmem:[#allocation3 + $0x6c] sm:$0xf]  ;;  %v9453_v3 = vld [vmem:[%s10693_s1] ss:$0 sm:$0xff] }
  0x5e   : > { %v723_v24 = vrot.slane %v721_v18, 7  ;;  %v8944_v28 = vld [vmem:[#allocation3 + $0x54] sm:$0xff]   ;;  %v3484_v29 = vsel %vm9306_vm10, %v3479_v21, %v3483_v10  ;;  %v478_v35 = vmax.f32 %v446_v15, 0.0  ;;  %v3489_v40 = vshll.u32 %v7257_v31, 16 }
  0x5f   : > { %v718_v13 = vor.u32 %v716_v11, %v715_v22  ;;  %v719_v34 = vrot.slane %v715_v22, 4  ;;  %v7308_v32 = vcombine.low %v3474_v54, %v3484_v29  ;;  %v479_v38 = vmax.f32 %v447_v26, 0.0  ;;  %v7258_v39 = vld [vmem:[#allocation3 + $0x58] sm:$0xf]  ;;  %8214 = vmatmul.mubr.bf16.gmra.mrb[12].mxu1 %v8944_v28  ;;  %v9466_v22 = vld [vmem:[%s10694_s2] ss:$0 sm:$0xff] }
  0x60   : > { %v726_v36 = vor.u32 %v724_v19, %v723_v24  ;;  %v728_v37 = vrot.slane %v723_v24, 4  ;;  %v7747_v14 = vpack.c.bf16 %v478_v35, %v478_v35  ;;  %v3488_v17 = vrot.slane %v3486_v27, 4  ;;  %v7327_v35 = vld [vmem:[#allocation3 + $0xc] sm:$0xe] }
  0x61   : > { %v969_v59 = vsel %vm9232_vm6, %v718_v13, %v968_v25  ;;  %8402 = vmatmul.mubr.bf16.gmra.mrb[8].mxu0 %v7308_v32  ;;  %v7748_v42 = vpack.c.bf16 %v479_v38, %v479_v38  ;;  %v3495_v45 = vshll.u32 %v7258_v39, 16  ;;  %v3499_v46 = vshrl.u32 %v7258_v39, 16 }
  0x62   : > { %v727_v41 = vsel %vm9224_vm5, %v719_v34, %v726_v36  ;;  %970 = vst [vmem:[#allocation3 + $0x60] sm:$0xf] %v969_v59  ;;  %v7259_v44 = vld [vmem:[#allocation3 + $0x5c] sm:$0x1]  ;;  %v730_v7 = vshrl.u32 %v7747_v14, 16  ;;  %v733_v48 = vshll.u32 %v7747_v14, 16  ;;  %v973_v30 = vsel %vm9238_vm7, %v728_v37, %v972_v47 }
  0x63   : > { %971 = vst [vmem:[#allocation3 + $0x64] sm:$0xf] %v727_v41  ;;  %v3491_v49 = vrot.slane %v3489_v40, 5  ;;  %v3505_v51 = vshll.u32 %v7259_v44, 16  ;;  %v738_v53 = vshrl.u32 %v7748_v42, 16  ;;  %v741_v56 = vshll.u32 %v7748_v42, 16 }
  0x64   : > { %v3497_v57 = vrot.slane %v3495_v45, 5  ;;  %v3501_v58 = vrot.slane %v3499_v46, 4  ;;  %v732_v61 = vrot.slane %v730_v7, 7  ;;  %974 = vst [vmem:[#allocation3 + $0x68] sm:$0x1] %v973_v30  ;;  %v7834_v2 = vunpack.c.h.bf16 %v9429_v8 }
  0x65   : > { %v3492_v62 = vor.u32 %v3491_v49, %v3488_v17  ;;  %v3507_v63 = vrot.slane %v3505_v51, 5  ;;  %v9447_v43 = vrot.slane %v738_v53, 7  ;;  %v409_v4 = vmul.f32 %v9453_v3, %v7833_v23  ;;  %v9479_v49 = vld [vmem:[%s9166_s22 + $0x58] sm:$0xff]  }
  0x66   : > { %v3502_v1 = vor.u32 %v3501_v58, %v3497_v57  ;;  %v735_v6 = vor.u32 %v733_v48, %v732_v61  ;;  %v736_v9 = vrot.slane %v732_v61, 4  ;;  %v7837_v12 = vunpack.c.l.bf16 %v7948_v52 }
  0x67   : > { %v3493_v10 = vrot.slane %v3492_v62, 4  ;;  %v743_v11 = vor.u32 %v741_v56, %v9447_v43  ;;  %v745_v16 = vrot.slane %v9447_v43, 4  ;;  %v410_v19 = vmul.f32 %v9453_v3, %v7834_v2 }
  0x68   : > { %v3503_v18 = vrot.slane %v3502_v1, 4  ;;  %vm2338_vm11 = vcmask 1042432   ;;  %vm2339_vm12 = vcmask 1046532   ;;  %v976_v8 = vsel %vm9232_vm6, %v735_v6, %v975_v0 }
  0x69   : > { %v3498_v20 = vsel %vm9306_vm10, %v3493_v10, %v3497_v57  ;;  %v7260_v21 = vld [vmem:[#allocation3 + $0x60] sm:$0xf]  ;;  %v448_v15 = vadd.f32 %v9466_v22, %v409_v4  ;;  %v7838_v31 = vunpack.c.h.bf16 %v7948_v52  ;;  %v744_v54 = vsel %vm9224_vm5, %v736_v9, %v743_v11  ;;  %977 = vst [vmem:[#allocation3 + $0x6c] sm:$0xf] %v976_v8  ;;  %v7328_v57 = vld [vmem:[#allocation3 + $0x10] sm:$0xf]  ;;  %vm9490_vm13 = vmor %vm2338_vm11, %vm2339_vm12 }
  0x6a   : > { %v8948_v23 = vld [vmem:[#allocation3 + $0x60] sm:$0xff]   ;;  %v3508_v24 = vsel %vm9306_vm10, %v3503_v18, %v3507_v63  ;;  %v3510_v26 = vshrl.u32 %v7260_v21, 16  ;;  %v449_v27 = vadd.f32 %v9466_v22, %v410_v19  ;;  %978 = vst [vmem:[#allocation3 + $0x70] sm:$0xf] %v744_v54  ;;  %v3513_v29 = vshll.u32 %v7260_v21, 16 }
  0x6b   : > { %v7261_v25 = vld [vmem:[#allocation3 + $0x64] sm:$0xf]  ;;  %v7309_v28 = vcombine.low %v3498_v20, %v3508_v24  ;;  %8217 = vmatprep.mubr.bf16.mxu1 %v8948_v23  ;;  %v480_v36 = vmax.f32 %v448_v15, 0.0  ;;  %v411_v38 = vmul.f32 %v9453_v3, %v7837_v12  ;;  %v7262_v39 = vld [vmem:[#allocation3 + $0x68] sm:$0x1]  ;;  %v412_v40 = vmul.f32 %v9453_v3, %v7838_v31 }
  0x6c   : > { %v3519_v13 = vshll.u32 %v7261_v25, 16  ;;  %v3523_v34 = vshrl.u32 %v7261_v25, 16  ;;  %v3512_v32 = vrot.slane %v3510_v26, 4  ;;  %v481_v37 = vmax.f32 %v449_v27, 0.0  ;;  %v982_v10 = vld [vmem:[#allocation3 + $0x78] sm:$0xf] }
  0x6d   : > { %8405 = vmatprep.mubr.bf16.mxu0 %v7309_v28  ;;  %v3515_v59 = vrot.slane %v3513_v29, 5  ;;  %v3529_v41 = vshll.u32 %v7262_v39, 16  ;;  %v7749_v42 = vpack.c.bf16 %v480_v36, %v480_v36  ;;  %v450_v45 = vadd.f32 %v9466_v22, %v411_v38  ;;  %v7329_v18 = vld [vmem:[#allocation3 + $0x14] sm:$0x1]  ;;  %v7330_v31 = vld [vmem:[#allocation3 + $0x18] sm:$0xe] }
  0x6e   : > { %v3521_v14 = vrot.slane %v3519_v13, 5  ;;  %v3525_v17 = vrot.slane %v3523_v34, 4  ;;  %v7750_v44 = vpack.c.bf16 %v481_v37, %v481_v37  ;;  %v451_v7 = vadd.f32 %v9466_v22, %v412_v40  ;;  %v7331_v23 = vld [vmem:[#allocation3 + $0x1c] sm:$0xf]  ;;  %v7332_v27 = vld [vmem:[#allocation3 + $0x20] sm:$0x1] }
  0x6f   : > { %v3516_v46 = vor.u32 %v3515_v59, %v3512_v32  ;;  %v7375_v48 = vrot.slane %v7327_v35, 9  ;;  %v3531_v51 = vrot.slane %v3529_v41, 5  ;;  %v747_v52 = vshrl.u32 %v7749_v42, 16  ;;  %v989_v37 = vld [vmem:[#allocation3 + $0x84] sm:$0xf] }
  0x70   : > { %v3526_v47 = vor.u32 %v3525_v17, %v3521_v14  ;;  %v750_v53 = vshll.u32 %v7749_v42, 16  ;;  %v755_v56 = vshrl.u32 %v7750_v44, 16  ;;  %v758_v62 = vshll.u32 %v7750_v44, 16  ;;  %v7950_v40 = vld [vmem:[%s9166_s22 + $0x60] sm:$0xff]  }
  0x71   : > { %v3517_v58 = vrot.slane %v3516_v46, 4  ;;  %v482_v63 = vmax.f32 %v450_v45, 0.0  ;;  %v8949_v30 = vld [vmem:[#allocation3 + $0x6c] sm:$0xff]   ;;  %v749_v0 = vrot.slane %v747_v52, 7  ;;  %v483_v2 = vmax.f32 %v451_v7, 0.0 }
  0x72   : > { %v3527_v61 = vrot.slane %v3526_v47, 4  ;;  %v9481_v1 = vrot.slane %v755_v56, 7  ;;  %v7841_v4 = vunpack.c.l.bf16 %v9479_v49  ;;  %v4209_v19 = vrot.slane %v7328_v57, 5  ;;  %8218 = vmatmul.mubr.bf16.gmra.mrb[16].mxu1 %v8949_v30  ;;  %v7333_v46 = vld [vmem:[#allocation3 + $0x24] sm:$0xe]  ;;  %v9517_v57 = vld [vmem:[%s9166_s22 + $0x68] sm:$0xff]  }
  0x73   : > { %v3522_v6 = vsel %vm9306_vm10, %v3517_v58, %v3521_v14  ;;  %v7751_v12 = vpack.c.bf16 %v482_v63, %v482_v63  ;;  %v752_v20 = vor.u32 %v750_v53, %v749_v0  ;;  %v753_v21 = vrot.slane %v749_v0, 4  ;;  %v7334_v30 = vld [vmem:[#allocation3 + $0x28] sm:$0xf]  ;;  %v7335_v0 = vld [vmem:[#allocation3 + $0x2c] sm:$0x1] }
  0x74   : > { %v3532_v9 = vsel %vm9306_vm10, %v3527_v61, %v3531_v51  ;;  %v760_v15 = vor.u32 %v758_v62, %v9481_v1  ;;  %v762_v54 = vrot.slane %v9481_v1, 4  ;;  %v7752_v24 = vpack.c.bf16 %v483_v2, %v483_v2  ;;  %v7336_v2 = vld [vmem:[#allocation3 + $0x30] sm:$0xe] }
  0x75   : > { %v7310_v8 = vcombine.low %v3522_v6, %v3532_v9  ;;  %v764_v25 = vshrl.u32 %v7751_v12, 16  ;;  %v767_v26 = vshll.u32 %v7751_v12, 16  ;;  %v983_v29 = vsel %vm9232_vm6, %v752_v20, %v982_v10  ;;  %v8960_v12 = vld [vmem:[%s10695_s3 + $0x188] sm:$0xff]  }
  0x76   : > { %v761_v28 = vsel %vm9224_vm5, %v753_v21, %v760_v15  ;;  %v4210_v13 = vsel %vm9490_vm13, %v7375_v48, %v4209_v19  ;;  %v4211_v34 = vrot.slane %v4209_v19, 4  ;;  %984 = vst [vmem:[#allocation3 + $0x78] sm:$0xf] %v983_v29  ;;  %v772_v32 = vshrl.u32 %v7752_v24, 16  ;;  %v7338_v19 = vld [vmem:[#allocation3 + $0x38] sm:$0x1] }
  0x77   : > { %8406 = vmatmul.mubr.bf16.gmra.mrb[12].mxu0 %v7310_v8  ;;  %985 = vst [vmem:[#allocation3 + $0x7c] sm:$0xf] %v761_v28  ;;  %v766_v35 = vrot.slane %v764_v25, 7  ;;  %v775_v36 = vshll.u32 %v7752_v24, 16  ;;  %v4212_v38 = vrot.slane %v7329_v18, 5  ;;  %v7376_v39 = vrot.slane %v7330_v31, 9 }
  0x78   : > { %v4216_v59 = vrot.slane %v7331_v23, 5  ;;  %v4219_v14 = vrot.slane %v7332_v27, 5  ;;  %v7842_v17 = vunpack.c.h.bf16 %v9479_v49  ;;  %v9504_v44 = vrot.slane %v772_v32, 7  ;;  %v7337_v18 = vld [vmem:[#allocation3 + $0x34] sm:$0xf] }
  0x79   : > { %v769_v41 = vor.u32 %v767_v26, %v766_v35  ;;  %v770_v42 = vrot.slane %v766_v35, 4  ;;  %v4213_v45 = vsel %vm9490_vm13, %v4211_v34, %v4212_v38  ;;  %v413_v51 = vmul.f32 %v9453_v3, %v7841_v4 }
  0x7a   : > { %v7407_v47 = vcombine.low %v4210_v13, %v4213_v45  ;;  %v4217_v7 = vsel %vm9490_vm13, %v7376_v39, %v4216_v59  ;;  %v4218_v48 = vrot.slane %v4216_v59, 4  ;;  %v777_v52 = vor.u32 %v775_v36, %v9504_v44  ;;  %v996_v45 = vld [vmem:[#allocation3 + $0x90] sm:$0xf] }
  0x7b   : > { %v779_v49 = vrot.slane %v9504_v44, 4  ;;  %v990_v53 = vsel %vm9232_vm6, %v769_v41, %v989_v37  ;;  %v414_v56 = vmul.f32 %v9453_v3, %v7842_v17  ;;  %v452_v61 = vadd.f32 %v9466_v22, %v413_v51  ;;  %v8964_v37 = vld [vmem:[%s10695_s3 + $0x190] sm:$0xff]  }
  0x7c   : > { %991 = vst [vmem:[#allocation3 + $0x84] sm:$0xf] %v990_v53  ;;  %8441 = vmatprep.mubr.bf16.mxu0 %v7407_v47  ;;  %v4220_v58 = vsel %vm9490_vm13, %v4218_v48, %v4219_v14  ;;  %v7845_v62 = vunpack.c.l.bf16 %v7950_v40  ;;  %v7846_v63 = vunpack.c.h.bf16 %v7950_v40  ;;  %v778_v4 = vsel %vm9224_vm5, %v770_v42, %v777_v52 }
  0x7d   : > { %v7408_v6 = vcombine.low %v4217_v7, %v4220_v58  ;;  %v453_v9 = vadd.f32 %v9466_v22, %v414_v56  ;;  %v7377_v10 = vrot.slane %v7333_v46, 9  ;;  %992 = vst [vmem:[#allocation3 + $0x88] sm:$0xf] %v778_v4  ;;  %v484_v20 = vmax.f32 %v452_v61, 0.0  ;;  %v8966_v58 = vld [vmem:[%s10695_s3 + $0x198] sm:$0xff]  }
  0x7e   : > { %v8953_v8 = vld [vmem:[#allocation3 + $0x78] sm:$0xff]   ;;  %v415_v21 = vmul.f32 %v9453_v3, %v7845_v62  ;;  %v416_v15 = vmul.f32 %v9453_v3, %v7846_v63  ;;  %v7849_v31 = vunpack.c.l.bf16 %v9517_v57  ;;  %v4223_v24 = vrot.slane %v7334_v30, 5 }
  0x7f   : > { %8442 = vmatmul.mubr.bf16.vlgmr.msra.gmra.mrb[0].mxu0 %v7408_v6  ;;  %v485_v23 = vmax.f32 %v453_v9, 0.0  ;;  %v4226_v25 = vrot.slane %v7335_v0, 5  ;;  %v7378_v26 = vrot.slane %v7336_v2, 9  ;;  %8221 = vmatprep.mubr.bf16.mxu1 %v8953_v8  ;;  %v7753_v27 = vpack.c.bf16 %v484_v20, %v484_v20  ;;  %v7339_v8 = vld [vmem:[#allocation3 + $0x3c] sm:$0xe] }
  0x80   : > { %8474 = vmatpush3.bf16.msra.mxu0 %v9420_v50  ;;  %v454_v28 = vadd.f32 %v9466_v22, %v415_v21  ;;  %v455_v29 = vadd.f32 %v9466_v22, %v416_v15  ;;  %v4230_v13 = vrot.slane %v7337_v18, 5  ;;  %v4224_v35 = vsel %vm9490_vm13, %v7377_v10, %v4223_v24 }
  0x81   : > { %v7754_v34 = vpack.c.bf16 %v485_v23, %v485_v23  ;;  %v4225_v32 = vrot.slane %v4223_v24, 4  ;;  %8475 = vmatprep.subr.bf16.mxu0 %v8960_v12  ;;  %v4233_v36 = vrot.slane %v7338_v19, 5  ;;  %v781_v38 = vshrl.u32 %v7753_v27, 16  ;;  %v7340_v23 = vld [vmem:[#allocation3 + $0x40] sm:$0xf] }
  0x82   : > { %v784_v39 = vshll.u32 %v7753_v27, 16  ;;  %v486_v50 = vmax.f32 %v454_v28, 0.0  ;;  %v487_v59 = vmax.f32 %v455_v29, 0.0  ;;  %v4231_v41 = vsel %vm9490_vm13, %v7378_v26, %v4230_v13  ;;  %v7341_v24 = vld [vmem:[#allocation3 + $0x44] sm:$0x1] }
  0x83   : > { %v789_v14 = vshrl.u32 %v7754_v34, 16  ;;  %v792_v17 = vshll.u32 %v7754_v34, 16  ;;  %v4227_v40 = vsel %vm9490_vm13, %v4225_v32, %v4226_v25  ;;  %v783_v42 = vrot.slane %v781_v38, 7  ;;  %v8968_v25 = vld [vmem:[%s10695_s3 + $0x1a0] sm:$0xff]  }
  0x84   : > { %v7755_v46 = vpack.c.bf16 %v486_v50, %v486_v50  ;;  %v7756_v47 = vpack.c.bf16 %v487_v59, %v487_v59  ;;  %v7409_v7 = vcombine.low %v4224_v35, %v4227_v40  ;;  %8476 = vmatpush3.bf16.msra.mxu0 %v8960_v12  ;;  %v8954_v48 = vld [vmem:[#allocation3 + $0x84] sm:$0xff]   ;;  %v4232_v52 = vrot.slane %v4230_v13, 4  ;;  %v1003_v12 = vld [vmem:[#allocation3 + $0x9c] sm:$0xf] }
  0x85   : > { %v9543_v51 = vrot.slane %v789_v14, 7  ;;  %v7850_v53 = vunpack.c.h.bf16 %v9517_v57  ;;  %v417_v56 = vmul.f32 %v9453_v3, %v7849_v31  ;;  %8477 = vmatprep.subr.bf16.mxu0 %v8964_v37  ;;  %v786_v61 = vor.u32 %v784_v39, %v783_v42  ;;  %8222 = vmatmul.mubr.bf16.gmra.mrb[20].mxu1 %v8954_v48  ;;  %v7952_v57 = vld [vmem:[%s9166_s22 + $0x70] sm:$0xff]  }
  0x86   : > { %v787_v62 = vrot.slane %v783_v42, 4  ;;  %v798_v63 = vshrl.u32 %v7755_v46, 16  ;;  %v801_v30 = vshll.u32 %v7755_v46, 16  ;;  %8445 = vmatprep.mubr.bf16.mxu0 %v7409_v7  ;;  %v806_v4 = vshrl.u32 %v7756_v47, 16  ;;  %v8970_v42 = vld [vmem:[%s10695_s3 + $0x1a8] sm:$0xff]  }
  0x87   : > { %v794_v0 = vor.u32 %v792_v17, %v9543_v51  ;;  %v796_v2 = vrot.slane %v9543_v51, 4  ;;  %v809_v6 = vshll.u32 %v7756_v47, 16  ;;  %v997_v9 = vsel %vm9232_vm6, %v786_v61, %v996_v45  ;;  %v9581_v7 = vld [vmem:[#allocation3 + $0x50] sm:$0x1] }
  0x88   : > { %v800_v10 = vrot.slane %v798_v63, 7  ;;  %v4234_v18 = vsel %vm9490_vm13, %v4232_v52, %v4233_v36  ;;  %v418_v19 = vmul.f32 %v9453_v3, %v7850_v53  ;;  %8478 = vmatpush3.bf16.msra.mxu0 %v8964_v37  ;;  %998 = vst [vmem:[#allocation3 + $0x90] sm:$0xf] %v997_v9  ;;  %v9560_v21 = vrot.slane %v806_v4, 7  ;;  %v9569_v36 = vld [vmem:[#allocation3 + $0x48] sm:$0xe] }
  0x89   : > { %v795_v20 = vsel %vm9224_vm5, %v787_v62, %v794_v0  ;;  %v7410_v15 = vcombine.low %v4231_v41, %v4234_v18  ;;  %v456_v31 = vadd.f32 %v9466_v22, %v417_v56  ;;  %8479 = vmatprep.subr.bf16.mxu0 %v8966_v58  ;;  %v7853_v29 = vunpack.c.l.bf16 %v7952_v57  ;;  %v7343_v41 = vld [vmem:[#allocation3 + $0x4c] sm:$0xf]  ;;  %v979_v52 = vld [vmem:[#allocation3 + $0x74] sm:$0x1] }
  0x8a   : > { %999 = vst [vmem:[#allocation3 + $0x94] sm:$0xf] %v795_v20  ;;  %v803_v26 = vor.u32 %v801_v30, %v800_v10  ;;  %v804_v27 = vrot.slane %v800_v10, 4  ;;  %v457_v28 = vadd.f32 %v9466_v22, %v418_v19  ;;  %v811_v13 = vor.u32 %v809_v6, %v9560_v21  ;;  %v8972_v61 = vld [vmem:[%s10695_s3 + $0x1b0] sm:$0xff]   ;;  %v1010_v30 = vld [vmem:[#allocation3 + $0xa8] sm:$0xf] }
  0x8b   : > { %v813_v34 = vrot.slane %v9560_v21, 4  ;;  %8446 = vmatmul.mubr.bf16.gmra.mrb[4].mxu0 %v7410_v15  ;;  %v488_v35 = vmax.f32 %v456_v31, 0.0  ;;  %v7854_v32 = vunpack.c.h.bf16 %v7952_v57  ;;  %v419_v39 = vmul.f32 %v9453_v3, %v7853_v29  ;;  %v1421_v20 = vld [vmem:[#allocation3] sm:$0xf]  ;;  %v1422_v15 = vld [vmem:[#allocation3 + $0x4] sm:$0xf] }
  0x8c   : > { %v1004_v37 = vsel %vm9232_vm6, %v803_v26, %v1003_v12  ;;  %v489_v38 = vmax.f32 %v457_v28, 0.0  ;;  %v7379_v50 = vrot.slane %v7339_v8, 9  ;;  %8480 = vmatpush3.bf16.msra.mxu0 %v8966_v58  ;;  %v812_v59 = vsel %vm9224_vm5, %v804_v27, %v811_v13 }
  0x8d   : > { %1005 = vst [vmem:[#allocation3 + $0x9c] sm:$0xf] %v1004_v37  ;;  %v7757_v14 = vpack.c.bf16 %v488_v35, %v488_v35  ;;  %v420_v17 = vmul.f32 %v9453_v3, %v7854_v32  ;;  %v4237_v40 = vrot.slane %v7340_v23, 5  ;;  %8481 = vmatprep.subr.bf16.mxu0 %v8968_v25  ;;  %1006 = vst [vmem:[#allocation3 + $0xa0] sm:$0xf] %v812_v59  ;;  %v4240_v47 = vrot.slane %v7341_v24, 5 }
  0x8e   : > { %v7758_v45 = vpack.c.bf16 %v489_v38, %v489_v38  ;;  %v458_v46 = vadd.f32 %v9466_v22, %v419_v39  ;;  %v7380_v48 = vrot.slane %v9569_v36, 9  ;;  %v4244_v10 = vrot.slane %v7343_v41, 5  ;;  %v1017_v32 = vld [vmem:[#allocation3 + $0xb4] sm:$0xf]  ;;  %v1423_v37 = vld [vmem:[#allocation3 + $0x8] sm:$0x1] }
  0x8f   : > { %v815_v53 = vshrl.u32 %v7757_v14, 16  ;;  %v818_v56 = vshll.u32 %v7757_v14, 16  ;;  %v459_v3 = vadd.f32 %v9466_v22, %v420_v17  ;;  %v4238_v58 = vsel %vm9490_vm13, %v7379_v50, %v4237_v40  ;;  %v8974_v38 = vld [vmem:[%s10695_s3 + $0x1b8] sm:$0xff]   ;;  %v1424_v17 = vld [vmem:[#allocation3 + $0xc] sm:$0xf] }
  0x90   : > { %v823_v62 = vshrl.u32 %v7758_v45, 16  ;;  %v826_v63 = vshll.u32 %v7758_v45, 16  ;;  %v490_v0 = vmax.f32 %v458_v46, 0.0  ;;  %v4239_v4 = vrot.slane %v4237_v40, 4  ;;  %8482 = vmatpush3.bf16.msra.mxu0 %v8968_v25  ;;  %v1425_v46 = vld [vmem:[#allocation3 + $0x10] sm:$0xf] }
  0x91   : > { %v8957_v6 = vld [vmem:[#allocation3 + $0x90] sm:$0xff]   ;;  %v817_v57 = vrot.slane %v815_v53, 7  ;;  %v491_v9 = vmax.f32 %v459_v3, 0.0  ;;  %v980_v22 = vsel %vm9238_vm7, %v745_v16, %v979_v52  ;;  %8483 = vmatprep.subr.bf16.mxu0 %v8970_v42  ;;  %v4247_v8 = vrot.slane %v9581_v7, 5 }
  0x92   : > { %v9594_v12 = vrot.slane %v823_v62, 7  ;;  %v7759_v18 = vpack.c.bf16 %v490_v0, %v490_v0  ;;  %v4241_v19 = vsel %vm9490_vm13, %v4239_v4, %v4240_v47  ;;  %981 = vst [vmem:[#allocation3 + $0x74] sm:$0x1] %v980_v22  ;;  %8225 = vmatprep.mubr.bf16.mxu1 %v8957_v6  ;;  %v4245_v36 = vsel %vm9490_vm13, %v7380_v48, %v4244_v10  ;;  %v1426_v53 = vld [vmem:[#allocation3 + $0x14] sm:$0x1] }
  0x93   : > { %v820_v31 = vor.u32 %v818_v56, %v817_v57  ;;  %v821_v23 = vrot.slane %v817_v57, 4  ;;  %v7760_v24 = vpack.c.bf16 %v491_v9, %v491_v9  ;;  %v7411_v43 = vcombine.low %v4238_v58, %v4241_v19  ;;  %v7345_v9 = vld [vmem:[#allocation3 + $0x54] sm:$0xe]  ;;  %v7346_v19 = vld [vmem:[#allocation3 + $0x58] sm:$0xf] }
  0x94   : > { %v828_v25 = vor.u32 %v826_v63, %v9594_v12  ;;  %v830_v16 = vrot.slane %v9594_v12, 4  ;;  %v832_v26 = vshrl.u32 %v7759_v18, 16  ;;  %v835_v27 = vshll.u32 %v7759_v18, 16  ;;  %8484 = vmatpush3.bf16.msra.mxu0 %v8970_v42  ;;  %v8958_v28 = vld [vmem:[#allocation3 + $0x9c] sm:$0xff]  }
  0x95   : > { %v1011_v29 = vsel %vm9232_vm6, %v820_v31, %v1010_v30  ;;  %v840_v13 = vshrl.u32 %v7760_v24, 16  ;;  %v843_v35 = vshll.u32 %v7760_v24, 16  ;;  %8449 = vmatprep.mubr.bf16.mxu0 %v7411_v43  ;;  %8485 = vmatprep.subr.bf16.mxu0 %v8972_v61  ;;  %v4246_v59 = vrot.slane %v4244_v10, 4  ;;  %v986_v63 = vld [vmem:[#allocation3 + $0x80] sm:$0x1] }
  0x96   : > { %v829_v39 = vsel %vm9224_vm5, %v821_v23, %v828_v25  ;;  %1012 = vst [vmem:[#allocation3 + $0xa8] sm:$0xf] %v1011_v29  ;;  %v834_v50 = vrot.slane %v832_v26, 7  ;;  %v1473_v14 = vshrl.u32 %v1421_v20, 16  ;;  %8226 = vmatmul.mubr.bf16.gmra.mrb[24].mxu1 %v8958_v28  ;;  %v1476_v41 = vshll.u32 %v1421_v20, 16  ;;  %v8977_v30 = vld [vmem:[%s10695_s3 + $0x1c0] sm:$0xff]  }
  0x97   : > { %1013 = vst [vmem:[#allocation3 + $0xac] sm:$0xf] %v829_v39  ;;  %v9610_v40 = vrot.slane %v840_v13, 7  ;;  %v1482_v42 = vshll.u32 %v1422_v15, 16  ;;  %v1486_v45 = vshrl.u32 %v1422_v15, 16  ;;  %v4248_v48 = vsel %vm9490_vm13, %v4246_v59, %v4247_v8 }
  0x98   : > { %v837_v47 = vor.u32 %v835_v27, %v834_v50  ;;  %v838_v7 = vrot.slane %v834_v50, 4  ;;  %v1475_v52 = vrot.slane %v1473_v14, 4  ;;  %8486 = vmatpush3.bf16.msra.mxu0 %v8972_v61  ;;  %v7412_v58 = vcombine.low %v4245_v36, %v4248_v48  ;;  %v7347_v8 = vld [vmem:[#allocation3 + $0x5c] sm:$0x1]  ;;  %v7348_v24 = vld [vmem:[#allocation3 + $0x60] sm:$0xe] }
  0x99   : > { %v845_v56 = vor.u32 %v843_v35, %v9610_v40  ;;  %v847_v3 = vrot.slane %v9610_v40, 4  ;;  %v1478_v62 = vrot.slane %v1476_v41, 5  ;;  %8487 = vmatprep.subr.bf16.mxu0 %v8974_v38  ;;  %v1484_v4 = vrot.slane %v1482_v42, 5  ;;  %v7349_v43 = vld [vmem:[#allocation3 + $0x64] sm:$0xf] }
  0x9a   : > { %v1018_v0 = vsel %vm9232_vm6, %v837_v47, %v1017_v32  ;;  %v1488_v6 = vrot.slane %v1486_v45, 4  ;;  %v1492_v57 = vshll.u32 %v1423_v37, 16  ;;  %8450 = vmatmul.mubr.bf16.gmra.mrb[8].mxu0 %v7412_v58  ;;  %v1497_v22 = vshrl.u32 %v1424_v17, 16  ;;  %v7350_v59 = vld [vmem:[#allocation3 + $0x68] sm:$0x1] }
  0x9b   : > { %v846_v61 = vsel %vm9224_vm5, %v838_v7, %v845_v56  ;;  %1019 = vst [vmem:[#allocation3 + $0xb4] sm:$0xf] %v1018_v0  ;;  %v1479_v10 = vor.u32 %v1478_v62, %v1475_v52  ;;  %v1500_v18 = vshll.u32 %v1424_v17, 16  ;;  %v1506_v31 = vshll.u32 %v1425_v46, 16  ;;  %v1427_v45 = vld [vmem:[#allocation3 + $0x18] sm:$0xf] }
  0x9c   : > { %1020 = vst [vmem:[#allocation3 + $0xb8] sm:$0xf] %v846_v61  ;;  %v1489_v20 = vor.u32 %v1488_v6, %v1484_v4  ;;  %v1494_v15 = vrot.slane %v1492_v57, 5  ;;  %v1510_v23 = vshrl.u32 %v1425_v46, 16  ;;  %8488 = vmatpush3.bf16.msra.mxu0 %v8974_v38  ;;  %v1499_v26 = vrot.slane %v1497_v22, 4 }
  0x9d   : > { %v1480_v25 = vrot.slane %v1479_v10, 4  ;;  %v1502_v27 = vrot.slane %v1500_v18, 5  ;;  %v1516_v28 = vshll.u32 %v1426_v53, 16  ;;  %8521 = vmatprep.subr.bf16.mxu0 %v8977_v30  ;;  %v1508_v35 = vrot.slane %v1506_v31, 5  ;;  %v1428_v7 = vld [vmem:[#allocation3 + $0x1c] sm:$0xf] }
  0x9e   : > { %v8961_v29 = vld [vmem:[#allocation3 + $0xa8] sm:$0xff]   ;;  %v1490_v13 = vrot.slane %v1489_v20, 4  ;;  %v1512_v32 = vrot.slane %v1510_v23, 4  ;;  %v987_v36 = vsel %vm9238_vm7, %v762_v54, %v986_v63  ;;  %v7381_v38 = vrot.slane %v7345_v9, 9  ;;  %v1429_v58 = vld [vmem:[#allocation3 + $0x20] sm:$0x1] }
  0x9f   : > { %v1485_v37 = vsel %vm9306_vm10, %v1480_v25, %v1484_v4  ;;  %v1503_v39 = vor.u32 %v1502_v27, %v1499_v26  ;;  %v1518_v50 = vrot.slane %v1516_v28, 5  ;;  %988 = vst [vmem:[#allocation3 + $0x80] sm:$0x1] %v987_v36  ;;  %8229 = vmatprep.mubr.bf16.mxu1 %v8961_v29  ;;  %v4251_v41 = vrot.slane %v7346_v19, 5  ;;  %v1430_v62 = vld [vmem:[#allocation3 + $0x24] sm:$0xf] }
  0xa0   : > { %v1495_v14 = vsel %vm9306_vm10, %v1490_v13, %v1494_v15  ;;  %v1513_v17 = vor.u32 %v1512_v32, %v1508_v35  ;;  %v4254_v42 = vrot.slane %v7347_v8, 5  ;;  %v7382_v47 = vrot.slane %v7348_v24, 9  ;;  %v1431_v22 = vld [vmem:[#allocation3 + $0x28] sm:$0xf]  ;;  %v1432_v18 = vld [vmem:[#allocation3 + $0x2c] sm:$0x1] }
  0xa1   : > { %v7087_v1 = vcombine.low %v1485_v37, %v1495_v14  ;;  %v1504_v46 = vrot.slane %v1503_v39, 4  ;;  %v4258_v54 = vrot.slane %v7349_v43, 5  ;;  %v4252_v52 = vsel %vm9490_vm13, %v7381_v38, %v4251_v41  ;;  %v7351_v25 = vld [vmem:[#allocation3 + $0x6c] sm:$0xe]  ;;  %v7352_v26 = vld [vmem:[#allocation3 + $0x70] sm:$0xf] }
  0xa2   : > { %v1514_v48 = vrot.slane %v1513_v17, 4  ;;  %v4253_v53 = vrot.slane %v4251_v41, 4  ;;  %v4261_v56 = vrot.slane %v7350_v59, 5  ;;  %v1521_v6 = vshrl.u32 %v1427_v45, 16  ;;  %v7354_v32 = vld [vmem:[#allocation3 + $0x78] sm:$0xe] }
  0xa3   : > { %v8962_v63 = vld [vmem:[#allocation3 + $0xb4] sm:$0xff]   ;;  %v1509_v30 = vsel %vm9306_vm10, %v1504_v46, %v1508_v35  ;;  %v4259_v0 = vsel %vm9490_vm13, %v7382_v47, %v4258_v54  ;;  %v4260_v4 = vrot.slane %v4258_v54, 4  ;;  %v1524_v61 = vshll.u32 %v1427_v45, 16  ;;  %v7355_v38 = vld [vmem:[#allocation3 + $0x7c] sm:$0xf] }
  0xa4   : > { %v1519_v57 = vsel %vm9306_vm10, %v1514_v48, %v1518_v50  ;;  %v4255_v9 = vsel %vm9490_vm13, %v4253_v53, %v4254_v42  ;;  %v1530_v10 = vshll.u32 %v1428_v7, 16  ;;  %8230 = vmatmul.mubr.bf16.gmra.mrb[28].mxu1 %v8962_v63  ;;  %v1523_v15 = vrot.slane %v1521_v6, 4  ;;  %v7353_v35 = vld [vmem:[#allocation3 + $0x74] sm:$0x1]  ;;  %v1433_v45 = vld [vmem:[#allocation3 + $0x30] sm:$0xf] }
  0xa5   : > { %v7088_v19 = vcombine.low %v1509_v30, %v1519_v57  ;;  %v7413_v8 = vcombine.low %v4252_v52, %v4255_v9  ;;  %v4262_v20 = vsel %vm9490_vm13, %v4260_v4, %v4261_v56  ;;  %8249 = vmatprep.mubr.bf16.mxu1 %v7087_v1  ;;  %v1526_v23 = vrot.slane %v1524_v61, 5  ;;  %v8969_v56 = vld [vmem:[%s10695_s3 + $0x88] sm:$0xff]   ;;  %v1434_v9 = vld [vmem:[#allocation3 + $0x34] sm:$0xf] }
  0xa6   : > { %v7414_v31 = vcombine.low %v4259_v0, %v4262_v20  ;;  %v1532_v24 = vrot.slane %v1530_v10, 5  ;;  %v1534_v43 = vshrl.u32 %v1428_v7, 16  ;;  %v1540_v27 = vshll.u32 %v1429_v58, 16  ;;  %v7356_v42 = vld [vmem:[#allocation3 + $0x80] sm:$0x1] }
  0xa7   : > { %8453 = vmatprep.mubr.bf16.mxu0 %v7413_v8  ;;  %v1545_v28 = vshrl.u32 %v1430_v62, 16  ;;  %v1548_v29 = vshll.u32 %v1430_v62, 16  ;;  %v1554_v13 = vshll.u32 %v1431_v22, 16  ;;  %v1527_v36 = vor.u32 %v1526_v23, %v1523_v15  ;;  %v1435_v8 = vld [vmem:[#allocation3 + $0x38] sm:$0x1] }
  0xa8   : > { %8454 = vmatmul.mubr.bf16.gmra.mrb[12].mxu0 %v7414_v31  ;;  %v1536_v37 = vrot.slane %v1534_v43, 4  ;;  %v1558_v39 = vshrl.u32 %v1431_v22, 16  ;;  %v1564_v50 = vshll.u32 %v1432_v18, 16  ;;  %v1542_v59 = vrot.slane %v1540_v27, 5  ;;  %v9037_v22 = vld [vmem:[%s10695_s3 + $0x80] sm:$0xff]  }
  0xa9   : > { %v1547_v14 = vrot.slane %v1545_v28, 4  ;;  %v1550_v17 = vrot.slane %v1548_v29, 5  ;;  %v1556_v41 = vrot.slane %v1554_v13, 5  ;;  %v1528_v1 = vrot.slane %v1527_v36, 4  ;;  %v1436_v43 = vld [vmem:[#allocation3 + $0x3c] sm:$0xf] }
  0xaa   : > { %v1537_v46 = vor.u32 %v1536_v37, %v1532_v24  ;;  %v1560_v47 = vrot.slane %v1558_v39, 4  ;;  %v1566_v54 = vrot.slane %v1564_v50, 5  ;;  %v7383_v48 = vrot.slane %v7351_v25, 9  ;;  %v1437_v25 = vld [vmem:[#allocation3 + $0x40] sm:$0xf] }
  0xab   : > { %v1551_v7 = vor.u32 %v1550_v17, %v1547_v14  ;;  %v4265_v52 = vrot.slane %v7352_v26, 5  ;;  %v4268_v53 = vrot.slane %v7353_v35, 5  ;;  %v1533_v58 = vsel %vm9306_vm10, %v1528_v1, %v1532_v24  ;;  %v1438_v13 = vld [vmem:[#allocation3 + $0x44] sm:$0x1]  ;;  %v993_v39 = vld [vmem:[#allocation3 + $0x8c] sm:$0x1] }
  0xac   : > { %v1538_v62 = vrot.slane %v1537_v46, 4  ;;  %v1561_v63 = vor.u32 %v1560_v47, %v1556_v41  ;;  %v7384_v30 = vrot.slane %v7354_v32, 9  ;;  %8250 = vmatmul.mubr.bf16.vlgmr.msra.gmra.mrb[0].mxu1 %v7088_v19  ;;  %v4272_v57 = vrot.slane %v7355_v38, 5  ;;  %v8971_v19 = vld [vmem:[%s10695_s3 + $0x90] sm:$0xff]   ;;  %v7357_v50 = vld [vmem:[#allocation3 + $0x84] sm:$0xe] }
  0xad   : > { %v1552_v0 = vrot.slane %v1551_v7, 4  ;;  %v4266_v4 = vsel %vm9490_vm13, %v7383_v48, %v4265_v52  ;;  %v4267_v6 = vrot.slane %v4265_v52, 4  ;;  %8282 = vmatpush3.bf16.msra.mxu1 %v9037_v22  ;;  %v4275_v18 = vrot.slane %v7356_v42, 5  ;;  %v7358_v47 = vld [vmem:[#allocation3 + $0x88] sm:$0xf] }
  0xae   : > { %v1543_v61 = vsel %vm9306_vm10, %v1538_v62, %v1542_v59  ;;  %v1562_v10 = vrot.slane %v1561_v63, 4  ;;  %v1569_v20 = vshrl.u32 %v1433_v45, 16  ;;  %v4273_v24 = vsel %vm9490_vm13, %v7384_v30, %v4272_v57  ;;  %8283 = vmatprep.subr.bf16.mxu1 %v8969_v56  ;;  %v7360_v7 = vld [vmem:[#allocation3 + $0x90] sm:$0xe] }
  0xaf   : > { %v7089_v15 = vcombine.low %v1533_v58, %v1543_v61  ;;  %v1557_v31 = vsel %vm9306_vm10, %v1552_v0, %v1556_v41  ;;  %v4269_v23 = vsel %vm9490_vm13, %v4267_v6, %v4268_v53  ;;  %v4274_v28 = vrot.slane %v4272_v57, 4 }
  0xb0   : > { %v1567_v26 = vsel %vm9306_vm10, %v1562_v10, %v1566_v54  ;;  %v7415_v27 = vcombine.low %v4266_v4, %v4269_v23  ;;  %v1571_v29 = vrot.slane %v1569_v20, 4  ;;  %v1572_v32 = vshll.u32 %v1433_v45, 16  ;;  %v1000_v54 = vld [vmem:[#allocation3 + $0x98] sm:$0x1] }
  0xb1   : > { %8253 = vmatprep.mubr.bf16.mxu1 %v7089_v15  ;;  %v7090_v35 = vcombine.low %v1557_v31, %v1567_v26  ;;  %v1578_v36 = vshll.u32 %v1434_v9, 16  ;;  %v1582_v37 = vshrl.u32 %v1434_v9, 16  ;;  %v4276_v38 = vsel %vm9490_vm13, %v4274_v28, %v4275_v18  ;;  %8284 = vmatpush3.bf16.msra.mxu1 %v8969_v56  ;;  %v8973_v45 = vld [vmem:[%s10695_s3 + $0x98] sm:$0xff]   ;;  %v7361_v9 = vld [vmem:[#allocation3 + $0x94] sm:$0xf] }
  0xb2   : > { %8457 = vmatprep.mubr.bf16.mxu0 %v7415_v27  ;;  %v1588_v59 = vshll.u32 %v1435_v8, 16  ;;  %v1593_v14 = vshrl.u32 %v1436_v43, 16  ;;  %v1596_v17 = vshll.u32 %v1436_v43, 16  ;;  %v7416_v41 = vcombine.low %v4273_v24, %v4276_v38  ;;  %8285 = vmatprep.subr.bf16.mxu1 %v8971_v19  ;;  %v8975_v8 = vld [vmem:[%s10695_s3 + $0xa0] sm:$0xff]   ;;  %v1439_v31 = vld [vmem:[#allocation3 + $0x48] sm:$0xf] }
  0xb3   : > { %v1574_v42 = vrot.slane %v1572_v32, 5  ;;  %v1580_v1 = vrot.slane %v1578_v36, 5  ;;  %v1584_v46 = vrot.slane %v1582_v37, 4  ;;  %v1602_v58 = vshll.u32 %v1437_v25, 16  ;;  %v1441_v26 = vld [vmem:[#allocation3 + $0x50] sm:$0x1] }
  0xb4   : > { %v1590_v48 = vrot.slane %v1588_v59, 5  ;;  %v1595_v52 = vrot.slane %v1593_v14, 4  ;;  %v1598_v53 = vrot.slane %v1596_v17, 5  ;;  %8254 = vmatmul.mubr.bf16.gmra.mrb[4].mxu1 %v7090_v35  ;;  %8458 = vmatmul.mubr.bf16.gmra.mrb[16].mxu0 %v7416_v41  ;;  %v1606_v63 = vshrl.u32 %v1437_v25, 16  ;;  %v1440_v25 = vld [vmem:[#allocation3 + $0x4c] sm:$0xf] }
  0xb5   : > { %v1575_v62 = vor.u32 %v1574_v42, %v1571_v29  ;;  %v1585_v56 = vor.u32 %v1584_v46, %v1580_v1  ;;  %v1612_v30 = vshll.u32 %v1438_v13, 16  ;;  %v1604_v4 = vrot.slane %v1602_v58, 5  ;;  %8286 = vmatpush3.bf16.msra.mxu1 %v8971_v19  ;;  %v1442_v29 = vld [vmem:[#allocation3 + $0x54] sm:$0xf]  ;;  %v1443_v37 = vld [vmem:[#allocation3 + $0x58] sm:$0xf] }
  0xb6   : > { %v1599_v0 = vor.u32 %v1598_v53, %v1595_v52  ;;  %v994_v6 = vsel %vm9238_vm7, %v779_v49, %v993_v39  ;;  %v7385_v57 = vrot.slane %v7357_v50, 9  ;;  %v1608_v22 = vrot.slane %v1606_v63, 4  ;;  %8287 = vmatprep.subr.bf16.mxu1 %v8973_v45  ;;  %v8979_v39 = vld [vmem:[%s10695_s3 + $0xa8] sm:$0xff]   ;;  %v1444_v17 = vld [vmem:[#allocation3 + $0x5c] sm:$0x1]  ;;  %v8983_v63 = vld [vmem:[%s10695_s3 + $0xb0] sm:$0xff]  }
  0xb7   : > { %v1576_v61 = vrot.slane %v1575_v62, 4  ;;  %v1586_v10 = vrot.slane %v1585_v56, 4  ;;  %v1614_v18 = vrot.slane %v1612_v30, 5  ;;  %995 = vst [vmem:[#allocation3 + $0x8c] sm:$0x1] %v994_v6  ;;  %v4279_v15 = vrot.slane %v7358_v47, 5 }
  0xb8   : > { %v1600_v20 = vrot.slane %v1599_v0, 4  ;;  %v1001_v44 = vsel %vm9238_vm7, %v796_v2, %v1000_v54  ;;  %v7386_v49 = vrot.slane %v7360_v7, 9  ;;  %v1609_v24 = vor.u32 %v1608_v22, %v1604_v4  ;;  %v1007_v56 = vld [vmem:[#allocation3 + $0xa4] sm:$0x1] }
  0xb9   : > { %v1581_v19 = vsel %vm9306_vm10, %v1576_v61, %v1580_v1  ;;  %v1591_v23 = vsel %vm9306_vm10, %v1586_v10, %v1590_v48  ;;  %1002 = vst [vmem:[#allocation3 + $0x98] sm:$0x1] %v1001_v44  ;;  %v4286_v43 = vrot.slane %v7361_v9, 5  ;;  %v4280_v2 = vsel %vm9490_vm13, %v7385_v57, %v4279_v15  ;;  %8288 = vmatpush3.bf16.msra.mxu1 %v8973_v45  ;;  %v7363_v9 = vld [vmem:[#allocation3 + $0x9c] sm:$0xe] }
  0xba   : > { %v7091_v27 = vcombine.low %v1581_v19, %v1591_v23  ;;  %v1605_v51 = vsel %vm9306_vm10, %v1600_v20, %v1604_v4  ;;  %v4281_v28 = vrot.slane %v4279_v15, 4  ;;  %v1610_v13 = vrot.slane %v1609_v24, 4  ;;  %8289 = vmatprep.subr.bf16.mxu1 %v8975_v8  ;;  %v1014_v20 = vld [vmem:[#allocation3 + $0xb0] sm:$0x1]  ;;  %v7366_v19 = vld [vmem:[#allocation3 + $0xa8] sm:$0xe] }
  0xbb   : > { %v9692_v35 = vsel %vm9490_vm13, %v7386_v49, %v4286_v43  ;;  %v4288_v32 = vrot.slane %v4286_v43, 4  ;;  %v1617_v36 = vshrl.u32 %v1439_v31, 16  ;;  %v1620_v50 = vshll.u32 %v1439_v31, 16 }
  0xbc   : > { %8257 = vmatprep.mubr.bf16.mxu1 %v7091_v27  ;;  %v1626_v38 = vshll.u32 %v1440_v25, 16  ;;  %v1630_v59 = vshrl.u32 %v1440_v25, 16  ;;  %v1636_v14 = vshll.u32 %v1441_v26, 16  ;;  %v1615_v41 = vsel %vm9306_vm10, %v1610_v13, %v1614_v18  ;;  %v7367_v26 = vld [vmem:[#allocation3 + $0xac] sm:$0xf]  ;;  %v8987_v27 = vld [vmem:[%s10695_s3 + $0xb8] sm:$0xff]  }
  0xbd   : > { %v1619_v42 = vrot.slane %v1617_v36, 4  ;;  %v1641_v1 = vshrl.u32 %v1442_v29, 16  ;;  %v1644_v46 = vshll.u32 %v1442_v29, 16  ;;  %v7092_v47 = vcombine.low %v1605_v51, %v1615_v41  ;;  %8290 = vmatpush3.bf16.msra.mxu1 %v8975_v8  ;;  %v7364_v8 = vld [vmem:[#allocation3 + $0xa0] sm:$0xf] }
  0xbe   : > { %v7359_v54 = vld [vmem:[#allocation3 + $0x8c] sm:$0x1]  ;;  %v1622_v7 = vrot.slane %v1620_v50, 5  ;;  %v1628_v45 = vrot.slane %v1626_v38, 5  ;;  %v1632_v48 = vrot.slane %v1630_v59, 4  ;;  %v1638_v53 = vrot.slane %v1636_v14, 5  ;;  %8291 = vmatprep.subr.bf16.mxu1 %v8979_v39 }
  0xbf   : > { %v4282_v52 = vrot.slane %v7359_v54, 5  ;;  %v1643_v58 = vrot.slane %v1641_v1, 4  ;;  %v1646_v62 = vrot.slane %v1644_v46, 5  ;;  %8258 = vmatmul.mubr.bf16.gmra.mrb[8].mxu1 %v7092_v47  ;;  %v1650_v6 = vshll.u32 %v1443_v37, 16  ;;  %v1445_v13 = vld [vmem:[#allocation3 + $0x60] sm:$0xf] }
  0xc0   : > { %v7362_v30 = vld [vmem:[#allocation3 + $0x98] sm:$0x1]  ;;  %v1623_v0 = vor.u32 %v1622_v7, %v1619_v42  ;;  %v1633_v4 = vor.u32 %v1632_v48, %v1628_v45  ;;  %v1654_v57 = vshrl.u32 %v1443_v37, 16  ;;  %v1660_v18 = vshll.u32 %v1444_v17, 16  ;;  %v1447_v50 = vld [vmem:[#allocation3 + $0x68] sm:$0x1] }
  0xc1   : > { %v4283_v61 = vsel %vm9490_vm13, %v4281_v28, %v4282_v52  ;;  %v4289_v10 = vrot.slane %v7362_v30, 5  ;;  %v1647_v22 = vor.u32 %v1646_v62, %v1643_v58  ;;  %v1652_v31 = vrot.slane %v1650_v6, 5  ;;  %8292 = vmatpush3.bf16.msra.mxu1 %v8979_v39  ;;  %v1448_v38 = vld [vmem:[#allocation3 + $0x6c] sm:$0xf]  ;;  %v1449_v17 = vld [vmem:[#allocation3 + $0x70] sm:$0xf] }
  0xc2   : > { %v7417_v15 = vcombine.low %v4280_v2, %v4283_v61  ;;  %v1624_v44 = vrot.slane %v1623_v0, 4  ;;  %v1634_v49 = vrot.slane %v1633_v4, 4  ;;  %v1656_v43 = vrot.slane %v1654_v57, 4  ;;  %8293 = vmatprep.subr.bf16.mxu1 %v8983_v63  ;;  %v9727_v41 = vld [vmem:[%s10695_s3 + $0xc0] sm:$0xff]   ;;  %v1450_v54 = vld [vmem:[#allocation3 + $0x74] sm:$0x1] }
  0xc3   : > { %v4290_v23 = vsel %vm9490_vm13, %v4288_v32, %v4289_v10  ;;  %v1648_v24 = vrot.slane %v1647_v22, 4  ;;  %v1662_v25 = vrot.slane %v1660_v18, 5  ;;  %v1008_v29 = vsel %vm9238_vm7, %v813_v34, %v1007_v56  ;;  %v1446_v32 = vld [vmem:[#allocation3 + $0x64] sm:$0xf]  ;;  %v1021_v62 = vld [vmem:[#allocation3 + $0xbc] sm:$0x1] }
  0xc4   : > { %8461 = vmatprep.mubr.bf16.mxu0 %v7417_v15  ;;  %v7418_v51 = vcombine.low %v9692_v35, %v4290_v23  ;;  %v1629_v2 = vsel %vm9306_vm10, %v1624_v44, %v1628_v45  ;;  %v1639_v28 = vsel %vm9306_vm10, %v1634_v49, %v1638_v53  ;;  %v1657_v39 = vor.u32 %v1656_v43, %v1652_v31 }
  0xc5   : > { %v7093_v36 = vcombine.low %v1629_v2, %v1639_v28  ;;  %v1653_v37 = vsel %vm9306_vm10, %v1648_v24, %v1652_v31  ;;  %1009 = vst [vmem:[#allocation3 + $0xa4] sm:$0x1] %v1008_v29  ;;  %v7387_v35 = vrot.slane %v7363_v9, 9  ;;  %v4293_v59 = vrot.slane %v7364_v8, 5  ;;  %8294 = vmatpush3.bf16.msra.mxu1 %v8983_v63 }
  0xc6   : > { %8462 = vmatmul.mubr.bf16.gmra.mrb[20].mxu0 %v7418_v51  ;;  %v1015_v21 = vsel %vm9238_vm7, %v830_v16, %v1014_v20  ;;  %v7388_v14 = vrot.slane %v7366_v19, 9  ;;  %v4300_v34 = vrot.slane %v7367_v26, 5  ;;  %v1658_v42 = vrot.slane %v1657_v39, 4  ;;  %8295 = vmatprep.subr.bf16.mxu1 %v8987_v27  ;;  %v7953_v20 = vld [vmem:[%s9166_s22 + $0x78] sm:$0xff]   ;;  %v7369_v19 = vld [vmem:[#allocation3 + $0xb4] sm:$0xe] }
  0xc7   : > { %8261 = vmatprep.mubr.bf16.mxu1 %v7093_v36  ;;  %1016 = vst [vmem:[#allocation3 + $0xb0] sm:$0x1] %v1015_v21  ;;  %v1665_v1 = vshrl.u32 %v1445_v13, 16  ;;  %v1668_v46 = vshll.u32 %v1445_v13, 16  ;;  %v1674_v47 = vshll.u32 %v1446_v32, 16  ;;  %v4294_v12 = vsel %vm9490_vm13, %v7387_v35, %v4293_v59 }
  0xc8   : > { %v4295_v16 = vrot.slane %v4293_v59, 4  ;;  %v4301_v7 = vsel %vm9490_vm13, %v7388_v14, %v4300_v34  ;;  %v4302_v45 = vrot.slane %v4300_v34, 4  ;;  %v1663_v48 = vsel %vm9306_vm10, %v1658_v42, %v1662_v25  ;;  %v1451_v39 = vld [vmem:[#allocation3 + $0x78] sm:$0xf]  ;;  %v1453_v59 = vld [vmem:[#allocation3 + $0x80] sm:$0x1] }
  0xc9   : > { %v1667_v52 = vrot.slane %v1665_v1, 4  ;;  %v1670_v53 = vrot.slane %v1668_v46, 5  ;;  %v1676_v58 = vrot.slane %v1674_v47, 5  ;;  %v7094_v56 = vcombine.low %v1653_v37, %v1663_v48  ;;  %8296 = vmatpush3.bf16.msra.mxu1 %v8987_v27  ;;  %v7370_v27 = vld [vmem:[#allocation3 + $0xb8] sm:$0xf] }
  0xca   : > { %v1678_v63 = vshrl.u32 %v1446_v32, 16  ;;  %v1684_v30 = vshll.u32 %v1447_v50, 16  ;;  %v1689_v0 = vshrl.u32 %v1448_v38, 16  ;;  %v1692_v6 = vshll.u32 %v1448_v38, 16  ;;  %8329 = vmatprep.subr.bf16.mxu1 %v9727_v41  ;;  %v1452_v38 = vld [vmem:[#allocation3 + $0x7c] sm:$0xf] }
  0xcb   : > { %v1671_v4 = vor.u32 %v1670_v53, %v1667_v52  ;;  %v1698_v57 = vshll.u32 %v1449_v17, 16  ;;  %v1702_v9 = vshrl.u32 %v1449_v17, 16  ;;  %8262 = vmatmul.mubr.bf16.gmra.mrb[12].mxu1 %v7094_v56  ;;  %v1708_v8 = vshll.u32 %v1450_v54, 16  ;;  %v1454_v54 = vld [vmem:[#allocation3 + $0x84] sm:$0xf] }
  0xcc   : > { %v7365_v61 = vld [vmem:[#allocation3 + $0xa4] sm:$0x1]  ;;  %v1680_v10 = vrot.slane %v1678_v63, 4  ;;  %v1686_v22 = vrot.slane %v1684_v30, 5  ;;  %v1691_v18 = vrot.slane %v1689_v0, 4  ;;  %v1694_v49 = vrot.slane %v1692_v6, 5 }
  0xcd   : > { %v4296_v15 = vrot.slane %v7365_v61, 5  ;;  %v1672_v44 = vrot.slane %v1671_v4, 4  ;;  %v1700_v31 = vrot.slane %v1698_v57, 5  ;;  %v1704_v43 = vrot.slane %v1702_v9, 4  ;;  %v9039_v63 = vld [vmem:[%s10694_s2] ss:$0 sm:$0xff] }
  0xce   : > { %v7368_v23 = vld [vmem:[#allocation3 + $0xb0] sm:$0x1]  ;;  %v1681_v24 = vor.u32 %v1680_v10, %v1676_v58  ;;  %v1710_v25 = vrot.slane %v1708_v8, 5  ;;  %v1022_v26 = vsel %vm9238_vm7, %v847_v3, %v1021_v62  ;;  %v1695_v29 = vor.u32 %v1694_v49, %v1691_v18 }
  0xcf   : > { %v4297_v51 = vsel %vm9490_vm13, %v4295_v16, %v4296_v15  ;;  %v4303_v2 = vrot.slane %v7368_v23, 5  ;;  %v1677_v28 = vsel %vm9306_vm10, %v1672_v44, %v1676_v58  ;;  %1023 = vst [vmem:[#allocation3 + $0xbc] sm:$0x1] %v1022_v26  ;;  %v1705_v36 = vor.u32 %v1704_v43, %v1700_v31  ;;  %v9038_v16 = vld [vmem:[%s10693_s1] ss:$0 sm:$0xff] }
  0xd0   : > { %v7419_v13 = vcombine.low %v4294_v12, %v4297_v51  ;;  %v1682_v32 = vrot.slane %v1681_v24, 4  ;;  %v7389_v37 = vrot.slane %v7369_v19, 9  ;;  %v1696_v35 = vrot.slane %v1695_v29, 4  ;;  %v1457_v26 = vld [vmem:[#allocation3 + $0x90] sm:$0xf] }
  0xd1   : > { %v4304_v40 = vsel %vm9490_vm13, %v4302_v45, %v4303_v2  ;;  %v4307_v3 = vrot.slane %v7370_v27, 5  ;;  %v7857_v50 = vunpack.c.l.bf16 %v7953_v20  ;;  %v1706_v34 = vrot.slane %v1705_v36, 4  ;;  %v1456_v2 = vld [vmem:[#allocation3 + $0x8c] sm:$0x1] }
  0xd2   : > { %8465 = vmatprep.mubr.bf16.mxu0 %v7419_v13  ;;  %v7420_v21 = vcombine.low %v4301_v7, %v4304_v40  ;;  %v1687_v14 = vsel %vm9306_vm10, %v1682_v32, %v1686_v22  ;;  %v7858_v17 = vunpack.c.h.bf16 %v7953_v20  ;;  %v1701_v1 = vsel %vm9306_vm10, %v1696_v35, %v1700_v31  ;;  %v1455_v20 = vld [vmem:[#allocation3 + $0x88] sm:$0xf] }
  0xd3   : > { %v7095_v42 = vcombine.low %v1677_v28, %v1687_v14  ;;  %v4308_v46 = vsel %vm9490_vm13, %v7389_v37, %v4307_v3  ;;  %v4309_v47 = vrot.slane %v4307_v3, 4  ;;  %v1711_v12 = vsel %vm9306_vm10, %v1706_v34, %v1710_v25  ;;  %v1028_v40 = vld [vmem:[#allocation3 + $0xc8] sm:$0x1] }
  0xd4   : > { %8466 = vmatmul.mubr.bf16.gmra.mrb[24].mxu0 %v7420_v21  ;;  %v421_v7 = vmul.f32 %v9038_v16, %v7857_v50  ;;  %v422_v45 = vmul.f32 %v9038_v16, %v7858_v17  ;;  %v1713_v48 = vshrl.u32 %v1451_v39, 16  ;;  %v7096_v52 = vcombine.low %v1701_v1, %v1711_v12  ;;  %v1458_v17 = vld [vmem:[#allocation3 + $0x94] sm:$0xf]  ;;  %v1460_v12 = vld [vmem:[#allocation3 + $0x9c] sm:$0xf] }
  0xd5   : > { %8265 = vmatprep.mubr.bf16.mxu1 %v7095_v42  ;;  %v1716_v53 = vshll.u32 %v1451_v39, 16  ;;  %v1722_v58 = vshll.u32 %v1452_v38, 16  ;;  %v1726_v62 = vshrl.u32 %v1452_v38, 16  ;;  %v1732_v6 = vshll.u32 %v1453_v59, 16  ;;  %v1024_v39 = vld [vmem:[#allocation3 + $0xc0] sm:$0xf] }
  0xd6   : > { %v7371_v56 = vld [vmem:[#allocation3 + $0xbc] sm:$0x1]  ;;  %v460_v30 = vadd.f32 %v9039_v63, %v421_v7  ;;  %v461_v0 = vadd.f32 %v9039_v63, %v422_v45  ;;  %v1715_v4 = vrot.slane %v1713_v48, 4  ;;  %8266 = vmatmul.mubr.bf16.gmra.mrb[16].mxu1 %v7096_v52  ;;  %v1737_v15 = vshrl.u32 %v1454_v54, 16  ;;  %v1459_v42 = vld [vmem:[#allocation3 + $0x98] sm:$0x1] }
  0xd7   : > { %v4310_v57 = vrot.slane %v7371_v56, 5  ;;  %v1718_v9 = vrot.slane %v1716_v53, 5  ;;  %v1724_v61 = vrot.slane %v1722_v58, 5  ;;  %v1728_v10 = vrot.slane %v1726_v62, 4  ;;  %v1461_v16 = vld [vmem:[#allocation3 + $0xa0] sm:$0xf] }
  0xd8   : > { %v492_v22 = vmax.f32 %v460_v30, 0.0  ;;  %v493_v18 = vmax.f32 %v461_v0, 0.0  ;;  %v1734_v8 = vrot.slane %v1732_v6, 5  ;;  %v1740_v19 = vshll.u32 %v1454_v54, 16 }
  0xd9   : > { %v4311_v44 = vsel %vm9490_vm13, %v4309_v47, %v4310_v57  ;;  %v1719_v49 = vor.u32 %v1718_v9, %v1715_v4  ;;  %v1729_v31 = vor.u32 %v1728_v10, %v1724_v61  ;;  %v1739_v25 = vrot.slane %v1737_v15, 4 }
  0xda   : > { %v7421_v23 = vcombine.low %v4308_v46, %v4311_v44  ;;  %v7761_v24 = vpack.c.bf16 %v492_v22, %v492_v22  ;;  %v7762_v43 = vpack.c.bf16 %v493_v18, %v493_v18  ;;  %v1742_v28 = vrot.slane %v1740_v19, 5  ;;  %v1462_v22 = vld [vmem:[#allocation3 + $0xa4] sm:$0x1] }
  0xdb   : > { %v1720_v27 = vrot.slane %v1719_v49, 4  ;;  %v1730_v51 = vrot.slane %v1729_v31, 4  ;;  %v1746_v29 = vshll.u32 %v1455_v20, 16  ;;  %v1750_v34 = vshrl.u32 %v1455_v20, 16  ;;  %v1463_v49 = vld [vmem:[#allocation3 + $0xa8] sm:$0xf] }
  0xdc   : > { %8469 = vmatprep.mubr.bf16.mxu0 %v7421_v23  ;;  %v849_v13 = vshrl.u32 %v7761_v24, 16  ;;  %v852_v32 = vshll.u32 %v7761_v24, 16  ;;  %v857_v36 = vshrl.u32 %v7762_v43, 16  ;;  %v860_v37 = vshll.u32 %v7762_v43, 16 }
  0xdd   : > { %v1725_v35 = vsel %vm9306_vm10, %v1720_v27, %v1724_v61  ;;  %v1735_v3 = vsel %vm9306_vm10, %v1730_v51, %v1734_v8  ;;  %v1743_v50 = vor.u32 %v1742_v28, %v1739_v25  ;;  %v1748_v38 = vrot.slane %v1746_v29, 5  ;;  %v1464_v28 = vld [vmem:[#allocation3 + $0xac] sm:$0xf] }
  0xde   : > { %v851_v59 = vrot.slane %v849_v13, 7  ;;  %v859_v21 = vrot.slane %v857_v36, 7  ;;  %v7097_v14 = vcombine.low %v1725_v35, %v1735_v3  ;;  %v1756_v46 = vshll.u32 %v1456_v2, 16 }
  0xdf   : > { %v1744_v1 = vrot.slane %v1743_v50, 4  ;;  %v1761_v47 = vshrl.u32 %v1457_v26, 16  ;;  %v1764_v54 = vshll.u32 %v1457_v26, 16  ;;  %v1752_v58 = vrot.slane %v1750_v34, 4  ;;  %v1466_v50 = vld [vmem:[#allocation3 + $0xb4] sm:$0xf] }
  0xe0   : > { %v854_v7 = vor.u32 %v852_v32, %v851_v59  ;;  %v855_v45 = vrot.slane %v851_v59, 4  ;;  %v862_v48 = vor.u32 %v860_v37, %v859_v21  ;;  %v864_v52 = vrot.slane %v859_v21, 4  ;;  %8269 = vmatprep.mubr.bf16.mxu1 %v7097_v14  ;;  %v1465_v37 = vld [vmem:[#allocation3 + $0xb0] sm:$0x1] }
  0xe1   : > { %v1749_v53 = vsel %vm9306_vm10, %v1744_v1, %v1748_v38  ;;  %v1758_v62 = vrot.slane %v1756_v46, 5  ;;  %v1763_v56 = vrot.slane %v1761_v47, 4  ;;  %v1766_v4 = vrot.slane %v1764_v54, 5 }
  0xe2   : > { %v863_v63 = vsel %vm9224_vm5, %v855_v45, %v862_v48  ;;  %v1025_v30 = vsel %vm9232_vm6, %v854_v7, %v1024_v39  ;;  %v1029_v0 = vsel %vm9238_vm7, %v864_v52, %v1028_v40  ;;  %v1753_v6 = vor.u32 %v1752_v58, %v1748_v38 }
  0xe3   : > { %1026 = vst [vmem:[#allocation3 + $0xc0] sm:$0xf] %v1025_v30  ;;  %1027 = vst [vmem:[#allocation3 + $0xc4] sm:$0xf] %v863_v63  ;;  %v1770_v57 = vshll.u32 %v1458_v17, 16  ;;  %v1774_v9 = vshrl.u32 %v1458_v17, 16  ;;  %v1767_v10 = vor.u32 %v1766_v4, %v1763_v56 }
  0xe4   : > { %1030 = vst [vmem:[#allocation3 + $0xc8] sm:$0x1] %v1029_v0  ;;  %v1780_v61 = vshll.u32 %v1459_v42, 16  ;;  %v1785_v18 = vshrl.u32 %v1460_v12, 16  ;;  %v1788_v8 = vshll.u32 %v1460_v12, 16  ;;  %v1794_v55 = vshll.u32 %v1461_v16, 16 }
  0xe5   : > { %v1754_v20 = vrot.slane %v1753_v6, 4  ;;  %v1772_v15 = vrot.slane %v1770_v57, 5  ;;  %v1776_v60 = vrot.slane %v1774_v9, 4  ;;  %v1768_v5 = vrot.slane %v1767_v10, 4  ;;  %v1468_v63 = vld [vmem:[#allocation3 + $0xbc] sm:$0x1] }
  0xe6   : > { %v1782_v44 = vrot.slane %v1780_v61, 5  ;;  %v1787_v31 = vrot.slane %v1785_v18, 4  ;;  %v1790_v19 = vrot.slane %v1788_v8, 5  ;;  %v1796_v23 = vrot.slane %v1794_v55, 5  ;;  %v2242_v0 = vld [vmem:[#allocation3] sm:$0xe] }
  0xe7   : > { %v1759_v24 = vsel %vm9306_vm10, %v1754_v20, %v1758_v62  ;;  %v1777_v43 = vor.u32 %v1776_v60, %v1772_v15  ;;  %v1798_v25 = vshrl.u32 %v1461_v16, 16  ;;  %v1804_v26 = vshll.u32 %v1462_v22, 16  ;;  %v8976_v16 = vld [vmem:[#allocation3 + $0x18] sm:$0xff]   ;;  %v2243_v61 = vld [vmem:[#allocation3 + $0x4] sm:$0xf] }
  0xe8   : > { %v7098_v27 = vcombine.low %v1749_v53, %v1759_v24  ;;  %v1773_v51 = vsel %vm9306_vm10, %v1768_v5, %v1772_v15  ;;  %v1791_v2 = vor.u32 %v1790_v19, %v1787_v31  ;;  %v1809_v29 = vshrl.u32 %v1463_v49, 16  ;;  %v1467_v53 = vld [vmem:[#allocation3 + $0xb8] sm:$0xf]  ;;  %v2244_v10 = vld [vmem:[#allocation3 + $0x8] sm:$0x1] }
  0xe9   : > { %v1778_v13 = vrot.slane %v1777_v43, 4  ;;  %v1800_v32 = vrot.slane %v1798_v25, 4  ;;  %v1806_v36 = vrot.slane %v1804_v26, 5  ;;  %v1812_v39 = vshll.u32 %v1463_v49, 16  ;;  %v2246_v19 = vld [vmem:[#allocation3 + $0x10] sm:$0xf] }
  0xea   : > { %v7372_v40 = vld [vmem:[#allocation3 + $0xc0] sm:$0xe]  ;;  %v7373_v35 = vld [vmem:[#allocation3 + $0xc4] sm:$0xf]  ;;  %8270 = vmatmul.mubr.bf16.gmra.mrb[20].mxu1 %v7098_v27  ;;  %v1792_v17 = vrot.slane %v1791_v2, 4  ;;  %v1811_v1 = vrot.slane %v1809_v29, 4 }
  0xeb   : > { %v7374_v3 = vld [vmem:[#allocation3 + $0xc8] sm:$0x1]  ;;  %v7390_v38 = vrot.slane %v7372_v40, 9  ;;  %v4314_v59 = vrot.slane %v7373_v35, 5  ;;  %v1783_v14 = vsel %vm9306_vm10, %v1778_v13, %v1782_v44  ;;  %v1801_v42 = vor.u32 %v1800_v32, %v1796_v23  ;;  %v2245_v27 = vld [vmem:[#allocation3 + $0xc] sm:$0xe] }
  0xec   : > { %v4317_v21 = vrot.slane %v7374_v3, 5  ;;  %v7099_v34 = vcombine.low %v1773_v51, %v1783_v14  ;;  %v1814_v54 = vrot.slane %v1812_v39, 5  ;;  %v1818_v12 = vshll.u32 %v1464_v28, 16  ;;  %v2247_v29 = vld [vmem:[#allocation3 + $0x14] sm:$0x1]  ;;  %v8981_v35 = vld [vmem:[%s10695_s3 + $0x1c8] sm:$0xff]  }
  0xed   : > { %v4315_v46 = vsel %vm9490_vm13, %v7390_v38, %v4314_v59  ;;  %v4316_v47 = vrot.slane %v4314_v59, 4  ;;  %v1797_v7 = vsel %vm9306_vm10, %v1792_v17, %v1796_v23  ;;  %v1802_v45 = vrot.slane %v1801_v42, 4  ;;  %v8978_v23 = vld [vmem:[#allocation3 + $0x24] sm:$0xff]   ;;  %v2249_v39 = vld [vmem:[#allocation3 + $0x1c] sm:$0xf]  ;;  %v8980_v40 = vld [vmem:[#allocation3 + $0x30] sm:$0xff]  }
  0xee   : > { %8273 = vmatprep.mubr.bf16.mxu1 %v7099_v34  ;;  %v1822_v48 = vshrl.u32 %v1464_v28, 16  ;;  %v1828_v52 = vshll.u32 %v1465_v37, 16  ;;  %v1815_v62 = vor.u32 %v1814_v54, %v1811_v1  ;;  %v1820_v56 = vrot.slane %v1818_v12, 5  ;;  %v2248_v34 = vld [vmem:[#allocation3 + $0x18] sm:$0xe] }
  0xef   : > { %v4318_v58 = vsel %vm9490_vm13, %v4316_v47, %v4317_v21  ;;  %v1833_v30 = vshrl.u32 %v1466_v50, 16  ;;  %v1807_v6 = vsel %vm9306_vm10, %v1802_v45, %v1806_v36  ;;  %v1836_v55 = vshll.u32 %v1466_v50, 16  ;;  %v2250_v17 = vld [vmem:[#allocation3 + $0x20] sm:$0x1]  ;;  %v2252_v54 = vld [vmem:[#allocation3 + $0x28] sm:$0xf] }
  0xf0   : > { %v7422_v4 = vcombine.low %v4315_v46, %v4318_v58  ;;  %v1824_v57 = vrot.slane %v1822_v48, 4  ;;  %v1830_v9 = vrot.slane %v1828_v52, 5  ;;  %v7100_v22 = vcombine.low %v1797_v7, %v1807_v6  ;;  %v2255_v7 = vld [vmem:[#allocation3 + $0x34] sm:$0xf]  ;;  %v9804_v45 = vld [vmem:[#allocation3 + $0x40] sm:$0xf] }
  0xf1   : > { %v1816_v18 = vrot.slane %v1815_v62, 4  ;;  %v1835_v8 = vrot.slane %v1833_v30, 4  ;;  %v1842_v15 = vshll.u32 %v1467_v53, 16  ;;  %v1846_v60 = vshrl.u32 %v1467_v53, 16  ;;  %v9040_v48 = vld [vmem:[%s10695_s3 + $0x1c0] sm:$0xff]  }
  0xf2   : > { %8470 = vmatmul.mubr.bf16.gmra.mrb[28].mxu0 %v7422_v4  ;;  %v1825_v20 = vor.u32 %v1824_v57, %v1820_v56  ;;  %v1852_v44 = vshll.u32 %v1468_v63, 16  ;;  %8274 = vmatmul.mubr.bf16.gmra.mrb[24].mxu1 %v7100_v22  ;;  %v1838_v49 = vrot.slane %v1836_v55, 5  ;;  %v7111_v5 = vrot.slane %v2242_v0, 9  ;;  %v2251_v63 = vld [vmem:[#allocation3 + $0x24] sm:$0xe]  ;;  %v8982_v0 = vld [vmem:[#allocation3 + $0x3c] sm:$0xff]  }
  0xf3   : > { %8489 = vmatprep.mubr.bf16.mxu0 %v8976_v16  ;;  %v2343_v31 = vrot.slane %v2243_v61, 5  ;;  %v1821_v24 = vsel %vm9306_vm10, %v1816_v18, %v1820_v56  ;;  %v1844_v25 = vrot.slane %v1842_v15, 5  ;;  %v1848_v26 = vrot.slane %v1846_v60, 4  ;;  %v8985_v56 = vld [vmem:[%s10695_s3 + $0x1d0] sm:$0xff]   ;;  %v2253_v57 = vld [vmem:[#allocation3 + $0x2c] sm:$0x1] }
  0xf4   : > { %v1826_v43 = vrot.slane %v1825_v20, 4  ;;  %v1839_v51 = vor.u32 %v1838_v49, %v1835_v8  ;;  %v2346_v28 = vrot.slane %v2244_v10, 5  ;;  %v1854_v36 = vrot.slane %v1852_v44, 5  ;;  %v8984_v10 = vld [vmem:[#allocation3 + $0x48] sm:$0xff]   ;;  %v2256_v22 = vld [vmem:[#allocation3 + $0x38] sm:$0x1] }
  0xf5   : > { %v2345_v2 = vrot.slane %v2343_v31, 4  ;;  %v1849_v32 = vor.u32 %v1848_v26, %v1844_v25  ;;  %v2350_v37 = vrot.slane %v2246_v19, 5  ;;  %v2344_v38 = vsel %vm9490_vm13, %v7111_v5, %v2343_v31  ;;  %v2257_v18 = vld [vmem:[#allocation3 + $0x3c] sm:$0xe]  ;;  %v2259_v15 = vld [vmem:[#allocation3 + $0x44] sm:$0x1] }
  0xf6   : > { %v1831_v13 = vsel %vm9306_vm10, %v1826_v43, %v1830_v9  ;;  %v1840_v50 = vrot.slane %v1839_v51, 4  ;;  %v7112_v14 = vrot.slane %v2245_v27, 9  ;;  %v2353_v46 = vrot.slane %v2247_v29, 5  ;;  %v2254_v9 = vld [vmem:[#allocation3 + $0x30] sm:$0xe]  ;;  %v8989_v44 = vld [vmem:[%s10695_s3 + $0x1d8] sm:$0xff]  }
  0xf7   : > { %v7101_v3 = vcombine.low %v1821_v24, %v1831_v13  ;;  %v2347_v59 = vsel %vm9490_vm13, %v2345_v2, %v2346_v28  ;;  %v1850_v21 = vrot.slane %v1849_v32, 4  ;;  %v2352_v1 = vrot.slane %v2350_v37, 4  ;;  %v2261_v31 = vld [vmem:[#allocation3 + $0x4c] sm:$0xf]  ;;  %v2260_v2 = vld [vmem:[#allocation3 + $0x48] sm:$0xe] }
  0xf8   : > { %v1845_v42 = vsel %vm9306_vm10, %v1840_v50, %v1844_v25  ;;  %v2357_v47 = vrot.slane %v2249_v39, 5  ;;  %v7143_v16 = vcombine.low %v2344_v38, %v2347_v59  ;;  %v7113_v53 = vrot.slane %v2248_v34, 9  ;;  %v8995_v28 = vld [vmem:[%s10695_s3 + $0xc8] sm:$0xff]   ;;  %v2263_v13 = vld [vmem:[#allocation3 + $0x54] sm:$0xe]  ;;  %v8993_v39 = vld [vmem:[%s10695_s3 + $0x1e0] sm:$0xff]  }
  0xf9   : > { %8277 = vmatprep.mubr.bf16.mxu1 %v7101_v3  ;;  %v1855_v12 = vsel %vm9306_vm10, %v1850_v21, %v1854_v36  ;;  %v2360_v62 = vrot.slane %v2250_v17, 5  ;;  %v2364_v30 = vrot.slane %v2252_v54, 5  ;;  %v2351_v4 = vsel %vm9490_vm13, %v7112_v14, %v2350_v37  ;;  %v2264_v32 = vld [vmem:[#allocation3 + $0x58] sm:$0xf]  ;;  %v8988_v3 = vld [vmem:[#allocation3 + $0x60] sm:$0xff]  }
  0xfa   : > { %8490 = vmatmul.mubr.bf16.vlgmr.msra.gmra.mrb[0].mxu0 %v8978_v23  ;;  %v7102_v52 = vcombine.low %v1845_v42, %v1855_v12  ;;  %v2359_v58 = vrot.slane %v2357_v47, 4  ;;  %v2354_v6 = vsel %vm9490_vm13, %v2352_v1, %v2353_v46  ;;  %v2371_v61 = vrot.slane %v2255_v7, 5  ;;  %v8986_v36 = vld [vmem:[#allocation3 + $0x54] sm:$0xff]   ;;  %v9846_v14 = vld [vmem:[#allocation3 + $0x60] sm:$0xe]  ;;  %v9864_v46 = vld [vmem:[%s10695_s3 + $0x1e8] sm:$0xff]  }
  0xfb   : > { %8522 = vmatpush3.bf16.msra.mxu0 %v9040_v48  ;;  %8493 = vmatprep.mubr.bf16.mxu0 %v8980_v40  ;;  %v2378_v8 = vrot.slane %v9804_v45, 5  ;;  %v2358_v55 = vsel %vm9490_vm13, %v7113_v53, %v2357_v47  ;;  %v7144_v60 = vcombine.low %v2351_v4, %v2354_v6  ;;  %v7114_v49 = vrot.slane %v2251_v63, 9  ;;  %v2262_v40 = vld [vmem:[#allocation3 + $0x50] sm:$0x1]  ;;  %v9848_v34 = vld [vmem:[#allocation3 + $0x64] sm:$0xf] }
  0xfc   : > { %8523 = vmatprep.subr.bf16.mxu0 %v8981_v35  ;;  %8278 = vmatmul.mubr.bf16.gmra.mrb[28].mxu1 %v7102_v52  ;;  %v2361_v20 = vsel %vm9490_vm13, %v2359_v58, %v2360_v62  ;;  %v2366_v5 = vrot.slane %v2364_v30, 4  ;;  %v2367_v19 = vrot.slane %v2253_v57, 5  ;;  %v7115_v23 = vrot.slane %v2254_v9, 9  ;;  %v9850_v17 = vld [vmem:[#allocation3 + $0x70] sm:$0xf] }
  0xfd   : > { %8297 = vmatprep.mubr.bf16.mxu1 %v7143_v16  ;;  %v2373_v24 = vrot.slane %v2371_v61, 4  ;;  %v2374_v43 = vrot.slane %v2256_v22, 5  ;;  %v7145_v25 = vcombine.low %v2358_v55, %v2361_v20  ;;  %v7116_v26 = vrot.slane %v2257_v18, 9  ;;  %v9868_v7 = vld [vmem:[#allocation3 + $0x6c] sm:$0xe]  ;;  %v8999_v58 = vld [vmem:[%s10695_s3 + $0xd0] sm:$0xff]  }
  0xfe   : > { %v2380_v27 = vrot.slane %v2378_v8, 4  ;;  %v2381_v51 = vrot.slane %v2259_v15, 5  ;;  %v2385_v29 = vrot.slane %v2261_v31, 5  ;;  %v9829_v37 = vsel %vm9490_vm13, %v7114_v49, %v2364_v30  ;;  %v7503_v45 = vld [vmem:[#allocation3 + $0x18] sm:$0xf]  ;;  %v9001_v22 = vld [vmem:[%s10695_s3 + $0x1f0] sm:$0xff]  }
  0xff   : > { %8524 = vmatpush3.bf16.msra.mxu0 %v8981_v35  ;;  %v9834_v35 = vld [vmem:[#allocation3 + $0x5c] sm:$0x1]  ;;  %v2368_v50 = vsel %vm9490_vm13, %v2366_v5, %v2367_v19  ;;  %v9840_v38 = vsel %vm9490_vm13, %v7115_v23, %v2371_v61  ;;  %v9844_v59 = vsel %vm9490_vm13, %v2373_v24, %v2374_v43  ;;  %v7117_v21 = vrot.slane %v2260_v2, 9  ;;  %v9877_v62 = vld [vmem:[#allocation3 + $0x74] sm:$0x1]  ;;  %v8990_v23 = vld [vmem:[#allocation3 + $0x6c] sm:$0xff]  }
 0x100   : > { %8525 = vmatprep.subr.bf16.mxu0 %v8985_v56  ;;  %v9855_v42 = vsel %vm9490_vm13, %v7116_v26, %v2378_v8  ;;  %v9859_v1 = vsel %vm9490_vm13, %v2380_v27, %v2381_v51  ;;  %v7118_v47 = vrot.slane %v2263_v13, 9  ;;  %v2392_v54 = vrot.slane %v2264_v32, 5  ;;  %v9881_v63 = vld [vmem:[#allocation3 + $0x7c] sm:$0xf]  ;;  %v9891_v9 = vld [vmem:[#allocation3 + $0x88] sm:$0xf] }
 0x101   : > { %v2387_v12 = vrot.slane %v2385_v29, 4  ;;  %v2388_v16 = vrot.slane %v2262_v40, 5  ;;  %v7146_v48 = vcombine.low %v9829_v37, %v2368_v50  ;;  %v7147_v52 = vcombine.low %v9840_v38, %v9844_v59  ;;  %v7504_v30 = vld [vmem:[#allocation3 + $0x1c] sm:$0xf]  ;;  %v9901_v8 = vld [vmem:[#allocation3 + $0x80] sm:$0x1] }
 0x102   : > { %8494 = vmatmul.mubr.bf16.gmra.mrb[4].mxu0 %v8982_v0  ;;  %v2395_v53 = vrot.slane %v9834_v35, 5  ;;  %v7148_v0 = vcombine.low %v9855_v42, %v9859_v1  ;;  %v9887_v4 = vsel %vm9490_vm13, %v7117_v21, %v2385_v29  ;;  %v2399_v6 = vrot.slane %v9848_v34, 5  ;;  %v9903_v55 = vld [vmem:[#allocation3 + $0x84] sm:$0xe]  ;;  %v9914_v49 = vld [vmem:[#allocation3 + $0x20] sm:$0x1] }
 0x103   : > { %8497 = vmatprep.mubr.bf16.mxu0 %v8984_v10  ;;  %8526 = vmatpush3.bf16.msra.mxu0 %v8985_v56  ;;  %v9879_v56 = vld [vmem:[#allocation3 + $0x78] sm:$0xe]  ;;  %v2406_v57 = vrot.slane %v9850_v17, 5  ;;  %v9895_v61 = vsel %vm9490_vm13, %v7118_v47, %v2392_v54  ;;  %v2394_v10 = vrot.slane %v2392_v54, 4  ;;  %v7119_v18 = vrot.slane %v9846_v14, 9  ;;  %v9007_v37 = vld [vmem:[%s10695_s3 + $0xe0] sm:$0xff]  }
 0x104   : > { %8527 = vmatprep.subr.bf16.mxu0 %v8989_v44  ;;  %8298 = vmatmul.mubr.bf16.vlgmr.msra.gmra.mrb[0].mxu1 %v7144_v60  ;;  %v5208_v20 = vshrl.u32 %v7503_v45, 16  ;;  %v9907_v15 = vsel %vm9490_vm13, %v2387_v12, %v2388_v16  ;;  %v9003_v60 = vld [vmem:[%s10695_s3 + $0xd8] sm:$0xff]   ;;  %v5211_v5 = vshll.u32 %v7503_v45, 16  ;;  %v5217_v31 = vshll.u32 %v7504_v30, 16  ;;  %v7506_v27 = vld [vmem:[#allocation3 + $0x24] sm:$0xf] }
 0x105   : > { %8301 = vmatprep.mubr.bf16.mxu1 %v7145_v25  ;;  %8330 = vmatpush3.bf16.msra.mxu1 %v9727_v41  ;;  %v9866_v41 = vld [vmem:[#allocation3 + $0x68] sm:$0x1]  ;;  %v5221_v19 = vshrl.u32 %v7504_v30, 16  ;;  %v7120_v43 = vrot.slane %v9868_v7, 9  ;;  %v2413_v25 = vrot.slane %v9881_v63, 5  ;;  %v2420_v26 = vrot.slane %v9891_v9, 5 }
 0x106   : > { %8331 = vmatprep.subr.bf16.mxu1 %v8995_v28  ;;  %v2402_v24 = vrot.slane %v9866_v41, 5  ;;  %v9921_v51 = vld [vmem:[#allocation3 + $0x28] sm:$0xf]  ;;  %v8992_v2 = vld [vmem:[#allocation3 + $0x78] sm:$0xff]   ;;  %v2408_v29 = vrot.slane %v2406_v57, 4  ;;  %v2409_v13 = vrot.slane %v9877_v62, 5  ;;  %v7149_v50 = vcombine.low %v9887_v4, %v9907_v15 }
 0x107   : > { %8528 = vmatpush3.bf16.msra.mxu0 %v8989_v44  ;;  %v9912_v44 = vld [vmem:[#allocation3 + $0x8c] sm:$0x1]  ;;  %v7121_v32 = vrot.slane %v9879_v56, 9  ;;  %v5213_v40 = vrot.slane %v5211_v5, 5  ;;  %v9933_v35 = vrot.slane %v5217_v31, 5  ;;  %v9940_v38 = vsel %vm9490_vm13, %v2394_v10, %v2395_v53  ;;  %v8994_v4 = vld [vmem:[#allocation3 + $0x84] sm:$0xff]  }
 0x108   : > { %8529 = vmatprep.subr.bf16.mxu0 %v8993_v39  ;;  %v2416_v59 = vrot.slane %v9901_v8, 5  ;;  %v7122_v21 = vrot.slane %v9903_v55, 9  ;;  %v2415_v14 = vrot.slane %v2413_v25, 4  ;;  %v2422_v34 = vrot.slane %v2420_v26, 4  ;;  %v9009_v53 = vld [vmem:[%s10695_s3 + $0xe8] sm:$0xff]   ;;  %v8996_v8 = vld [vmem:[#allocation3 + $0x90] sm:$0xff]  }
 0x109   : > { %8332 = vmatpush3.bf16.msra.mxu1 %v8995_v28  ;;  %v2401_v28 = vrot.slane %v2399_v6, 4  ;;  %v2423_v17 = vrot.slane %v9912_v44, 5  ;;  %v5227_v47 = vshll.u32 %v9914_v49, 16  ;;  %v5232_v54 = vshrl.u32 %v7506_v27, 16  ;;  %v9972_v63 = vld [vmem:[#allocation3 + $0x90] sm:$0xe] }
 0x10a   : > { %8498 = vmatmul.mubr.bf16.gmra.mrb[8].mxu0 %v8986_v36  ;;  %8333 = vmatprep.subr.bf16.mxu1 %v8999_v58  ;;  %v9928_v36 = vld [vmem:[%s10695_s3 + $0x1f8] sm:$0xff]   ;;  %v5235_v12 = vshll.u32 %v7506_v27, 16  ;;  %v5241_v16 = vshll.u32 %v9921_v51, 16  ;;  %v9953_v41 = vsel %vm9490_vm13, %v7120_v43, %v2406_v57  ;;  %v9966_v62 = vsel %vm9490_vm13, %v2408_v29, %v2409_v13  ;;  %v9974_v30 = vld [vmem:[#allocation3 + $0x94] sm:$0xf] }
 0x10b   : > { %8501 = vmatprep.mubr.bf16.mxu0 %v8988_v3  ;;  %8530 = vmatpush3.bf16.msra.mxu0 %v8993_v39  ;;  %v5210_v39 = vrot.slane %v5208_v20, 4  ;;  %v5223_v3 = vrot.slane %v5221_v19, 4  ;;  %v9970_v56 = vsel %vm9490_vm13, %v7121_v32, %v2413_v25  ;;  %v9983_v57 = vsel %vm9490_vm13, %v7122_v21, %v2420_v26  ;;  %v9999_v44 = vld [vmem:[#allocation3 + $0x98] sm:$0x1]  ;;  %v7510_v49 = vld [vmem:[#allocation3 + $0x34] sm:$0xf] }
 0x10c   : > { %8531 = vmatprep.subr.bf16.mxu0 %v9864_v46  ;;  %8302 = vmatmul.mubr.bf16.gmra.mrb[4].mxu1 %v7146_v48  ;;  %v7508_v48 = vld [vmem:[#allocation3 + $0x2c] sm:$0x1]  ;;  %v9987_v9 = vsel %vm9490_vm13, %v2422_v34, %v2423_v17  ;;  %v5229_v10 = vrot.slane %v5227_v47, 5  ;;  %v5234_v55 = vrot.slane %v5232_v54, 4  ;;  %v5237_v20 = vrot.slane %v5235_v12, 5  ;;  %v9011_v5 = vld [vmem:[%s10695_s3 + $0xf0] sm:$0xff]  }
 0x10d   : > { %8305 = vmatprep.mubr.bf16.mxu1 %v7147_v52  ;;  %8334 = vmatpush3.bf16.msra.mxu1 %v8999_v58  ;;  %v5214_v7 = vor.u32 %v5213_v40, %v5210_v39  ;;  %v5224_v45 = vor.u32 %v5223_v3, %v9933_v35  ;;  %v5245_v52 = vshrl.u32 %v9921_v51, 16  ;;  %v9962_v58 = vsel %vm9490_vm13, %v2401_v28, %v2402_v24  ;;  %v10005_v1 = vld [vmem:[#allocation3 + $0xa0] sm:$0xf]  ;;  %v7512_v28 = vld [vmem:[#allocation3 + $0x3c] sm:$0xf] }
 0x10e   : > { %8335 = vmatprep.subr.bf16.mxu1 %v9003_v60  ;;  %v9997_v15 = vrot.slane %v5241_v16, 5  ;;  %v2427_v42 = vrot.slane %v9974_v30, 5  ;;  %v7152_v26 = vcombine.low %v9953_v41, %v9966_v62  ;;  %v7154_v51 = vcombine.low %v9983_v57, %v9987_v9  ;;  %v9013_v21 = vld [vmem:[%s10695_s3 + $0xf8] sm:$0xff]  }
 0x10f   : > { %8532 = vmatpush3.bf16.msra.mxu0 %v9864_v46  ;;  %v9948_v46 = vsel %vm9490_vm13, %v7119_v18, %v2399_v6  ;;  %v9979_v6 = vsel %vm9490_vm13, %v2415_v14, %v2416_v59  ;;  %v7509_v18 = vld [vmem:[#allocation3 + $0x30] sm:$0xf]  ;;  %v5215_v31 = vrot.slane %v5214_v7, 4  ;;  %v5225_v19 = vrot.slane %v5224_v45, 4  ;;  %v7511_v59 = vld [vmem:[#allocation3 + $0x38] sm:$0x1] }
 0x110   : > { %8533 = vmatprep.subr.bf16.mxu0 %v9001_v22  ;;  %v7151_v24 = vcombine.low %v9948_v46, %v9962_v58  ;;  %v5256_v43 = vshrl.u32 %v7509_v18, 16  ;;  %v5259_v25 = vshll.u32 %v7509_v18, 16  ;;  %v7153_v27 = vcombine.low %v9970_v56, %v9979_v6  ;;  %v8998_v16 = vld [vmem:[#allocation3 + $0x9c] sm:$0xff]   ;;  %v9000_v58 = vld [vmem:[#allocation3 + $0xa8] sm:$0xff]  }
 0x111   : > { %8336 = vmatpush3.bf16.msra.mxu1 %v9003_v60  ;;  %v5251_v60 = vshll.u32 %v7508_v48, 16  ;;  %v5238_v29 = vor.u32 %v5237_v20, %v5234_v55  ;;  %v5265_v32 = vshll.u32 %v7510_v49, 16  ;;  %v5220_v39 = vsel %vm9306_vm10, %v5215_v31, %v9933_v35  ;;  %v10045_v18 = vld [vmem:[#allocation3 + $0xac] sm:$0xf] }
 0x112   : > { %8502 = vmatmul.mubr.bf16.gmra.mrb[12].mxu0 %v8990_v23  ;;  %8337 = vmatprep.subr.bf16.mxu1 %v9007_v37  ;;  %v5247_v23 = vrot.slane %v5245_v52, 4  ;;  %v5230_v40 = vsel %vm9306_vm10, %v5225_v19, %v5229_v10  ;;  %v2429_v14 = vrot.slane %v2427_v42, 4  ;;  %v2434_v34 = vrot.slane %v10005_v1, 5 }
 0x113   : > { %8505 = vmatprep.mubr.bf16.mxu0 %v8992_v2  ;;  %8534 = vmatpush3.bf16.msra.mxu0 %v9001_v22  ;;  %v9992_v22 = vld [vmem:[%s10695_s3 + $0x200] sm:$0xff]   ;;  %v2281_v2 = vld [vmem:[#allocation3 + $0x9c] sm:$0xe]  ;;  %v10020_v13 = vrot.slane %v5251_v60, 5  ;;  %v5258_v17 = vrot.slane %v5256_v43, 4  ;;  %v5261_v35 = vrot.slane %v5259_v25, 5  ;;  %v10033_v7 = vcombine.low %v5220_v39, %v5230_v40 }
 0x114   : > { %8535 = vmatprep.subr.bf16.mxu0 %v9928_v36  ;;  %8306 = vmatmul.mubr.bf16.gmra.mrb[8].mxu1 %v7148_v0  ;;  %v7150_v0 = vcombine.low %v9895_v61, %v9940_v38  ;;  %v7123_v61 = vrot.slane %v9972_v63, 9  ;;  %v5248_v3 = vor.u32 %v5247_v23, %v9997_v15  ;;  %v2283_v38 = vld [vmem:[#allocation3 + $0xa4] sm:$0x1]  ;;  %v5280_v47 = vshrl.u32 %v7512_v28, 16 }
 0x115   : > { %8309 = vmatprep.mubr.bf16.mxu1 %v7149_v50  ;;  %8338 = vmatpush3.bf16.msra.mxu1 %v9007_v37  ;;  %v7513_v37 = vld [vmem:[#allocation3 + $0x40] sm:$0xf]  ;;  %v2430_v50 = vrot.slane %v9999_v44, 5  ;;  %v5283_v46 = vshll.u32 %v7512_v28, 16  ;;  %v7124_v45 = vrot.slane %v2281_v2, 9  ;;  %v10035_v48 = vrot.slane %v5265_v32, 5 }
 0x116   : > { %8339 = vmatprep.subr.bf16.mxu1 %v9009_v53  ;;  %v5289_v54 = vshll.u32 %v7513_v37, 16  ;;  %v5293_v12 = vshrl.u32 %v7513_v37, 16  ;;  %v10037_v63 = vrot.slane %v5238_v29, 4  ;;  %v10039_v30 = vrot.slane %v5248_v3, 4  ;;  %v2286_v29 = vld [vmem:[#allocation3 + $0xb0] sm:$0x1] }
 0x117   : > { %8536 = vmatpush3.bf16.msra.mxu0 %v9928_v36  ;;  %v5269_v36 = vshrl.u32 %v7510_v49, 16  ;;  %v5275_v10 = vshll.u32 %v7511_v59, 16  ;;  %v10049_v55 = vsel %vm9490_vm13, %v2429_v14, %v2430_v50  ;;  %v2436_v20 = vrot.slane %v2434_v34, 4  ;;  %v7516_v49 = vld [vmem:[#allocation3 + $0x4c] sm:$0xf]  ;;  %v9002_v3 = vld [vmem:[#allocation3 + $0xb4] sm:$0xff]  }
 0x118   : > { %8569 = vmatprep.subr.bf16.mxu0 %v9992_v22  ;;  %v2437_v60 = vrot.slane %v2283_v38, 5  ;;  %v5262_v44 = vor.u32 %v5261_v35, %v5258_v17  ;;  %v5282_v31 = vrot.slane %v5280_v47, 4  ;;  %v5285_v19 = vrot.slane %v5283_v46, 5  ;;  %v10066_v32 = vld [vmem:[#allocation3 + $0xb8] sm:$0xf]  ;;  %v10079_v17 = vld [vmem:[%s10695_s3 + $0x100] sm:$0xff]  }
 0x119   : > { %8340 = vmatpush3.bf16.msra.mxu1 %v9009_v53  ;;  %v5271_v52 = vrot.slane %v5269_v36, 4  ;;  %v7514_v53 = vld [vmem:[#allocation3 + $0x44] sm:$0x1]  ;;  %v10051_v23 = vrot.slane %v5289_v54, 5  ;;  %v10055_v1 = vsel %vm9490_vm13, %v7124_v45, %v2434_v34  ;;  %v5244_v25 = vsel %vm9306_vm10, %v10037_v63, %v9997_v15  ;;  %v7518_v36 = vld [vmem:[#allocation3 + $0x54] sm:$0xf] }
 0x11a   : > { %8506 = vmatmul.mubr.bf16.gmra.mrb[16].mxu0 %v8994_v4  ;;  %8341 = vmatprep.subr.bf16.mxu1 %v9011_v5  ;;  %v10043_v4 = vsel %vm9490_vm13, %v7123_v61, %v2427_v42  ;;  %v5295_v42 = vrot.slane %v5293_v12, 4  ;;  %v5254_v61 = vsel %vm9306_vm10, %v10039_v30, %v10020_v13  ;;  %v5277_v2 = vrot.slane %v5275_v10, 5  ;;  %v2287_v38 = vld [vmem:[#allocation3 + $0xb4] sm:$0xe]  ;;  %v2289_v59 = vld [vmem:[#allocation3 + $0xbc] sm:$0x1] }
 0x11b   : > { %8509 = vmatprep.mubr.bf16.mxu0 %v8996_v8  ;;  %v7515_v8 = vld [vmem:[#allocation3 + $0x48] sm:$0xf]  ;;  %v5299_v28 = vshll.u32 %v7514_v53, 16  ;;  %v7155_v37 = vcombine.low %v10043_v4, %v10049_v55  ;;  %v10072_v39 = vsel %vm9490_vm13, %v2436_v20, %v2437_v60  ;;  %v5263_v15 = vrot.slane %v5262_v44, 4  ;;  %v7517_v47 = vld [vmem:[#allocation3 + $0x50] sm:$0x1] }
 0x11c   : > { %8310 = vmatmul.mubr.bf16.gmra.mrb[12].mxu1 %v7150_v0  ;;  %v2284_v0 = vld [vmem:[#allocation3 + $0xa8] sm:$0xe]  ;;  %v5307_v43 = vshll.u32 %v7515_v8, 16  ;;  %v2441_v40 = vrot.slane %v10045_v18, 5  ;;  %v5286_v13 = vor.u32 %v5285_v19, %v5282_v31  ;;  %v5296_v50 = vor.u32 %v5295_v42, %v10051_v23  ;;  %v7519_v12 = vld [vmem:[#allocation3 + $0x58] sm:$0xf] }
 0x11d   : > { %8313 = vmatprep.mubr.bf16.mxu1 %v7151_v24  ;;  %8342 = vmatpush3.bf16.msra.mxu1 %v9011_v5  ;;  %v5272_v5 = vor.u32 %v5271_v52, %v10035_v48  ;;  %v5304_v24 = vshrl.u32 %v7515_v8, 16  ;;  %v5313_v14 = vshll.u32 %v7516_v49, 16  ;;  %v5317_v34 = vshrl.u32 %v7516_v49, 16  ;;  %v7520_v55 = vld [vmem:[#allocation3 + $0x5c] sm:$0x1] }
 0x11e   : > { %8343 = vmatprep.subr.bf16.mxu1 %v9013_v21  ;;  %v2448_v35 = vrot.slane %v10066_v32, 5  ;;  %v5309_v54 = vrot.slane %v5307_v43, 5  ;;  %v7125_v45 = vrot.slane %v2284_v0, 9  ;;  %v5328_v52 = vshrl.u32 %v7518_v36, 16 }
 0x11f   : > { %v5306_v46 = vrot.slane %v5304_v24, 4  ;;  %v5331_v53 = vshll.u32 %v7518_v36, 16  ;;  %v5268_v41 = vsel %vm9306_vm10, %v5263_v15, %v10035_v48  ;;  %v2444_v62 = vrot.slane %v2286_v29, 5  ;;  %v9006_v29 = vld [vmem:[#allocation3 + $0xcc] sm:$0xff]   ;;  %v7527_v15 = vld [vmem:[#allocation3 + $0x78] sm:$0xf] }
 0x120   : > { %v5319_v63 = vrot.slane %v5317_v34, 4  ;;  %v5287_v30 = vrot.slane %v5286_v13, 4  ;;  %v5297_v4 = vrot.slane %v5296_v50, 4  ;;  %v2443_v10 = vrot.slane %v2441_v40, 4  ;;  %v7524_v36 = vld [vmem:[#allocation3 + $0x6c] sm:$0xf] }
 0x121   : > { %8344 = vmatpush3.bf16.msra.mxu1 %v9013_v21  ;;  %v5273_v21 = vrot.slane %v5272_v5, 4  ;;  %v7126_v18 = vrot.slane %v2287_v38, 9  ;;  %v2450_v6 = vrot.slane %v2448_v35, 4  ;;  %v5310_v8 = vor.u32 %v5309_v54, %v5306_v46  ;;  %v7521_v5 = vld [vmem:[#allocation3 + $0x60] sm:$0xf] }
 0x122   : > { %8510 = vmatmul.mubr.bf16.gmra.mrb[20].mxu0 %v8998_v16  ;;  %8617 = vmatprep.subr.bf16.mxu1 %v10079_v17  ;;  %v5301_v16 = vrot.slane %v5299_v28, 5  ;;  %v5323_v20 = vshll.u32 %v7517_v47, 16  ;;  %v5330_v60 = vrot.slane %v5328_v52, 4  ;;  %v5333_v44 = vrot.slane %v5331_v53, 5  ;;  %v7522_v28 = vld [vmem:[#allocation3 + $0x64] sm:$0xf] }
 0x123   : > { %8513 = vmatprep.mubr.bf16.mxu0 %v9000_v58  ;;  %v9004_v58 = vld [vmem:[#allocation3 + $0xc0] sm:$0xff]   ;;  %v5278_v56 = vsel %vm9306_vm10, %v5273_v21, %v5277_v2  ;;  %v5337_v48 = vshll.u32 %v7519_v12, 16  ;;  %v10096_v49 = vcombine.low %v5244_v25, %v5254_v61  ;;  %v7156_v31 = vcombine.low %v10055_v1, %v10072_v39  ;;  %v7528_v38 = vld [vmem:[#allocation3 + $0x7c] sm:$0xf] }
 0x124   : > { %8314 = vmatmul.mubr.bf16.gmra.mrb[16].mxu1 %v7152_v26  ;;  %v10092_v26 = vrot.slane %v5313_v14, 5  ;;  %v2442_v19 = vsel %vm9490_vm13, %v7125_v45, %v2441_v40  ;;  %v10103_v0 = vcombine.low %v5268_v41, %v5278_v56  ;;  %v2445_v24 = vsel %vm9490_vm13, %v2443_v10, %v2444_v62 }
 0x125   : > { %8317 = vmatprep.mubr.bf16.mxu1 %v7153_v27  ;;  %v2451_v27 = vrot.slane %v2289_v59, 5  ;;  %v5341_v43 = vshrl.u32 %v7519_v12, 16  ;;  %v5347_v2 = vshll.u32 %v7520_v55, 16  ;;  %v5292_v1 = vsel %vm9306_vm10, %v5287_v30, %v10051_v23  ;;  %v7525_v23 = vld [vmem:[#allocation3 + $0x70] sm:$0xf] }
 0x126   : > { %v5320_v42 = vor.u32 %v5319_v63, %v10092_v26  ;;  %v5302_v25 = vsel %vm9306_vm10, %v5297_v4, %v5301_v16  ;;  %v10117_v61 = vsel %vm9490_vm13, %v7126_v18, %v2448_v35  ;;  %v10119_v32 = vrot.slane %v5310_v8, 4  ;;  %v7523_v12 = vld [vmem:[#allocation3 + $0x68] sm:$0x1]  ;;  %v7530_v63 = vld [vmem:[#allocation3 + $0x84] sm:$0xf] }
 0x127   : > { %v10123_v39 = vsel %vm9490_vm13, %v2450_v6, %v2451_v27  ;;  %v10125_v57 = vrot.slane %v5323_v20, 5  ;;  %v5334_v9 = vor.u32 %v5333_v44, %v5330_v60  ;;  %v5355_v13 = vshll.u32 %v7521_v5, 16  ;;  %v7531_v18 = vld [vmem:[#allocation3 + $0x88] sm:$0xf]  ;;  %v7526_v27 = vld [vmem:[#allocation3 + $0x74] sm:$0x1] }
 0x128   : > { %v10129_v40 = vrot.slane %v5320_v42, 4  ;;  %v5361_v50 = vshll.u32 %v7522_v28, 16  ;;  %v10131_v59 = vcombine.low %v5292_v1, %v5302_v25  ;;  %v10133_v14 = vrot.slane %v5341_v43, 4  ;;  %v7529_v44 = vld [vmem:[#allocation3 + $0x80] sm:$0x1] }
 0x129   : > { %v10135_v34 = vrot.slane %v5347_v2, 5  ;;  %v7158_v21 = vcombine.low %v10117_v61, %v10123_v39  ;;  %v5316_v35 = vsel %vm9306_vm10, %v10119_v32, %v10092_v26  ;;  %v5365_v47 = vshrl.u32 %v7522_v28, 16  ;;  %v9010_v2 = vld [vmem:[%s10695_s3 + $0x208] sm:$0xff]  }
 0x12a   : > { %8514 = vmatmul.mubr.bf16.gmra.mrb[24].mxu0 %v9002_v3  ;;  %v5352_v3 = vshrl.u32 %v7521_v5, 16  ;;  %v5376_v46 = vshrl.u32 %v7524_v36, 16  ;;  %v10143_v54 = vrot.slane %v5334_v9, 4  ;;  %v5379_v16 = vshll.u32 %v7524_v36, 16  ;;  %v7532_v5 = vld [vmem:[#allocation3 + $0x8c] sm:$0x1] }
 0x12b   : > { %8517 = vmatprep.mubr.bf16.mxu0 %v9004_v58  ;;  %v5385_v45 = vshll.u32 %v7525_v23, 16  ;;  %v5389_v52 = vshrl.u32 %v7525_v23, 16  ;;  %v5357_v58 = vrot.slane %v5355_v13, 5  ;;  %v5400_v41 = vshrl.u32 %v7527_v15, 16  ;;  %v9014_v23 = vld [vmem:[#allocation3 + $0xc] sm:$0xff]  }
 0x12c   : > { %8318 = vmatmul.mubr.bf16.gmra.mrb[20].mxu1 %v7154_v51  ;;  %v10127_v51 = vrot.slane %v5337_v48, 5  ;;  %v5354_v53 = vrot.slane %v5352_v3, 4  ;;  %v5403_v62 = vshll.u32 %v7527_v15, 16  ;;  %v5326_v26 = vsel %vm9306_vm10, %v10129_v40, %v10125_v57 }
 0x12d   : > { %8321 = vmatprep.mubr.bf16.mxu1 %v7155_v37  ;;  %v7157_v37 = vcombine.low %v2442_v19, %v2445_v24  ;;  %v10150_v30 = vrot.slane %v5361_v50, 5  ;;  %v5409_v4 = vshll.u32 %v7528_v38, 16  ;;  %v5413_v10 = vshrl.u32 %v7528_v38, 16 }
 0x12e   : > { %v5344_v56 = vor.u32 %v10133_v14, %v10127_v51  ;;  %v5371_v6 = vshll.u32 %v7523_v12, 16  ;;  %v5378_v8 = vrot.slane %v5376_v46, 4  ;;  %v5381_v55 = vrot.slane %v5379_v16, 5 }
 0x12f   : > { %v10154_v20 = vrot.slane %v5385_v45, 5  ;;  %v5391_v60 = vrot.slane %v5389_v52, 4  ;;  %v5424_v48 = vshrl.u32 %v7530_v63, 16  ;;  %v5402_v19 = vrot.slane %v5400_v41, 4 }
 0x130   : > { %v5405_v42 = vrot.slane %v5403_v62, 5  ;;  %v5427_v24 = vshll.u32 %v7530_v63, 16  ;;  %v5433_v43 = vshll.u32 %v7531_v18, 16  ;;  %v5358_v28 = vor.u32 %v5357_v58, %v5354_v53  ;;  %v7534_v53 = vld [vmem:[#allocation3 + $0x94] sm:$0xf]  ;;  %v9016_v58 = vld [vmem:[%s10695_s3 + $0x218] sm:$0xff]  }
 0x131   : > { %v5415_v1 = vrot.slane %v5413_v10, 4  ;;  %v5437_v25 = vshrl.u32 %v7531_v18, 16  ;;  %v5426_v36 = vrot.slane %v5424_v48, 4  ;;  %v5382_v15 = vor.u32 %v5381_v55, %v5378_v8  ;;  %v7536_v18 = vld [vmem:[#allocation3 + $0x9c] sm:$0xf] }
 0x132   : > { %8518 = vmatmul.mubr.bf16.gmra.mrb[28].mxu0 %v9006_v29  ;;  %v10159_v29 = vrot.slane %v5409_v4, 5  ;;  %v5429_v57 = vrot.slane %v5427_v24, 5  ;;  %v10162_v9 = vrot.slane %v5433_v43, 5  ;;  %v5392_v40 = vor.u32 %v5391_v60, %v10154_v20  ;;  %v9015_v4 = vld [vmem:[#allocation3 + $0x18] sm:$0xff]  }
 0x133   : > { %8537 = vmatprep.mubr.bf16.mxu0 %v10033_v7  ;;  %v5367_v7 = vrot.slane %v5365_v47, 4  ;;  %v5395_v3 = vshll.u32 %v7526_v27, 16  ;;  %v5439_v13 = vrot.slane %v5437_v25, 4  ;;  %v5406_v50 = vor.u32 %v5405_v42, %v5402_v19  ;;  %v7539_v25 = vld [vmem:[#allocation3 + $0xa8] sm:$0xf] }
 0x134   : > { %8322 = vmatmul.mubr.bf16.gmra.mrb[24].mxu1 %v7156_v31  ;;  %v7533_v31 = vld [vmem:[#allocation3 + $0x90] sm:$0xf]  ;;  %v5419_v38 = vshll.u32 %v7529_v44, 16  ;;  %v7571_v47 = vcombine.low %v5316_v35, %v5326_v26  ;;  %v5345_v46 = vrot.slane %v5344_v56, 4  ;;  %v5416_v12 = vor.u32 %v5415_v1, %v10159_v29  ;;  %v7535_v26 = vld [vmem:[#allocation3 + $0x98] sm:$0x1] }
 0x135   : > { %8325 = vmatprep.mubr.bf16.mxu1 %v7157_v37  ;;  %v5368_v32 = vor.u32 %v5367_v7, %v10150_v30  ;;  %v5448_v37 = vshrl.u32 %v7533_v31, 16  ;;  %v5451_v14 = vshll.u32 %v7533_v31, 16  ;;  %v5443_v16 = vshll.u32 %v7532_v5, 16 }
 0x136   : > { %v5430_v45 = vor.u32 %v5429_v57, %v5426_v36  ;;  %v5440_v52 = vor.u32 %v5439_v13, %v10162_v9  ;;  %v5383_v41 = vrot.slane %v5382_v15, 4  ;;  %v5393_v62 = vrot.slane %v5392_v40, 4  ;;  %v10216_v15 = vld [vmem:[#allocation3 + $0xa4] sm:$0x1] }
 0x137   : > { %v5369_v35 = vrot.slane %v5368_v32, 4  ;;  %v5397_v63 = vrot.slane %v5395_v3, 5  ;;  %v5407_v61 = vrot.slane %v5406_v50, 4  ;;  %v5421_v39 = vrot.slane %v5419_v38, 5  ;;  %v7540_v32 = vld [vmem:[#allocation3 + $0xac] sm:$0xf] }
 0x138   : > { %v5453_v10 = vrot.slane %v5451_v14, 5  ;;  %v5417_v56 = vrot.slane %v5416_v12, 4  ;;  %v5445_v7 = vrot.slane %v5443_v16, 5  ;;  %v5461_v27 = vshrl.u32 %v7534_v53, 16  ;;  %v7542_v3 = vld [vmem:[#allocation3 + $0xb4] sm:$0xf] }
 0x139   : > { %v5340_v8 = vsel %vm9306_vm10, %v10143_v54, %v10127_v51  ;;  %v5431_v55 = vrot.slane %v5430_v45, 4  ;;  %v5441_v60 = vrot.slane %v5440_v52, 4  ;;  %v5350_v44 = vsel %vm9306_vm10, %v5345_v46, %v10135_v34  ;;  %v9017_v51 = vld [vmem:[#allocation3 + $0x24] sm:$0xff]   ;;  %v9018_v50 = vld [vmem:[#allocation3 + $0x30] sm:$0xff]   ;;  %v9020_v46 = vld [vmem:[#allocation3 + $0x3c] sm:$0xff]  }
 0x13a   : > { %8538 = vmatmul.mubr.bf16.vlgmr.msra.gmra.mrb[0].mxu0 %v10096_v49  ;;  %v9012_v49 = vld [vmem:[%s10695_s3 + $0x210] sm:$0xff]   ;;  %v5388_v42 = vsel %vm9306_vm10, %v5383_v41, %v10154_v20  ;;  %v5412_v34 = vsel %vm9306_vm10, %v5407_v61, %v10159_v29  ;;  %v5467_v5 = vshll.u32 %v7535_v26, 16  ;;  %v5422_v24 = vsel %vm9306_vm10, %v5417_v56, %v5421_v39  ;;  %v9019_v20 = vld [vmem:[%s10695_s3 + $0x220] sm:$0xff]  }
 0x13b   : > { %8570 = vmatpush3.bf16.msra.mxu0 %v9992_v22  ;;  %8541 = vmatprep.mubr.bf16.mxu0 %v10103_v0  ;;  %v5359_v22 = vrot.slane %v5358_v28, 4  ;;  %v5373_v0 = vrot.slane %v5371_v6, 5  ;;  %v5457_v6 = vshll.u32 %v7534_v53, 16  ;;  %v5463_v31 = vrot.slane %v5461_v27, 4  ;;  %v9025_v61 = vld [vmem:[%s10695_s3 + $0x230] sm:$0xff]  }
 0x13c   : > { %8571 = vmatprep.subr.bf16.mxu0 %v9010_v2  ;;  %8326 = vmatmul.mubr.bf16.gmra.mrb[28].mxu1 %v7158_v21  ;;  %v5450_v21 = vrot.slane %v5448_v37, 4  ;;  %v5436_v28 = vsel %vm9306_vm10, %v5431_v55, %v10162_v9  ;;  %v5446_v29 = vsel %vm9306_vm10, %v5441_v60, %v5445_v7  ;;  %v5475_v1 = vshll.u32 %v7536_v18, 16  ;;  %v7543_v9 = vld [vmem:[#allocation3 + $0xb8] sm:$0xf]  ;;  %v9042_v37 = vld [vmem:[%s10695_s3 + $0x108] sm:$0xff]   ;;  %v9043_v56 = vld [vmem:[%s10695_s3 + $0x110] sm:$0xff]  }
 0x13d   : > { %8345 = vmatprep.mubr.bf16.mxu1 %v9014_v23  ;;  %v5364_v48 = vsel %vm9306_vm10, %v5359_v22, %v10150_v30  ;;  %v5374_v19 = vsel %vm9306_vm10, %v5369_v35, %v5373_v0  ;;  %v7537_v30 = vld [vmem:[#allocation3 + $0xa0] sm:$0xf]  ;;  %v10205_v43 = vrot.slane %v5457_v6, 5  ;;  %v7572_v36 = vcombine.low %v5340_v8, %v5350_v44  ;;  %v9022_v23 = vld [vmem:[%s10695_s3 + $0x228] sm:$0xff]   ;;  %v7546_v0 = vld [vmem:[#allocation3 + $0xc4] sm:$0xf] }
 0x13e   : > { %v5454_v54 = vor.u32 %v5453_v10, %v5450_v21  ;;  %v7573_v57 = vcombine.low %v5364_v48, %v5374_v19  ;;  %v5481_v40 = vshll.u32 %v7537_v30, 16  ;;  %v10220_v38 = vcombine.low %v5412_v34, %v5422_v24  ;;  %v10251_v7 = vld [vmem:[#allocation3 + $0xb0] sm:$0x1]  ;;  %v7548_v48 = vld [vmem:[#allocation3 + $0xcc] sm:$0xf]  ;;  %v9044_v24 = vld [vmem:[%s10695_s3 + $0x118] sm:$0xff]  }
 0x13f   : > { %8572 = vmatpush3.bf16.msra.mxu0 %v9010_v2  ;;  %v5472_v2 = vshrl.u32 %v7536_v18, 16  ;;  %v10227_v14 = vrot.slane %v5467_v5, 5  ;;  %v5464_v12 = vor.u32 %v5463_v31, %v10205_v43  ;;  %v5485_v22 = vshrl.u32 %v7537_v30, 16 }
 0x140   : > { %8573 = vmatprep.subr.bf16.mxu0 %v9012_v49  ;;  %v10234_v45 = vrot.slane %v5475_v1, 5  ;;  %v5496_v52 = vshrl.u32 %v7539_v25, 16  ;;  %v5499_v53 = vshll.u32 %v7539_v25, 16  ;;  %v5505_v35 = vshll.u32 %v7540_v32, 16  ;;  %v7549_v1 = vld [vmem:[#allocation3 + $0xd0] sm:$0xf] }
 0x141   : > { %v10232_v16 = vrot.slane %v5472_v2, 4  ;;  %v5509_v41 = vshrl.u32 %v7540_v32, 16  ;;  %v5529_v39 = vshll.u32 %v7543_v9, 16  ;;  %v5533_v21 = vshrl.u32 %v7543_v9, 16  ;;  %v9023_v9 = vld [vmem:[#allocation3 + $0x54] sm:$0xff]  }
 0x142   : > { %8542 = vmatmul.mubr.bf16.gmra.mrb[4].mxu0 %v10131_v59  ;;  %v5398_v59 = vsel %vm9306_vm10, %v5393_v62, %v5397_v63  ;;  %v5520_v62 = vshrl.u32 %v7542_v3, 16  ;;  %v5523_v63 = vshll.u32 %v7542_v3, 16  ;;  %v10246_v10 = vrot.slane %v5464_v12, 4 }
 0x143   : > { %8545 = vmatprep.mubr.bf16.mxu0 %v7571_v47  ;;  %8574 = vmatpush3.bf16.msra.mxu0 %v9012_v49  ;;  %v10218_v13 = vcombine.low %v5388_v42, %v5398_v59  ;;  %v7545_v47 = vld [vmem:[#allocation3 + $0xc0] sm:$0xf]  ;;  %v10229_v49 = vcombine.low %v5436_v28, %v5446_v29  ;;  %v5487_v18 = vrot.slane %v5485_v22, 4  ;;  %v5498_v8 = vrot.slane %v5496_v52, 4  ;;  %v7544_v42 = vld [vmem:[#allocation3 + $0xbc] sm:$0x1] }
 0x144   : > { %8575 = vmatprep.subr.bf16.mxu0 %v9016_v58  ;;  %8346 = vmatmul.mubr.bf16.vlgmr.msra.gmra.mrb[0].mxu1 %v9015_v4  ;;  %v5491_v4 = vshll.u32 %v10216_v15, 16  ;;  %v5544_v6 = vshrl.u32 %v7545_v47, 16  ;;  %v5547_v27 = vshll.u32 %v7545_v47, 16  ;;  %v5501_v55 = vrot.slane %v5499_v53, 5  ;;  %v9045_v53 = vld [vmem:[%s10695_s3 + $0x120] sm:$0xff]   ;;  %v9046_v15 = vld [vmem:[%s10695_s3 + $0x128] sm:$0xff]  }
 0x145   : > { %8349 = vmatprep.mubr.bf16.mxu1 %v9017_v51  ;;  %8625 = vmatpush3.bf16.msra.mxu1 %v10079_v17  ;;  %v10225_v17 = vrot.slane %v5454_v54, 4  ;;  %v10253_v60 = vrot.slane %v5505_v35, 5  ;;  %v5553_v44 = vshll.u32 %v7546_v0, 16  ;;  %v5511_v19 = vrot.slane %v5509_v41, 4  ;;  %v9028_v54 = vld [vmem:[%s10695_s3 + $0x238] sm:$0xff]  }
 0x146   : > { %8618 = vmatprep.subr.bf16.mxu1 %v9042_v37  ;;  %v5522_v51 = vrot.slane %v5520_v62, 4  ;;  %v5525_v59 = vrot.slane %v5523_v63, 5  ;;  %v5557_v34 = vshrl.u32 %v7546_v0, 16  ;;  %v10258_v5 = vrot.slane %v5529_v39, 5 }
 0x147   : > { %8576 = vmatpush3.bf16.msra.mxu0 %v9016_v58  ;;  %v10236_v58 = vrot.slane %v5481_v40, 5  ;;  %v5460_v26 = vsel %vm9306_vm10, %v10225_v17, %v10205_v43  ;;  %v5535_v30 = vrot.slane %v5533_v21, 4  ;;  %v5546_v31 = vrot.slane %v5544_v6, 4 }
 0x148   : > { %8577 = vmatprep.subr.bf16.mxu0 %v9019_v20  ;;  %v5549_v2 = vrot.slane %v5547_v27, 5  ;;  %v10263_v28 = vrot.slane %v5553_v44, 5  ;;  %v5559_v29 = vrot.slane %v5557_v34, 4  ;;  %v5568_v25 = vshrl.u32 %v7548_v48, 16  ;;  %v9026_v34 = vld [vmem:[#allocation3 + $0x6c] sm:$0xff]  }
 0x149   : > { %8626 = vmatpush3.bf16.msra.mxu1 %v9042_v37  ;;  %v5571_v32 = vshll.u32 %v7548_v48, 16  ;;  %v5488_v40 = vor.u32 %v5487_v18, %v10236_v58  ;;  %v5515_v3 = vshll.u32 %v10251_v7, 16  ;;  %v5512_v37 = vor.u32 %v5511_v19, %v10253_v60  ;;  %v7550_v7 = vld [vmem:[#allocation3 + $0xd4] sm:$0x1]  ;;  %v9024_v48 = vld [vmem:[#allocation3 + $0x60] sm:$0xff]  }
 0x14a   : > { %8546 = vmatmul.mubr.bf16.gmra.mrb[8].mxu0 %v7572_v36  ;;  %8619 = vmatprep.subr.bf16.mxu1 %v9043_v56  ;;  %v9021_v36 = vld [vmem:[#allocation3 + $0x48] sm:$0xff]   ;;  %v5526_v47 = vor.u32 %v5525_v59, %v5522_v51  ;;  %v5581_v22 = vshrl.u32 %v7549_v1, 16  ;;  %v5550_v0 = vor.u32 %v5549_v2, %v5546_v31  ;;  %v5493_v62 = vrot.slane %v5491_v4, 5  ;;  %v7593_v19 = vld [vmem:[#allocation3 + $0x20] sm:$0x1] }
 0x14b   : > { %8549 = vmatprep.mubr.bf16.mxu0 %v7573_v57  ;;  %8578 = vmatpush3.bf16.msra.mxu0 %v9019_v20  ;;  %v7547_v20 = vld [vmem:[#allocation3 + $0xc8] sm:$0x1]  ;;  %v5470_v57 = vsel %vm9306_vm10, %v10246_v10, %v10227_v14  ;;  %v5536_v14 = vor.u32 %v5535_v30, %v10258_v5  ;;  %v5573_v52 = vrot.slane %v5571_v32, 5  ;;  %v5489_v41 = vrot.slane %v5488_v40, 4  ;;  %v10288_v10 = vld [vmem:[#allocation3 + $0x1c] sm:$0xf] }
 0x14c   : > { %8579 = vmatprep.subr.bf16.mxu0 %v9022_v23  ;;  %8350 = vmatmul.mubr.bf16.gmra.mrb[4].mxu1 %v9018_v50  ;;  %v5502_v50 = vor.u32 %v5501_v55, %v5498_v8  ;;  %v5563_v12 = vshll.u32 %v7547_v20, 16  ;;  %v5517_v39 = vrot.slane %v5515_v3, 5  ;;  %v5527_v18 = vrot.slane %v5526_v47, 4  ;;  %v7591_v8 = vld [vmem:[#allocation3 + $0x18] sm:$0xe] }
 0x14d   : > { %8353 = vmatprep.mubr.bf16.mxu1 %v9020_v46  ;;  %8627 = vmatpush3.bf16.msra.mxu1 %v9043_v56  ;;  %v5539_v46 = vshll.u32 %v7544_v42, 16  ;;  %v5537_v56 = vrot.slane %v5536_v14, 4  ;;  %v5583_v43 = vrot.slane %v5581_v22, 4  ;;  %v5551_v17 = vrot.slane %v5550_v0, 4  ;;  %v10307_v30 = vld [vmem:[#allocation3 + $0x28] sm:$0xf] }
 0x14e   : > { %8620 = vmatprep.subr.bf16.mxu1 %v9044_v24  ;;  %v5503_v63 = vrot.slane %v5502_v50, 4  ;;  %v5565_v4 = vrot.slane %v5563_v12, 5  ;;  %v5494_v44 = vsel %vm9306_vm10, %v5489_v41, %v5493_v62  ;;  %v6075_v42 = vrot.slane %v10288_v10, 5  ;;  %v10317_v31 = vld [vmem:[#allocation3 + $0x24] sm:$0xe]  ;;  %v9048_v41 = vld [vmem:[%s10695_s3 + $0x138] sm:$0xff]  }
 0x14f   : > { %8580 = vmatpush3.bf16.msra.mxu0 %v9022_v23  ;;  %v5478_v23 = vor.u32 %v10234_v45, %v10232_v16  ;;  %v5577_v16 = vshll.u32 %v7549_v1, 16  ;;  %v5560_v45 = vor.u32 %v5559_v29, %v10263_v28  ;;  %v5541_v21 = vrot.slane %v5539_v46, 5  ;;  %v10319_v2 = vld [vmem:[#allocation3 + $0x2c] sm:$0x1]  ;;  %v9047_v29 = vld [vmem:[%s10695_s3 + $0x130] sm:$0xff]   ;;  %v9027_v62 = vld [vmem:[#allocation3 + $0x78] sm:$0xff]  }
 0x150   : > { %8581 = vmatprep.subr.bf16.mxu0 %v9025_v61  ;;  %v5508_v51 = vsel %vm9306_vm10, %v5503_v63, %v10253_v60  ;;  %v7639_v20 = vrot.slane %v7591_v8, 9  ;;  %v6077_v40 = vrot.slane %v6075_v42, 4  ;;  %v6078_v3 = vrot.slane %v7593_v19, 5  ;;  %v7599_v50 = vld [vmem:[#allocation3 + $0x38] sm:$0x1] }
 0x151   : > { %8628 = vmatpush3.bf16.msra.mxu1 %v9044_v24  ;;  %v5479_v35 = vrot.slane %v5478_v23, 4  ;;  %v10290_v6 = vrot.slane %v5577_v16, 5  ;;  %v5532_v24 = vsel %vm9306_vm10, %v5527_v18, %v10258_v5  ;;  %v5556_v5 = vsel %vm9306_vm10, %v5551_v17, %v10263_v28  ;;  %v10335_v23 = vld [vmem:[#allocation3 + $0x4c] sm:$0xf]  ;;  %v7600_v28 = vld [vmem:[#allocation3 + $0x3c] sm:$0xe] }
 0x152   : > { %8550 = vmatmul.mubr.bf16.gmra.mrb[12].mxu0 %v10218_v13  ;;  %v5570_v13 = vrot.slane %v5568_v25, 4  ;;  %8621 = vmatprep.subr.bf16.mxu1 %v9045_v53  ;;  %v10339_v47 = vld [vmem:[#allocation3 + $0x58] sm:$0xf]  ;;  %v7640_v16 = vrot.slane %v10317_v31, 9  ;;  %v7602_v22 = vld [vmem:[#allocation3 + $0x44] sm:$0x1] }
 0x153   : > { %8553 = vmatprep.mubr.bf16.mxu0 %v10220_v38  ;;  %8582 = vmatpush3.bf16.msra.mxu0 %v9025_v61  ;;  %v7577_v38 = vcombine.low %v5460_v26, %v5470_v57  ;;  %v5513_v61 = vrot.slane %v5512_v37, 4  ;;  %v5561_v26 = vrot.slane %v5560_v45, 4  ;;  %v5484_v55 = vsel %vm9306_vm10, %v5479_v35, %v10236_v58  ;;  %v10309_v58 = vld [vmem:[#allocation3 + $0x34] sm:$0xf]  ;;  %v10333_v57 = vld [vmem:[#allocation3 + $0x40] sm:$0xf] }
 0x154   : > { %8583 = vmatprep.subr.bf16.mxu0 %v9028_v54  ;;  %8354 = vmatmul.mubr.bf16.gmra.mrb[8].mxu1 %v9021_v36  ;;  %v5574_v27 = vor.u32 %v5573_v52, %v5570_v13  ;;  %v5584_v60 = vor.u32 %v5583_v43, %v10290_v6  ;;  %v7578_v1 = vcombine.low %v5484_v55, %v5494_v44  ;;  %v10331_v36 = vld [vmem:[#allocation3 + $0x30] sm:$0xe]  ;;  %v6089_v37 = vrot.slane %v10309_v58, 5  ;;  %v7603_v0 = vld [vmem:[#allocation3 + $0x48] sm:$0xe] }
 0x155   : > { %8357 = vmatprep.mubr.bf16.mxu1 %v9023_v9  ;;  %8629 = vmatpush3.bf16.msra.mxu1 %v9045_v53  ;;  %v5518_v59 = vsel %vm9306_vm10, %v5513_v61, %v5517_v39  ;;  %v5566_v25 = vsel %vm9306_vm10, %v5561_v26, %v5565_v4  ;;  %v6082_v9 = vrot.slane %v10307_v30, 5  ;;  %v10352_v52 = vsel %vm9490_vm13, %v7639_v20, %v6075_v42  ;;  %v7606_v35 = vld [vmem:[#allocation3 + $0x54] sm:$0xe]  ;;  %v7263_v10 = vld [vmem:[#allocation3 + $0x6c] sm:$0xf]  ;;  %v9029_v18 = vld [vmem:[#allocation3 + $0x84] sm:$0xff]  }
 0x156   : > { %8622 = vmatprep.subr.bf16.mxu1 %v9046_v15  ;;  %v10329_v32 = vrot.slane %v5574_v27, 4  ;;  %v7579_v46 = vcombine.low %v5508_v51, %v5518_v59  ;;  %v10346_v45 = vcombine.low %v5556_v5, %v5566_v25  ;;  %v10348_v13 = vrot.slane %v5584_v60, 4  ;;  %v7608_v17 = vld [vmem:[#allocation3 + $0x5c] sm:$0x1]  ;;  %v7264_v8 = vld [vmem:[#allocation3 + $0x70] sm:$0xf] }
 0x157   : > { %8584 = vmatpush3.bf16.msra.mxu0 %v9028_v54  ;;  %v5587_v54 = vshll.u32 %v7550_v7, 16  ;;  %v6096_v53 = vrot.slane %v10333_v57, 5  ;;  %v6085_v61 = vrot.slane %v10319_v2, 5  ;;  %v6103_v39 = vrot.slane %v10335_v23, 5  ;;  %v7265_v58 = vld [vmem:[#allocation3 + $0x74] sm:$0x1] }
 0x158   : > { %v5580_v63 = vsel %vm9306_vm10, %v10329_v32, %v10290_v6  ;;  %v6084_v7 = vrot.slane %v6082_v9, 4  ;;  %v7641_v43 = vrot.slane %v10331_v36, 9  ;;  %v6092_v26 = vrot.slane %v7599_v50, 5  ;;  %v7267_v36 = vld [vmem:[#allocation3 + $0x7c] sm:$0xf] }
 0x159   : > { %8630 = vmatpush3.bf16.msra.mxu1 %v9046_v15  ;;  %v10343_v12 = vrot.slane %v5587_v54, 5  ;;  %v6091_v15 = vrot.slane %v6089_v37, 4  ;;  %v7642_v6 = vrot.slane %v7600_v28, 9  ;;  %v6099_v4 = vrot.slane %v7602_v22, 5 }
 0x15a   : > { %8554 = vmatmul.mubr.bf16.gmra.mrb[16].mxu0 %v10229_v49  ;;  %v5542_v49 = vsel %vm9306_vm10, %v5537_v56, %v5541_v21  ;;  %8623 = vmatprep.subr.bf16.mxu1 %v9047_v29  ;;  %v6110_v21 = vrot.slane %v10339_v47, 5  ;;  %v10367_v56 = vsel %vm9490_vm13, %v6077_v40, %v6078_v3  ;;  %v7643_v27 = vrot.slane %v7603_v0, 9  ;;  %v10419_v0 = vld [vmem:[#allocation3 + $0x64] sm:$0xf] }
 0x15b   : > { %8557 = vmatprep.mubr.bf16.mxu0 %v7577_v38  ;;  %v10341_v14 = vcombine.low %v5532_v24, %v5542_v49  ;;  %v7605_v38 = vld [vmem:[#allocation3 + $0x50] sm:$0x1]  ;;  %v6098_v55 = vrot.slane %v6096_v53, 4  ;;  %v3537_v19 = vshll.u32 %v7263_v10, 16  ;;  %v6105_v42 = vrot.slane %v6103_v39, 4 }
 0x15c   : > { %8358 = vmatmul.mubr.bf16.gmra.mrb[12].mxu1 %v9024_v48  ;;  %v6106_v44 = vrot.slane %v7605_v38, 5  ;;  %v3534_v48 = vshrl.u32 %v7263_v10, 16  ;;  %v7644_v51 = vrot.slane %v7606_v35, 9  ;;  %v6112_v59 = vrot.slane %v6110_v21, 4 }
 0x15d   : > { %8361 = vmatprep.mubr.bf16.mxu1 %v9026_v34  ;;  %8631 = vmatpush3.bf16.msra.mxu1 %v9047_v29  ;;  %v6113_v34 = vrot.slane %v7608_v17, 5  ;;  %v5590_v54 = vsel %vm9306_vm10, %v10348_v13, %v10343_v12  ;;  %v10376_v30 = vsel %vm9490_vm13, %v7640_v16, %v6082_v9  ;;  %v3543_v24 = vshll.u32 %v7264_v8, 16  ;;  %v7266_v29 = vld [vmem:[#allocation3 + $0x78] sm:$0xf]  ;;  %v9030_v9 = vld [vmem:[#allocation3 + $0x90] sm:$0xff]   ;;  %v9031_v12 = vld [vmem:[#allocation3 + $0x9c] sm:$0xff]  }
 0x15e   : > { %8624 = vmatprep.subr.bf16.mxu1 %v9048_v41  ;;  %v3547_v49 = vshrl.u32 %v7264_v8, 16  ;;  %v10380_v60 = vsel %vm9490_vm13, %v6084_v7, %v6085_v61  ;;  %v10384_v20 = vsel %vm9490_vm13, %v7641_v43, %v6089_v37  ;;  %v10388_v31 = vsel %vm9490_vm13, %v6091_v15, %v6092_v26  ;;  %v7273_v43 = vld [vmem:[#allocation3 + $0x94] sm:$0xf] }
 0x15f   : > { %v10392_v2 = vsel %vm9490_vm13, %v7642_v6, %v6096_v53  ;;  %v10400_v5 = vsel %vm9490_vm13, %v7643_v27, %v6103_v39  ;;  %v3536_v25 = vrot.slane %v3534_v48, 4  ;;  %v3539_v32 = vrot.slane %v3537_v19, 5  ;;  %v7270_v39 = vld [vmem:[#allocation3 + $0x88] sm:$0xf] }
 0x160   : > { %v10404_v57 = vsel %vm9490_vm13, %v6105_v42, %v6106_v44  ;;  %v10408_v23 = vsel %vm9490_vm13, %v7644_v51, %v6110_v21  ;;  %v10412_v40 = vsel %vm9490_vm13, %v6112_v59, %v6113_v34  ;;  %v3553_v3 = vshll.u32 %v7265_v58, 16  ;;  %v7272_v21 = vld [vmem:[#allocation3 + $0x90] sm:$0xf]  ;;  %v7611_v27 = vld [vmem:[#allocation3 + $0x68] sm:$0x1] }
 0x161   : > { %8632 = vmatpush3.bf16.msra.mxu1 %v9048_v41  ;;  %v10414_v50 = vrot.slane %v3543_v24, 5  ;;  %v3549_v37 = vrot.slane %v3547_v49, 4  ;;  %v3558_v28 = vshrl.u32 %v7266_v29, 16  ;;  %v3561_v47 = vshll.u32 %v7266_v29, 16  ;;  %v7268_v41 = vld [vmem:[#allocation3 + $0x80] sm:$0x1] }
 0x162   : > { %8558 = vmatmul.mubr.bf16.gmra.mrb[20].mxu0 %v7578_v1  ;;  %v10396_v1 = vsel %vm9490_vm13, %v6098_v55, %v6099_v4  ;;  %v3567_v16 = vshll.u32 %v7267_v36, 16  ;;  %v3571_v22 = vshrl.u32 %v7267_v36, 16  ;;  %v7582_v13 = vcombine.low %v5580_v63, %v5590_v54  ;;  %v10438_v42 = vld [vmem:[#allocation3 + $0x6c] sm:$0xe]  ;;  %v10440_v49 = vld [vmem:[#allocation3 + $0x70] sm:$0xf] }
 0x163   : > { %8561 = vmatprep.mubr.bf16.mxu0 %v7579_v46  ;;  %v7671_v46 = vcombine.low %v10352_v52, %v10367_v56  ;;  %v7672_v53 = vcombine.low %v10376_v30, %v10380_v60  ;;  %v7673_v38 = vcombine.low %v10384_v20, %v10388_v31  ;;  %v3540_v35 = vor.u32 %v3539_v32, %v3536_v25  ;;  %v9032_v34 = vld [vmem:[#allocation3 + $0xa8] sm:$0xff]   ;;  %v9033_v25 = vld [vmem:[#allocation3 + $0xb4] sm:$0xff]  }
 0x164   : > { %8362 = vmatmul.mubr.bf16.gmra.mrb[16].mxu1 %v9027_v62  ;;  %v7269_v62 = vld [vmem:[#allocation3 + $0x84] sm:$0xf]  ;;  %v7674_v52 = vcombine.low %v10392_v2, %v10396_v1  ;;  %v7675_v61 = vcombine.low %v10400_v5, %v10404_v57  ;;  %v10432_v63 = vrot.slane %v3553_v3, 5  ;;  %v3550_v10 = vor.u32 %v3549_v37, %v10414_v50  ;;  %v7271_v3 = vld [vmem:[#allocation3 + $0x8c] sm:$0x1] }
 0x165   : > { %8365 = vmatprep.mubr.bf16.mxu1 %v9029_v18  ;;  %v3560_v18 = vrot.slane %v3558_v28, 4  ;;  %v3563_v56 = vrot.slane %v3561_v47, 5  ;;  %v6117_v7 = vrot.slane %v10419_v0, 5  ;;  %v10436_v15 = vrot.slane %v3567_v16, 5  ;;  %v7283_v1 = vld [vmem:[#allocation3 + $0xbc] sm:$0x1] }
 0x166   : > { %v3573_v17 = vrot.slane %v3571_v22, 4  ;;  %v3582_v26 = vshrl.u32 %v7269_v62, 16  ;;  %v3585_v6 = vshll.u32 %v7269_v62, 16  ;;  %v3541_v4 = vrot.slane %v3540_v35, 4 }
 0x167   : > { %v3591_v8 = vshll.u32 %v7270_v39, 16  ;;  %v3595_v55 = vshrl.u32 %v7270_v39, 16  ;;  %v3606_v44 = vshrl.u32 %v7272_v21, 16  ;;  %v3577_v48 = vshll.u32 %v7268_v41, 16 }
 0x168   : > { %v3609_v51 = vshll.u32 %v7272_v21, 16  ;;  %v3615_v59 = vshll.u32 %v7273_v43, 16  ;;  %v3551_v54 = vrot.slane %v3550_v10, 4  ;;  %v3564_v58 = vor.u32 %v3563_v56, %v3560_v18  ;;  %v7276_v10 = vld [vmem:[#allocation3 + $0xa0] sm:$0xf] }
 0x169   : > { %v6119_v24 = vrot.slane %v6117_v7, 4  ;;  %v3619_v29 = vshrl.u32 %v7273_v43, 16  ;;  %v3574_v32 = vor.u32 %v3573_v17, %v10436_v15  ;;  %v6120_v36 = vrot.slane %v7611_v27, 5  ;;  %v7614_v43 = vld [vmem:[#allocation3 + $0x74] sm:$0x1] }
 0x16a   : > { %8562 = vmatmul.mubr.bf16.gmra.mrb[24].mxu0 %v10341_v14  ;;  %v7609_v14 = vld [vmem:[#allocation3 + $0x60] sm:$0xe]  ;;  %v3587_v37 = vrot.slane %v3585_v6, 5  ;;  %v10443_v28 = vrot.slane %v3591_v8, 5  ;;  %v3597_v47 = vrot.slane %v3595_v55, 4  ;;  %v3608_v16 = vrot.slane %v3606_v44, 4 }
 0x16b   : > { %8565 = vmatprep.mubr.bf16.mxu0 %v10346_v45  ;;  %v7676_v45 = vcombine.low %v10408_v23, %v10412_v40  ;;  %v7645_v19 = vrot.slane %v7609_v14, 9  ;;  %v3611_v22 = vrot.slane %v3609_v51, 5  ;;  %v3546_v0 = vsel %vm9306_vm10, %v3541_v4, %v10414_v50  ;;  %v7275_v14 = vld [vmem:[#allocation3 + $0x9c] sm:$0xf] }
 0x16c   : > { %8366 = vmatmul.mubr.bf16.gmra.mrb[20].mxu1 %v9030_v9  ;;  %v3584_v9 = vrot.slane %v3582_v26, 4  ;;  %v10448_v35 = vrot.slane %v3577_v48, 5  ;;  %v3621_v41 = vrot.slane %v3619_v29, 4  ;;  %v3565_v62 = vrot.slane %v3564_v58, 4  ;;  %v9034_v48 = vld [vmem:[#allocation3 + $0xc0] sm:$0xff]  }
 0x16d   : > { %8369 = vmatprep.mubr.bf16.mxu1 %v9031_v12  ;;  %v7274_v12 = vld [vmem:[#allocation3 + $0x98] sm:$0x1]  ;;  %v7646_v39 = vrot.slane %v10438_v42, 9  ;;  %v6124_v21 = vrot.slane %v10440_v49, 5  ;;  %v3556_v50 = vsel %vm9306_vm10, %v3551_v54, %v10432_v63  ;;  %v3575_v18 = vrot.slane %v3574_v32, 4 }
 0x16e   : > { %v10463_v56 = vsel %vm9490_vm13, %v6119_v24, %v6120_v36  ;;  %v3601_v17 = vshll.u32 %v7271_v3, 16  ;;  %v3588_v26 = vor.u32 %v3587_v37, %v3584_v9  ;;  %v3612_v6 = vor.u32 %v3611_v22, %v3608_v16  ;;  %v7279_v49 = vld [vmem:[#allocation3 + $0xac] sm:$0xf]  ;;  %v10481_v3 = vld [vmem:[#allocation3 + $0x7c] sm:$0xf] }
 0x16f   : > { %v3625_v4 = vshll.u32 %v7274_v12, 16  ;;  %v3630_v8 = vshrl.u32 %v7275_v14, 16  ;;  %v3633_v55 = vshll.u32 %v7275_v14, 16  ;;  %v3639_v44 = vshll.u32 %v7276_v10, 16  ;;  %v10495_v14 = vld [vmem:[#allocation3 + $0x78] sm:$0xe] }
 0x170   : > { %v3570_v63 = vsel %vm9306_vm10, %v3565_v62, %v10436_v15  ;;  %v6127_v42 = vrot.slane %v7614_v43, 5  ;;  %v3643_v51 = vshrl.u32 %v7276_v10, 16  ;;  %v3603_v54 = vrot.slane %v3601_v17, 5  ;;  %v7281_v43 = vld [vmem:[#allocation3 + $0xb4] sm:$0xf] }
 0x171   : > { %v3632_v58 = vrot.slane %v3630_v8, 4  ;;  %v3635_v24 = vrot.slane %v3633_v55, 5  ;;  %v3589_v15 = vrot.slane %v3588_v26, 4  ;;  %v10479_v32 = vrot.slane %v3639_v44, 5  ;;  %v7282_v55 = vld [vmem:[#allocation3 + $0xb8] sm:$0xf] }
 0x172   : > { %8566 = vmatmul.mubr.bf16.gmra.mrb[28].mxu0 %v7582_v13  ;;  %v10450_v13 = vrot.slane %v3615_v59, 5  ;;  %v7278_v59 = vld [vmem:[#allocation3 + $0xa8] sm:$0xf]  ;;  %v3645_v36 = vrot.slane %v3643_v51, 4  ;;  %v3613_v30 = vrot.slane %v3612_v6, 4  ;;  %v3663_v12 = vshll.u32 %v7279_v49, 16 }
 0x173   : > { %8585 = vmatprep.mubr.bf16.mxu0 %v7671_v46  ;;  %v10454_v46 = vsel %vm9490_vm13, %v7645_v19, %v6117_v7  ;;  %v3598_v7 = vor.u32 %v3597_v47, %v10443_v28  ;;  %v7311_v19 = vcombine.low %v3546_v0, %v3556_v50  ;;  %v3636_v9 = vor.u32 %v3635_v24, %v3632_v58 }
 0x174   : > { %8370 = vmatmul.mubr.bf16.gmra.mrb[24].mxu1 %v9032_v34  ;;  %v3622_v27 = vor.u32 %v3621_v41, %v10450_v13  ;;  %v3580_v34 = vsel %vm9306_vm10, %v3575_v18, %v10448_v35  ;;  %v3654_v37 = vshrl.u32 %v7278_v59, 16  ;;  %v3657_v47 = vshll.u32 %v7278_v59, 16  ;;  %v7284_v59 = vld [vmem:[#allocation3 + $0xc0] sm:$0xf] }
 0x175   : > { %8373 = vmatprep.mubr.bf16.mxu1 %v9033_v25  ;;  %v3599_v29 = vrot.slane %v3598_v7, 4  ;;  %v7277_v25 = vld [vmem:[#allocation3 + $0xa4] sm:$0x1]  ;;  %v3667_v16 = vshrl.u32 %v7279_v49, 16  ;;  %v7677_v20 = vcombine.low %v10454_v46, %v10463_v56  ;;  %v6126_v31 = vrot.slane %v6124_v21, 4 }
 0x176   : > { %v3623_v60 = vrot.slane %v3622_v27, 4  ;;  %v3649_v22 = vshll.u32 %v7277_v25, 16  ;;  %v10488_v0 = vsel %vm9490_vm13, %v7646_v39, %v6124_v21  ;;  %v3594_v35 = vsel %vm9306_vm10, %v3589_v15, %v10443_v28  ;;  %v10503_v21 = vld [vmem:[#allocation3 + $0x80] sm:$0x1]  ;;  %v7280_v28 = vld [vmem:[#allocation3 + $0xb0] sm:$0x1] }
 0x177   : > { %v3604_v41 = vsel %vm9306_vm10, %v3599_v29, %v3603_v54  ;;  %v6131_v62 = vrot.slane %v10481_v3, 5  ;;  %v7312_v10 = vcombine.low %v3570_v63, %v3580_v34  ;;  %v3618_v50 = vsel %vm9306_vm10, %v3613_v30, %v10450_v13  ;;  %v7285_v34 = vld [vmem:[#allocation3 + $0xc4] sm:$0xf]  ;;  %v7623_v3 = vld [vmem:[#allocation3 + $0x98] sm:$0x1] }
 0x178   : > { %v3637_v18 = vrot.slane %v3636_v9, 4  ;;  %v3656_v17 = vrot.slane %v3654_v37, 4  ;;  %v3659_v26 = vrot.slane %v3657_v47, 5  ;;  %v10505_v7 = vrot.slane %v3663_v12, 5  ;;  %v7618_v30 = vld [vmem:[#allocation3 + $0x84] sm:$0xe] }
 0x179   : > { %v3669_v6 = vrot.slane %v3667_v16, 4  ;;  %v10512_v13 = vsel %vm9490_vm13, %v6126_v31, %v6127_v42  ;;  %v3651_v8 = vrot.slane %v3649_v22, 5  ;;  %v7647_v44 = vrot.slane %v10495_v14, 9 }
 0x17a   : > { %8586 = vmatmul.mubr.bf16.vlgmr.msra.gmra.mrb[0].mxu0 %v7672_v53  ;;  %v3627_v53 = vrot.slane %v3625_v4, 5  ;;  %v7313_v4 = vcombine.low %v3594_v35, %v3604_v41  ;;  %v6134_v2 = vrot.slane %v10503_v21, 5  ;;  %v3642_v63 = vsel %vm9306_vm10, %v3637_v18, %v10479_v32  ;;  %v7620_v35 = vld [vmem:[#allocation3 + $0x8c] sm:$0x1] }
 0x17b   : > { %8589 = vmatprep.mubr.bf16.mxu0 %v7673_v38  ;;  %v3646_v38 = vor.u32 %v3645_v36, %v10479_v32  ;;  %v3673_v42 = vshll.u32 %v7280_v28, 16  ;;  %v3681_v51 = vshll.u32 %v7281_v43, 16  ;;  %v3660_v5 = vor.u32 %v3659_v26, %v3656_v17  ;;  %v7621_v26 = vld [vmem:[#allocation3 + $0x90] sm:$0xe] }
 0x17c   : > { %8374 = vmatmul.mubr.bf16.gmra.mrb[28].mxu1 %v9034_v48  ;;  %v3628_v39 = vsel %vm9306_vm10, %v3623_v60, %v3627_v53  ;;  %v6133_v48 = vrot.slane %v6131_v62, 4  ;;  %v3670_v57 = vor.u32 %v3669_v6, %v10505_v7  ;;  %v3687_v54 = vshll.u32 %v7282_v55, 16  ;;  %v7619_v60 = vld [vmem:[#allocation3 + $0x88] sm:$0xf] }
 0x17d   : > { %8409 = vmatprep.mubr.bf16.mxu1 %v7311_v19  ;;  %v3647_v27 = vrot.slane %v3646_v38, 4  ;;  %v7314_v19 = vcombine.low %v3618_v50, %v3628_v39  ;;  %v3683_v24 = vrot.slane %v3681_v51, 5  ;;  %v3691_v49 = vshrl.u32 %v7282_v55, 16  ;;  %v7622_v38 = vld [vmem:[#allocation3 + $0x94] sm:$0xf] }
 0x17e   : > { %v3697_v15 = vshll.u32 %v7283_v1, 16  ;;  %v3689_v29 = vrot.slane %v3687_v54, 5  ;;  %v3702_v25 = vshrl.u32 %v7284_v59, 16  ;;  %v3705_v32 = vshll.u32 %v7284_v59, 16  ;;  %v7624_v54 = vld [vmem:[#allocation3 + $0x9c] sm:$0xe] }
 0x17f   : > { %v3652_v58 = vsel %vm9306_vm10, %v3647_v27, %v3651_v8  ;;  %v3711_v36 = vshll.u32 %v7285_v34, 16  ;;  %v3675_v53 = vrot.slane %v3673_v42, 5  ;;  %v3693_v37 = vrot.slane %v3691_v49, 4  ;;  %v7627_v49 = vld [vmem:[#allocation3 + $0xa8] sm:$0xe] }
 0x180   : > { %v3715_v47 = vshrl.u32 %v7285_v34, 16  ;;  %v7315_v12 = vcombine.low %v3642_v63, %v3652_v58  ;;  %v3661_v16 = vrot.slane %v3660_v5, 4  ;;  %v3671_v31 = vrot.slane %v3670_v57, 4  ;;  %v7626_v58 = vld [vmem:[#allocation3 + $0xa4] sm:$0x1] }
 0x181   : > { %v3704_v22 = vrot.slane %v3702_v25, 4  ;;  %v3694_v41 = vor.u32 %v3693_v37, %v3689_v29  ;;  %v3707_v14 = vrot.slane %v3705_v32, 5  ;;  %v6138_v39 = vrot.slane %v7619_v60, 5 }
 0x182   : > { %8590 = vmatmul.mubr.bf16.gmra.mrb[4].mxu0 %v7674_v52  ;;  %v3678_v52 = vshrl.u32 %v7281_v43, 16  ;;  %v3717_v50 = vrot.slane %v3715_v47, 4  ;;  %v3699_v18 = vrot.slane %v3697_v15, 5  ;;  %v7286_v43 = vld [vmem:[#allocation3 + $0xc8] sm:$0x1]  ;;  %v6132_v23 = vsel %vm9490_vm13, %v7647_v44, %v6131_v62 }
 0x183   : > { %8593 = vmatprep.mubr.bf16.mxu0 %v7675_v61  ;;  %v6135_v40 = vsel %vm9490_vm13, %v6133_v48, %v6134_v2  ;;  %v3695_v28 = vrot.slane %v3694_v41, 4  ;;  %v7678_v17 = vcombine.low %v10488_v0, %v10512_v13  ;;  %v7648_v46 = vrot.slane %v7618_v30, 9  ;;  %v7625_v2 = vld [vmem:[#allocation3 + $0xa0] sm:$0xf]  ;;  %v7629_v15 = vld [vmem:[#allocation3 + $0xb0] sm:$0x1] }
 0x184   : > { %8410 = vmatmul.mubr.bf16.vlgmr.msra.gmra.mrb[16].mxu1 %v7312_v10  ;;  %v3680_v61 = vrot.slane %v3678_v52, 4  ;;  %v10530_v10 = vrot.slane %v3711_v36, 5  ;;  %v6141_v56 = vrot.slane %v7620_v35, 5  ;;  %v3676_v62 = vsel %vm9306_vm10, %v3671_v31, %v3675_v53  ;;  %v7628_v52 = vld [vmem:[#allocation3 + $0xac] sm:$0xf] }
 0x185   : > { %8413 = vmatprep.mubr.bf16.mxu1 %v7313_v4  ;;  %v3708_v6 = vor.u32 %v3707_v14, %v3704_v22  ;;  %v3721_v27 = vshll.u32 %v7286_v43, 16  ;;  %v7679_v8 = vcombine.low %v6132_v23, %v6135_v40  ;;  %v6140_v55 = vrot.slane %v6138_v39, 4  ;;  %v7634_v31 = vld [vmem:[#allocation3 + $0xc4] sm:$0xf]  ;;  %v7630_v14 = vld [vmem:[#allocation3 + $0xb4] sm:$0xe] }
 0x186   : > { %v3684_v9 = vor.u32 %v3683_v24, %v3680_v61  ;;  %v3718_v4 = vor.u32 %v3717_v50, %v10530_v10  ;;  %v3700_v13 = vsel %vm9306_vm10, %v3695_v28, %v3699_v18  ;;  %v7649_v44 = vrot.slane %v7621_v26, 9 }
 0x187   : > { %v6148_v48 = vrot.slane %v7623_v3, 5  ;;  %v3709_v63 = vrot.slane %v3708_v6, 4  ;;  %v3723_v51 = vrot.slane %v3721_v27, 5  ;;  %v6139_v59 = vsel %vm9490_vm13, %v7648_v46, %v6138_v39  ;;  %v7633_v39 = vld [vmem:[#allocation3 + $0xc0] sm:$0xe] }
 0x188   : > { %v3685_v21 = vrot.slane %v3684_v9, 4  ;;  %v3719_v42 = vrot.slane %v3718_v4, 4  ;;  %v6142_v34 = vsel %vm9490_vm13, %v6140_v55, %v6141_v56  ;;  %v6152_v5 = vrot.slane %v7625_v2, 5  ;;  %v7637_v56 = vld [vmem:[#allocation3 + $0xd0] sm:$0xf] }
 0x189   : > { %v6159_v24 = vrot.slane %v7628_v52, 5  ;;  %v3714_v25 = vsel %vm9306_vm10, %v3709_v63, %v10530_v10  ;;  %v7650_v30 = vrot.slane %v7624_v54, 9  ;;  %v6155_v53 = vrot.slane %v7626_v58, 5  ;;  %v7632_v10 = vld [vmem:[#allocation3 + $0xbc] sm:$0x1] }
 0x18a   : > { %8594 = vmatmul.mubr.bf16.gmra.mrb[8].mxu0 %v7676_v45  ;;  %v6145_v45 = vrot.slane %v7622_v38, 5  ;;  %v3690_v0 = vsel %vm9306_vm10, %v3685_v21, %v3689_v29  ;;  %v7680_v29 = vcombine.low %v6139_v59, %v6142_v34  ;;  %v3724_v32 = vsel %vm9306_vm10, %v3719_v42, %v3723_v51  ;;  %v7635_v21 = vld [vmem:[#allocation3 + $0xc8] sm:$0x1]  ;;  %v7636_v4 = vld [vmem:[#allocation3 + $0xcc] sm:$0xe] }
 0x18b   : > { %8597 = vmatprep.mubr.bf16.mxu0 %v7677_v20  ;;  %v3666_v20 = vsel %vm9306_vm10, %v3661_v16, %v10505_v7  ;;  %v6154_v60 = vrot.slane %v6152_v5, 4  ;;  %v7651_v9 = vrot.slane %v7627_v49, 9  ;;  %v6161_v37 = vrot.slane %v6159_v24, 4  ;;  %v7638_v27 = vld [vmem:[#allocation3 + $0xd4] sm:$0x1] }
 0x18c   : > { %8414 = vmatmul.mubr.bf16.gmra.mrb[20].mxu1 %v7314_v19  ;;  %v6147_v7 = vrot.slane %v6145_v45, 4  ;;  %v7316_v1 = vcombine.low %v3666_v20, %v3676_v62  ;;  %v7317_v19 = vcombine.low %v3690_v0, %v3700_v13  ;;  %v6146_v57 = vsel %vm9490_vm13, %v7649_v44, %v6145_v45 }
 0x18d   : > { %8417 = vmatprep.mubr.bf16.mxu1 %v7315_v12  ;;  %v6162_v47 = vrot.slane %v7629_v15, 5  ;;  %v7631_v12 = vld [vmem:[#allocation3 + $0xb8] sm:$0xf]  ;;  %v7318_v16 = vcombine.low %v3714_v25, %v3724_v32  ;;  %v6153_v38 = vsel %vm9490_vm13, %v7650_v30, %v6152_v5  ;;  %v6156_v22 = vsel %vm9490_vm13, %v6154_v60, %v6155_v53 }
 0x18e   : > { %v6149_v61 = vsel %vm9490_vm13, %v6147_v7, %v6148_v48  ;;  %v6166_v33 = vrot.slane %v7631_v12, 5  ;;  %v6160_v35 = vsel %vm9490_vm13, %v7651_v9, %v6159_v24  ;;  %v6173_v50 = vrot.slane %v7634_v31, 5 }
 0x18f   : > { %v7681_v36 = vcombine.low %v6146_v57, %v6149_v61  ;;  %v6163_v41 = vsel %vm9490_vm13, %v6161_v37, %v6162_v47  ;;  %v7682_v18 = vcombine.low %v6153_v38, %v6156_v22  ;;  %v7652_v23 = vrot.slane %v7630_v14, 9 }
 0x190   : > { %v7683_v43 = vcombine.low %v6160_v35, %v6163_v41  ;;  %v6168_v40 = vrot.slane %v6166_v33, 4  ;;  %v6169_v45 = vrot.slane %v7632_v10, 5  ;;  %v7653_v28 = vrot.slane %v7633_v39, 9 }
 0x191   : > { %v6176_v46 = vrot.slane %v7635_v21, 5  ;;  %v6167_v20 = vsel %vm9490_vm13, %v7652_v23, %v6166_v33  ;;  %v6180_v3 = vrot.slane %v7637_v56, 5  ;;  %v7654_v0 = vrot.slane %v7636_v4, 9 }
 0x192   : > { %8598 = vmatmul.mubr.bf16.gmra.mrb[12].mxu0 %v7678_v17  ;;  %v6175_v17 = vrot.slane %v6173_v50, 4  ;;  %v6170_v26 = vsel %vm9490_vm13, %v6168_v40, %v6169_v45  ;;  %v6174_v62 = vsel %vm9490_vm13, %v7653_v28, %v6173_v50  ;;  %v6183_v44 = vrot.slane %v7638_v27, 5 }
 0x193   : > { %8601 = vmatprep.mubr.bf16.mxu0 %v7679_v8  ;;  %v7684_v8 = vcombine.low %v6167_v20, %v6170_v26  ;;  %v6182_v13 = vrot.slane %v6180_v3, 4  ;;  %v6181_v7 = vsel %vm9490_vm13, %v7654_v0, %v6180_v3 }
 0x194   : > { %8418 = vmatmul.mubr.bf16.gmra.mrb[24].mxu1 %v7316_v1  ;;  %v6177_v6 = vsel %vm9490_vm13, %v6175_v17, %v6176_v46  ;;  %v9074_v1 = vmov 0.0  }
 0x195   : > { %8421 = vmatprep.mubr.bf16.mxu1 %v7317_v19  ;;  %v7685_v55 = vcombine.low %v6174_v62, %v6177_v6  ;;  %v6184_v48 = vsel %vm9490_vm13, %v6182_v13, %v6183_v44  ;;  %1031 = vst [vmem:[%s10590_s28] sm:$0xff] %v9074_v1 }
 0x196   : > { %v7686_v2 = vcombine.low %v6181_v7, %v6184_v48 }
 0x19a   : > { %8602 = vmatmul.mubr.bf16.gmra.mrb[16].mxu0 %v7680_v29 }
 0x19b   : > { %8605 = vmatprep.mubr.bf16.mxu0 %v7681_v36 }
 0x19c   : > { %8422 = vmatmul.mubr.bf16.gmra.mrb[28].mxu1 %v7318_v16 }
 0x1a2   : > { %8606 = vmatmul.mubr.bf16.gmra.mrb[20].mxu0 %v7682_v18 }
 0x1a3   : > { %8609 = vmatprep.mubr.bf16.mxu0 %v7683_v43 }
 0x1aa   : > { %8610 = vmatmul.mubr.bf16.gmra.mrb[24].mxu0 %v7684_v8 }
 0x1ab   : > { %8613 = vmatprep.mubr.bf16.mxu0 %v7685_v55 }
 0x1b2   : > { %8614 = vmatmul.mubr.bf16.gmra.mrb[28].mxu0 %v7686_v2 }
 0x217   : > { %v8347_v52 = vpop.f32.mrb[0].mxu1 }
 0x218   : > { %v3070_v19 = vpop.f32.mrb[1].mxu1 }
 0x219   : > { %v8348_v63 = vpop.f32.mrb[2].mxu1 }
 0x21a   : > { %v3073_v42 = vpop.f32.mrb[3].mxu1 }
 0x21f   : > { %v8351_v51 = vpop.f32.mrb[4].mxu1 }
 0x220   : > { %v3086_v59 = vpop.f32.mrb[5].mxu1 }
 0x221   : > { %v8352_v34 = vpop.f32.mrb[6].mxu1 }
 0x222   : > { %v3089_v11 = vpop.f32.mrb[7].mxu1 }
 0x227   : > { %v8355_v5 = vpop.f32.mrb[8].mxu1 }
 0x228   : > { %v3102_v57 = vpop.f32.mrb[9].mxu1 }
 0x229   : > { %v8356_v61 = vpop.f32.mrb[10].mxu1 }
 0x22a   : > { %v10593_v54 = vpop.f32.mrb[11].mxu1 }
 0x22f   : > { %v10595_v58 = vpop.f32.mrb[12].mxu1 }
 0x230   : > { %v10597_v24 = vpop.f32.mrb[13].mxu1 }
 0x231   : > { %v10599_v49 = vpop.f32.mrb[14].mxu1 }
 0x232   : > { %v10601_v15 = vpop.f32.mrb[15].mxu1 }
 0x24d   : > { %v8587_v29 = vpop.f32.mrb[0].mxu0 }
 0x24e   : > { %v8633_v25 = vadd.f32 %v8587_v29, %v8347_v52  ;;  %v6348_v32 = vpop.f32.mrb[1].mxu0 }
 0x24f   : > { %v8634_v36 = vadd.f32 %v6348_v32, %v3070_v19  ;;  %v8588_v30 = vpop.f32.mrb[2].mxu0 }
 0x250   : > { %v8635_v60 = vadd.f32 %v8588_v30, %v8348_v63  ;;  %v6351_v53 = vpop.f32.mrb[3].mxu0  ;;  %v6806_v38 = vmul.f32 %v8633_v25, %v8633_v25 }
 0x251   : > { %v8636_v9 = vadd.f32 %v6351_v53, %v3073_v42  ;;  %v6804_v47 = vmul.f32 %v8634_v36, %v8634_v36 }
 0x252   : > { %v7867_v37 = vpack.c.bf16 %v8635_v60, %v8633_v25  ;;  %v6807_v10 = vmul.f32 %v8635_v60, %v8635_v60 }
 0x253   : > { %v7862_v12 = vpack.c.bf16 %v8636_v9, %v8634_v36  ;;  %v6764_v16 = vadd.f32 %v8636_v9, %v8634_v36  ;;  %v6805_v31 = vmul.f32 %v8636_v9, %v8636_v9 }
 0x254   : > { %7954 = vst [vmem:[%s10608_s6 + $0x8] sm:$0xff] %v7867_v37  }
 0x255   : > { %7863 = vst [vmem:[%s10608_s6] sm:$0xff] %v7862_v12   ;;  %v6765_v22 = vadd.f32 %v8633_v25, %v6764_v16  ;;  %v6836_v33 = vadd.f32 %v6805_v31, %v6804_v47  ;;  %v8591_v35 = vpop.f32.mrb[4].mxu0 }
 0x256   : > { %v8637_v41 = vadd.f32 %v8591_v35, %v8351_v51  ;;  %v6364_v14 = vpop.f32.mrb[5].mxu0 }
 0x257   : > { %v6837_v50 = vadd.f32 %v6836_v33, %v6806_v38  ;;  %v8638_v39 = vadd.f32 %v6364_v14, %v3086_v59  ;;  %v6766_v21 = vadd.f32 %v8635_v60, %v6765_v22  ;;  %v8592_v18 = vpop.f32.mrb[6].mxu0  ;;  %v10612_v40 = vpop.f32.mrb[16].mxu1 }
 0x258   : > { %v8639_v43 = vadd.f32 %v8592_v18, %v8352_v34  ;;  %v6367_v23 = vpop.f32.mrb[7].mxu0  ;;  %v10614_v56 = vpop.f32.mrb[17].mxu1  ;;  %v6810_v8 = vmul.f32 %v8637_v41, %v8637_v41 }
 0x259   : > { %v6767_v45 = vadd.f32 %v8638_v39, %v6766_v21  ;;  %v6808_v28 = vmul.f32 %v8638_v39, %v8638_v39  ;;  %v6838_v17 = vadd.f32 %v6837_v50, %v6807_v10  ;;  %v8640_v46 = vadd.f32 %v6367_v23, %v3089_v11  ;;  %v10616_v26 = vpop.f32.mrb[18].mxu1 }
 0x25a   : > { %v7877_v20 = vpack.c.bf16 %v8639_v43, %v8637_v41  ;;  %v10618_v27 = vpop.f32.mrb[19].mxu1  ;;  %v6811_v48 = vmul.f32 %v8639_v43, %v8639_v43 }
 0x25b   : > { %v6839_v3 = vadd.f32 %v6838_v17, %v6808_v28  ;;  %v7872_v62 = vpack.c.bf16 %v8640_v46, %v8638_v39  ;;  %v6768_v6 = vadd.f32 %v8640_v46, %v6767_v45  ;;  %v6809_v4 = vmul.f32 %v8640_v46, %v8640_v46 }
 0x25c   : > { %7956 = vst [vmem:[%s10608_s6 + $0x18] sm:$0xff] %v7877_v20  }
 0x25d   : > { %7955 = vst [vmem:[%s10608_s6 + $0x10] sm:$0xff] %v7872_v62   ;;  %v6769_v55 = vadd.f32 %v8637_v41, %v6768_v6  ;;  %v6840_v0 = vadd.f32 %v6839_v3, %v6809_v4  ;;  %v8595_v13 = vpop.f32.mrb[8].mxu0 }
 0x25e   : > { %v8641_v44 = vadd.f32 %v8595_v13, %v8355_v5  ;;  %v6380_v7 = vpop.f32.mrb[9].mxu0 }
 0x25f   : > { %v6841_v2 = vadd.f32 %v6840_v0, %v6810_v8  ;;  %v8642_v1 = vadd.f32 %v6380_v7, %v3102_v57  ;;  %v6770_v52 = vadd.f32 %v8639_v43, %v6769_v55  ;;  %v8596_v19 = vpop.f32.mrb[10].mxu0  ;;  %v10622_v51 = vpop.f32.mrb[20].mxu1 }
 0x260   : > { %v8643_v63 = vadd.f32 %v8596_v19, %v8356_v61  ;;  %v6383_v42 = vpop.f32.mrb[11].mxu0  ;;  %v10625_v25 = vpop.f32.mrb[21].mxu1  ;;  %v6814_v61 = vmul.f32 %v8641_v44, %v8641_v44 }
 0x261   : > { %v6771_v59 = vadd.f32 %v8642_v1, %v6770_v52  ;;  %v6812_v34 = vmul.f32 %v8642_v1, %v8642_v1  ;;  %v6842_v11 = vadd.f32 %v6841_v2, %v6811_v48  ;;  %v8644_v29 = vadd.f32 %v6383_v42, %v10593_v54  ;;  %v10627_v32 = vpop.f32.mrb[22].mxu1 }
 0x262   : > { %v7887_v5 = vpack.c.bf16 %v8643_v63, %v8641_v44  ;;  %v10629_v53 = vpop.f32.mrb[23].mxu1  ;;  %v6815_v16 = vmul.f32 %v8643_v63, %v8643_v63 }
 0x263   : > { %v6843_v36 = vadd.f32 %v6842_v11, %v6812_v34  ;;  %v7882_v57 = vpack.c.bf16 %v8644_v29, %v8642_v1  ;;  %v6772_v30 = vadd.f32 %v8644_v29, %v6771_v59  ;;  %v6813_v60 = vmul.f32 %v8644_v29, %v8644_v29 }
 0x264   : > { %7958 = vst [vmem:[%s10608_s6 + $0x28] sm:$0xff] %v7887_v5  }
 0x265   : > { %7957 = vst [vmem:[%s10608_s6 + $0x20] sm:$0xff] %v7882_v57   ;;  %v6773_v9 = vadd.f32 %v8641_v44, %v6772_v30  ;;  %v6844_v37 = vadd.f32 %v6843_v36, %v6813_v60  ;;  %v8599_v47 = vpop.f32.mrb[12].mxu0 }
 0x266   : > { %v8645_v12 = vadd.f32 %v8599_v47, %v10595_v58  ;;  %v6396_v54 = vpop.f32.mrb[13].mxu0 }
 0x267   : > { %v6845_v31 = vadd.f32 %v6844_v37, %v6814_v61  ;;  %v8646_v38 = vadd.f32 %v6396_v54, %v10597_v24  ;;  %v6774_v22 = vadd.f32 %v8643_v63, %v6773_v9  ;;  %v8600_v33 = vpop.f32.mrb[14].mxu0  ;;  %v10636_v14 = vpop.f32.mrb[24].mxu1 }
 0x268   : > { %v8647_v35 = vadd.f32 %v8600_v33, %v10599_v49  ;;  %v6399_v41 = vpop.f32.mrb[15].mxu0  ;;  %v10639_v58 = vpop.f32.mrb[25].mxu1  ;;  %v6818_v49 = vmul.f32 %v8645_v12, %v8645_v12 }
 0x269   : > { %v6775_v10 = vadd.f32 %v8646_v38, %v6774_v22  ;;  %v6816_v50 = vmul.f32 %v8646_v38, %v8646_v38  ;;  %v6846_v39 = vadd.f32 %v6845_v31, %v6815_v16  ;;  %v8648_v21 = vadd.f32 %v6399_v41, %v10601_v15  ;;  %v10641_v43 = vpop.f32.mrb[26].mxu1 }
 0x26a   : > { %v7897_v18 = vpack.c.bf16 %v8647_v35, %v8645_v12  ;;  %v10643_v17 = vpop.f32.mrb[27].mxu1  ;;  %v6819_v6 = vmul.f32 %v8647_v35, %v8647_v35 }
 0x26b   : > { %v6847_v24 = vadd.f32 %v6846_v39, %v6816_v50  ;;  %v7892_v23 = vpack.c.bf16 %v8648_v21, %v8646_v38  ;;  %v6776_v45 = vadd.f32 %v8648_v21, %v6775_v10  ;;  %v6817_v28 = vmul.f32 %v8648_v21, %v8648_v21 }
 0x26c   : > { %7960 = vst [vmem:[%s10608_s6 + $0x38] sm:$0xff] %v7897_v18  }
 0x26d   : > { %7959 = vst [vmem:[%s10608_s6 + $0x30] sm:$0xff] %v7892_v23   ;;  %v6777_v46 = vadd.f32 %v8645_v12, %v6776_v45  ;;  %v6848_v20 = vadd.f32 %v6847_v24, %v6817_v28  ;;  %v8603_v3 = vpop.f32.mrb[16].mxu0 }
 0x26e   : > { %v8649_v62 = vadd.f32 %v8603_v3, %v10612_v40  ;;  %v6412_v15 = vpop.f32.mrb[17].mxu0 }
 0x26f   : > { %v6849_v4 = vadd.f32 %v6848_v20, %v6818_v49  ;;  %v8650_v8 = vadd.f32 %v6412_v15, %v10614_v56  ;;  %v6778_v55 = vadd.f32 %v8647_v35, %v6777_v46  ;;  %v8604_v0 = vpop.f32.mrb[18].mxu0  ;;  %v10650_v7 = vpop.f32.mrb[28].mxu1 }
 0x270   : > { %v8651_v13 = vadd.f32 %v8604_v0, %v10616_v26  ;;  %v6415_v44 = vpop.f32.mrb[19].mxu0  ;;  %v10653_v40 = vpop.f32.mrb[29].mxu1  ;;  %v6822_v26 = vmul.f32 %v8649_v62, %v8649_v62 }
 0x271   : > { %v6779_v48 = vadd.f32 %v8650_v8, %v6778_v55  ;;  %v6820_v2 = vmul.f32 %v8650_v8, %v8650_v8  ;;  %v6850_v1 = vadd.f32 %v6849_v4, %v6819_v6  ;;  %v8652_v52 = vadd.f32 %v6415_v44, %v10618_v27  ;;  %v10655_v63 = vpop.f32.mrb[30].mxu1 }
 0x272   : > { %v7907_v19 = vpack.c.bf16 %v8651_v13, %v8649_v62  ;;  %v10657_v11 = vpop.f32.mrb[31].mxu1  ;;  %v6823_v30 = vmul.f32 %v8651_v13, %v8651_v13 }
 0x273   : > { %v6851_v56 = vadd.f32 %v6850_v1, %v6820_v2  ;;  %v7902_v42 = vpack.c.bf16 %v8652_v52, %v8650_v8  ;;  %v6780_v59 = vadd.f32 %v8652_v52, %v6779_v48  ;;  %v6821_v34 = vmul.f32 %v8652_v52, %v8652_v52 }
 0x274   : > { %7962 = vst [vmem:[%s10608_s6 + $0x48] sm:$0xff] %v7907_v19  }
 0x275   : > { %7961 = vst [vmem:[%s10608_s6 + $0x40] sm:$0xff] %v7902_v42   ;;  %v6781_v29 = vadd.f32 %v8649_v62, %v6780_v59  ;;  %v6852_v5 = vadd.f32 %v6851_v56, %v6821_v34  ;;  %v8607_v36 = vpop.f32.mrb[20].mxu0 }
 0x276   : > { %v8653_v57 = vadd.f32 %v8607_v36, %v10622_v51  ;;  %v6428_v27 = vpop.f32.mrb[21].mxu0 }
 0x277   : > { %v6853_v60 = vadd.f32 %v6852_v5, %v6822_v26  ;;  %v8654_v61 = vadd.f32 %v6428_v27, %v10625_v25  ;;  %v6782_v9 = vadd.f32 %v8651_v13, %v6781_v29  ;;  %v8608_v37 = vpop.f32.mrb[22].mxu0 }
 0x278   : > { %v8655_v47 = vadd.f32 %v8608_v37, %v10627_v32  ;;  %v6431_v12 = vpop.f32.mrb[23].mxu0  ;;  %v6826_v10 = vmul.f32 %v8653_v57, %v8653_v57 }
 0x279   : > { %v6783_v54 = vadd.f32 %v8654_v61, %v6782_v9  ;;  %v6824_v16 = vmul.f32 %v8654_v61, %v8654_v61  ;;  %v6854_v31 = vadd.f32 %v6853_v60, %v6823_v30  ;;  %v8656_v38 = vadd.f32 %v6431_v12, %v10629_v53 }
 0x27a   : > { %v7917_v22 = vpack.c.bf16 %v8655_v47, %v8653_v57  ;;  %v6827_v18 = vmul.f32 %v8655_v47, %v8655_v47 }
 0x27b   : > { %v6855_v33 = vadd.f32 %v6854_v31, %v6824_v16  ;;  %v7912_v51 = vpack.c.bf16 %v8656_v38, %v8654_v61  ;;  %v6784_v35 = vadd.f32 %v8656_v38, %v6783_v54  ;;  %v6825_v41 = vmul.f32 %v8656_v38, %v8656_v38 }
 0x27c   : > { %7964 = vst [vmem:[%s10608_s6 + $0x58] sm:$0xff] %v7917_v22  }
 0x27d   : > { %7963 = vst [vmem:[%s10608_s6 + $0x50] sm:$0xff] %v7912_v51   ;;  %v6785_v25 = vadd.f32 %v8653_v57, %v6784_v35  ;;  %v6856_v50 = vadd.f32 %v6855_v33, %v6825_v41  ;;  %v8611_v39 = vpop.f32.mrb[24].mxu0  ;;  %v6763_v33 = vld [vmem:[%s10590_s28] sm:$0x1]  ;;  %v6803_v41 = vld [vmem:[%s10590_s28 + $0x1] sm:$0x1] }
 0x27e   : > { %v8657_v21 = vadd.f32 %v8611_v39, %v10636_v14  ;;  %v6444_v32 = vpop.f32.mrb[25].mxu0 }
 0x27f   : > { %v6857_v24 = vadd.f32 %v6856_v50, %v6826_v10  ;;  %v8658_v23 = vadd.f32 %v6444_v32, %v10639_v58  ;;  %v6786_v53 = vadd.f32 %v8655_v47, %v6785_v25  ;;  %v8612_v45 = vpop.f32.mrb[26].mxu0 }
 0x280   : > { %v8659_v28 = vadd.f32 %v8612_v45, %v10641_v43  ;;  %v6447_v49 = vpop.f32.mrb[27].mxu0  ;;  %v6830_v55 = vmul.f32 %v8657_v21, %v8657_v21 }
 0x281   : > { %v6787_v46 = vadd.f32 %v8658_v23, %v6786_v53  ;;  %v6828_v20 = vmul.f32 %v8658_v23, %v8658_v23  ;;  %v6858_v3 = vadd.f32 %v6857_v24, %v6827_v18  ;;  %v8660_v62 = vadd.f32 %v6447_v49, %v10643_v17 }
 0x282   : > { %v7927_v15 = vpack.c.bf16 %v8659_v28, %v8657_v21  ;;  %v6831_v48 = vmul.f32 %v8659_v28, %v8659_v28 }
 0x283   : > { %v6859_v6 = vadd.f32 %v6858_v3, %v6828_v20  ;;  %v7922_v14 = vpack.c.bf16 %v8660_v62, %v8658_v23  ;;  %v6788_v4 = vadd.f32 %v8660_v62, %v6787_v46  ;;  %v6829_v8 = vmul.f32 %v8660_v62, %v8660_v62 }
 0x284   : > { %7966 = vst [vmem:[%s10608_s6 + $0x68] sm:$0xff] %v7927_v15  }
 0x285   : > { %7965 = vst [vmem:[%s10608_s6 + $0x60] sm:$0xff] %v7922_v14   ;;  %v6789_v58 = vadd.f32 %v8657_v21, %v6788_v4  ;;  %v6860_v0 = vadd.f32 %v6859_v6, %v6829_v8  ;;  %v8615_v13 = vpop.f32.mrb[28].mxu0 }
 0x286   : > { %v8661_v44 = vadd.f32 %v8615_v13, %v10650_v7  ;;  %v6460_v43 = vpop.f32.mrb[29].mxu0 }
 0x287   : > { %v6861_v2 = vadd.f32 %v6860_v0, %v6830_v55  ;;  %v8662_v1 = vadd.f32 %v6460_v43, %v10653_v40  ;;  %v6790_v17 = vadd.f32 %v8659_v28, %v6789_v58  ;;  %v8616_v52 = vpop.f32.mrb[30].mxu0 }
 0x288   : > { %v8663_v19 = vadd.f32 %v8616_v52, %v10655_v63  ;;  %v6463_v56 = vpop.f32.mrb[31].mxu0  ;;  %v6834_v27 = vmul.f32 %v8661_v44, %v8661_v44 }
 0x289   : > { %v6791_v42 = vadd.f32 %v8662_v1, %v6790_v17  ;;  %v6832_v59 = vmul.f32 %v8662_v1, %v8662_v1  ;;  %v6862_v34 = vadd.f32 %v6861_v2, %v6831_v48  ;;  %v8664_v26 = vadd.f32 %v6463_v56, %v10657_v11 }
 0x28a   : > { %v7937_v29 = vpack.c.bf16 %v8663_v19, %v8661_v44  ;;  %v6835_v60 = vmul.f32 %v8663_v19, %v8663_v19 }
 0x28b   : > { %v6863_v5 = vadd.f32 %v6862_v34, %v6832_v59  ;;  %v7932_v7 = vpack.c.bf16 %v8664_v26, %v8662_v1  ;;  %v6792_v36 = vadd.f32 %v8664_v26, %v6791_v42  ;;  %v6833_v57 = vmul.f32 %v8664_v26, %v8664_v26 }
 0x28c   : > { %7968 = vst [vmem:[%s10608_s6 + $0x78] sm:$0xff] %v7937_v29  }
 0x28d   : > { %7967 = vst [vmem:[%s10608_s6 + $0x70] sm:$0xff] %v7932_v7   ;;  %v6793_v40 = vadd.f32 %v8661_v44, %v6792_v36  ;;  %v6864_v30 = vadd.f32 %v6863_v5, %v6833_v57 }
 0x28f   : > { %v6794_v63 = vadd.f32 %v8663_v19, %v6793_v40  ;;  %v6865_v61 = vadd.f32 %v6864_v30, %v6834_v27 }
 0x291   : > { %v6795_v9 = vrot.slane %v6794_v63, 4  ;;  %v6866_v37 = vadd.f32 %v6865_v61, %v6835_v60 }
 0x293   : > { %v6796_v47 = vadd.f32 %v6795_v9, %v6794_v63  ;;  %v6867_v11 = vrot.slane %v6866_v37, 4 }
 0x295   : > { %v6797_v12 = vrot.slane %v6796_v47, 2  ;;  %v6868_v54 = vadd.f32 %v6867_v11, %v6866_v37 }
 0x297   : > { %v6798_v16 = vadd.f32 %v6797_v12, %v6796_v47  ;;  %v6869_v31 = vrot.slane %v6868_v54, 2 }
 0x299   : > { %v6799_v38 = vrot.slane %v6798_v16, 1  ;;  %v6870_v22 = vadd.f32 %v6869_v31, %v6868_v54 }
 0x29b   : > { %v6800_v51 = vadd.f32 %v6799_v38, %v6798_v16  ;;  %v6871_v35 = vrot.slane %v6870_v22, 1 }
 0x29d   : > { %v6801_v10 = vadd.f32 %v6800_v51, %v6763_v33  ;;  %v6872_v25 = vadd.f32 %v6871_v35, %v6870_v22 }
 0x29f   : > { %6802 = vst [vmem:[%s10590_s28] sm:$0x1] %v6801_v10  ;;  %v6873_v50 = vadd.f32 %v6872_v25, %v6803_v41 }
 0x2a1   : > { %6874 = vst [vmem:[%s10590_s28 + $0x1] sm:$0x1] %v6873_v50 }
 0x2a2 PF: > { %s16_s20 = sadd.s32 1, %s9071_s20   ;;  %s10708_s18 = smov %s9067_s19 }
 0x2a3   : > { %p13_p5 = scmp.ge.s32.totalorder %s16_s20, 4   ;;  %s10709_s19 = smov %s10711_s21 }
 0x2a5   :  { %15 = sbr.rel (!%p13_p5) target bundleno = 2 (0x2), region = 94 }

</bundles_post_ra>
